<compile_context>
chip_gen: v7x
topology: tpu7x:2x2x1
jax: 0.10.0
libtpu: 0.0.40
codegen_flags: <defaults>
</compile_context>

<pallas_src>
import math

import jax
import jax.numpy as jnp
from jax.experimental import pallas as pl
from jax.experimental.pallas import tpu as pltpu

# ---------------- synthetic (small) model configuration ---------------------
HIDDEN_DIM = 32            # transformer.d_model (small, synthetic)
PIXEL_EMBED_DIM = 768      # must stay 768: classifier = nn.Linear(768, 94)
NUM_CLASSES = 94
NUM_REC_QUERIES = 25       # rec_query_embed = nn.Embedding(25, hidden)
NUM_SR_QUERIES = 64        # sr_query_embed  = nn.Embedding(64, hidden)
NUM_QUERIES = NUM_REC_QUERIES + NUM_SR_QUERIES           # 89
FEAT_CH = 768              # backbone feature channels (input_proj in_channels)
FEAT_H, FEAT_W = 8, 32     # forced by src.view(b, C, 8, 32)
NUM_TOKENS = FEAT_H * FEAT_W
PATCH = 4                  # backbone-stub patch size
SR_SCALE = 4               # fcn_decoder-stub pixel-shuffle scale
DEC_OUT = 3 * SR_SCALE * SR_SCALE                         # 48
LANE = 128                 # TPU lane width (narrow heads padded to this)

# ------------------------------- opt-in flags --------------------------------
FOLD_QUERY_BIAS = True     # fold query_embed bias into head biases at init
                           # ((q+b)W+c == qW + (bW+c); f32 rounding order only)
COLLAPSE_HEAD = False      # opt-in: collapse head to one [M,32]x[32,256] dot
MXU_DTYPE = jnp.float32    # opt-in: jnp.bfloat16 MXU operands (v5e/v6e/v7x)


def _round_up(x, m):
    return (x + m - 1) // m * m


def _row_split():
    """Generation-aware grid split for the 512-row fused backbone kernel."""
    try:
        kind = jax.devices()[0].device_kind.lower()
    except Exception:
        kind = ""
    if "v7" in kind:
        # v7x: 2 TensorCores/chip — shard the row blocks across cores.
        return 2, (getattr(pltpu, "CORE_PARALLEL", "parallel"),)
    # v5e/v6e: single TensorCore; grid>1 is a serial loop (+~0.35us/step).
    return 1, ("arbitrary",)


# ---------------------------- Pallas kernels ---------------------------------
def _matmul_bias_kernel(x_ref, w_ref, b_ref, o_ref):
    acc = jnp.dot(x_ref[...], w_ref[...], preferred_element_type=jnp.float32)
    o_ref[...] = (acc + b_ref[...]).astype(o_ref.dtype)


def pallas_matmul_bias(x, w, b, *, m_blocks=1, semantics=("arbitrary",)):
    """y = x @ w + b (single block, or m_blocks row blocks for v7x)."""
    M, K = x.shape
    Kw, N = w.shape
    assert K == Kw and M % m_blocks == 0
    tm = M // m_blocks
    isz = jnp.dtype(x.dtype).itemsize
    flops = 2 * M * K * N
    bytes_accessed = isz * (M * K + K * N) + 4 * (N + M * N)
    return pl.pallas_call(
        _matmul_bias_kernel,
        out_shape=jax.ShapeDtypeStruct((M, N), jnp.float32),
        grid=(m_blocks,),
        in_specs=[
            pl.BlockSpec((tm, K), lambda i: (i, 0)),
            pl.BlockSpec((K, N), lambda i: (0, 0)),
            pl.BlockSpec((1, N), lambda i: (0, 0)),
        ],
        out_specs=pl.BlockSpec((tm, N), lambda i: (i, 0)),
        compiler_params=pltpu.CompilerParams(dimension_semantics=semantics),
        cost_estimate=pl.CostEstimate(
            flops=flops, transcendentals=0, bytes_accessed=bytes_accessed),
    )(x, w, b.reshape(1, N))


def _backbone_proj_kernel(p_ref, w1_ref, b1_ref, w2_ref, b2_ref, o_ref):
    # Patch embedding: [tm,48]@[48,768]; the 768-wide slab stays in VMEM.
    src = jnp.dot(p_ref[...], w1_ref[...], preferred_element_type=jnp.float32)
    src = src + b1_ref[...]
    # input_proj (1x1 Conv2d == per-token matmul), 128-lane padded columns.
    proj = jnp.dot(src.astype(w2_ref.dtype), w2_ref[...],
                   preferred_element_type=jnp.float32)
    o_ref[...] = (proj + b2_ref[...]).astype(o_ref.dtype)


def pallas_backbone_input_proj(patches, w1, b1, w2_pad, b2_pad,
                               *, m_blocks, semantics):
    """Fused backbone patch-embed + input_proj; only [M,128] hits HBM."""
    M, K1 = patches.shape
    N1 = w1.shape[1]          # 768
    N2 = w2_pad.shape[1]      # 128 (lane-dense)
    assert M % m_blocks == 0
    tm = M // m_blocks
    isz = jnp.dtype(patches.dtype).itemsize
    flops = 2 * M * K1 * N1 + 2 * M * N1 * N2
    bytes_accessed = (isz * (M * K1 + K1 * N1 + N1 * N2)
                      + 4 * (N1 + N2 + M * N2))
    return pl.pallas_call(
        _backbone_proj_kernel,
        out_shape=jax.ShapeDtypeStruct((M, N2), jnp.float32),
        grid=(m_blocks,),
        in_specs=[
            pl.BlockSpec((tm, K1), lambda i: (i, 0)),   # rows split across TCs
            pl.BlockSpec((K1, N1), lambda i: (0, 0)),   # weights resident
            pl.BlockSpec((1, N1), lambda i: (0, 0)),
            pl.BlockSpec((N1, N2), lambda i: (0, 0)),
            pl.BlockSpec((1, N2), lambda i: (0, 0)),
        ],
        out_specs=pl.BlockSpec((tm, N2), lambda i: (i, 0)),
        compiler_params=pltpu.CompilerParams(dimension_semantics=semantics),
        cost_estimate=pl.CostEstimate(
            flops=flops, transcendentals=0, bytes_accessed=bytes_accessed),
    )(patches, w1, b1.reshape(1, N1), w2_pad, b2_pad.reshape(1, N2))


def _make_head_kernel(rec_rows, fold_bias):
    def kernel(h_ref, wq_ref, bq_ref, wc_ref, bc_ref, wd_ref, bd_ref,
               oc_ref, od_ref):
        # query_embed: Linear(hidden -> 768); intermediate stays in VMEM.
        qo = jnp.dot(h_ref[...], wq_ref[...],
                     preferred_element_type=jnp.float32)
        if not fold_bias:
            qo = qo + bq_ref[...]
        qo = qo.astype(wc_ref.dtype)
        # Query-group split (rec_rows is a multiple of 8): classifier only on
        # rec-query rows, SR-decoder projection only on sr-query rows.
        cls = jnp.dot(qo[:rec_rows], wc_ref[...],
                      preferred_element_type=jnp.float32)
        dec = jnp.dot(qo[rec_rows:], wd_ref[...],
                      preferred_element_type=jnp.float32)
        oc_ref[...] = (cls + bc_ref[...]).astype(oc_ref.dtype)
        od_ref[...] = (dec + bd_ref[...]).astype(od_ref.dtype)
    return kernel


def pallas_fused_head(h_pad, rec_rows, wq, bq, wc, bc, wd, bd):
    """Fused query_embed -> {classifier | SR-dec projection} head.

    TODO(synk): add M row-blocking (and a v7x CORE_PARALLEL split) once batch
    grows enough for the [M,768] f32 intermediate to pressure VMEM.
    """
    M, K = h_pad.shape
    Nq = wq.shape[1]                     # 768
    sr_rows = M - rec_rows
    isz = jnp.dtype(h_pad.dtype).itemsize
    flops = 2 * M * K * Nq + 2 * (rec_rows + sr_rows) * Nq * LANE
    bytes_accessed = (isz * (M * K + K * Nq + 2 * Nq * LANE)
                      + 4 * (Nq + 2 * LANE + M * LANE))
    return pl.pallas_call(
        _make_head_kernel(rec_rows, FOLD_QUERY_BIAS),
        out_shape=(jax.ShapeDtypeStruct((rec_rows, LANE), jnp.float32),
                   jax.ShapeDtypeStruct((sr_rows, LANE), jnp.float32)),
        grid=(1,),
        in_specs=[
            pl.BlockSpec((M, K), lambda i: (0, 0)),
            pl.BlockSpec((K, Nq), lambda i: (0, 0)),
            pl.BlockSpec((1, Nq), lambda i: (0, 0)),
            pl.BlockSpec((Nq, LANE), lambda i: (0, 0)),
            pl.BlockSpec((1, LANE), lambda i: (0, 0)),
            pl.BlockSpec((Nq, LANE), lambda i: (0, 0)),
            pl.BlockSpec((1, LANE), lambda i: (0, 0)),
        ],
        out_specs=(pl.BlockSpec((rec_rows, LANE), lambda i: (0, 0)),
                   pl.BlockSpec((sr_rows, LANE), lambda i: (0, 0))),
        compiler_params=pltpu.CompilerParams(
            dimension_semantics=("arbitrary",)),
        cost_estimate=pl.CostEstimate(
            flops=flops, transcendentals=0, bytes_accessed=bytes_accessed),
    )(h_pad, wq, bq.reshape(1, Nq), wc, bc.reshape(1, LANE),
      wd, bd.reshape(1, LANE))


# -------------------------- external-module stubs ----------------------------
def extract_patches(samples):
    """ViT-style patch extraction for the backbone stub (pure layout)."""
    b, c, H, W = samples.shape
    gh, gw = H // PATCH, W // PATCH
    p = samples.reshape(b, c, gh, PATCH, gw, PATCH)
    p = jnp.transpose(p, (0, 2, 4, 1, 3, 5))
    return p.reshape(b * gh * gw, c * PATCH * PATCH), b, gh * gw


def transformer_stub(params, proj_tok, query_embed, pos):
    # TODO(synk): the real `transformer` module is injected from
    # transformer.py (pos/mask unused by this stub).  Eval only consumes
    # decoder layer 5, so layers 0-4 (dead in eval) are not computed at all.
    del pos
    mem = jnp.mean(proj_tok, axis=1)                       # [b, hidden]
    q = jnp.transpose(query_embed, (1, 0, 2))              # [Q, b, hidden]
    return jnp.tanh(q * (0.5 + 0.1 * 5) + mem[None, :, :])  # == hs[5]


def pixel_shuffle_sr(dec):
    # TODO(synk): the real `deconv_decoder` (fcn_decoder) module is injected
    # externally; its Linear projection lives inside the fused head kernel,
    # this is only the pixel-shuffle (8x8 grid, x4 upscale -> [b, 3, 32, 32]).
    b = dec.shape[0]
    x = dec.reshape(b, 8, 8, 3, SR_SCALE, SR_SCALE)
    x = jnp.transpose(x, (0, 3, 1, 4, 2, 5))
    return x.reshape(b, 3, 8 * SR_SCALE, 8 * SR_SCALE)


# ------------------------------ forward pass ---------------------------------
def pix2seq_forward(params, samples):
    """Eval-mode Pix2Seq.forward: returns (pixel_output[-1], rec_logit[-1])."""
    patches, b, N = extract_patches(samples)               # [b*N, 48]
    m_blocks, semantics = _row_split()

    # Fused backbone patch-embed + input_proj (1x1 conv): the [b*N, 768]
    # feature slab never leaves VMEM; NCHW round-trip of the PyTorch code is
    # pure layout churn and is elided.
    proj_pad = pallas_backbone_input_proj(
        patches.astype(MXU_DTYPE),
        params["backbone_w"], params["backbone_b"],
        params["input_proj_w_pad"], params["input_proj_b_pad"],
        m_blocks=m_blocks, semantics=semantics)             # [b*N, 128]
    proj_tok = proj_pad[:, :HIDDEN_DIM].reshape(b, N, HIDDEN_DIM)

    # query embeddings: weight.unsqueeze(1).repeat(1, b, 1).permute(1, 0, 2)
    rec_q = jnp.broadcast_to(params["rec_query_embed"][None],
                             (b, NUM_REC_QUERIES, HIDDEN_DIM))
    sr_q = jnp.broadcast_to(params["sr_query_embed"][None],
                            (b, NUM_SR_QUERIES, HIDDEN_DIM))
    query_embed = jnp.concatenate([rec_q, sr_q], axis=1)    # [b, 89, hid]

    h5 = transformer_stub(params, proj_tok, query_embed,
                          params["pos_embed"])               # [89, b, hid]

    # Head input: rec-query rows padded up to a multiple of 8 sublanes so the
    # in-kernel query-group split and every store are unmasked.
    rec_rows = NUM_REC_QUERIES * b
    rec_rows_pad = _round_up(rec_rows, 8)
    h_rec = h5[:NUM_REC_QUERIES].reshape(rec_rows, HIDDEN_DIM)
    h_sr = h5[NUM_REC_QUERIES:].reshape(NUM_SR_QUERIES * b, HIDDEN_DIM)
    h_pad = jnp.concatenate(
        [h_rec,
         jnp.zeros((rec_rows_pad - rec_rows, HIDDEN_DIM), h_rec.dtype),
         h_sr], axis=0)                                      # [Mpad, hid]

    if COLLAPSE_HEAD:
        # Opt-in: no nonlinearity between query_embed and the heads, so the
        # whole head is one [M,32]x[32,256] dot (f32 rounding differs).
        head = pallas_matmul_bias(h_pad.astype(MXU_DTYPE),
                                  params["head_w_eff"], params["head_b_eff"])
        cls_out = head[:rec_rows_pad, :LANE]
        dec_out = head[rec_rows_pad:, LANE:]
    else:
        cls_out, dec_out = pallas_fused_head(
            h_pad.astype(MXU_DTYPE), rec_rows_pad,
            params["query_embed_w"], params["query_embed_b"],
            params["cls_w_pad"], params["cls_b_eff"],
            params["dec_w_pad"], params["dec_b_eff"])

    # classifier logits: rows are query-major -> first 25*b rows valid,
    # columns 0:94 valid within the 128-lane slab.
    logit = cls_out[:rec_rows, :NUM_CLASSES]
    logit = jnp.transpose(
        logit.reshape(NUM_REC_QUERIES, b, NUM_CLASSES), (1, 0, 2))

    # SR decoder head: all 64*b rows valid, columns 0:48 valid.
    dec = dec_out[:, :DEC_OUT]
    dec = jnp.transpose(dec.reshape(NUM_SR_QUERIES, b, DEC_OUT), (1, 0, 2))
    pixel_output = pixel_shuffle_sr(dec)

    # not self.training -> return (pixel_output[-1], rec_logit[-1])
    # TODO(synk): training branch needs the external vgg16 feature_extractor.
    return pixel_output, logit


# ------------------------------ parameter init -------------------------------
def init_params(key):
    ks = jax.random.split(key, 12)

    def w_init(k, shape, fan_in):
        return jax.random.normal(k, shape, jnp.float32) / math.sqrt(fan_in)

    patch_dim = 3 * PATCH * PATCH

    backbone_w = w_init(ks[0], (patch_dim, FEAT_CH), patch_dim)
    backbone_b = jnp.zeros((FEAT_CH,), jnp.float32)

    input_proj_w = w_init(ks[1], (FEAT_CH, HIDDEN_DIM), FEAT_CH)
    input_proj_b = 0.01 * jax.random.normal(ks[2], (HIDDEN_DIM,), jnp.float32)

    query_embed_w = w_init(ks[3], (HIDDEN_DIM, PIXEL_EMBED_DIM), HIDDEN_DIM)
    query_embed_b = 0.01 * jax.random.normal(
        ks[4], (PIXEL_EMBED_DIM,), jnp.float32)

    cls_w = w_init(ks[5], (PIXEL_EMBED_DIM, NUM_CLASSES), PIXEL_EMBED_DIM)
    cls_b = 0.01 * jax.random.normal(ks[6], (NUM_CLASSES,), jnp.float32)
    dec_w = w_init(ks[7], (PIXEL_EMBED_DIM, DEC_OUT), PIXEL_EMBED_DIM)
    dec_b = 0.01 * jax.random.normal(ks[8], (DEC_OUT,), jnp.float32)

    # Lane-dense zero padding (done once; valid columns sliced in the wrapper).
    input_proj_w_pad = jnp.pad(input_proj_w, ((0, 0), (0, LANE - HIDDEN_DIM)))
    input_proj_b_pad = jnp.pad(input_proj_b, (0, LANE - HIDDEN_DIM))
    cls_w_pad = jnp.pad(cls_w, ((0, 0), (0, LANE - NUM_CLASSES)))
    cls_b_pad = jnp.pad(cls_b, (0, LANE - NUM_CLASSES))
    dec_w_pad = jnp.pad(dec_w, ((0, 0), (0, LANE - DEC_OUT)))
    dec_b_pad = jnp.pad(dec_b, (0, LANE - DEC_OUT))

    if FOLD_QUERY_BIAS:
        # (q + bq) @ W + c == q @ W + (bq @ W + c): fold the query_embed bias
        # into the per-head biases at init (f32 rounding-order change only).
        cls_b_eff = query_embed_b @ cls_w_pad + cls_b_pad
        dec_b_eff = query_embed_b @ dec_w_pad + dec_b_pad
    else:
        cls_b_eff, dec_b_eff = cls_b_pad, dec_b_pad

    # Opt-in algebraic collapse of the whole head (COLLAPSE_HEAD).
    head_w_eff = jnp.concatenate(
        [query_embed_w @ cls_w_pad, query_embed_w @ dec_w_pad], axis=1)
    head_b_eff = jnp.concatenate(
        [query_embed_b @ cls_w_pad + cls_b_pad,
         query_embed_b @ dec_w_pad + dec_b_pad], axis=0)

    return {
        "backbone_w": backbone_w.astype(MXU_DTYPE),
        "backbone_b": backbone_b,
        "pos_embed": 0.02 * jax.random.normal(
            ks[9], (NUM_TOKENS, HIDDEN_DIM), jnp.float32),
        "rec_query_embed": jax.random.normal(
            ks[10], (NUM_REC_QUERIES, HIDDEN_DIM), jnp.float32),
        "sr_query_embed": jax.random.normal(
            ks[11], (NUM_SR_QUERIES, HIDDEN_DIM), jnp.float32),
        "input_proj_w_pad": input_proj_w_pad.astype(MXU_DTYPE),
        "input_proj_b_pad": input_proj_b_pad,
        "query_embed_w": query_embed_w.astype(MXU_DTYPE),
        "query_embed_b": query_embed_b,
        "cls_w_pad": cls_w_pad.astype(MXU_DTYPE),
        "cls_b_eff": cls_b_eff,
        "dec_w_pad": dec_w_pad.astype(MXU_DTYPE),
        "dec_b_eff": dec_b_eff,
        "head_w_eff": head_w_eff.astype(MXU_DTYPE),
        "head_b_eff": head_b_eff,
    }


# ---------------------------------- main --------------------------------------
if __name__ == "__main__":
    key = jax.random.PRNGKey(0)
    pkey, xkey = jax.random.split(key)
    params = init_params(pkey)
    # image sized so the backbone stub yields exactly 8x32 = 256 tokens
    samples = jax.random.normal(
        xkey, (2, 3, FEAT_H * PATCH, FEAT_W * PATCH), jnp.float32)

    fwd = jax.jit(pix2seq_forward)
    pixel_out, rec_logit = fwd(params, samples)
    jax.block_until_ready((pixel_out, rec_logit))

    assert pixel_out.shape == (2, 3, 8 * SR_SCALE, 8 * SR_SCALE)
    assert rec_logit.shape == (2, NUM_REC_QUERIES, NUM_CLASSES)
    assert bool(jnp.all(jnp.isfinite(pixel_out)))
    assert bool(jnp.all(jnp.isfinite(rec_logit)))
    print("KERNEL_OK")
</pallas_src>

<mosaic_0001>
module attributes {stable_mosaic.version = 11 : i64} {
  func.func @_backbone_proj_kernel(%arg0: i32, %arg1: memref<512x48xf32, #tpu.memory_space<vmem>>, %arg2: memref<48x768xf32, #tpu.memory_space<vmem>>, %arg3: memref<1x768xf32, #tpu.memory_space<vmem>>, %arg4: memref<768x128xf32, #tpu.memory_space<vmem>>, %arg5: memref<1x128xf32, #tpu.memory_space<vmem>>, %arg6: memref<512x128xf32, #tpu.memory_space<vmem>>) attributes {dimension_semantics = [#tpu.dimension_semantics<arbitrary>], iteration_bounds = array<i64: 1>, scalar_prefetch = 0 : i64, scratch_operands = 0 : i64, tpu.core_type = #tpu.core_type<tc>, window_params = [{transform_indices = @transform_0, window_bounds = array<i64: 512, 48>}, {pipeline_mode = #tpu.pipeline_mode<synchronous>, transform_indices = @transform_1, window_bounds = array<i64: 48, 768>}, {pipeline_mode = #tpu.pipeline_mode<synchronous>, transform_indices = @transform_2, window_bounds = array<i64: 1, 768>}, {pipeline_mode = #tpu.pipeline_mode<synchronous>, transform_indices = @transform_3, window_bounds = array<i64: 768, 128>}, {pipeline_mode = #tpu.pipeline_mode<synchronous>, transform_indices = @transform_4, window_bounds = array<i64: 1, 128>}, {transform_indices = @transform_5, window_bounds = array<i64: 512, 128>}]} {
    %c0 = arith.constant 0 : index
    %c0_0 = arith.constant 0 : index
    %0 = vector.load %arg1[%c0, %c0_0] : memref<512x48xf32, #tpu.memory_space<vmem>>, vector<512x48xf32>
    %c0_1 = arith.constant 0 : index
    %c0_2 = arith.constant 0 : index
    %1 = vector.load %arg2[%c0_1, %c0_2] : memref<48x768xf32, #tpu.memory_space<vmem>>, vector<48x768xf32>
    %cst = arith.constant dense<0.000000e+00> : vector<512x768xf32>
    %2 = tpu.matmul %0, %1, %cst {dimension_numbers = #tpu.dot_dimension_numbers<[1], [0], [0], [1], [0, 0, 1, 1], [], []>} : vector<512x48xf32>, vector<48x768xf32>, vector<512x768xf32> -> vector<512x768xf32>
    %c0_3 = arith.constant 0 : index
    %c0_4 = arith.constant 0 : index
    %3 = vector.load %arg3[%c0_3, %c0_4] : memref<1x768xf32, #tpu.memory_space<vmem>>, vector<1x768xf32>
    %4 = vector.broadcast %3 : vector<1x768xf32> to vector<512x768xf32>
    %5 = arith.addf %2, %4 : vector<512x768xf32>
    %c0_5 = arith.constant 0 : index
    %c0_6 = arith.constant 0 : index
    %6 = vector.load %arg4[%c0_5, %c0_6] : memref<768x128xf32, #tpu.memory_space<vmem>>, vector<768x128xf32>
    %cst_7 = arith.constant dense<0.000000e+00> : vector<512x128xf32>
    %7 = tpu.matmul %5, %6, %cst_7 {dimension_numbers = #tpu.dot_dimension_numbers<[1], [0], [0], [1], [0, 0, 1, 1], [], []>} : vector<512x768xf32>, vector<768x128xf32>, vector<512x128xf32> -> vector<512x128xf32>
    %c0_8 = arith.constant 0 : index
    %c0_9 = arith.constant 0 : index
    %8 = vector.load %arg5[%c0_8, %c0_9] : memref<1x128xf32, #tpu.memory_space<vmem>>, vector<1x128xf32>
    %9 = vector.broadcast %8 : vector<1x128xf32> to vector<512x128xf32>
    %10 = arith.addf %7, %9 : vector<512x128xf32>
    %c0_10 = arith.constant 0 : index
    %c0_11 = arith.constant 0 : index
    %11 = vector.load %arg6[%c0_10, %c0_11] : memref<512x128xf32, #tpu.memory_space<vmem>>, vector<512x128xf32>
    tpu.vector_store %arg6[%c0_10, %c0_11], %10 {strides = array<i32>} : memref<512x128xf32, #tpu.memory_space<vmem>>, vector<512x128xf32>,
    return
  }
  func.func @transform_0(%arg0: i32) -> (i32, i32) {
    %c0_i32 = arith.constant 0 : i32
    %c0_i32_0 = arith.constant 0 : i32
    return %arg0, %c0_i32 : i32, i32
  }
  func.func @transform_1(%arg0: i32) -> (i32, i32) {
    %c0_i32 = arith.constant 0 : i32
    %c0_i32_0 = arith.constant 0 : i32
    %c0_i32_1 = arith.constant 0 : i32
    return %c0_i32, %c0_i32_0 : i32, i32
  }
  func.func @transform_2(%arg0: i32) -> (i32, i32) {
    %c0_i32 = arith.constant 0 : i32
    %c0_i32_0 = arith.constant 0 : i32
    %c0_i32_1 = arith.constant 0 : i32
    return %c0_i32, %c0_i32_0 : i32, i32
  }
  func.func @transform_3(%arg0: i32) -> (i32, i32) {
    %c0_i32 = arith.constant 0 : i32
    %c0_i32_0 = arith.constant 0 : i32
    %c0_i32_1 = arith.constant 0 : i32
    return %c0_i32, %c0_i32_0 : i32, i32
  }
  func.func @transform_4(%arg0: i32) -> (i32, i32) {
    %c0_i32 = arith.constant 0 : i32
    %c0_i32_0 = arith.constant 0 : i32
    %c0_i32_1 = arith.constant 0 : i32
    return %c0_i32, %c0_i32_0 : i32, i32
  }
  func.func @transform_5(%arg0: i32) -> (i32, i32) {
    %c0_i32 = arith.constant 0 : i32
    %c0_i32_0 = arith.constant 0 : i32
    return %arg0, %c0_i32 : i32, i32
  }
}

module attributes {stable_mosaic.version = 11 : i64} {
  func.func @kernel(%arg0: i32, %arg1: memref<184x32xf32, #tpu.memory_space<vmem>>, %arg2: memref<32x768xf32, #tpu.memory_space<vmem>>, %arg3: memref<1x768xf32, #tpu.memory_space<vmem>>, %arg4: memref<768x128xf32, #tpu.memory_space<vmem>>, %arg5: memref<1x128xf32, #tpu.memory_space<vmem>>, %arg6: memref<768x128xf32, #tpu.memory_space<vmem>>, %arg7: memref<1x128xf32, #tpu.memory_space<vmem>>, %arg8: memref<56x128xf32, #tpu.memory_space<vmem>>, %arg9: memref<128x128xf32, #tpu.memory_space<vmem>>) attributes {dimension_semantics = [#tpu.dimension_semantics<arbitrary>], iteration_bounds = array<i64: 1>, scalar_prefetch = 0 : i64, scratch_operands = 0 : i64, tpu.core_type = #tpu.core_type<tc>, window_params = [{pipeline_mode = #tpu.pipeline_mode<synchronous>, transform_indices = @transform_0, window_bounds = array<i64: 184, 32>}, {pipeline_mode = #tpu.pipeline_mode<synchronous>, transform_indices = @transform_1, window_bounds = array<i64: 32, 768>}, {pipeline_mode = #tpu.pipeline_mode<synchronous>, transform_indices = @transform_2, window_bounds = array<i64: 1, 768>}, {pipeline_mode = #tpu.pipeline_mode<synchronous>, transform_indices = @transform_3, window_bounds = array<i64: 768, 128>}, {pipeline_mode = #tpu.pipeline_mode<synchronous>, transform_indices = @transform_4, window_bounds = array<i64: 1, 128>}, {pipeline_mode = #tpu.pipeline_mode<synchronous>, transform_indices = @transform_5, window_bounds = array<i64: 768, 128>}, {pipeline_mode = #tpu.pipeline_mode<synchronous>, transform_indices = @transform_6, window_bounds = array<i64: 1, 128>}, {pipeline_mode = #tpu.pipeline_mode<synchronous>, transform_indices = @transform_7, window_bounds = array<i64: 56, 128>}, {pipeline_mode = #tpu.pipeline_mode<synchronous>, transform_indices = @transform_8, window_bounds = array<i64: 128, 128>}]} {
    %c0 = arith.constant 0 : index
    %c0_0 = arith.constant 0 : index
    %0 = vector.load %arg1[%c0, %c0_0] : memref<184x32xf32, #tpu.memory_space<vmem>>, vector<184x32xf32>
    %c0_1 = arith.constant 0 : index
    %c0_2 = arith.constant 0 : index
    %1 = vector.load %arg2[%c0_1, %c0_2] : memref<32x768xf32, #tpu.memory_space<vmem>>, vector<32x768xf32>
    %cst = arith.constant dense<0.000000e+00> : vector<184x768xf32>
    %2 = tpu.matmul %0, %1, %cst {dimension_numbers = #tpu.dot_dimension_numbers<[1], [0], [0], [1], [0, 0, 1, 1], [], []>} : vector<184x32xf32>, vector<32x768xf32>, vector<184x768xf32> -> vector<184x768xf32>
    %3 = vector.extract_strided_slice %2 {offsets = [0, 0], sizes = [56, 768], strides = [1, 1]} : vector<184x768xf32> to vector<56x768xf32>
    %c0_3 = arith.constant 0 : index
    %c0_4 = arith.constant 0 : index
    %4 = vector.load %arg4[%c0_3, %c0_4] : memref<768x128xf32, #tpu.memory_space<vmem>>, vector<768x128xf32>
    %cst_5 = arith.constant dense<0.000000e+00> : vector<56x128xf32>
    %5 = tpu.matmul %3, %4, %cst_5 {dimension_numbers = #tpu.dot_dimension_numbers<[1], [0], [0], [1], [0, 0, 1, 1], [], []>} : vector<56x768xf32>, vector<768x128xf32>, vector<56x128xf32> -> vector<56x128xf32>
    %6 = vector.extract_strided_slice %2 {offsets = [56, 0], sizes = [128, 768], strides = [1, 1]} : vector<184x768xf32> to vector<128x768xf32>
    %c0_6 = arith.constant 0 : index
    %c0_7 = arith.constant 0 : index
    %7 = vector.load %arg6[%c0_6, %c0_7] : memref<768x128xf32, #tpu.memory_space<vmem>>, vector<768x128xf32>
    %cst_8 = arith.constant dense<0.000000e+00> : vector<128x128xf32>
    %8 = tpu.matmul %6, %7, %cst_8 {dimension_numbers = #tpu.dot_dimension_numbers<[1], [0], [0], [1], [0, 0, 1, 1], [], []>} : vector<128x768xf32>, vector<768x128xf32>, vector<128x128xf32> -> vector<128x128xf32>
    %c0_9 = arith.constant 0 : index
    %c0_10 = arith.constant 0 : index
    %9 = vector.load %arg5[%c0_9, %c0_10] : memref<1x128xf32, #tpu.memory_space<vmem>>, vector<1x128xf32>
    %10 = vector.broadcast %9 : vector<1x128xf32> to vector<56x128xf32>
    %11 = arith.addf %5, %10 : vector<56x128xf32>
    %c0_11 = arith.constant 0 : index
    %c0_12 = arith.constant 0 : index
    %12 = vector.load %arg8[%c0_11, %c0_12] : memref<56x128xf32, #tpu.memory_space<vmem>>, vector<56x128xf32>
    tpu.vector_store %arg8[%c0_11, %c0_12], %11 {strides = array<i32>} : memref<56x128xf32, #tpu.memory_space<vmem>>, vector<56x128xf32>,
    %c0_13 = arith.constant 0 : index
    %c0_14 = arith.constant 0 : index
    %13 = vector.load %arg7[%c0_13, %c0_14] : memref<1x128xf32, #tpu.memory_space<vmem>>, vector<1x128xf32>
    %14 = vector.broadcast %13 : vector<1x128xf32> to vector<128x128xf32>
    %15 = arith.addf %8, %14 : vector<128x128xf32>
    %c0_15 = arith.constant 0 : index
    %c0_16 = arith.constant 0 : index
    %16 = vector.load %arg9[%c0_15, %c0_16] : memref<128x128xf32, #tpu.memory_space<vmem>>, vector<128x128xf32>
    tpu.vector_store %arg9[%c0_15, %c0_16], %15 {strides = array<i32>} : memref<128x128xf32, #tpu.memory_space<vmem>>, vector<128x128xf32>,
    return
  }
  func.func @transform_0(%arg0: i32) -> (i32, i32) {
    %c0_i32 = arith.constant 0 : i32
    %c0_i32_0 = arith.constant 0 : i32
    %c0_i32_1 = arith.constant 0 : i32
    return %c0_i32, %c0_i32_0 : i32, i32
  }
  func.func @transform_1(%arg0: i32) -> (i32, i32) {
    %c0_i32 = arith.constant 0 : i32
    %c0_i32_0 = arith.constant 0 : i32
    %c0_i32_1 = arith.constant 0 : i32
    return %c0_i32, %c0_i32_0 : i32, i32
  }
  func.func @transform_2(%arg0: i32) -> (i32, i32) {
    %c0_i32 = arith.constant 0 : i32
    %c0_i32_0 = arith.constant 0 : i32
    %c0_i32_1 = arith.constant 0 : i32
    return %c0_i32, %c0_i32_0 : i32, i32
  }
  func.func @transform_3(%arg0: i32) -> (i32, i32) {
    %c0_i32 = arith.constant 0 : i32
    %c0_i32_0 = arith.constant 0 : i32
    %c0_i32_1 = arith.constant 0 : i32
    return %c0_i32, %c0_i32_0 : i32, i32
  }
  func.func @transform_4(%arg0: i32) -> (i32, i32) {
    %c0_i32 = arith.constant 0 : i32
    %c0_i32_0 = arith.constant 0 : i32
    %c0_i32_1 = arith.constant 0 : i32
    return %c0_i32, %c0_i32_0 : i32, i32
  }
  func.func @transform_5(%arg0: i32) -> (i32, i32) {
    %c0_i32 = arith.constant 0 : i32
    %c0_i32_0 = arith.constant 0 : i32
    %c0_i32_1 = arith.constant 0 : i32
    return %c0_i32, %c0_i32_0 : i32, i32
  }
  func.func @transform_6(%arg0: i32) -> (i32, i32) {
    %c0_i32 = arith.constant 0 : i32
    %c0_i32_0 = arith.constant 0 : i32
    %c0_i32_1 = arith.constant 0 : i32
    return %c0_i32, %c0_i32_0 : i32, i32
  }
  func.func @transform_7(%arg0: i32) -> (i32, i32) {
    %c0_i32 = arith.constant 0 : i32
    %c0_i32_0 = arith.constant 0 : i32
    %c0_i32_1 = arith.constant 0 : i32
    return %c0_i32, %c0_i32_0 : i32, i32
  }
  func.func @transform_8(%arg0: i32) -> (i32, i32) {
    %c0_i32 = arith.constant 0 : i32
    %c0_i32_0 = arith.constant 0 : i32
    %c0_i32_1 = arith.constant 0 : i32
    return %c0_i32, %c0_i32_0 : i32, i32
  }
}

</mosaic_0001>

<bundles_post_ra>
// kernel: pix2seq_forward.2
= control target key start
LH: loop header
LB: loop body
LE: loop exit
PB: predicated region body
PF: predicated region fallthrough
CT: control target
= control target key end

     0   :  { %v6794_v3 = vmov 0.0   ;;  %vm152_vm0 = vcmask 392192   ;;  %v6792_v46 = vmov 0.0|0.0   ;;  %s6786_s1 = inlined_call_operand.vmem [shape: f32[48,768], index: 1, kind: input, shape index: {}]   ;;  %s6787_s3 = inlined_call_operand.vmem [shape: f32[768,128], index: 3, kind: input, shape index: {}]   ;;  %s6788_s0 = inlined_call_operand.vmem [shape: f32[512,48], index: 0, kind: input, shape index: {}]   ;;  %s6789_s2 = inlined_call_operand.vmem [shape: f32[1,768], index: 2, kind: input, shape index: {}]   ;;  %s6790_s4 = inlined_call_operand.vmem [shape: f32[1,128], index: 4, kind: input, shape index: {}]   ;;  %s6791_s5 = inlined_call_operand.vmem [shape: f32[512,128], index: 5, kind: output, shape index: {}]  }
   0x1   :  { %v85_v0 = vld [vmem:[%s6786_s1 + $0x8] sm:$0xff]  ;;  %v91_v1 = vld [vmem:[%s6786_s1 + $0x38] sm:$0xff]  ;;  %409 = vmatprep.mubr.f32.mxu0 %v6794_v3  ;;  %858 = vmatprep.mubr.f32.mxu1 %v6794_v3  ;;  %v84_v6 = vld [vmem:[%s6786_s1] sm:$0xff] }
   0x2   :  { %v87_v2 = vld [vmem:[%s6786_s1 + $0x18] sm:$0xff]  ;;  %v3211_v4 = vpack.c.bf16 %v91_v1, %v85_v0  ;;  %v93_v5 = vld [vmem:[%s6786_s1 + $0x48] sm:$0xff]  ;;  %v90_v7 = vld [vmem:[%s6786_s1 + $0x30] sm:$0xff] }
   0x3   :  { %v3223_v8 = vpack.c.bf16 %v93_v5, %v87_v2  ;;  %v3213_v9 = vpack.c.bf16 %v90_v7, %v84_v6  ;;  %v86_v10 = vld [vmem:[%s6786_s1 + $0x10] sm:$0xff]  ;;  %v92_v11 = vld [vmem:[%s6786_s1 + $0x40] sm:$0xff]  ;;  %v97_v12 = vld [vmem:[%s6786_s1 + $0x68] sm:$0xff] }
   0x4   :  { %3212 = vmatprep.subr.bf16.mxu0 %v3211_v4  ;;  %v3225_v13 = vpack.c.bf16 %v92_v11, %v86_v10  ;;  %v103_v14 = vld [vmem:[%s6786_s1 + $0x98] sm:$0xff]  ;;  %v105_v16 = vld [vmem:[%s6786_s1 + $0xa8] sm:$0xff]  ;;  %v96_v19 = vld [vmem:[%s6786_s1 + $0x60] sm:$0xff] }
   0x5   :  { %v99_v15 = vld [vmem:[%s6786_s1 + $0x78] sm:$0xff]  ;;  %3224 = vmatprep.subr.bf16.mxu1 %v3223_v8  ;;  %3214 = vmatpush1.bf16.msra.mxu0 %v3213_v9  ;;  %v3215_v17 = vpack.c.bf16 %v103_v14, %v97_v12  ;;  %v102_v20 = vld [vmem:[%s6786_s1 + $0x90] sm:$0xff]  ;;  %v104_v23 = vld [vmem:[%s6786_s1 + $0xa0] sm:$0xff] }
   0x6   :  { %v3227_v18 = vpack.c.bf16 %v105_v16, %v99_v15  ;;  %v98_v21 = vld [vmem:[%s6786_s1 + $0x70] sm:$0xff]  ;;  %3226 = vmatpush1.bf16.msra.mxu1 %v3225_v13  ;;  %v3217_v22 = vpack.c.bf16 %v102_v20, %v96_v19  ;;  %v109_v24 = vld [vmem:[%s6786_s1 + $0xc8] sm:$0xff]  ;;  %v115_v25 = vld [vmem:[%s6786_s1 + $0xf8] sm:$0xff] }
   0x7   :  { %3216 = vmatprep.subr.bf16.mxu0 %v3215_v17  ;;  %v3229_v26 = vpack.c.bf16 %v104_v23, %v98_v21  ;;  %v3219_v27 = vpack.c.bf16 %v115_v25, %v109_v24  ;;  %v111_v28 = vld [vmem:[%s6786_s1 + $0xd8] sm:$0xff]  ;;  %v117_v29 = vld [vmem:[%s6786_s1 + $0x108] sm:$0xff]  ;;  %v108_v30 = vld [vmem:[%s6786_s1 + $0xc0] sm:$0xff] }
   0x8   :  { %3228 = vmatprep.subr.bf16.mxu1 %v3227_v18  ;;  %v3231_v31 = vpack.c.bf16 %v117_v29, %v111_v28  ;;  %v114_v32 = vld [vmem:[%s6786_s1 + $0xf0] sm:$0xff]  ;;  %v116_v34 = vld [vmem:[%s6786_s1 + $0x100] sm:$0xff]  ;;  %v89_v36 = vld [vmem:[%s6786_s1 + $0x28] sm:$0xff] }
   0x9   :  { %v110_v33 = vld [vmem:[%s6786_s1 + $0xd0] sm:$0xff]  ;;  %3218 = vmatpush1.bf16.msra.mxu0 %v3217_v22  ;;  %v3221_v35 = vpack.c.bf16 %v114_v32, %v108_v30  ;;  %v95_v37 = vld [vmem:[%s6786_s1 + $0x58] sm:$0xff]  ;;  %v88_v40 = vld [vmem:[%s6786_s1 + $0x20] sm:$0xff] }
   0xa   :  { %3230 = vmatpush1.bf16.msra.mxu1 %v3229_v26  ;;  %3220 = vmatprep.subr.bf16.mxu0 %v3219_v27  ;;  %v3233_v38 = vpack.c.bf16 %v116_v34, %v110_v33  ;;  %v3235_v39 = vpack.c.bf16 %v95_v37, %v89_v36  ;;  %v94_v41 = vld [vmem:[%s6786_s1 + $0x50] sm:$0xff]  ;;  %v1724_v42 = vld [vmem:[%s6787_s3 + $0x100] sm:$0xff]  ;;  %v1725_v43 = vld [vmem:[%s6787_s3 + $0x108] sm:$0xff] }
   0xb   :  { %3232 = vmatprep.subr.bf16.mxu1 %v3231_v31  ;;  %v3838_v44 = vld [vmem:[%s6788_s0] sm:$0xff]  ;;  %v3237_v45 = vpack.c.bf16 %v94_v41, %v88_v40  ;;  %v3296_v47 = vpack.c.bf16 %v1725_v43, %v1724_v42  ;;  %v1726_v48 = vld [vmem:[%s6787_s3 + $0x110] sm:$0xff]  ;;  %v1727_v49 = vld [vmem:[%s6787_s3 + $0x118] sm:$0xff] }
   0xc   :  { %v3854_v50 = vld [vmem:[%s6788_s0 + $0x8] sm:$0xff]  ;;  %v3299_v51 = vpack.c.bf16 %v1727_v49, %v1726_v48  ;;  %v1728_v52 = vld [vmem:[%s6787_s3 + $0x120] sm:$0xff]  ;;  %v3873_v54 = vld [vmem:[%s6788_s0 + $0x10] sm:$0xff] }
   0xd   :  { %3222 = vmatpush1.bf16.msra.mxu0 %v3221_v35  ;;  %v1729_v53 = vld [vmem:[%s6787_s3 + $0x128] sm:$0xff]  ;;  %v107_v56 = vld [vmem:[%s6786_s1 + $0xb8] sm:$0xff]  ;;  %v100_v57 = vld [vmem:[%s6786_s1 + $0x80] sm:$0xff] }
   0xe   :  { %3234 = vmatpush1.bf16.msra.mxu1 %v3233_v38  ;;  %3236 = vmatprep.subr.bf16.mxu0 %v3235_v39  ;;  %v101_v55 = vld [vmem:[%s6786_s1 + $0x88] sm:$0xff]  ;;  %v106_v58 = vld [vmem:[%s6786_s1 + $0xb0] sm:$0xff]  ;;  %v3302_v59 = vpack.c.bf16 %v1729_v53, %v1728_v52  ;;  %v1731_v63 = vld [vmem:[%s6787_s3 + $0x138] sm:$0xff] }
   0xf   :  { %3295 = vmatprep.subr.bf16.mxu1 %v6792_v46  ;;  %v3239_v60 = vpack.c.bf16 %v107_v56, %v101_v55  ;;  %v3241_v61 = vpack.c.bf16 %v106_v58, %v100_v57  ;;  %v1730_v62 = vld [vmem:[%s6787_s3 + $0x130] sm:$0xff]  ;;  %v3903_v0 = vld [vmem:[%s6788_s0 + $0x18] sm:$0xff]  ;;  %v1732_v2 = vld [vmem:[%s6787_s3 + $0x140] sm:$0xff] }
  0x10   :  { %3018 = vmatmul.mubr.msk.f32.vlgmr.msra.gmra.mrb[0].mxu0 %vm152_vm0, %v3838_v44  ;;  %v3305_v1 = vpack.c.bf16 %v1731_v63, %v1730_v62  ;;  %v1733_v4 = vld [vmem:[%s6787_s3 + $0x148] sm:$0xff]  ;;  %v24_v5 = vld [vmem:[%s6788_s0 + $0x20] sm:$0xff]  ;;  %v1734_v7 = vld [vmem:[%s6787_s3 + $0x150] sm:$0xff] }
  0x11   :  { %3082 = vmatmul.mubr.msk.f32.vlgmr.msra.gmra.mrb[0].mxu1 %vm152_vm0, %v3838_v44  ;;  %3238 = vmatpush1.bf16.msra.mxu0 %v3237_v45  ;;  %v3308_v6 = vpack.c.bf16 %v1733_v4, %v1732_v2  ;;  %v1735_v8 = vld [vmem:[%s6787_s3 + $0x158] sm:$0xff]  ;;  %v25_v9 = vld [vmem:[%s6788_s0 + $0x28] sm:$0xff]  ;;  %v1736_v11 = vld [vmem:[%s6787_s3 + $0x160] sm:$0xff] }
  0x12   :  { %415 = vmatprep.mubr.f32.mxu0 %v6794_v3  ;;  %864 = vmatprep.mubr.f32.mxu1 %v6794_v3  ;;  %v3311_v10 = vpack.c.bf16 %v1735_v8, %v1734_v7  ;;  %v1737_v12 = vld [vmem:[%s6787_s3 + $0x168] sm:$0xff]  ;;  %v26_v13 = vld [vmem:[%s6788_s0 + $0x30] sm:$0xff]  ;;  %v1739_v16 = vld [vmem:[%s6787_s3 + $0x178] sm:$0xff] }
  0x13   :  { %3297 = vmatpush1.bf16.msra.mxu1 %v3296_v47  ;;  %3240 = vmatprep.subr.bf16.mxu0 %v3239_v60  ;;  %v3314_v14 = vpack.c.bf16 %v1737_v12, %v1736_v11  ;;  %v1738_v15 = vld [vmem:[%s6787_s3 + $0x170] sm:$0xff]  ;;  %v27_v17 = vld [vmem:[%s6788_s0 + $0x38] sm:$0xff]  ;;  %v1740_v19 = vld [vmem:[%s6787_s3 + $0x180] sm:$0xff] }
  0x14   :  { %3019 = vmatmul.mubr.msk.f32.gmra.mrb[2].mxu0 %vm152_vm0, %v3854_v50  ;;  %3298 = vmatprep.subr.bf16.mxu1 %v6792_v46  ;;  %v3317_v18 = vpack.c.bf16 %v1739_v16, %v1738_v15  ;;  %v1741_v20 = vld [vmem:[%s6787_s3 + $0x188] sm:$0xff]  ;;  %v28_v21 = vld [vmem:[%s6788_s0 + $0x40] sm:$0xff]  ;;  %v1742_v23 = vld [vmem:[%s6787_s3 + $0x190] sm:$0xff] }
  0x15   :  { %3083 = vmatmul.mubr.msk.f32.gmra.mrb[2].mxu1 %vm152_vm0, %v3854_v50  ;;  %421 = vmatprep.mubr.f32.mxu0 %v6794_v3  ;;  %v3320_v22 = vpack.c.bf16 %v1741_v20, %v1740_v19  ;;  %v1743_v24 = vld [vmem:[%s6787_s3 + $0x198] sm:$0xff]  ;;  %v29_v25 = vld [vmem:[%s6788_s0 + $0x48] sm:$0xff]  ;;  %v1744_v27 = vld [vmem:[%s6787_s3 + $0x1a0] sm:$0xff] }
  0x16   :  { %870 = vmatprep.mubr.f32.mxu1 %v6794_v3  ;;  %3242 = vmatpush1.bf16.msra.mxu0 %v3241_v61  ;;  %v3323_v26 = vpack.c.bf16 %v1743_v24, %v1742_v23  ;;  %v1745_v28 = vld [vmem:[%s6787_s3 + $0x1a8] sm:$0xff]  ;;  %v30_v29 = vld [vmem:[%s6788_s0 + $0x50] sm:$0xff]  ;;  %v31_v31 = vld [vmem:[%s6788_s0 + $0x58] sm:$0xff] }
  0x17   :  { %3300 = vmatpush1.bf16.msra.mxu1 %v3299_v51  ;;  %v3326_v30 = vpack.c.bf16 %v1745_v28, %v1744_v27  ;;  %v113_v32 = vld [vmem:[%s6786_s1 + $0xe8] sm:$0xff]  ;;  %v119_v33 = vld [vmem:[%s6786_s1 + $0x118] sm:$0xff]  ;;  %v32_v35 = vld [vmem:[%s6788_s0 + $0x60] sm:$0xff] }
  0x18   :  { %3020 = vmatmul.mubr.msk.f32.gmra.mrb[4].mxu0 %vm152_vm0, %v3873_v54  ;;  %3301 = vmatprep.subr.bf16.mxu1 %v6792_v46  ;;  %v3243_v34 = vpack.c.bf16 %v119_v33, %v113_v32  ;;  %v112_v36 = vld [vmem:[%s6786_s1 + $0xe0] sm:$0xff]  ;;  %v118_v37 = vld [vmem:[%s6786_s1 + $0x110] sm:$0xff]  ;;  %v33_v39 = vld [vmem:[%s6788_s0 + $0x68] sm:$0xff] }
  0x19   :  { %3084 = vmatmul.mubr.msk.f32.gmra.mrb[4].mxu1 %vm152_vm0, %v3873_v54  ;;  %427 = vmatprep.mubr.f32.mxu0 %v6794_v3  ;;  %v3245_v38 = vpack.c.bf16 %v118_v37, %v112_v36  ;;  %v1746_v40 = vld [vmem:[%s6787_s3 + $0x1b0] sm:$0xff]  ;;  %v1747_v41 = vld [vmem:[%s6787_s3 + $0x1b8] sm:$0xff]  ;;  %v36_v47 = vld [vmem:[%s6788_s0 + $0x80] sm:$0xff] }
  0x1a   :  { %876 = vmatprep.mubr.f32.mxu1 %v6794_v3  ;;  %3244 = vmatprep.subr.bf16.mxu0 %v3243_v34  ;;  %v3329_v42 = vpack.c.bf16 %v1747_v41, %v1746_v40  ;;  %v34_v43 = vld [vmem:[%s6788_s0 + $0x70] sm:$0xff]  ;;  %v35_v45 = vld [vmem:[%s6788_s0 + $0x78] sm:$0xff]  ;;  %v37_v48 = vld [vmem:[%s6788_s0 + $0x88] sm:$0xff] }
  0x1b   :  { %3303 = vmatpush1.bf16.msra.mxu1 %v3302_v59  ;;  %3246 = vmatpush1.bf16.msra.mxu0 %v3245_v38  ;;  %v1748_v49 = vld [vmem:[%s6787_s3 + $0x1c0] sm:$0xff]  ;;  %v1749_v51 = vld [vmem:[%s6787_s3 + $0x1c8] sm:$0xff]  ;;  %v38_v53 = vld [vmem:[%s6788_s0 + $0x90] sm:$0xff] }
  0x1c   :  { %3021 = vmatmul.mubr.msk.f32.gmra.mrb[6].mxu0 %vm152_vm0, %v3903_v0  ;;  %3304 = vmatprep.subr.bf16.mxu1 %v6792_v46  ;;  %v3332_v52 = vpack.c.bf16 %v1749_v51, %v1748_v49  ;;  %v39_v55 = vld [vmem:[%s6788_s0 + $0x98] sm:$0xff]  ;;  %v40_v56 = vld [vmem:[%s6788_s0 + $0xa0] sm:$0xff]  ;;  %v41_v57 = vld [vmem:[%s6788_s0 + $0xa8] sm:$0xff] }
  0x1d   :  { %3085 = vmatmul.mubr.msk.f32.gmra.mrb[6].mxu1 %vm152_vm0, %v3903_v0  ;;  %433 = vmatprep.mubr.f32.mxu0 %v6794_v3  ;;  %v1750_v58 = vld [vmem:[%s6787_s3 + $0x1d0] sm:$0xff]  ;;  %v1751_v59 = vld [vmem:[%s6787_s3 + $0x1d8] sm:$0xff]  ;;  %v44_v63 = vld [vmem:[%s6788_s0 + $0xc0] sm:$0xff] }
  0x1e   :  { %882 = vmatprep.mubr.f32.mxu1 %v6794_v3  ;;  %3247 = vmatprep.subr.bf16.mxu0 %v6792_v46  ;;  %v42_v60 = vld [vmem:[%s6788_s0 + $0xb0] sm:$0xff]  ;;  %v3335_v61 = vpack.c.bf16 %v1751_v59, %v1750_v58  ;;  %v43_v62 = vld [vmem:[%s6788_s0 + $0xb8] sm:$0xff]  ;;  %v1752_v2 = vld [vmem:[%s6787_s3 + $0x1e0] sm:$0xff] }
  0x1f   :  { %3306 = vmatpush1.bf16.msra.mxu1 %v3305_v1  ;;  %v45_v1 = vld [vmem:[%s6788_s0 + $0xc8] sm:$0xff]  ;;  %v47_v7 = vld [vmem:[%s6788_s0 + $0xd8] sm:$0xff]  ;;  %v48_v8 = vld [vmem:[%s6788_s0 + $0xe0] sm:$0xff] }
  0x20   :  { %3022 = vmatmul.mubr.msk.f32.gmra.mrb[8].mxu0 %vm152_vm0, %v24_v5  ;;  %3307 = vmatprep.subr.bf16.mxu1 %v6792_v46  ;;  %v1753_v4 = vld [vmem:[%s6787_s3 + $0x1e8] sm:$0xff]  ;;  %v1755_v11 = vld [vmem:[%s6787_s3 + $0x1f8] sm:$0xff]  ;;  %v50_v12 = vld [vmem:[%s6788_s0 + $0xf0] sm:$0xff] }
  0x21   :  { %3086 = vmatmul.mubr.msk.f32.gmra.mrb[8].mxu1 %vm152_vm0, %v24_v5  ;;  %439 = vmatprep.mubr.f32.mxu0 %v6794_v3  ;;  %v46_v5 = vld [vmem:[%s6788_s0 + $0xd0] sm:$0xff]  ;;  %v52_v15 = vld [vmem:[%s6788_s0 + $0x100] sm:$0xff]  ;;  %v53_v16 = vld [vmem:[%s6788_s0 + $0x108] sm:$0xff] }
  0x22   :  { %888 = vmatprep.mubr.f32.mxu1 %v6794_v3  ;;  %v56_v19 = vld [vmem:[%s6788_s0 + $0x120] sm:$0xff]  ;;  %v57_v20 = vld [vmem:[%s6788_s0 + $0x128] sm:$0xff]  ;;  %v70_v33 = vld [vmem:[%s6788_s0 + $0x190] sm:$0xff] }
  0x23   :  { %3309 = vmatpush1.bf16.msra.mxu1 %v3308_v6  ;;  %v3338_v6 = vpack.c.bf16 %v1753_v4, %v1752_v2  ;;  %v60_v23 = vld [vmem:[%s6788_s0 + $0x140] sm:$0xff]  ;;  %v61_v24 = vld [vmem:[%s6788_s0 + $0x148] sm:$0xff]  ;;  %v71_v34 = vld [vmem:[%s6788_s0 + $0x198] sm:$0xff] }
  0x24   :  { %3023 = vmatmul.mubr.msk.f32.gmra.mrb[10].mxu0 %vm152_vm0, %v25_v9  ;;  %3310 = vmatprep.subr.bf16.mxu1 %v6792_v46  ;;  %v64_v27 = vld [vmem:[%s6788_s0 + $0x160] sm:$0xff]  ;;  %v65_v28 = vld [vmem:[%s6788_s0 + $0x168] sm:$0xff]  ;;  %v74_v41 = vld [vmem:[%s6788_s0 + $0x1b0] sm:$0xff] }
  0x25   :  { %3087 = vmatmul.mubr.msk.f32.gmra.mrb[10].mxu1 %vm152_vm0, %v25_v9  ;;  %445 = vmatprep.mubr.f32.mxu0 %v6794_v3  ;;  %v49_v9 = vld [vmem:[%s6788_s0 + $0xe8] sm:$0xff]  ;;  %v78_v2 = vld [vmem:[%s6788_s0 + $0x1d0] sm:$0xff] }
  0x26   :  { %894 = vmatprep.mubr.f32.mxu1 %v6794_v3  ;;  %v69_v32 = vld [vmem:[%s6788_s0 + $0x188] sm:$0xff] }
  0x27   :  { %3312 = vmatpush1.bf16.msra.mxu1 %v3311_v10  ;;  %v1754_v10 = vld [vmem:[%s6787_s3 + $0x1f0] sm:$0xff]  ;;  %v73_v36 = vld [vmem:[%s6788_s0 + $0x1a8] sm:$0xff] }
  0x28   :  { %3024 = vmatmul.mubr.msk.f32.gmra.mrb[12].mxu0 %vm152_vm0, %v26_v13  ;;  %3313 = vmatprep.subr.bf16.mxu1 %v6792_v46 }
  0x29   :  { %3088 = vmatmul.mubr.msk.f32.gmra.mrb[12].mxu1 %vm152_vm0, %v26_v13  ;;  %451 = vmatprep.mubr.f32.mxu0 %v6794_v3  ;;  %v3341_v13 = vpack.c.bf16 %v1755_v11, %v1754_v10 }
  0x2a   :  { %900 = vmatprep.mubr.f32.mxu1 %v6794_v3 }
  0x2b   :  { %3315 = vmatpush1.bf16.msra.mxu1 %v3314_v14  ;;  %v51_v14 = vld [vmem:[%s6788_s0 + $0xf8] sm:$0xff] }
  0x2c   :  { %3025 = vmatmul.mubr.msk.f32.gmra.mrb[14].mxu0 %vm152_vm0, %v27_v17  ;;  %3316 = vmatprep.subr.bf16.mxu1 %v6792_v46 }
  0x2d   :  { %3089 = vmatmul.mubr.msk.f32.gmra.mrb[14].mxu1 %vm152_vm0, %v27_v17  ;;  %457 = vmatprep.mubr.f32.mxu0 %v6794_v3  ;;  %v54_v17 = vld [vmem:[%s6788_s0 + $0x110] sm:$0xff] }
  0x2e   :  { %906 = vmatprep.mubr.f32.mxu1 %v6794_v3 }
  0x2f   :  { %3318 = vmatpush1.bf16.msra.mxu1 %v3317_v18  ;;  %v55_v18 = vld [vmem:[%s6788_s0 + $0x118] sm:$0xff] }
  0x30   :  { %3026 = vmatmul.mubr.msk.f32.gmra.mrb[16].mxu0 %vm152_vm0, %v28_v21  ;;  %3319 = vmatprep.subr.bf16.mxu1 %v6792_v46 }
  0x31   :  { %3090 = vmatmul.mubr.msk.f32.gmra.mrb[16].mxu1 %vm152_vm0, %v28_v21  ;;  %463 = vmatprep.mubr.f32.mxu0 %v6794_v3  ;;  %v58_v21 = vld [vmem:[%s6788_s0 + $0x130] sm:$0xff] }
  0x32   :  { %912 = vmatprep.mubr.f32.mxu1 %v6794_v3 }
  0x33   :  { %3321 = vmatpush1.bf16.msra.mxu1 %v3320_v22  ;;  %v59_v22 = vld [vmem:[%s6788_s0 + $0x138] sm:$0xff] }
  0x34   :  { %3027 = vmatmul.mubr.msk.f32.gmra.mrb[18].mxu0 %vm152_vm0, %v29_v25  ;;  %3322 = vmatprep.subr.bf16.mxu1 %v6792_v46 }
  0x35   :  { %3091 = vmatmul.mubr.msk.f32.gmra.mrb[18].mxu1 %vm152_vm0, %v29_v25  ;;  %469 = vmatprep.mubr.f32.mxu0 %v6794_v3  ;;  %v62_v25 = vld [vmem:[%s6788_s0 + $0x150] sm:$0xff] }
  0x36   :  { %918 = vmatprep.mubr.f32.mxu1 %v6794_v3 }
  0x37   :  { %3324 = vmatpush1.bf16.msra.mxu1 %v3323_v26  ;;  %v63_v26 = vld [vmem:[%s6788_s0 + $0x158] sm:$0xff] }
  0x38   :  { %3028 = vmatmul.mubr.msk.f32.gmra.mrb[20].mxu0 %vm152_vm0, %v30_v29  ;;  %3325 = vmatprep.subr.bf16.mxu1 %v6792_v46 }
  0x39   :  { %3092 = vmatmul.mubr.msk.f32.gmra.mrb[20].mxu1 %vm152_vm0, %v30_v29  ;;  %475 = vmatprep.mubr.f32.mxu0 %v6794_v3  ;;  %v66_v29 = vld [vmem:[%s6788_s0 + $0x170] sm:$0xff] }
  0x3a   :  { %924 = vmatprep.mubr.f32.mxu1 %v6794_v3 }
  0x3b   :  { %3327 = vmatpush1.bf16.msra.mxu1 %v3326_v30  ;;  %v67_v30 = vld [vmem:[%s6788_s0 + $0x178] sm:$0xff] }
  0x3c   :  { %3029 = vmatmul.mubr.msk.f32.gmra.mrb[22].mxu0 %vm152_vm0, %v31_v31  ;;  %3328 = vmatprep.subr.bf16.mxu1 %v6792_v46 }
  0x3d   :  { %3093 = vmatmul.mubr.msk.f32.gmra.mrb[22].mxu1 %vm152_vm0, %v31_v31  ;;  %481 = vmatprep.mubr.f32.mxu0 %v6794_v3  ;;  %v68_v31 = vld [vmem:[%s6788_s0 + $0x180] sm:$0xff] }
  0x3e   :  { %930 = vmatprep.mubr.f32.mxu1 %v6794_v3 }
  0x3f   :  { %3330 = vmatpush1.bf16.msra.mxu1 %v3329_v42 }
  0x40   :  { %3030 = vmatmul.mubr.msk.f32.gmra.mrb[24].mxu0 %vm152_vm0, %v32_v35  ;;  %3331 = vmatprep.subr.bf16.mxu1 %v6792_v46 }
  0x41   :  { %3094 = vmatmul.mubr.msk.f32.gmra.mrb[24].mxu1 %vm152_vm0, %v32_v35  ;;  %487 = vmatprep.mubr.f32.mxu0 %v6794_v3  ;;  %v72_v35 = vld [vmem:[%s6788_s0 + $0x1a0] sm:$0xff] }
  0x42   :  { %936 = vmatprep.mubr.f32.mxu1 %v6794_v3 }
  0x43   :  { %3333 = vmatpush1.bf16.msra.mxu1 %v3332_v52 }
  0x44   :  { %3031 = vmatmul.mubr.msk.f32.gmra.mrb[26].mxu0 %vm152_vm0, %v33_v39  ;;  %3334 = vmatprep.subr.bf16.mxu1 %v6792_v46 }
  0x45   :  { %3095 = vmatmul.mubr.msk.f32.gmra.mrb[26].mxu1 %vm152_vm0, %v33_v39  ;;  %493 = vmatprep.mubr.f32.mxu0 %v6794_v3 }
  0x46   :  { %942 = vmatprep.mubr.f32.mxu1 %v6794_v3 }
  0x47   :  { %3336 = vmatpush1.bf16.msra.mxu1 %v3335_v61 }
  0x48   :  { %3032 = vmatmul.mubr.msk.f32.gmra.mrb[28].mxu0 %vm152_vm0, %v34_v43  ;;  %3337 = vmatprep.subr.bf16.mxu1 %v6792_v46 }
  0x49   :  { %3096 = vmatmul.mubr.msk.f32.gmra.mrb[28].mxu1 %vm152_vm0, %v34_v43  ;;  %499 = vmatprep.mubr.f32.mxu0 %v6794_v3 }
  0x4a   :  { %948 = vmatprep.mubr.f32.mxu1 %v6794_v3 }
  0x4b   :  { %3339 = vmatpush1.bf16.msra.mxu1 %v3338_v6 }
  0x4c   :  { %3033 = vmatmul.mubr.msk.f32.gmra.mrb[30].mxu0 %vm152_vm0, %v35_v45  ;;  %3340 = vmatprep.subr.bf16.mxu1 %v6792_v46 }
  0x4d   :  { %3097 = vmatmul.mubr.msk.f32.gmra.mrb[30].mxu1 %vm152_vm0, %v35_v45  ;;  %505 = vmatprep.mubr.f32.mxu0 %v6794_v3 }
  0x4e   :  { %954 = vmatprep.mubr.f32.mxu1 %v6794_v3 }
  0x4f   :  { %3342 = vmatpush1.bf16.msra.mxu1 %v3341_v13  ;;  %v80_v13 = vld [vmem:[%s6788_s0 + $0x1e0] sm:$0xff] }
  0x50   :  { %3034 = vmatmul.mubr.msk.f32.gmra.mrb[32].mxu0 %vm152_vm0, %v36_v47  ;;  %3343 = vmatprep.subr.bf16.mxu1 %v6792_v46 }
  0x51   :  { %3098 = vmatmul.mubr.msk.f32.gmra.mrb[32].mxu1 %vm152_vm0, %v36_v47  ;;  %511 = vmatprep.mubr.f32.mxu0 %v6794_v3 }
  0x52   :  { %960 = vmatprep.mubr.f32.mxu1 %v6794_v3 }
  0x54   :  { %3035 = vmatmul.mubr.msk.f32.gmra.mrb[34].mxu0 %vm152_vm0, %v37_v48 }
  0x55   :  { %3099 = vmatmul.mubr.msk.f32.gmra.mrb[34].mxu1 %vm152_vm0, %v37_v48  ;;  %517 = vmatprep.mubr.f32.mxu0 %v6794_v3  ;;  %v75_v48 = vld [vmem:[%s6788_s0 + $0x1b8] sm:$0xff] }
  0x56   :  { %966 = vmatprep.mubr.f32.mxu1 %v6794_v3 }
  0x58   :  { %3036 = vmatmul.mubr.msk.f32.gmra.mrb[36].mxu0 %vm152_vm0, %v38_v53 }
  0x59   :  { %3100 = vmatmul.mubr.msk.f32.gmra.mrb[36].mxu1 %vm152_vm0, %v38_v53  ;;  %523 = vmatprep.mubr.f32.mxu0 %v6794_v3 }
  0x5a   :  { %972 = vmatprep.mubr.f32.mxu1 %v6794_v3 }
  0x5c   :  { %3037 = vmatmul.mubr.msk.f32.gmra.mrb[38].mxu0 %vm152_vm0, %v39_v55 }
  0x5d   :  { %3101 = vmatmul.mubr.msk.f32.gmra.mrb[38].mxu1 %vm152_vm0, %v39_v55  ;;  %529 = vmatprep.mubr.f32.mxu0 %v6794_v3  ;;  %v76_v55 = vld [vmem:[%s6788_s0 + $0x1c0] sm:$0xff] }
  0x5e   :  { %978 = vmatprep.mubr.f32.mxu1 %v6794_v3 }
  0x60   :  { %3038 = vmatmul.mubr.msk.f32.gmra.mrb[40].mxu0 %vm152_vm0, %v40_v56 }
  0x61   :  { %3102 = vmatmul.mubr.msk.f32.gmra.mrb[40].mxu1 %vm152_vm0, %v40_v56  ;;  %535 = vmatprep.mubr.f32.mxu0 %v6794_v3 }
  0x62   :  { %984 = vmatprep.mubr.f32.mxu1 %v6794_v3 }
  0x64   :  { %3039 = vmatmul.mubr.msk.f32.gmra.mrb[42].mxu0 %vm152_vm0, %v41_v57 }
  0x65   :  { %3103 = vmatmul.mubr.msk.f32.gmra.mrb[42].mxu1 %vm152_vm0, %v41_v57  ;;  %541 = vmatprep.mubr.f32.mxu0 %v6794_v3 }
  0x66   :  { %990 = vmatprep.mubr.f32.mxu1 %v6794_v3 }
  0x68   :  { %3040 = vmatmul.mubr.msk.f32.gmra.mrb[44].mxu0 %vm152_vm0, %v42_v60 }
  0x69   :  { %3104 = vmatmul.mubr.msk.f32.gmra.mrb[44].mxu1 %vm152_vm0, %v42_v60  ;;  %547 = vmatprep.mubr.f32.mxu0 %v6794_v3  ;;  %v77_v60 = vld [vmem:[%s6788_s0 + $0x1c8] sm:$0xff] }
  0x6a   :  { %996 = vmatprep.mubr.f32.mxu1 %v6794_v3 }
  0x6c   :  { %3041 = vmatmul.mubr.msk.f32.gmra.mrb[46].mxu0 %vm152_vm0, %v43_v62 }
  0x6d   :  { %3105 = vmatmul.mubr.msk.f32.gmra.mrb[46].mxu1 %vm152_vm0, %v43_v62  ;;  %553 = vmatprep.mubr.f32.mxu0 %v6794_v3 }
  0x6e   :  { %1002 = vmatprep.mubr.f32.mxu1 %v6794_v3 }
  0x70   :  { %3042 = vmatmul.mubr.msk.f32.gmra.mrb[48].mxu0 %vm152_vm0, %v44_v63 }
  0x71   :  { %3106 = vmatmul.mubr.msk.f32.gmra.mrb[48].mxu1 %vm152_vm0, %v44_v63  ;;  %559 = vmatprep.mubr.f32.mxu0 %v6794_v3 }
  0x72   :  { %1008 = vmatprep.mubr.f32.mxu1 %v6794_v3 }
  0x74   :  { %3043 = vmatmul.mubr.msk.f32.gmra.mrb[50].mxu0 %vm152_vm0, %v45_v1 }
  0x75   :  { %3107 = vmatmul.mubr.msk.f32.gmra.mrb[50].mxu1 %vm152_vm0, %v45_v1  ;;  %565 = vmatprep.mubr.f32.mxu0 %v6794_v3 }
  0x76   :  { %1014 = vmatprep.mubr.f32.mxu1 %v6794_v3 }
  0x78   :  { %3044 = vmatmul.mubr.msk.f32.gmra.mrb[52].mxu0 %vm152_vm0, %v46_v5 }
  0x79   :  { %3108 = vmatmul.mubr.msk.f32.gmra.mrb[52].mxu1 %vm152_vm0, %v46_v5  ;;  %571 = vmatprep.mubr.f32.mxu0 %v6794_v3 }
  0x7a   :  { %1020 = vmatprep.mubr.f32.mxu1 %v6794_v3 }
  0x7c   :  { %3045 = vmatmul.mubr.msk.f32.gmra.mrb[54].mxu0 %vm152_vm0, %v47_v7 }
  0x7d   :  { %3109 = vmatmul.mubr.msk.f32.gmra.mrb[54].mxu1 %vm152_vm0, %v47_v7  ;;  %577 = vmatprep.mubr.f32.mxu0 %v6794_v3 }
  0x7e   :  { %1026 = vmatprep.mubr.f32.mxu1 %v6794_v3 }
  0x80   :  { %3046 = vmatmul.mubr.msk.f32.gmra.mrb[56].mxu0 %vm152_vm0, %v48_v8 }
  0x81   :  { %3110 = vmatmul.mubr.msk.f32.gmra.mrb[56].mxu1 %vm152_vm0, %v48_v8  ;;  %583 = vmatprep.mubr.f32.mxu0 %v6794_v3  ;;  %v79_v8 = vld [vmem:[%s6788_s0 + $0x1d8] sm:$0xff] }
  0x82   :  { %1032 = vmatprep.mubr.f32.mxu1 %v6794_v3 }
  0x84   :  { %3047 = vmatmul.mubr.msk.f32.gmra.mrb[58].mxu0 %vm152_vm0, %v49_v9 }
  0x85   :  { %3111 = vmatmul.mubr.msk.f32.gmra.mrb[58].mxu1 %vm152_vm0, %v49_v9  ;;  %589 = vmatprep.mubr.f32.mxu0 %v6794_v3 }
  0x86   :  { %1038 = vmatprep.mubr.f32.mxu1 %v6794_v3 }
  0x88   :  { %3048 = vmatmul.mubr.msk.f32.gmra.mrb[60].mxu0 %vm152_vm0, %v50_v12 }
  0x89   :  { %3112 = vmatmul.mubr.msk.f32.gmra.mrb[60].mxu1 %vm152_vm0, %v50_v12  ;;  %595 = vmatprep.mubr.f32.mxu0 %v6794_v3 }
  0x8a   :  { %1044 = vmatprep.mubr.f32.mxu1 %v6794_v3 }
  0x8c   :  { %3049 = vmatmul.mubr.msk.f32.gmra.mrb[62].mxu0 %vm152_vm0, %v51_v14 }
  0x8d   :  { %3113 = vmatmul.mubr.msk.f32.gmra.mrb[62].mxu1 %vm152_vm0, %v51_v14  ;;  %601 = vmatprep.mubr.f32.mxu0 %v6794_v3  ;;  %v122_v14 = vlaneseq }
  0x8e   :  { %1050 = vmatprep.mubr.f32.mxu1 %v6794_v3 }
  0x90   :  { %3050 = vmatmul.mubr.msk.f32.gmra.mrb[64].mxu0 %vm152_vm0, %v52_v15 }
  0x91   :  { %3114 = vmatmul.mubr.msk.f32.gmra.mrb[64].mxu1 %vm152_vm0, %v52_v15  ;;  %607 = vmatprep.mubr.f32.mxu0 %v6794_v3 }
  0x92   :  { %1056 = vmatprep.mubr.f32.mxu1 %v6794_v3 }
  0x94   :  { %3051 = vmatmul.mubr.msk.f32.gmra.mrb[66].mxu0 %vm152_vm0, %v53_v16 }
  0x95   :  { %3115 = vmatmul.mubr.msk.f32.gmra.mrb[66].mxu1 %vm152_vm0, %v53_v16  ;;  %613 = vmatprep.mubr.f32.mxu0 %v6794_v3 }
  0x96   :  { %1062 = vmatprep.mubr.f32.mxu1 %v6794_v3 }
  0x98   :  { %3052 = vmatmul.mubr.msk.f32.gmra.mrb[68].mxu0 %vm152_vm0, %v54_v17 }
  0x99   :  { %3116 = vmatmul.mubr.msk.f32.gmra.mrb[68].mxu1 %vm152_vm0, %v54_v17  ;;  %619 = vmatprep.mubr.f32.mxu0 %v6794_v3 }
  0x9a   :  { %1068 = vmatprep.mubr.f32.mxu1 %v6794_v3 }
  0x9c   :  { %3053 = vmatmul.mubr.msk.f32.gmra.mrb[70].mxu0 %vm152_vm0, %v55_v18 }
  0x9d   :  { %3117 = vmatmul.mubr.msk.f32.gmra.mrb[70].mxu1 %vm152_vm0, %v55_v18  ;;  %625 = vmatprep.mubr.f32.mxu0 %v6794_v3 }
  0x9e   :  { %1074 = vmatprep.mubr.f32.mxu1 %v6794_v3 }
  0xa0   :  { %3054 = vmatmul.mubr.msk.f32.gmra.mrb[72].mxu0 %vm152_vm0, %v56_v19 }
  0xa1   :  { %3118 = vmatmul.mubr.msk.f32.gmra.mrb[72].mxu1 %vm152_vm0, %v56_v19  ;;  %631 = vmatprep.mubr.f32.mxu0 %v6794_v3  ;;  %v81_v19 = vld [vmem:[%s6788_s0 + $0x1e8] sm:$0xff] }
  0xa2   :  { %1080 = vmatprep.mubr.f32.mxu1 %v6794_v3 }
  0xa4   :  { %3055 = vmatmul.mubr.msk.f32.gmra.mrb[74].mxu0 %vm152_vm0, %v57_v20 }
  0xa5   :  { %3119 = vmatmul.mubr.msk.f32.gmra.mrb[74].mxu1 %vm152_vm0, %v57_v20  ;;  %637 = vmatprep.mubr.f32.mxu0 %v6794_v3  ;;  %v4476_v20 = vshrl.u32 %v122_v14, 7 }
  0xa6   :  { %1086 = vmatprep.mubr.f32.mxu1 %v6794_v3 }
  0xa8   :  { %3056 = vmatmul.mubr.msk.f32.gmra.mrb[76].mxu0 %vm152_vm0, %v58_v21 }
  0xa9   :  { %3120 = vmatmul.mubr.msk.f32.gmra.mrb[76].mxu1 %vm152_vm0, %v58_v21  ;;  %643 = vmatprep.mubr.f32.mxu0 %v6794_v3 }
  0xaa   :  { %1092 = vmatprep.mubr.f32.mxu1 %v6794_v3 }
  0xac   :  { %3057 = vmatmul.mubr.msk.f32.gmra.mrb[78].mxu0 %vm152_vm0, %v59_v22 }
  0xad   :  { %3121 = vmatmul.mubr.msk.f32.gmra.mrb[78].mxu1 %vm152_vm0, %v59_v22  ;;  %649 = vmatprep.mubr.f32.mxu0 %v6794_v3  ;;  %v136_v22 = vsub.s32 3, %v4476_v20 }
  0xae   :  { %1098 = vmatprep.mubr.f32.mxu1 %v6794_v3 }
  0xb0   :  { %3058 = vmatmul.mubr.msk.f32.gmra.mrb[80].mxu0 %vm152_vm0, %v60_v23 }
  0xb1   :  { %3122 = vmatmul.mubr.msk.f32.gmra.mrb[80].mxu1 %vm152_vm0, %v60_v23  ;;  %655 = vmatprep.mubr.f32.mxu0 %v6794_v3 }
  0xb2   :  { %1104 = vmatprep.mubr.f32.mxu1 %v6794_v3 }
  0xb4   :  { %3059 = vmatmul.mubr.msk.f32.gmra.mrb[82].mxu0 %vm152_vm0, %v61_v24 }
  0xb5   :  { %3123 = vmatmul.mubr.msk.f32.gmra.mrb[82].mxu1 %vm152_vm0, %v61_v24  ;;  %661 = vmatprep.mubr.f32.mxu0 %v6794_v3 }
  0xb6   :  { %1110 = vmatprep.mubr.f32.mxu1 %v6794_v3 }
  0xb8   :  { %3060 = vmatmul.mubr.msk.f32.gmra.mrb[84].mxu0 %vm152_vm0, %v62_v25 }
  0xb9   :  { %3124 = vmatmul.mubr.msk.f32.gmra.mrb[84].mxu1 %vm152_vm0, %v62_v25  ;;  %667 = vmatprep.mubr.f32.mxu0 %v6794_v3 }
  0xba   :  { %1116 = vmatprep.mubr.f32.mxu1 %v6794_v3 }
  0xbc   :  { %3061 = vmatmul.mubr.msk.f32.gmra.mrb[86].mxu0 %vm152_vm0, %v63_v26 }
  0xbd   :  { %3125 = vmatmul.mubr.msk.f32.gmra.mrb[86].mxu1 %vm152_vm0, %v63_v26  ;;  %673 = vmatprep.mubr.f32.mxu0 %v6794_v3  ;;  %v82_v26 = vld [vmem:[%s6788_s0 + $0x1f0] sm:$0xff] }
  0xbe   :  { %1122 = vmatprep.mubr.f32.mxu1 %v6794_v3 }
  0xc0   :  { %3062 = vmatmul.mubr.msk.f32.gmra.mrb[88].mxu0 %vm152_vm0, %v64_v27 }
  0xc1   :  { %3126 = vmatmul.mubr.msk.f32.gmra.mrb[88].mxu1 %vm152_vm0, %v64_v27  ;;  %679 = vmatprep.mubr.f32.mxu0 %v6794_v3  ;;  %v120_v27 = vld [vmem:[%s6789_s2] sm:$0x3f] }
  0xc2   :  { %1128 = vmatprep.mubr.f32.mxu1 %v6794_v3 }
  0xc4   :  { %3063 = vmatmul.mubr.msk.f32.gmra.mrb[90].mxu0 %vm152_vm0, %v65_v28 }
  0xc5   :  { %3127 = vmatmul.mubr.msk.f32.gmra.mrb[90].mxu1 %vm152_vm0, %v65_v28  ;;  %685 = vmatprep.mubr.f32.mxu0 %v6794_v3  ;;  %v132_v28 = vsub.s32 2, %v4476_v20 }
  0xc6   :  { %1134 = vmatprep.mubr.f32.mxu1 %v6794_v3 }
  0xc8   :  { %3064 = vmatmul.mubr.msk.f32.gmra.mrb[92].mxu0 %vm152_vm0, %v66_v29 }
  0xc9   :  { %3128 = vmatmul.mubr.msk.f32.gmra.mrb[92].mxu1 %vm152_vm0, %v66_v29  ;;  %691 = vmatprep.mubr.f32.mxu0 %v6794_v3 }
  0xca   :  { %1140 = vmatprep.mubr.f32.mxu1 %v6794_v3 }
  0xcc   :  { %3065 = vmatmul.mubr.msk.f32.gmra.mrb[94].mxu0 %vm152_vm0, %v67_v30 }
  0xcd   :  { %3129 = vmatmul.mubr.msk.f32.gmra.mrb[94].mxu1 %vm152_vm0, %v67_v30  ;;  %697 = vmatprep.mubr.f32.mxu0 %v6794_v3  ;;  %v4501_v30 = vrot.slane %v120_v27, %v136_v22 }
  0xce   :  { %1146 = vmatprep.mubr.f32.mxu1 %v6794_v3 }
  0xd0   :  { %3066 = vmatmul.mubr.msk.f32.gmra.mrb[96].mxu0 %vm152_vm0, %v68_v31 }
  0xd1   :  { %3130 = vmatmul.mubr.msk.f32.gmra.mrb[96].mxu1 %vm152_vm0, %v68_v31  ;;  %703 = vmatprep.mubr.f32.mxu0 %v6794_v3 }
  0xd2   :  { %1152 = vmatprep.mubr.f32.mxu1 %v6794_v3 }
  0xd4   :  { %3067 = vmatmul.mubr.msk.f32.gmra.mrb[98].mxu0 %vm152_vm0, %v69_v32 }
  0xd5   :  { %3131 = vmatmul.mubr.msk.f32.gmra.mrb[98].mxu1 %vm152_vm0, %v69_v32  ;;  %709 = vmatprep.mubr.f32.mxu0 %v6794_v3 }
  0xd6   :  { %1158 = vmatprep.mubr.f32.mxu1 %v6794_v3 }
  0xd8   :  { %3068 = vmatmul.mubr.msk.f32.gmra.mrb[100].mxu0 %vm152_vm0, %v70_v33 }
  0xd9   :  { %3132 = vmatmul.mubr.msk.f32.gmra.mrb[100].mxu1 %vm152_vm0, %v70_v33  ;;  %715 = vmatprep.mubr.f32.mxu0 %v6794_v3 }
  0xda   :  { %1164 = vmatprep.mubr.f32.mxu1 %v6794_v3 }
  0xdc   :  { %3069 = vmatmul.mubr.msk.f32.gmra.mrb[102].mxu0 %vm152_vm0, %v71_v34 }
  0xdd   :  { %3133 = vmatmul.mubr.msk.f32.gmra.mrb[102].mxu1 %vm152_vm0, %v71_v34  ;;  %721 = vmatprep.mubr.f32.mxu0 %v6794_v3  ;;  %v83_v34 = vld [vmem:[%s6788_s0 + $0x1f8] sm:$0xff] }
  0xde   :  { %1170 = vmatprep.mubr.f32.mxu1 %v6794_v3 }
  0xe0   :  { %3070 = vmatmul.mubr.msk.f32.gmra.mrb[104].mxu0 %vm152_vm0, %v72_v35 }
  0xe1   :  { %3134 = vmatmul.mubr.msk.f32.gmra.mrb[104].mxu1 %vm152_vm0, %v72_v35  ;;  %727 = vmatprep.mubr.f32.mxu0 %v6794_v3  ;;  %v1692_v35 = vld [vmem:[%s6787_s3] sm:$0xff] }
  0xe2   :  { %1176 = vmatprep.mubr.f32.mxu1 %v6794_v3 }
  0xe3   :  { %v4357_v37 = vpop.f32.mrb[0].mxu0 }
  0xe4   :  { %v4359_v38 = vpop.f32.mrb[1].mxu0  ;;  %3071 = vmatmul.mubr.msk.f32.gmra.mrb[106].mxu0 %vm152_vm0, %v73_v36  ;;  %v4362_v39 = vpop.f32.mrb[0].mxu1 }
  0xe5   :  { %3135 = vmatmul.mubr.msk.f32.gmra.mrb[106].mxu1 %vm152_vm0, %v73_v36  ;;  %v4365_v40 = vpop.f32.mrb[1].mxu1  ;;  %733 = vmatprep.mubr.f32.mxu0 %v6794_v3  ;;  %v1693_v36 = vld [vmem:[%s6787_s3 + $0x8] sm:$0xff] }
  0xe6   :  { %1182 = vmatprep.mubr.f32.mxu1 %v6794_v3 }
  0xe7   :  { %v4372_v42 = vpop.f32.mrb[2].mxu0 }
  0xe8   :  { %v4374_v43 = vpop.f32.mrb[3].mxu0  ;;  %3072 = vmatmul.mubr.msk.f32.gmra.mrb[108].mxu0 %vm152_vm0, %v74_v41  ;;  %v4377_v45 = vpop.f32.mrb[2].mxu1 }
  0xe9   :  { %3136 = vmatmul.mubr.msk.f32.gmra.mrb[108].mxu1 %vm152_vm0, %v74_v41  ;;  %v4380_v47 = vpop.f32.mrb[3].mxu1  ;;  %739 = vmatprep.mubr.f32.mxu0 %v6794_v3  ;;  %v4522_v41 = vrot.slane %v120_v27, %v132_v28  ;;  %v1694_v27 = vld [vmem:[%s6787_s3 + $0x10] sm:$0xff]  ;;  %v1695_v28 = vld [vmem:[%s6787_s3 + $0x18] sm:$0xff] }
  0xea   :  { %1188 = vmatprep.mubr.f32.mxu1 %v6794_v3 }
  0xeb   :  { %v4387_v49 = vpop.f32.mrb[4].mxu0 }
  0xec   :  { %v4389_v51 = vpop.f32.mrb[5].mxu0  ;;  %3073 = vmatmul.mubr.msk.f32.gmra.mrb[110].mxu0 %vm152_vm0, %v75_v48  ;;  %v4392_v52 = vpop.f32.mrb[4].mxu1 }
  0xed   :  { %3137 = vmatmul.mubr.msk.f32.gmra.mrb[110].mxu1 %vm152_vm0, %v75_v48  ;;  %v4395_v53 = vpop.f32.mrb[5].mxu1  ;;  %745 = vmatprep.mubr.f32.mxu0 %v6794_v3 }
  0xee   :  { %1194 = vmatprep.mubr.f32.mxu1 %v6794_v3 }
  0xef   :  { %v4402_v56 = vpop.f32.mrb[6].mxu0 }
  0xf0   :  { %v4404_v57 = vpop.f32.mrb[7].mxu0  ;;  %3074 = vmatmul.mubr.msk.f32.gmra.mrb[112].mxu0 %vm152_vm0, %v76_v55  ;;  %v4407_v58 = vpop.f32.mrb[6].mxu1 }
  0xf1   :  { %3138 = vmatmul.mubr.msk.f32.gmra.mrb[112].mxu1 %vm152_vm0, %v76_v55  ;;  %v4410_v59 = vpop.f32.mrb[7].mxu1  ;;  %751 = vmatprep.mubr.f32.mxu0 %v6794_v3  ;;  %v863_v55 = vadd.f32 %v4365_v40, %v4501_v30  ;;  %v3248_v40 = vpack.c.bf16 %v1693_v36, %v1692_v35  ;;  %v1758_v35 = vld [vmem:[%s6787_s3 + $0x210] sm:$0xff]  ;;  %v1759_v36 = vld [vmem:[%s6787_s3 + $0x218] sm:$0xff] }
  0xf2   :  { %1200 = vmatprep.mubr.f32.mxu1 %v6794_v3 }
  0xf3   :  { %v4417_v61 = vpop.f32.mrb[8].mxu0 }
  0xf4   :  { %v4419_v62 = vpop.f32.mrb[9].mxu0  ;;  %3075 = vmatmul.mubr.msk.f32.gmra.mrb[114].mxu0 %vm152_vm0, %v77_v60  ;;  %v4422_v63 = vpop.f32.mrb[8].mxu1 }
  0xf5   :  { %3139 = vmatmul.mubr.msk.f32.gmra.mrb[114].mxu1 %vm152_vm0, %v77_v60  ;;  %v4425_v1 = vpop.f32.mrb[9].mxu1  ;;  %757 = vmatprep.mubr.f32.mxu0 %v6794_v3 }
  0xf6   :  { %1206 = vmatprep.mubr.f32.mxu1 %v6794_v3 }
  0xf7   :  { %v4432_v4 = vpop.f32.mrb[10].mxu0 }
  0xf8   :  { %v4434_v5 = vpop.f32.mrb[11].mxu0  ;;  %3076 = vmatmul.mubr.msk.f32.gmra.mrb[116].mxu0 %vm152_vm0, %v78_v2  ;;  %v4437_v6 = vpop.f32.mrb[10].mxu1 }
  0xf9   :  { %3140 = vmatmul.mubr.msk.f32.gmra.mrb[116].mxu1 %vm152_vm0, %v78_v2  ;;  %v4440_v7 = vpop.f32.mrb[11].mxu1  ;;  %763 = vmatprep.mubr.f32.mxu0 %v6794_v3 }
  0xfa   :  { %1212 = vmatprep.mubr.f32.mxu1 %v6794_v3 }
  0xfb   :  { %v4447_v9 = vpop.f32.mrb[12].mxu0 }
  0xfc   :  { %v4449_v10 = vpop.f32.mrb[13].mxu0  ;;  %3077 = vmatmul.mubr.msk.f32.gmra.mrb[118].mxu0 %vm152_vm0, %v79_v8  ;;  %v4452_v11 = vpop.f32.mrb[12].mxu1 }
  0xfd   :  { %3141 = vmatmul.mubr.msk.f32.gmra.mrb[118].mxu1 %vm152_vm0, %v79_v8  ;;  %v4455_v12 = vpop.f32.mrb[13].mxu1  ;;  %769 = vmatprep.mubr.f32.mxu0 %v6794_v3  ;;  %v1756_v8 = vld [vmem:[%s6787_s3 + $0x200] sm:$0xff] }
  0xfe   :  { %1218 = vmatprep.mubr.f32.mxu1 %v6794_v3 }
  0xff   :  { %v4462_v15 = vpop.f32.mrb[14].mxu0 }
 0x100   :  { %v4464_v16 = vpop.f32.mrb[15].mxu0  ;;  %3078 = vmatmul.mubr.msk.f32.gmra.mrb[120].mxu0 %vm152_vm0, %v80_v13  ;;  %v4467_v17 = vpop.f32.mrb[14].mxu1 }
 0x101   :  { %3142 = vmatmul.mubr.msk.f32.gmra.mrb[120].mxu1 %vm152_vm0, %v80_v13  ;;  %v4470_v18 = vpop.f32.mrb[15].mxu1  ;;  %775 = vmatprep.mubr.f32.mxu0 %v6794_v3  ;;  %v1757_v13 = vld [vmem:[%s6787_s3 + $0x208] sm:$0xff] }
 0x102   :  { %1224 = vmatprep.mubr.f32.mxu1 %v6794_v3 }
 0x103   :  { %v4479_v21 = vpop.f32.mrb[16].mxu0 }
 0x104   :  { %v4482_v23 = vpop.f32.mrb[17].mxu0  ;;  %3079 = vmatmul.mubr.msk.f32.gmra.mrb[122].mxu0 %vm152_vm0, %v81_v19  ;;  %v4485_v24 = vpop.f32.mrb[16].mxu1 }
 0x105   :  { %3143 = vmatmul.mubr.msk.f32.gmra.mrb[122].mxu1 %vm152_vm0, %v81_v19  ;;  %v4488_v25 = vpop.f32.mrb[17].mxu1  ;;  %781 = vmatprep.mubr.f32.mxu0 %v6794_v3  ;;  %v861_v19 = vadd.f32 %v4362_v39, %v4522_v41 }
 0x106   :  { %1230 = vmatprep.mubr.f32.mxu1 %v6794_v3 }
 0x107   :  { %v4499_v29 = vpop.f32.mrb[18].mxu0 }
 0x108   :  { %v4503_v31 = vpop.f32.mrb[19].mxu0  ;;  %3080 = vmatmul.mubr.msk.f32.gmra.mrb[124].mxu0 %vm152_vm0, %v82_v26  ;;  %v4506_v32 = vpop.f32.mrb[18].mxu1 }
 0x109   :  { %3144 = vmatmul.mubr.msk.f32.gmra.mrb[124].mxu1 %vm152_vm0, %v82_v26  ;;  %v4509_v33 = vpop.f32.mrb[19].mxu1  ;;  %787 = vmatprep.mubr.f32.mxu0 %v6794_v3  ;;  %v3344_v26 = vpack.c.bf16 %v1757_v13, %v1756_v8  ;;  %v6798_v13 = vmov 0.0|0.0  }
 0x10a   :  { %1236 = vmatprep.mubr.f32.mxu1 %v6794_v3 }
 0x10b   :  { %v4524_v48 = vpop.f32.mrb[20].mxu0 }
 0x10c   :  { %v4528_v60 = vpop.f32.mrb[21].mxu0  ;;  %3081 = vmatmul.mubr.msk.f32.gmra.mrb[126].mxu0 %vm152_vm0, %v83_v34  ;;  %v4531_v2 = vpop.f32.mrb[20].mxu1 }
 0x10d   :  { %3145 = vmatmul.mubr.msk.f32.gmra.mrb[126].mxu1 %vm152_vm0, %v83_v34  ;;  %v4540_v14 = vpop.f32.mrb[21].mxu1  ;;  %1307 = vmatprep.mubr.f32.mxu0 %v6794_v3  ;;  %v869_v34 = vadd.f32 %v4380_v47, %v4501_v30  ;;  %v3251_v47 = vpack.c.bf16 %v1695_v28, %v1694_v27  ;;  %v875_v27 = vadd.f32 %v4395_v53, %v4501_v30 }
 0x10e   :  { %2244 = vmatprep.mubr.f32.mxu1 %v863_v55  ;;  %v873_v53 = vadd.f32 %v4392_v52, %v4522_v41 }
 0x10f   :  { %v4545_v22 = vpop.f32.mrb[22].mxu0 }
 0x110   :  { %6796 = vst [vmem:[#allocation2_spill] sm:$0xff] %v4545_v22  ;;  %v4555_v46 = vpop.f32.mrb[23].mxu0  ;;  %3146 = vmatmul.mubr.msk.f32.vlgmr.msra.gmra.mrb[128].mxu0 %vm152_vm0, %v3838_v44  ;;  %v4559_v39 = vpop.f32.mrb[22].mxu1  ;;  %v867_v44 = vadd.f32 %v4377_v45, %v4522_v41  ;;  %v3347_v22 = vpack.c.bf16 %v1759_v36, %v1758_v35 }
 0x111   :  { %2245 = vmatmul.mubr.f32.vlgmr.msra.gmra.mrb[128].mxu1 %v861_v19  ;;  %3249 = vmatpush1.bf16.msra.mxu0 %v3248_v40  ;;  %v4567_v55 = vpop.f32.mrb[23].mxu1  ;;  %v1696_v19 = vld [vmem:[%s6787_s3 + $0x20] sm:$0xff]  ;;  %v1697_v40 = vld [vmem:[%s6787_s3 + $0x28] sm:$0xff] }
 0x112   :  { %2249 = vmatprep.mubr.f32.mxu1 %v869_v34  ;;  %1313 = vmatprep.mubr.f32.mxu0 %v6794_v3  ;;  %v1761_v34 = vld [vmem:[%s6787_s3 + $0x228] sm:$0xff] }
 0x113   :  { %v4572_v8 = vpop.f32.mrb[24].mxu0  ;;  %3345 = vmatpush1.bf16.msra.mxu1 %v3344_v26  ;;  %3250 = vmatprep.subr.bf16.mxu0 %v6798_v13  ;;  %v1760_v26 = vld [vmem:[%s6787_s3 + $0x220] sm:$0xff] }
 0x114   :  { %6797 = vst [vmem:[#allocation3_spill] sm:$0xff] %v4572_v8  ;;  %v4583_v28 = vpop.f32.mrb[25].mxu0  ;;  %3147 = vmatmul.mubr.msk.f32.gmra.mrb[130].mxu0 %vm152_vm0, %v3854_v50  ;;  %v4587_v45 = vpop.f32.mrb[24].mxu1  ;;  %3346 = vmatprep.subr.bf16.mxu1 %v6798_v13  ;;  %v3254_v50 = vpack.c.bf16 %v1697_v40, %v1696_v19  ;;  %v3350_v8 = vpack.c.bf16 %v1761_v34, %v1760_v26  ;;  %v1763_v40 = vld [vmem:[%s6787_s3 + $0x238] sm:$0xff] }
 0x115   :  { %2250 = vmatmul.mubr.f32.gmra.mrb[130].mxu1 %v867_v44  ;;  %v4596_v35 = vpop.f32.mrb[25].mxu1  ;;  %1319 = vmatprep.mubr.f32.mxu0 %v6794_v3  ;;  %v1698_v44 = vld [vmem:[%s6787_s3 + $0x30] sm:$0xff]  ;;  %v1699_v3 = vld [vmem:[%s6787_s3 + $0x38] sm:$0xff]  ;;  %v879_v26 = vadd.f32 %v4407_v58, %v4522_v41 }
 0x116   :  { %2254 = vmatprep.mubr.f32.mxu1 %v875_v27  ;;  %3252 = vmatpush1.bf16.msra.mxu0 %v3251_v47  ;;  %v881_v47 = vadd.f32 %v4410_v59, %v4501_v30  ;;  %v6801_v59 = vmov 0.0  }
 0x117   :  { %v4601_v36 = vpop.f32.mrb[26].mxu0  ;;  %3348 = vmatpush1.bf16.msra.mxu1 %v3347_v22  ;;  %3253 = vmatprep.subr.bf16.mxu0 %v6798_v13  ;;  %v1762_v22 = vld [vmem:[%s6787_s3 + $0x230] sm:$0xff] }
 0x118   :  { %6799 = vst [vmem:[#allocation4_spill] sm:$0xff] %v4601_v36  ;;  %v4612_v19 = vpop.f32.mrb[27].mxu0  ;;  %3148 = vmatmul.mubr.msk.f32.gmra.mrb[132].mxu0 %vm152_vm0, %v3873_v54  ;;  %v4616_v52 = vpop.f32.mrb[26].mxu1  ;;  %3349 = vmatprep.subr.bf16.mxu1 %v6798_v13  ;;  %v3257_v54 = vpack.c.bf16 %v1699_v3, %v1698_v44  ;;  %v3353_v36 = vpack.c.bf16 %v1763_v40, %v1762_v22  ;;  %v1765_v44 = vld [vmem:[%s6787_s3 + $0x248] sm:$0xff] }
 0x119   :  { %6800 = vst [vmem:[#allocation5_spill] sm:$0xff] %v4612_v19  ;;  %2255 = vmatmul.mubr.f32.gmra.mrb[132].mxu1 %v873_v53  ;;  %v4625_v27 = vpop.f32.mrb[27].mxu1  ;;  %1325 = vmatprep.mubr.f32.mxu0 %v6801_v59  ;;  %v1700_v53 = vld [vmem:[%s6787_s3 + $0x40] sm:$0xff]  ;;  %v1701_v19 = vld [vmem:[%s6787_s3 + $0x48] sm:$0xff]  ;;  %v887_v3 = vadd.f32 %v4425_v1, %v4501_v30  ;;  %v885_v1 = vadd.f32 %v4422_v63, %v4522_v41 }
 0x11a   :  { %2259 = vmatprep.mubr.f32.mxu1 %v881_v47  ;;  %3255 = vmatpush1.bf16.msra.mxu0 %v3254_v50  ;;  %v3649_v63 = vld [vmem:[%s6788_s0 + $0x20] sm:$0xff] }
 0x11b   :  { %v4630_v34 = vpop.f32.mrb[28].mxu0  ;;  %3351 = vmatpush1.bf16.msra.mxu1 %v3350_v8  ;;  %3256 = vmatprep.subr.bf16.mxu0 %v6798_v13  ;;  %v1764_v8 = vld [vmem:[%s6787_s3 + $0x240] sm:$0xff] }
 0x11c   :  { %6802 = vst [vmem:[#allocation6_spill] sm:$0xff] %v4630_v34  ;;  %v4641_v50 = vpop.f32.mrb[29].mxu0  ;;  %3149 = vmatmul.mubr.msk.f32.gmra.mrb[134].mxu0 %vm152_vm0, %v3903_v0  ;;  %v4645_v58 = vpop.f32.mrb[28].mxu1  ;;  %3352 = vmatprep.subr.bf16.mxu1 %v6798_v13  ;;  %v3260_v0 = vpack.c.bf16 %v1701_v19, %v1700_v53  ;;  %v3356_v40 = vpack.c.bf16 %v1765_v44, %v1764_v8  ;;  %v1703_v34 = vld [vmem:[%s6787_s3 + $0x58] sm:$0xff]  ;;  %v1766_v53 = vld [vmem:[%s6787_s3 + $0x250] sm:$0xff] }
 0x11d   :  { %2260 = vmatmul.mubr.f32.gmra.mrb[134].mxu1 %v879_v26  ;;  %v4654_v47 = vpop.f32.mrb[29].mxu1  ;;  %1331 = vmatprep.mubr.f32.mxu0 %v6801_v59  ;;  %v1702_v26 = vld [vmem:[%s6787_s3 + $0x50] sm:$0xff]  ;;  %v893_v19 = vadd.f32 %v4440_v7, %v4501_v30  ;;  %v1767_v7 = vld [vmem:[%s6787_s3 + $0x258] sm:$0xff]  ;;  %v891_v44 = vadd.f32 %v4437_v6, %v4522_v41  ;;  %v3650_v6 = vld [vmem:[%s6788_s0 + $0x28] sm:$0xff] }
 0x11e   :  { %2264 = vmatprep.mubr.f32.mxu1 %v887_v3  ;;  %3258 = vmatpush1.bf16.msra.mxu0 %v3257_v54  ;;  %v3263_v8 = vpack.c.bf16 %v1703_v34, %v1702_v26  ;;  %v899_v34 = vadd.f32 %v4455_v12, %v4501_v30  ;;  %v1768_v26 = vld [vmem:[%s6787_s3 + $0x260] sm:$0xff]  ;;  %v1769_v12 = vld [vmem:[%s6787_s3 + $0x268] sm:$0xff] }
 0x11f   :  { %v4659_v22 = vpop.f32.mrb[30].mxu0  ;;  %3354 = vmatpush1.bf16.msra.mxu1 %v3353_v36  ;;  %3259 = vmatprep.subr.bf16.mxu0 %v6798_v13 }
 0x120   :  { %6803 = vst [vmem:[#allocation7_spill] sm:$0xff] %v4659_v22  ;;  %v4670_v54 = vpop.f32.mrb[31].mxu0  ;;  %3150 = vmatmul.mubr.msk.f32.gmra.mrb[136].mxu0 %vm152_vm0, %v3649_v63  ;;  %v4676_v36 = vpop.f32.mrb[30].mxu1  ;;  %3355 = vmatprep.subr.bf16.mxu1 %v6798_v13  ;;  %v3359_v22 = vpack.c.bf16 %v1767_v7, %v1766_v53  ;;  %v897_v7 = vadd.f32 %v4452_v11, %v4522_v41  ;;  %v3651_v11 = vld [vmem:[%s6788_s0 + $0x30] sm:$0xff] }
 0x121   :  { %6804 = vst [vmem:[#allocation8_spill] sm:$0xff] %v4670_v54  ;;  %2265 = vmatmul.mubr.f32.gmra.mrb[136].mxu1 %v885_v1  ;;  %v4685_v3 = vpop.f32.mrb[31].mxu1  ;;  %1337 = vmatprep.mubr.f32.mxu0 %v6801_v59  ;;  %v1704_v1 = vld [vmem:[%s6787_s3 + $0x60] sm:$0xff]  ;;  %v1705_v54 = vld [vmem:[%s6787_s3 + $0x68] sm:$0xff] }
 0x122   :  { %2269 = vmatprep.mubr.f32.mxu1 %v893_v19  ;;  %3261 = vmatpush1.bf16.msra.mxu0 %v3260_v0  ;;  %v3266_v53 = vpack.c.bf16 %v1705_v54, %v1704_v1  ;;  %v905_v54 = vadd.f32 %v4470_v18, %v4501_v30  ;;  %v1770_v1 = vld [vmem:[%s6787_s3 + $0x270] sm:$0xff]  ;;  %v1771_v18 = vld [vmem:[%s6787_s3 + $0x278] sm:$0xff] }
 0x123   :  { %v4690_v63 = vpop.f32.mrb[32].mxu0  ;;  %3357 = vmatpush1.bf16.msra.mxu1 %v3356_v40  ;;  %3262 = vmatprep.subr.bf16.mxu0 %v6798_v13 }
 0x124   :  { %6805 = vst [vmem:[#allocation9_spill] sm:$0xff] %v4690_v63  ;;  %v4701_v0 = vpop.f32.mrb[33].mxu0  ;;  %3151 = vmatmul.mubr.msk.f32.gmra.mrb[138].mxu0 %vm152_vm0, %v3650_v6  ;;  %v4707_v40 = vpop.f32.mrb[32].mxu1  ;;  %3358 = vmatprep.subr.bf16.mxu1 %v6798_v13  ;;  %v3362_v63 = vpack.c.bf16 %v1769_v12, %v1768_v26  ;;  %v903_v12 = vadd.f32 %v4467_v17, %v4522_v41  ;;  %v3652_v17 = vld [vmem:[%s6788_s0 + $0x38] sm:$0xff] }
 0x125   :  { %6806 = vst [vmem:[#allocation10_spill] sm:$0xff] %v4701_v0  ;;  %2270 = vmatmul.mubr.f32.gmra.mrb[138].mxu1 %v891_v44  ;;  %v4716_v19 = vpop.f32.mrb[33].mxu1  ;;  %1343 = vmatprep.mubr.f32.mxu0 %v6801_v59  ;;  %v1706_v44 = vld [vmem:[%s6787_s3 + $0x70] sm:$0xff]  ;;  %v1707_v0 = vld [vmem:[%s6787_s3 + $0x78] sm:$0xff] }
 0x126   :  { %2274 = vmatprep.mubr.f32.mxu1 %v899_v34  ;;  %3264 = vmatpush1.bf16.msra.mxu0 %v3263_v8  ;;  %v3269_v26 = vpack.c.bf16 %v1707_v0, %v1706_v44  ;;  %v911_v0 = vadd.f32 %v4488_v25, %v4501_v30  ;;  %v1772_v44 = vld [vmem:[%s6787_s3 + $0x280] sm:$0xff]  ;;  %v1773_v25 = vld [vmem:[%s6787_s3 + $0x288] sm:$0xff] }
 0x127   :  { %v4721_v6 = vpop.f32.mrb[34].mxu0  ;;  %3360 = vmatpush1.bf16.msra.mxu1 %v3359_v22  ;;  %3265 = vmatprep.subr.bf16.mxu0 %v6798_v13 }
 0x128   :  { %6807 = vst [vmem:[#allocation11_spill] sm:$0xff] %v4721_v6  ;;  %v4732_v8 = vpop.f32.mrb[35].mxu0  ;;  %3152 = vmatmul.mubr.msk.f32.gmra.mrb[140].mxu0 %vm152_vm0, %v3651_v11  ;;  %v4738_v22 = vpop.f32.mrb[34].mxu1  ;;  %3361 = vmatprep.subr.bf16.mxu1 %v6798_v13  ;;  %v3365_v6 = vpack.c.bf16 %v1771_v18, %v1770_v1  ;;  %v909_v18 = vadd.f32 %v4485_v24, %v4522_v41  ;;  %v3653_v24 = vld [vmem:[%s6788_s0 + $0x40] sm:$0xff] }
 0x129   :  { %6808 = vst [vmem:[#allocation12_spill] sm:$0xff] %v4732_v8  ;;  %2275 = vmatmul.mubr.f32.gmra.mrb[140].mxu1 %v897_v7  ;;  %v4747_v34 = vpop.f32.mrb[35].mxu1  ;;  %1349 = vmatprep.mubr.f32.mxu0 %v6801_v59  ;;  %v1708_v7 = vld [vmem:[%s6787_s3 + $0x80] sm:$0xff]  ;;  %v1709_v8 = vld [vmem:[%s6787_s3 + $0x88] sm:$0xff] }
 0x12a   :  { %2279 = vmatprep.mubr.f32.mxu1 %v905_v54  ;;  %3267 = vmatpush1.bf16.msra.mxu0 %v3266_v53  ;;  %v3272_v1 = vpack.c.bf16 %v1709_v8, %v1708_v7  ;;  %v917_v8 = vadd.f32 %v4509_v33, %v4501_v30  ;;  %v1774_v7 = vld [vmem:[%s6787_s3 + $0x290] sm:$0xff]  ;;  %v1775_v33 = vld [vmem:[%s6787_s3 + $0x298] sm:$0xff] }
 0x12b   :  { %v4752_v11 = vpop.f32.mrb[36].mxu0  ;;  %3363 = vmatpush1.bf16.msra.mxu1 %v3362_v63  ;;  %3268 = vmatprep.subr.bf16.mxu0 %v6798_v13 }
 0x12c   :  { %6809 = vst [vmem:[#allocation13_spill] sm:$0xff] %v4752_v11  ;;  %v4763_v53 = vpop.f32.mrb[37].mxu0  ;;  %3153 = vmatmul.mubr.msk.f32.gmra.mrb[142].mxu0 %vm152_vm0, %v3652_v17  ;;  %v4769_v63 = vpop.f32.mrb[36].mxu1  ;;  %3364 = vmatprep.subr.bf16.mxu1 %v6798_v13  ;;  %v3368_v11 = vpack.c.bf16 %v1773_v25, %v1772_v44  ;;  %v915_v25 = vadd.f32 %v4506_v32, %v4522_v41  ;;  %v3654_v32 = vld [vmem:[%s6788_s0 + $0x48] sm:$0xff] }
 0x12d   :  { %6810 = vst [vmem:[#allocation14_spill] sm:$0xff] %v4763_v53  ;;  %2280 = vmatmul.mubr.f32.gmra.mrb[142].mxu1 %v903_v12  ;;  %v4778_v54 = vpop.f32.mrb[37].mxu1  ;;  %1355 = vmatprep.mubr.f32.mxu0 %v6801_v59  ;;  %v1710_v12 = vld [vmem:[%s6787_s3 + $0x90] sm:$0xff]  ;;  %v1711_v53 = vld [vmem:[%s6787_s3 + $0x98] sm:$0xff] }
 0x12e   :  { %2284 = vmatprep.mubr.f32.mxu1 %v911_v0  ;;  %3270 = vmatpush1.bf16.msra.mxu0 %v3269_v26  ;;  %v3275_v44 = vpack.c.bf16 %v1711_v53, %v1710_v12  ;;  %v923_v53 = vadd.f32 %v4540_v14, %v4501_v30  ;;  %v1776_v12 = vld [vmem:[%s6787_s3 + $0x2a0] sm:$0xff]  ;;  %v1777_v14 = vld [vmem:[%s6787_s3 + $0x2a8] sm:$0xff] }
 0x12f   :  { %v4783_v17 = vpop.f32.mrb[38].mxu0  ;;  %3366 = vmatpush1.bf16.msra.mxu1 %v3365_v6  ;;  %3271 = vmatprep.subr.bf16.mxu0 %v6798_v13 }
 0x130   :  { %6811 = vst [vmem:[#allocation15_spill] sm:$0xff] %v4783_v17  ;;  %v4794_v26 = vpop.f32.mrb[39].mxu0  ;;  %3154 = vmatmul.mubr.msk.f32.gmra.mrb[144].mxu0 %vm152_vm0, %v3653_v24  ;;  %v4800_v6 = vpop.f32.mrb[38].mxu1  ;;  %3367 = vmatprep.subr.bf16.mxu1 %v6798_v13  ;;  %v3371_v17 = vpack.c.bf16 %v1775_v33, %v1774_v7  ;;  %v921_v33 = vadd.f32 %v4531_v2, %v4522_v41 }
 0x131   :  { %6812 = vst [vmem:[#allocation16_spill] sm:$0xff] %v4794_v26  ;;  %2285 = vmatmul.mubr.f32.gmra.mrb[144].mxu1 %v909_v18  ;;  %v4809_v0 = vpop.f32.mrb[39].mxu1  ;;  %1361 = vmatprep.mubr.f32.mxu0 %v6801_v59  ;;  %v1712_v18 = vld [vmem:[%s6787_s3 + $0xa0] sm:$0xff]  ;;  %v1713_v26 = vld [vmem:[%s6787_s3 + $0xa8] sm:$0xff] }
 0x132   :  { %2289 = vmatprep.mubr.f32.mxu1 %v917_v8  ;;  %3273 = vmatpush1.bf16.msra.mxu0 %v3272_v1  ;;  %v3278_v7 = vpack.c.bf16 %v1713_v26, %v1712_v18 }
 0x133   :  { %v4814_v24 = vpop.f32.mrb[40].mxu0  ;;  %3369 = vmatpush1.bf16.msra.mxu1 %v3368_v11  ;;  %3274 = vmatprep.subr.bf16.mxu0 %v6798_v13 }
 0x134   :  { %6813 = vst [vmem:[#allocation17_spill] sm:$0xff] %v4814_v24  ;;  %v4825_v1 = vpop.f32.mrb[41].mxu0  ;;  %3155 = vmatmul.mubr.msk.f32.gmra.mrb[146].mxu0 %vm152_vm0, %v3654_v32  ;;  %v4831_v11 = vpop.f32.mrb[40].mxu1  ;;  %3370 = vmatprep.subr.bf16.mxu1 %v6798_v13  ;;  %v3374_v24 = vpack.c.bf16 %v1777_v14, %v1776_v12  ;;  %v3656_v12 = vld [vmem:[%s6788_s0 + $0x58] sm:$0xff]  ;;  %v941_v14 = vadd.f32 %v4625_v27, %v4501_v30 }
 0x135   :  { %6814 = vst [vmem:[#allocation18_spill] sm:$0xff] %v4825_v1  ;;  %2290 = vmatmul.mubr.f32.gmra.mrb[146].mxu1 %v915_v25  ;;  %v4840_v8 = vpop.f32.mrb[41].mxu1  ;;  %1367 = vmatprep.mubr.f32.mxu0 %v6801_v59  ;;  %v929_v1 = vadd.f32 %v4567_v55, %v4501_v30  ;;  %v927_v55 = vadd.f32 %v4559_v39, %v4522_v41  ;;  %v1715_v27 = vld [vmem:[%s6787_s3 + $0xb8] sm:$0xff] }
 0x136   :  { %2294 = vmatprep.mubr.f32.mxu1 %v923_v53  ;;  %3276 = vmatpush1.bf16.msra.mxu0 %v3275_v44  ;;  %v3655_v53 = vld [vmem:[%s6788_s0 + $0x50] sm:$0xff]  ;;  %v935_v44 = vadd.f32 %v4596_v35, %v4501_v30  ;;  %v933_v35 = vadd.f32 %v4587_v45, %v4522_v41 }
 0x137   :  { %v4845_v32 = vpop.f32.mrb[42].mxu0  ;;  %3372 = vmatpush1.bf16.msra.mxu1 %v3371_v17  ;;  %3277 = vmatprep.subr.bf16.mxu0 %v6798_v13  ;;  %v1714_v45 = vld [vmem:[%s6787_s3 + $0xb0] sm:$0xff] }
 0x138   :  { %v4850_v25 = vpop.f32.mrb[43].mxu0  ;;  %3156 = vmatmul.mubr.msk.f32.gmra.mrb[148].mxu0 %vm152_vm0, %v3655_v53  ;;  %v4856_v26 = vpop.f32.mrb[42].mxu1  ;;  %3373 = vmatprep.subr.bf16.mxu1 %v6798_v13 }
 0x139   :  { %2295 = vmatmul.mubr.f32.gmra.mrb[148].mxu1 %v921_v33  ;;  %v4859_v2 = vpop.f32.mrb[43].mxu1  ;;  %1373 = vmatprep.mubr.f32.mxu0 %v6801_v59  ;;  %v3657_v33 = vld [vmem:[%s6788_s0 + $0x60] sm:$0xff] }
 0x13a   :  { %2299 = vmatprep.mubr.f32.mxu1 %v929_v1  ;;  %3279 = vmatpush1.bf16.msra.mxu0 %v3278_v7 }
 0x13b   :  { %v4864_v17 = vpop.f32.mrb[44].mxu0  ;;  %3375 = vmatpush1.bf16.msra.mxu1 %v3374_v24  ;;  %3280 = vmatprep.subr.bf16.mxu0 %v6798_v13 }
 0x13c   :  { %6815 = vst [vmem:[#allocation19_spill] sm:$0xff] %v4864_v17  ;;  %v4869_v18 = vpop.f32.mrb[45].mxu0  ;;  %3157 = vmatmul.mubr.msk.f32.gmra.mrb[150].mxu0 %vm152_vm0, %v3656_v12  ;;  %v4875_v1 = vpop.f32.mrb[44].mxu1  ;;  %3376 = vmatprep.subr.bf16.mxu1 %v6798_v13  ;;  %v939_v12 = vadd.f32 %v4616_v52, %v4522_v41  ;;  %v1779_v52 = vld [vmem:[%s6787_s3 + $0x2b8] sm:$0xff] }
 0x13d   :  { %6816 = vst [vmem:[#allocation20_spill] sm:$0xff] %v4869_v18  ;;  %2300 = vmatmul.mubr.f32.gmra.mrb[150].mxu1 %v927_v55  ;;  %v4878_v39 = vpop.f32.mrb[45].mxu1  ;;  %1379 = vmatprep.mubr.f32.mxu0 %v6801_v59 }
 0x13e   :  { %2304 = vmatprep.mubr.f32.mxu1 %v935_v44  ;;  %v3281_v44 = vpack.c.bf16 %v1715_v27, %v1714_v45 }
 0x13f   :  { %v4883_v24 = vpop.f32.mrb[46].mxu0 }
 0x140   :  { %6817 = vst [vmem:[#allocation21_spill] sm:$0xff] %v4883_v24  ;;  %v4887_v7 = vpop.f32.mrb[47].mxu0  ;;  %3158 = vmatmul.mubr.msk.f32.gmra.mrb[152].mxu0 %vm152_vm0, %v3657_v33  ;;  %v4893_v53 = vpop.f32.mrb[46].mxu1 }
 0x141   :  { %6818 = vst [vmem:[#allocation22_spill] sm:$0xff] %v4887_v7  ;;  %2305 = vmatmul.mubr.f32.gmra.mrb[152].mxu1 %v933_v35  ;;  %v4895_v55 = vpop.f32.mrb[47].mxu1  ;;  %1385 = vmatprep.mubr.f32.mxu0 %v6801_v59  ;;  %v947_v35 = vadd.f32 %v4654_v47, %v4501_v30  ;;  %v3658_v7 = vld [vmem:[%s6788_s0 + $0x68] sm:$0xff] }
 0x142   :  { %2309 = vmatprep.mubr.f32.mxu1 %v941_v14  ;;  %v1778_v14 = vld [vmem:[%s6787_s3 + $0x2b0] sm:$0xff]  ;;  %3282 = vmatpush1.bf16.msra.mxu0 %v3281_v44 }
 0x143   :  { %v4906_v33 = vpop.f32.mrb[48].mxu0  ;;  %v3377_v45 = vpack.c.bf16 %v1779_v52, %v1778_v14  ;;  %3283 = vmatprep.subr.bf16.mxu0 %v6798_v13  ;;  %v959_v14 = vadd.f32 %v4716_v19, %v4501_v30 }
 0x144   :  { %6819 = vst [vmem:[#allocation23_spill] sm:$0xff] %v4906_v33  ;;  %v4910_v24 = vpop.f32.mrb[49].mxu0  ;;  %3159 = vmatmul.mubr.msk.f32.gmra.mrb[154].mxu0 %vm152_vm0, %v3658_v7  ;;  %v4916_v17 = vpop.f32.mrb[48].mxu1  ;;  %v945_v7 = vadd.f32 %v4645_v58, %v4522_v41  ;;  %v953_v33 = vadd.f32 %v4685_v3, %v4501_v30  ;;  %v951_v3 = vadd.f32 %v4676_v36, %v4522_v41 }
 0x145   :  { %6820 = vst [vmem:[#allocation24_spill] sm:$0xff] %v4910_v24  ;;  %2310 = vmatmul.mubr.f32.gmra.mrb[154].mxu1 %v939_v12  ;;  %v4924_v47 = vpop.f32.mrb[49].mxu1  ;;  %1391 = vmatprep.mubr.f32.mxu0 %v6801_v59  ;;  %v3659_v12 = vld [vmem:[%s6788_s0 + $0x70] sm:$0xff]  ;;  %v957_v36 = vadd.f32 %v4707_v40, %v4522_v41  ;;  %v1716_v40 = vld [vmem:[%s6787_s3 + $0xc0] sm:$0xff] }
 0x146   :  { %2314 = vmatprep.mubr.f32.mxu1 %v947_v35  ;;  %3378 = vmatpush1.bf16.msra.mxu1 %v3377_v45  ;;  %v3660_v45 = vld [vmem:[%s6788_s0 + $0x78] sm:$0xff] }
 0x147   :  { %v4929_v27 = vpop.f32.mrb[50].mxu0  ;;  %3379 = vmatprep.subr.bf16.mxu1 %v6798_v13 }
 0x148   :  { %6821 = vst [vmem:[#allocation25_spill] sm:$0xff] %v4929_v27  ;;  %v4934_v24 = vpop.f32.mrb[51].mxu0  ;;  %3160 = vmatmul.mubr.msk.f32.gmra.mrb[156].mxu0 %vm152_vm0, %v3659_v12  ;;  %v4940_v44 = vpop.f32.mrb[50].mxu1  ;;  %v965_v12 = vadd.f32 %v4747_v34, %v4501_v30  ;;  %v1717_v34 = vld [vmem:[%s6787_s3 + $0xc8] sm:$0xff] }
 0x149   :  { %6822 = vst [vmem:[#allocation26_spill] sm:$0xff] %v4934_v24  ;;  %2315 = vmatmul.mubr.f32.gmra.mrb[156].mxu1 %v945_v7  ;;  %v4943_v58 = vpop.f32.mrb[51].mxu1  ;;  %1397 = vmatprep.mubr.f32.mxu0 %v6801_v59  ;;  %v3662_v27 = vld [vmem:[%s6788_s0 + $0x88] sm:$0xff] }
 0x14a   :  { %2319 = vmatprep.mubr.f32.mxu1 %v953_v33 }
 0x14b   :  { %v4948_v35 = vpop.f32.mrb[52].mxu0 }
 0x14c   :  { %6823 = vst [vmem:[#allocation27_spill] sm:$0xff] %v4948_v35  ;;  %v4952_v52 = vpop.f32.mrb[53].mxu0  ;;  %3161 = vmatmul.mubr.msk.f32.gmra.mrb[158].mxu0 %vm152_vm0, %v3660_v45  ;;  %v4958_v7 = vpop.f32.mrb[52].mxu1  ;;  %v3661_v45 = vld [vmem:[%s6788_s0 + $0x80] sm:$0xff] }
 0x14d   :  { %6824 = vst [vmem:[#allocation28_spill] sm:$0xff] %v4952_v52  ;;  %2320 = vmatmul.mubr.f32.gmra.mrb[158].mxu1 %v951_v3  ;;  %v4960_v33 = vpop.f32.mrb[53].mxu1  ;;  %1403 = vmatprep.mubr.f32.mxu0 %v6801_v59 }
 0x14e   :  { %2324 = vmatprep.mubr.f32.mxu1 %v959_v14 }
 0x14f   :  { %v4965_v19 = vpop.f32.mrb[54].mxu0 }
 0x150   :  { %6825 = vst [vmem:[#allocation29_spill] sm:$0xff] %v4965_v19  ;;  %v4969_v35 = vpop.f32.mrb[55].mxu0  ;;  %3162 = vmatmul.mubr.msk.f32.gmra.mrb[160].mxu0 %vm152_vm0, %v3661_v45  ;;  %v4975_v3 = vpop.f32.mrb[54].mxu1  ;;  %v3284_v19 = vpack.c.bf16 %v1717_v34, %v1716_v40  ;;  %v963_v45 = vadd.f32 %v4738_v22, %v4522_v41  ;;  %v1781_v22 = vld [vmem:[%s6787_s3 + $0x2c8] sm:$0xff] }
 0x151   :  { %6826 = vst [vmem:[#allocation30_spill] sm:$0xff] %v4969_v35  ;;  %2325 = vmatmul.mubr.f32.gmra.mrb[160].mxu1 %v957_v36  ;;  %v4977_v14 = vpop.f32.mrb[55].mxu1  ;;  %1409 = vmatprep.mubr.f32.mxu0 %v6801_v59  ;;  %v971_v36 = vadd.f32 %v4778_v54, %v4501_v30 }
 0x152   :  { %2329 = vmatprep.mubr.f32.mxu1 %v965_v12  ;;  %v1780_v12 = vld [vmem:[%s6787_s3 + $0x2c0] sm:$0xff]  ;;  %3285 = vmatpush1.bf16.msra.mxu0 %v3284_v19 }
 0x153   :  { %v4988_v35 = vpop.f32.mrb[56].mxu0  ;;  %v3380_v40 = vpack.c.bf16 %v1781_v22, %v1780_v12  ;;  %3286 = vmatprep.subr.bf16.mxu0 %v6798_v13  ;;  %v983_v12 = vadd.f32 %v4840_v8, %v4501_v30 }
 0x154   :  { %6827 = vst [vmem:[#allocation31_spill] sm:$0xff] %v4988_v35  ;;  %v4992_v52 = vpop.f32.mrb[57].mxu0  ;;  %3163 = vmatmul.mubr.msk.f32.gmra.mrb[162].mxu0 %vm152_vm0, %v3662_v27  ;;  %v4998_v24 = vpop.f32.mrb[56].mxu1  ;;  %v969_v27 = vadd.f32 %v4769_v63, %v4522_v41  ;;  %v977_v35 = vadd.f32 %v4809_v0, %v4501_v30  ;;  %v975_v0 = vadd.f32 %v4800_v6, %v4522_v41 }
 0x155   :  { %6828 = vst [vmem:[#allocation32_spill] sm:$0xff] %v4992_v52  ;;  %2330 = vmatmul.mubr.f32.gmra.mrb[162].mxu1 %v963_v45  ;;  %v5006_v54 = vpop.f32.mrb[57].mxu1  ;;  %1415 = vmatprep.mubr.f32.mxu0 %v6801_v59  ;;  %v3663_v45 = vld [vmem:[%s6788_s0 + $0x90] sm:$0xff]  ;;  %v981_v6 = vadd.f32 %v4831_v11, %v4522_v41 }
 0x156   :  { %2334 = vmatprep.mubr.f32.mxu1 %v971_v36  ;;  %3381 = vmatpush1.bf16.msra.mxu1 %v3380_v40  ;;  %v3664_v40 = vld [vmem:[%s6788_s0 + $0x98] sm:$0xff]  ;;  %v1718_v11 = vld [vmem:[%s6787_s3 + $0xd0] sm:$0xff] }
 0x157   :  { %v5011_v34 = vpop.f32.mrb[58].mxu0  ;;  %3382 = vmatprep.subr.bf16.mxu1 %v6798_v13 }
 0x158   :  { %6829 = vst [vmem:[#allocation33_spill] sm:$0xff] %v5011_v34  ;;  %v5016_v52 = vpop.f32.mrb[59].mxu0  ;;  %3164 = vmatmul.mubr.msk.f32.gmra.mrb[164].mxu0 %vm152_vm0, %v3663_v45  ;;  %v5022_v19 = vpop.f32.mrb[58].mxu1  ;;  %v989_v45 = vadd.f32 %v4859_v2, %v4501_v30  ;;  %v1719_v2 = vld [vmem:[%s6787_s3 + $0xd8] sm:$0xff]  ;;  %v3666_v34 = vld [vmem:[%s6788_s0 + $0xa8] sm:$0xff] }
 0x159   :  { %6830 = vst [vmem:[#allocation34_spill] sm:$0xff] %v5016_v52  ;;  %2335 = vmatmul.mubr.f32.gmra.mrb[164].mxu1 %v969_v27  ;;  %v5025_v63 = vpop.f32.mrb[59].mxu1  ;;  %1421 = vmatprep.mubr.f32.mxu0 %v6801_v59 }
 0x15a   :  { %2339 = vmatprep.mubr.f32.mxu1 %v977_v35 }
 0x15b   :  { %v5030_v36 = vpop.f32.mrb[60].mxu0 }
 0x15c   :  { %6831 = vst [vmem:[#allocation35_spill] sm:$0xff] %v5030_v36  ;;  %v5034_v22 = vpop.f32.mrb[61].mxu0  ;;  %3165 = vmatmul.mubr.msk.f32.gmra.mrb[166].mxu0 %vm152_vm0, %v3664_v40  ;;  %v5040_v27 = vpop.f32.mrb[60].mxu1  ;;  %v3665_v40 = vld [vmem:[%s6788_s0 + $0xa0] sm:$0xff] }
 0x15d   :  { %6832 = vst [vmem:[#allocation36_spill] sm:$0xff] %v5034_v22  ;;  %2340 = vmatmul.mubr.f32.gmra.mrb[166].mxu1 %v975_v0  ;;  %v5042_v35 = vpop.f32.mrb[61].mxu1  ;;  %1427 = vmatprep.mubr.f32.mxu0 %v6801_v59 }
 0x15e   :  { %2344 = vmatprep.mubr.f32.mxu1 %v983_v12 }
 0x15f   :  { %v5047_v8 = vpop.f32.mrb[62].mxu0 }
 0x160   :  { %6833 = vst [vmem:[#allocation37_spill] sm:$0xff] %v5047_v8  ;;  %v5051_v36 = vpop.f32.mrb[63].mxu0  ;;  %3166 = vmatmul.mubr.msk.f32.gmra.mrb[168].mxu0 %vm152_vm0, %v3665_v40  ;;  %v5057_v0 = vpop.f32.mrb[62].mxu1  ;;  %v3287_v8 = vpack.c.bf16 %v1719_v2, %v1718_v11  ;;  %v987_v40 = vadd.f32 %v4856_v26, %v4522_v41  ;;  %v1783_v26 = vld [vmem:[%s6787_s3 + $0x2d8] sm:$0xff] }
 0x161   :  { %6834 = vst [vmem:[#allocation38_spill] sm:$0xff] %v5051_v36  ;;  %2345 = vmatmul.mubr.f32.gmra.mrb[168].mxu1 %v981_v6  ;;  %v5059_v12 = vpop.f32.mrb[63].mxu1  ;;  %1433 = vmatprep.mubr.f32.mxu0 %v6801_v59  ;;  %v995_v6 = vadd.f32 %v4878_v39, %v4501_v30 }
 0x162   :  { %2349 = vmatprep.mubr.f32.mxu1 %v989_v45  ;;  %v1782_v45 = vld [vmem:[%s6787_s3 + $0x2d0] sm:$0xff]  ;;  %3288 = vmatpush1.bf16.msra.mxu0 %v3287_v8 }
 0x163   :  { %v5070_v36 = vpop.f32.mrb[64].mxu0  ;;  %v3383_v11 = vpack.c.bf16 %v1783_v26, %v1782_v45  ;;  %3289 = vmatprep.subr.bf16.mxu0 %v6798_v13  ;;  %v1007_v45 = vadd.f32 %v4924_v47, %v4501_v30 }
 0x164   :  { %6835 = vst [vmem:[#allocation39_spill] sm:$0xff] %v5070_v36  ;;  %v5074_v22 = vpop.f32.mrb[65].mxu0  ;;  %3167 = vmatmul.mubr.msk.f32.gmra.mrb[170].mxu0 %vm152_vm0, %v3666_v34  ;;  %v5080_v52 = vpop.f32.mrb[64].mxu1  ;;  %v993_v34 = vadd.f32 %v4875_v1, %v4522_v41  ;;  %v1001_v36 = vadd.f32 %v4895_v55, %v4501_v30  ;;  %v999_v55 = vadd.f32 %v4893_v53, %v4522_v41 }
 0x165   :  { %6836 = vst [vmem:[#allocation40_spill] sm:$0xff] %v5074_v22  ;;  %2350 = vmatmul.mubr.f32.gmra.mrb[170].mxu1 %v987_v40  ;;  %v5088_v39 = vpop.f32.mrb[65].mxu1  ;;  %1439 = vmatprep.mubr.f32.mxu0 %v6801_v59  ;;  %v3667_v40 = vld [vmem:[%s6788_s0 + $0xb0] sm:$0xff]  ;;  %v1005_v53 = vadd.f32 %v4916_v17, %v4522_v41  ;;  %v1720_v17 = vld [vmem:[%s6787_s3 + $0xe0] sm:$0xff] }
 0x166   :  { %2354 = vmatprep.mubr.f32.mxu1 %v995_v6  ;;  %3384 = vmatpush1.bf16.msra.mxu1 %v3383_v11  ;;  %v3668_v11 = vld [vmem:[%s6788_s0 + $0xb8] sm:$0xff] }
 0x167   :  { %v5093_v2 = vpop.f32.mrb[66].mxu0  ;;  %3385 = vmatprep.subr.bf16.mxu1 %v6798_v13 }
 0x168   :  { %6837 = vst [vmem:[#allocation41_spill] sm:$0xff] %v5093_v2  ;;  %v5098_v22 = vpop.f32.mrb[67].mxu0  ;;  %3168 = vmatmul.mubr.msk.f32.gmra.mrb[172].mxu0 %vm152_vm0, %v3667_v40  ;;  %v5104_v8 = vpop.f32.mrb[66].mxu1  ;;  %v1013_v40 = vadd.f32 %v4943_v58, %v4501_v30  ;;  %v1721_v58 = vld [vmem:[%s6787_s3 + $0xe8] sm:$0xff] }
 0x169   :  { %6838 = vst [vmem:[#allocation42_spill] sm:$0xff] %v5098_v22  ;;  %2355 = vmatmul.mubr.f32.gmra.mrb[172].mxu1 %v993_v34  ;;  %v5107_v1 = vpop.f32.mrb[67].mxu1  ;;  %1445 = vmatprep.mubr.f32.mxu0 %v6801_v59  ;;  %v3670_v2 = vld [vmem:[%s6788_s0 + $0xc8] sm:$0xff] }
 0x16a   :  { %2359 = vmatprep.mubr.f32.mxu1 %v1001_v36 }
 0x16b   :  { %v5112_v6 = vpop.f32.mrb[68].mxu0 }
 0x16c   :  { %6839 = vst [vmem:[#allocation43_spill] sm:$0xff] %v5112_v6  ;;  %v5116_v26 = vpop.f32.mrb[69].mxu0  ;;  %3169 = vmatmul.mubr.msk.f32.gmra.mrb[174].mxu0 %vm152_vm0, %v3668_v11  ;;  %v5122_v34 = vpop.f32.mrb[68].mxu1  ;;  %v3669_v11 = vld [vmem:[%s6788_s0 + $0xc0] sm:$0xff] }
 0x16d   :  { %6840 = vst [vmem:[#allocation44_spill] sm:$0xff] %v5116_v26  ;;  %2360 = vmatmul.mubr.f32.gmra.mrb[174].mxu1 %v999_v55  ;;  %v5124_v36 = vpop.f32.mrb[69].mxu1  ;;  %1451 = vmatprep.mubr.f32.mxu0 %v6801_v59 }
 0x16e   :  { %2364 = vmatprep.mubr.f32.mxu1 %v1007_v45 }
 0x16f   :  { %v5129_v47 = vpop.f32.mrb[70].mxu0 }
 0x170   :  { %6841 = vst [vmem:[#allocation45_spill] sm:$0xff] %v5129_v47  ;;  %v5133_v6 = vpop.f32.mrb[71].mxu0  ;;  %3170 = vmatmul.mubr.msk.f32.gmra.mrb[176].mxu0 %vm152_vm0, %v3669_v11  ;;  %v5139_v55 = vpop.f32.mrb[70].mxu1  ;;  %v3290_v47 = vpack.c.bf16 %v1721_v58, %v1720_v17  ;;  %v1011_v11 = vadd.f32 %v4940_v44, %v4522_v41  ;;  %v1785_v44 = vld [vmem:[%s6787_s3 + $0x2e8] sm:$0xff] }
 0x171   :  { %6842 = vst [vmem:[#allocation46_spill] sm:$0xff] %v5133_v6  ;;  %2365 = vmatmul.mubr.f32.gmra.mrb[176].mxu1 %v1005_v53  ;;  %v5141_v45 = vpop.f32.mrb[71].mxu1  ;;  %1457 = vmatprep.mubr.f32.mxu0 %v6801_v59  ;;  %v1019_v53 = vadd.f32 %v4960_v33, %v4501_v30 }
 0x172   :  { %2369 = vmatprep.mubr.f32.mxu1 %v1013_v40  ;;  %v1784_v40 = vld [vmem:[%s6787_s3 + $0x2e0] sm:$0xff]  ;;  %3291 = vmatpush1.bf16.msra.mxu0 %v3290_v47 }
 0x173   :  { %v5152_v6 = vpop.f32.mrb[72].mxu0  ;;  %v3386_v17 = vpack.c.bf16 %v1785_v44, %v1784_v40  ;;  %3292 = vmatprep.subr.bf16.mxu0 %v6798_v13  ;;  %v1031_v40 = vadd.f32 %v5006_v54, %v4501_v30 }
 0x174   :  { %6843 = vst [vmem:[#allocation47_spill] sm:$0xff] %v5152_v6  ;;  %v5156_v26 = vpop.f32.mrb[73].mxu0  ;;  %3171 = vmatmul.mubr.msk.f32.gmra.mrb[178].mxu0 %vm152_vm0, %v3670_v2  ;;  %v5162_v22 = vpop.f32.mrb[72].mxu1  ;;  %v1017_v2 = vadd.f32 %v4958_v7, %v4522_v41  ;;  %v1025_v6 = vadd.f32 %v4977_v14, %v4501_v30  ;;  %v1023_v14 = vadd.f32 %v4975_v3, %v4522_v41 }
 0x175   :  { %6844 = vst [vmem:[#allocation48_spill] sm:$0xff] %v5156_v26  ;;  %2370 = vmatmul.mubr.f32.gmra.mrb[178].mxu1 %v1011_v11  ;;  %v5170_v33 = vpop.f32.mrb[73].mxu1  ;;  %1463 = vmatprep.mubr.f32.mxu0 %v6801_v59  ;;  %v3671_v11 = vld [vmem:[%s6788_s0 + $0xd0] sm:$0xff]  ;;  %v1029_v3 = vadd.f32 %v4998_v24, %v4522_v41 }
 0x176   :  { %2374 = vmatprep.mubr.f32.mxu1 %v1019_v53  ;;  %3387 = vmatpush1.bf16.msra.mxu1 %v3386_v17  ;;  %v1722_v24 = vld [vmem:[%s6787_s3 + $0xf0] sm:$0xff] }
 0x177   :  { %v5175_v58 = vpop.f32.mrb[74].mxu0  ;;  %3388 = vmatprep.subr.bf16.mxu1 %v6798_v13  ;;  %v3672_v13 = vld [vmem:[%s6788_s0 + $0xd8] sm:$0xff] }
 0x178   :  { %6845 = vst [vmem:[#allocation49_spill] sm:$0xff] %v5175_v58  ;;  %v5180_v26 = vpop.f32.mrb[75].mxu0  ;;  %3172 = vmatmul.mubr.msk.f32.gmra.mrb[180].mxu0 %vm152_vm0, %v3671_v11  ;;  %v5186_v47 = vpop.f32.mrb[74].mxu1 }
 0x179   :  { %6846 = vst [vmem:[#allocation50_spill] sm:$0xff] %v5180_v26  ;;  %2375 = vmatmul.mubr.f32.gmra.mrb[180].mxu1 %v1017_v2  ;;  %v5189_v7 = vpop.f32.mrb[75].mxu1  ;;  %1469 = vmatprep.mubr.f32.mxu0 %v6801_v59  ;;  %v1037_v2 = vadd.f32 %v5025_v63, %v4501_v30  ;;  %v1723_v63 = vld [vmem:[%s6787_s3 + $0xf8] sm:$0xff] }
 0x17a   :  { %2379 = vmatprep.mubr.f32.mxu1 %v1025_v6 }
 0x17b   :  { %v5194_v53 = vpop.f32.mrb[76].mxu0 }
 0x17c   :  { %6847 = vst [vmem:[#allocation51_spill] sm:$0xff] %v5194_v53  ;;  %v5198_v44 = vpop.f32.mrb[77].mxu0  ;;  %3173 = vmatmul.mubr.msk.f32.gmra.mrb[182].mxu0 %vm152_vm0, %v3672_v13  ;;  %v5204_v17 = vpop.f32.mrb[76].mxu1  ;;  %v3673_v13 = vld [vmem:[%s6788_s0 + $0xe0] sm:$0xff] }
 0x17d   :  { %6848 = vst [vmem:[#allocation52_spill] sm:$0xff] %v5198_v44  ;;  %2380 = vmatmul.mubr.f32.gmra.mrb[182].mxu1 %v1023_v14  ;;  %v5206_v6 = vpop.f32.mrb[77].mxu1  ;;  %1475 = vmatprep.mubr.f32.mxu0 %v6801_v59  ;;  %v3674_v44 = vld [vmem:[%s6788_s0 + $0xe8] sm:$0xff] }
 0x17e   :  { %2384 = vmatprep.mubr.f32.mxu1 %v1031_v40 }
 0x17f   :  { %v5211_v54 = vpop.f32.mrb[78].mxu0 }
 0x180   :  { %6849 = vst [vmem:[#allocation53_spill] sm:$0xff] %v5211_v54  ;;  %v5215_v11 = vpop.f32.mrb[79].mxu0  ;;  %3174 = vmatmul.mubr.msk.f32.gmra.mrb[184].mxu0 %vm152_vm0, %v3673_v13  ;;  %v5221_v14 = vpop.f32.mrb[78].mxu1  ;;  %v3293_v54 = vpack.c.bf16 %v1723_v63, %v1722_v24  ;;  %v1035_v13 = vadd.f32 %v5022_v19, %v4522_v41  ;;  %v1787_v19 = vld [vmem:[%s6787_s3 + $0x2f8] sm:$0xff] }
 0x181   :  { %6850 = vst [vmem:[#allocation54_spill] sm:$0xff] %v5215_v11  ;;  %2385 = vmatmul.mubr.f32.gmra.mrb[184].mxu1 %v1029_v3  ;;  %v5223_v40 = vpop.f32.mrb[79].mxu1  ;;  %1481 = vmatprep.mubr.f32.mxu0 %v6801_v59  ;;  %v1043_v3 = vadd.f32 %v5042_v35, %v4501_v30 }
 0x182   :  { %2389 = vmatprep.mubr.f32.mxu1 %v1037_v2  ;;  %v1786_v2 = vld [vmem:[%s6787_s3 + $0x2f0] sm:$0xff]  ;;  %3294 = vmatpush1.bf16.msra.mxu0 %v3293_v54 }
 0x183   :  { %v5234_v11 = vpop.f32.mrb[80].mxu0  ;;  %v3389_v24 = vpack.c.bf16 %v1787_v19, %v1786_v2 }
 0x184   :  { %6851 = vst [vmem:[#allocation55_spill] sm:$0xff] %v5234_v11  ;;  %v5238_v53 = vpop.f32.mrb[81].mxu0  ;;  %3175 = vmatmul.mubr.msk.f32.gmra.mrb[186].mxu0 %vm152_vm0, %v3674_v44  ;;  %v5244_v58 = vpop.f32.mrb[80].mxu1  ;;  %v1041_v44 = vadd.f32 %v5040_v27, %v4522_v41  ;;  %v1049_v11 = vadd.f32 %v5059_v12, %v4501_v30  ;;  %v1047_v27 = vadd.f32 %v5057_v0, %v4522_v41 }
 0x185   :  { %6852 = vst [vmem:[#allocation56_spill] sm:$0xff] %v5238_v53  ;;  %2390 = vmatmul.mubr.f32.gmra.mrb[186].mxu1 %v1035_v13  ;;  %v5252_v35 = vpop.f32.mrb[81].mxu1  ;;  %1487 = vmatprep.mubr.f32.mxu0 %v6801_v59  ;;  %v3675_v13 = vld [vmem:[%s6788_s0 + $0xf0] sm:$0xff]  ;;  %v1053_v0 = vadd.f32 %v5080_v52, %v4522_v41  ;;  %v1059_v52 = vadd.f32 %v5104_v8, %v4522_v41 }
 0x186   :  { %2394 = vmatprep.mubr.f32.mxu1 %v1043_v3  ;;  %3390 = vmatpush1.bf16.msra.mxu1 %v3389_v24  ;;  %v1055_v3 = vadd.f32 %v5088_v39, %v4501_v30  ;;  %v3676_v24 = vld [vmem:[%s6788_s0 + $0xf8] sm:$0xff]  ;;  %v1065_v8 = vadd.f32 %v5122_v34, %v4522_v41  ;;  %v1071_v34 = vadd.f32 %v5139_v55, %v4522_v41 }
 0x187   :  { %v5257_v63 = vpop.f32.mrb[82].mxu0  ;;  %v1077_v55 = vadd.f32 %v5162_v22, %v4522_v41  ;;  %v1083_v22 = vadd.f32 %v5186_v47, %v4522_v41  ;;  %v1089_v47 = vadd.f32 %v5204_v17, %v4522_v41  ;;  %v1095_v17 = vadd.f32 %v5221_v14, %v4522_v41 }
 0x188   :  { %6853 = vst [vmem:[#allocation57_spill] sm:$0xff] %v5257_v63  ;;  %v5261_v53 = vpop.f32.mrb[83].mxu0  ;;  %3176 = vmatmul.mubr.msk.f32.gmra.mrb[188].mxu0 %vm152_vm0, %v3675_v13  ;;  %v5267_v2 = vpop.f32.mrb[82].mxu1  ;;  %v1061_v13 = vadd.f32 %v5107_v1, %v4501_v30  ;;  %v1101_v14 = vadd.f32 %v5244_v58, %v4522_v41 }
 0x189   :  { %6854 = vst [vmem:[#allocation58_spill] sm:$0xff] %v5261_v53  ;;  %2395 = vmatmul.mubr.f32.gmra.mrb[188].mxu1 %v1041_v44  ;;  %v5269_v54 = vpop.f32.mrb[83].mxu1  ;;  %1493 = vmatprep.mubr.f32.mxu0 %v6801_v59  ;;  %v1107_v58 = vadd.f32 %v5267_v2, %v4522_v41  ;;  %v140_v53 = vsub.s32 4, %v4476_v20 }
 0x18a   :  { %2399 = vmatprep.mubr.f32.mxu1 %v1049_v11 }
 0x18b   :  { %v5274_v12 = vpop.f32.mrb[84].mxu0 }
 0x18c   :  { %6855 = vst [vmem:[#allocation59_spill] sm:$0xff] %v5274_v12  ;;  %v5278_v19 = vpop.f32.mrb[85].mxu0  ;;  %3177 = vmatmul.mubr.msk.f32.gmra.mrb[190].mxu0 %vm152_vm0, %v3676_v24  ;;  %v5284_v44 = vpop.f32.mrb[84].mxu1  ;;  %v3677_v24 = vld [vmem:[%s6788_s0 + $0x100] sm:$0xff] }
 0x18d   :  { %6856 = vst [vmem:[#allocation60_spill] sm:$0xff] %v5278_v19  ;;  %2400 = vmatmul.mubr.f32.gmra.mrb[190].mxu1 %v1047_v27  ;;  %v5286_v11 = vpop.f32.mrb[85].mxu1  ;;  %1499 = vmatprep.mubr.f32.mxu0 %v6801_v59  ;;  %v1113_v2 = vadd.f32 %v5284_v44, %v4522_v41  ;;  %v3699_v19 = vld [vmem:[%s6788_s0 + $0x1b0] sm:$0xff] }
 0x18e   :  { %2404 = vmatprep.mubr.f32.mxu1 %v1055_v3 }
 0x18f   :  { %v5291_v39 = vpop.f32.mrb[86].mxu0 }
 0x190   :  { %6857 = vst [vmem:[#allocation61_spill] sm:$0xff] %v5291_v39  ;;  %v5295_v12 = vpop.f32.mrb[87].mxu0  ;;  %3178 = vmatmul.mubr.msk.f32.gmra.mrb[192].mxu0 %vm152_vm0, %v3677_v24  ;;  %v5301_v27 = vpop.f32.mrb[86].mxu1  ;;  %v1067_v39 = vadd.f32 %v5124_v36, %v4501_v30  ;;  %v3678_v24 = vld [vmem:[%s6788_s0 + $0x108] sm:$0xff] }
 0x191   :  { %6858 = vst [vmem:[#allocation62_spill] sm:$0xff] %v5295_v12  ;;  %2405 = vmatmul.mubr.f32.gmra.mrb[192].mxu1 %v1053_v0  ;;  %v5303_v3 = vpop.f32.mrb[87].mxu1  ;;  %1505 = vmatprep.mubr.f32.mxu0 %v6801_v59  ;;  %v1119_v44 = vadd.f32 %v5301_v27, %v4522_v41 }
 0x192   :  { %2409 = vmatprep.mubr.f32.mxu1 %v1061_v13 }
 0x193   :  { %v5308_v1 = vpop.f32.mrb[88].mxu0 }
 0x194   :  { %6859 = vst [vmem:[#allocation63_spill] sm:$0xff] %v5308_v1  ;;  %v5312_v12 = vpop.f32.mrb[89].mxu0  ;;  %3179 = vmatmul.mubr.msk.f32.gmra.mrb[194].mxu0 %vm152_vm0, %v3678_v24  ;;  %v5318_v0 = vpop.f32.mrb[88].mxu1  ;;  %v1073_v1 = vadd.f32 %v5141_v45, %v4501_v30  ;;  %v3679_v24 = vld [vmem:[%s6788_s0 + $0x110] sm:$0xff] }
 0x195   :  { %6860 = vst [vmem:[#allocation64_spill] sm:$0xff] %v5312_v12  ;;  %2410 = vmatmul.mubr.f32.gmra.mrb[194].mxu1 %v1059_v52  ;;  %v5320_v13 = vpop.f32.mrb[89].mxu1  ;;  %1511 = vmatprep.mubr.f32.mxu0 %v6801_v59  ;;  %v1125_v27 = vadd.f32 %v5318_v0, %v4522_v41 }
 0x196   :  { %2414 = vmatprep.mubr.f32.mxu1 %v1067_v39 }
 0x197   :  { %v5325_v36 = vpop.f32.mrb[90].mxu0 }
 0x198   :  { %6861 = vst [vmem:[#allocation65_spill] sm:$0xff] %v5325_v36  ;;  %v5329_v12 = vpop.f32.mrb[91].mxu0  ;;  %3180 = vmatmul.mubr.msk.f32.gmra.mrb[196].mxu0 %vm152_vm0, %v3679_v24  ;;  %v5335_v52 = vpop.f32.mrb[90].mxu1  ;;  %v1079_v36 = vadd.f32 %v5170_v33, %v4501_v30  ;;  %v3680_v24 = vld [vmem:[%s6788_s0 + $0x118] sm:$0xff] }
 0x199   :  { %6862 = vst [vmem:[#allocation66_spill] sm:$0xff] %v5329_v12  ;;  %2415 = vmatmul.mubr.f32.gmra.mrb[196].mxu1 %v1065_v8  ;;  %v5337_v39 = vpop.f32.mrb[91].mxu1  ;;  %1517 = vmatprep.mubr.f32.mxu0 %v6801_v59  ;;  %v1131_v0 = vadd.f32 %v5335_v52, %v4522_v41 }
 0x19a   :  { %2419 = vmatprep.mubr.f32.mxu1 %v1073_v1 }
 0x19b   :  { %v5342_v45 = vpop.f32.mrb[92].mxu0 }
 0x19c   :  { %6863 = vst [vmem:[#allocation67_spill] sm:$0xff] %v5342_v45  ;;  %v5346_v12 = vpop.f32.mrb[93].mxu0  ;;  %3181 = vmatmul.mubr.msk.f32.gmra.mrb[198].mxu0 %vm152_vm0, %v3680_v24  ;;  %v5352_v8 = vpop.f32.mrb[92].mxu1  ;;  %v1085_v45 = vadd.f32 %v5189_v7, %v4501_v30  ;;  %v3681_v24 = vld [vmem:[%s6788_s0 + $0x120] sm:$0xff] }
 0x19d   :  { %6864 = vst [vmem:[#allocation68_spill] sm:$0xff] %v5346_v12  ;;  %2420 = vmatmul.mubr.f32.gmra.mrb[198].mxu1 %v1071_v34  ;;  %v5354_v1 = vpop.f32.mrb[93].mxu1  ;;  %1523 = vmatprep.mubr.f32.mxu0 %v6801_v59  ;;  %v1137_v52 = vadd.f32 %v5352_v8, %v4522_v41 }
 0x19e   :  { %2424 = vmatprep.mubr.f32.mxu1 %v1079_v36 }
 0x19f   :  { %v5359_v33 = vpop.f32.mrb[94].mxu0 }
 0x1a0   :  { %6865 = vst [vmem:[#allocation69_spill] sm:$0xff] %v5359_v33  ;;  %v5363_v12 = vpop.f32.mrb[95].mxu0  ;;  %3182 = vmatmul.mubr.msk.f32.gmra.mrb[200].mxu0 %vm152_vm0, %v3681_v24  ;;  %v5369_v34 = vpop.f32.mrb[94].mxu1  ;;  %v1091_v33 = vadd.f32 %v5206_v6, %v4501_v30  ;;  %v3682_v24 = vld [vmem:[%s6788_s0 + $0x128] sm:$0xff] }
 0x1a1   :  { %6866 = vst [vmem:[#allocation70_spill] sm:$0xff] %v5363_v12  ;;  %2425 = vmatmul.mubr.f32.gmra.mrb[200].mxu1 %v1077_v55  ;;  %v5371_v36 = vpop.f32.mrb[95].mxu1  ;;  %1529 = vmatprep.mubr.f32.mxu0 %v6801_v59  ;;  %v1143_v8 = vadd.f32 %v5369_v34, %v4522_v41 }
 0x1a2   :  { %2429 = vmatprep.mubr.f32.mxu1 %v1085_v45 }
 0x1a3   :  { %v5376_v7 = vpop.f32.mrb[96].mxu0 }
 0x1a4   :  { %6867 = vst [vmem:[#allocation71_spill] sm:$0xff] %v5376_v7  ;;  %v5380_v12 = vpop.f32.mrb[97].mxu0  ;;  %3183 = vmatmul.mubr.msk.f32.gmra.mrb[202].mxu0 %vm152_vm0, %v3682_v24  ;;  %v5386_v55 = vpop.f32.mrb[96].mxu1  ;;  %v1097_v7 = vadd.f32 %v5223_v40, %v4501_v30  ;;  %v3683_v24 = vld [vmem:[%s6788_s0 + $0x130] sm:$0xff] }
 0x1a5   :  { %6868 = vst [vmem:[#allocation72_spill] sm:$0xff] %v5380_v12  ;;  %2430 = vmatmul.mubr.f32.gmra.mrb[202].mxu1 %v1083_v22  ;;  %v5388_v45 = vpop.f32.mrb[97].mxu1  ;;  %1535 = vmatprep.mubr.f32.mxu0 %v6801_v59  ;;  %v1149_v34 = vadd.f32 %v5386_v55, %v4522_v41 }
 0x1a6   :  { %2434 = vmatprep.mubr.f32.mxu1 %v1091_v33 }
 0x1a7   :  { %v5393_v6 = vpop.f32.mrb[98].mxu0 }
 0x1a8   :  { %6869 = vst [vmem:[#allocation73_spill] sm:$0xff] %v5393_v6  ;;  %v5397_v12 = vpop.f32.mrb[99].mxu0  ;;  %3184 = vmatmul.mubr.msk.f32.gmra.mrb[204].mxu0 %vm152_vm0, %v3683_v24  ;;  %v5403_v22 = vpop.f32.mrb[98].mxu1  ;;  %v1103_v6 = vadd.f32 %v5252_v35, %v4501_v30  ;;  %v3684_v24 = vld [vmem:[%s6788_s0 + $0x138] sm:$0xff] }
 0x1a9   :  { %6870 = vst [vmem:[#allocation74_spill] sm:$0xff] %v5397_v12  ;;  %2435 = vmatmul.mubr.f32.gmra.mrb[204].mxu1 %v1089_v47  ;;  %v5405_v33 = vpop.f32.mrb[99].mxu1  ;;  %1541 = vmatprep.mubr.f32.mxu0 %v6801_v59  ;;  %v1155_v55 = vadd.f32 %v5403_v22, %v4522_v41 }
 0x1aa   :  { %2439 = vmatprep.mubr.f32.mxu1 %v1097_v7 }
 0x1ab   :  { %v5410_v40 = vpop.f32.mrb[100].mxu0 }
 0x1ac   :  { %6871 = vst [vmem:[#allocation75_spill] sm:$0xff] %v5410_v40  ;;  %v5414_v12 = vpop.f32.mrb[101].mxu0  ;;  %3185 = vmatmul.mubr.msk.f32.gmra.mrb[206].mxu0 %vm152_vm0, %v3684_v24  ;;  %v5420_v47 = vpop.f32.mrb[100].mxu1  ;;  %v1109_v40 = vadd.f32 %v5269_v54, %v4501_v30  ;;  %v3685_v24 = vld [vmem:[%s6788_s0 + $0x140] sm:$0xff] }
 0x1ad   :  { %6872 = vst [vmem:[#allocation76_spill] sm:$0xff] %v5414_v12  ;;  %2440 = vmatmul.mubr.f32.gmra.mrb[206].mxu1 %v1095_v17  ;;  %v5422_v7 = vpop.f32.mrb[101].mxu1  ;;  %1547 = vmatprep.mubr.f32.mxu0 %v6801_v59  ;;  %v1161_v22 = vadd.f32 %v5420_v47, %v4522_v41 }
 0x1ae   :  { %2444 = vmatprep.mubr.f32.mxu1 %v1103_v6 }
 0x1af   :  { %v5427_v35 = vpop.f32.mrb[102].mxu0 }
 0x1b0   :  { %6873 = vst [vmem:[#allocation77_spill] sm:$0xff] %v5427_v35  ;;  %v5431_v12 = vpop.f32.mrb[103].mxu0  ;;  %3186 = vmatmul.mubr.msk.f32.gmra.mrb[208].mxu0 %vm152_vm0, %v3685_v24  ;;  %v5437_v17 = vpop.f32.mrb[102].mxu1  ;;  %v1115_v35 = vadd.f32 %v5286_v11, %v4501_v30  ;;  %v3686_v24 = vld [vmem:[%s6788_s0 + $0x148] sm:$0xff] }
 0x1b1   :  { %6874 = vst [vmem:[#allocation78_spill] sm:$0xff] %v5431_v12  ;;  %2445 = vmatmul.mubr.f32.gmra.mrb[208].mxu1 %v1101_v14  ;;  %v5439_v6 = vpop.f32.mrb[103].mxu1  ;;  %1553 = vmatprep.mubr.f32.mxu0 %v6801_v59  ;;  %v1167_v47 = vadd.f32 %v5437_v17, %v4522_v41 }
 0x1b2   :  { %2449 = vmatprep.mubr.f32.mxu1 %v1109_v40 }
 0x1b3   :  { %v5444_v54 = vpop.f32.mrb[104].mxu0 }
 0x1b4   :  { %6875 = vst [vmem:[#allocation79_spill] sm:$0xff] %v5444_v54  ;;  %v5448_v12 = vpop.f32.mrb[105].mxu0  ;;  %3187 = vmatmul.mubr.msk.f32.gmra.mrb[210].mxu0 %vm152_vm0, %v3686_v24  ;;  %v5454_v14 = vpop.f32.mrb[104].mxu1  ;;  %v1121_v54 = vadd.f32 %v5303_v3, %v4501_v30  ;;  %v3687_v24 = vld [vmem:[%s6788_s0 + $0x150] sm:$0xff] }
 0x1b5   :  { %6876 = vst [vmem:[#allocation80_spill] sm:$0xff] %v5448_v12  ;;  %2450 = vmatmul.mubr.f32.gmra.mrb[210].mxu1 %v1107_v58  ;;  %v5456_v40 = vpop.f32.mrb[105].mxu1  ;;  %1559 = vmatprep.mubr.f32.mxu0 %v6801_v59  ;;  %v1173_v17 = vadd.f32 %v5454_v14, %v4522_v41 }
 0x1b6   :  { %2454 = vmatprep.mubr.f32.mxu1 %v1115_v35 }
 0x1b7   :  { %v5461_v11 = vpop.f32.mrb[106].mxu0 }
 0x1b8   :  { %6877 = vst [vmem:[#allocation81_spill] sm:$0xff] %v5461_v11  ;;  %v5465_v12 = vpop.f32.mrb[107].mxu0  ;;  %3188 = vmatmul.mubr.msk.f32.gmra.mrb[212].mxu0 %vm152_vm0, %v3687_v24  ;;  %v5471_v58 = vpop.f32.mrb[106].mxu1  ;;  %v1127_v11 = vadd.f32 %v5320_v13, %v4501_v30  ;;  %v3688_v24 = vld [vmem:[%s6788_s0 + $0x158] sm:$0xff] }
 0x1b9   :  { %6878 = vst [vmem:[#allocation82_spill] sm:$0xff] %v5465_v12  ;;  %2455 = vmatmul.mubr.f32.gmra.mrb[212].mxu1 %v1113_v2  ;;  %v5473_v35 = vpop.f32.mrb[107].mxu1  ;;  %1565 = vmatprep.mubr.f32.mxu0 %v6801_v59  ;;  %v1179_v14 = vadd.f32 %v5471_v58, %v4522_v41 }
 0x1ba   :  { %2459 = vmatprep.mubr.f32.mxu1 %v1121_v54 }
 0x1bb   :  { %v5478_v3 = vpop.f32.mrb[108].mxu0 }
 0x1bc   :  { %6879 = vst [vmem:[#allocation83_spill] sm:$0xff] %v5478_v3  ;;  %v5482_v12 = vpop.f32.mrb[109].mxu0  ;;  %3189 = vmatmul.mubr.msk.f32.gmra.mrb[214].mxu0 %vm152_vm0, %v3688_v24  ;;  %v5488_v2 = vpop.f32.mrb[108].mxu1  ;;  %v1133_v3 = vadd.f32 %v5337_v39, %v4501_v30  ;;  %v3689_v24 = vld [vmem:[%s6788_s0 + $0x160] sm:$0xff] }
 0x1bd   :  { %6880 = vst [vmem:[#allocation84_spill] sm:$0xff] %v5482_v12  ;;  %2460 = vmatmul.mubr.f32.gmra.mrb[214].mxu1 %v1119_v44  ;;  %v5490_v54 = vpop.f32.mrb[109].mxu1  ;;  %1571 = vmatprep.mubr.f32.mxu0 %v6801_v59  ;;  %v1185_v58 = vadd.f32 %v5488_v2, %v4522_v41 }
 0x1be   :  { %2464 = vmatprep.mubr.f32.mxu1 %v1127_v11 }
 0x1bf   :  { %v5495_v13 = vpop.f32.mrb[110].mxu0 }
 0x1c0   :  { %6881 = vst [vmem:[#allocation85_spill] sm:$0xff] %v5495_v13  ;;  %v5499_v12 = vpop.f32.mrb[111].mxu0  ;;  %3190 = vmatmul.mubr.msk.f32.gmra.mrb[216].mxu0 %vm152_vm0, %v3689_v24  ;;  %v5505_v44 = vpop.f32.mrb[110].mxu1  ;;  %v1139_v13 = vadd.f32 %v5354_v1, %v4501_v30  ;;  %v3690_v24 = vld [vmem:[%s6788_s0 + $0x168] sm:$0xff] }
 0x1c1   :  { %6882 = vst [vmem:[#allocation86_spill] sm:$0xff] %v5499_v12  ;;  %2465 = vmatmul.mubr.f32.gmra.mrb[216].mxu1 %v1125_v27  ;;  %v5507_v11 = vpop.f32.mrb[111].mxu1  ;;  %1577 = vmatprep.mubr.f32.mxu0 %v6801_v59  ;;  %v1191_v2 = vadd.f32 %v5505_v44, %v4522_v41 }
 0x1c2   :  { %2469 = vmatprep.mubr.f32.mxu1 %v1133_v3 }
 0x1c3   :  { %v5512_v39 = vpop.f32.mrb[112].mxu0 }
 0x1c4   :  { %6883 = vst [vmem:[#allocation87_spill] sm:$0xff] %v5512_v39  ;;  %v5516_v12 = vpop.f32.mrb[113].mxu0  ;;  %3191 = vmatmul.mubr.msk.f32.gmra.mrb[218].mxu0 %vm152_vm0, %v3690_v24  ;;  %v5522_v27 = vpop.f32.mrb[112].mxu1  ;;  %v1145_v39 = vadd.f32 %v5371_v36, %v4501_v30  ;;  %v3691_v24 = vld [vmem:[%s6788_s0 + $0x170] sm:$0xff] }
 0x1c5   :  { %6884 = vst [vmem:[#allocation88_spill] sm:$0xff] %v5516_v12  ;;  %2470 = vmatmul.mubr.f32.gmra.mrb[218].mxu1 %v1131_v0  ;;  %v5524_v3 = vpop.f32.mrb[113].mxu1  ;;  %1583 = vmatprep.mubr.f32.mxu0 %v6801_v59 }
 0x1c6   :  { %2474 = vmatprep.mubr.f32.mxu1 %v1139_v13 }
 0x1c7   :  { %v5529_v1 = vpop.f32.mrb[114].mxu0 }
 0x1c8   :  { %6885 = vst [vmem:[#allocation89_spill] sm:$0xff] %v5529_v1  ;;  %v5533_v12 = vpop.f32.mrb[115].mxu0  ;;  %3192 = vmatmul.mubr.msk.f32.gmra.mrb[220].mxu0 %vm152_vm0, %v3691_v24  ;;  %v5539_v0 = vpop.f32.mrb[114].mxu1  ;;  %v1151_v1 = vadd.f32 %v5388_v45, %v4501_v30  ;;  %v3692_v24 = vld [vmem:[%s6788_s0 + $0x178] sm:$0xff] }
 0x1c9   :  { %6886 = vst [vmem:[#allocation90_spill] sm:$0xff] %v5533_v12  ;;  %2475 = vmatmul.mubr.f32.gmra.mrb[220].mxu1 %v1137_v52  ;;  %v5541_v13 = vpop.f32.mrb[115].mxu1  ;;  %1589 = vmatprep.mubr.f32.mxu0 %v6801_v59 }
 0x1ca   :  { %2479 = vmatprep.mubr.f32.mxu1 %v1145_v39 }
 0x1cb   :  { %v5546_v36 = vpop.f32.mrb[116].mxu0 }
 0x1cc   :  { %6887 = vst [vmem:[#allocation91_spill] sm:$0xff] %v5546_v36  ;;  %v5550_v12 = vpop.f32.mrb[117].mxu0  ;;  %3193 = vmatmul.mubr.msk.f32.gmra.mrb[222].mxu0 %vm152_vm0, %v3692_v24  ;;  %v5556_v52 = vpop.f32.mrb[116].mxu1  ;;  %v1157_v36 = vadd.f32 %v5405_v33, %v4501_v30  ;;  %v3693_v24 = vld [vmem:[%s6788_s0 + $0x180] sm:$0xff] }
 0x1cd   :  { %6888 = vst [vmem:[#allocation92_spill] sm:$0xff] %v5550_v12  ;;  %2480 = vmatmul.mubr.f32.gmra.mrb[222].mxu1 %v1143_v8  ;;  %v5558_v39 = vpop.f32.mrb[117].mxu1  ;;  %1595 = vmatprep.mubr.f32.mxu0 %v6801_v59 }
 0x1ce   :  { %2484 = vmatprep.mubr.f32.mxu1 %v1151_v1 }
 0x1cf   :  { %v5563_v45 = vpop.f32.mrb[118].mxu0 }
 0x1d0   :  { %6889 = vst [vmem:[#allocation93_spill] sm:$0xff] %v5563_v45  ;;  %v5567_v12 = vpop.f32.mrb[119].mxu0  ;;  %3194 = vmatmul.mubr.msk.f32.gmra.mrb[224].mxu0 %vm152_vm0, %v3693_v24  ;;  %v5573_v8 = vpop.f32.mrb[118].mxu1  ;;  %v1163_v45 = vadd.f32 %v5422_v7, %v4501_v30  ;;  %v3694_v24 = vld [vmem:[%s6788_s0 + $0x188] sm:$0xff] }
 0x1d1   :  { %6890 = vst [vmem:[#allocation94_spill] sm:$0xff] %v5567_v12  ;;  %2485 = vmatmul.mubr.f32.gmra.mrb[224].mxu1 %v1149_v34  ;;  %v5575_v1 = vpop.f32.mrb[119].mxu1  ;;  %1601 = vmatprep.mubr.f32.mxu0 %v6801_v59 }
 0x1d2   :  { %2489 = vmatprep.mubr.f32.mxu1 %v1157_v36 }
 0x1d3   :  { %v5580_v33 = vpop.f32.mrb[120].mxu0 }
 0x1d4   :  { %6891 = vst [vmem:[#allocation95_spill] sm:$0xff] %v5580_v33  ;;  %v5584_v12 = vpop.f32.mrb[121].mxu0  ;;  %3195 = vmatmul.mubr.msk.f32.gmra.mrb[226].mxu0 %vm152_vm0, %v3694_v24  ;;  %v5590_v34 = vpop.f32.mrb[120].mxu1  ;;  %v1169_v33 = vadd.f32 %v5439_v6, %v4501_v30  ;;  %v3695_v24 = vld [vmem:[%s6788_s0 + $0x190] sm:$0xff] }
 0x1d5   :  { %6892 = vst [vmem:[#allocation96_spill] sm:$0xff] %v5584_v12  ;;  %2490 = vmatmul.mubr.f32.gmra.mrb[226].mxu1 %v1155_v55  ;;  %v5592_v36 = vpop.f32.mrb[121].mxu1  ;;  %1607 = vmatprep.mubr.f32.mxu0 %v6801_v59 }
 0x1d6   :  { %2494 = vmatprep.mubr.f32.mxu1 %v1163_v45 }
 0x1d7   :  { %v5597_v7 = vpop.f32.mrb[122].mxu0 }
 0x1d8   :  { %6893 = vst [vmem:[#allocation97_spill] sm:$0xff] %v5597_v7  ;;  %v5601_v12 = vpop.f32.mrb[123].mxu0  ;;  %3196 = vmatmul.mubr.msk.f32.gmra.mrb[228].mxu0 %vm152_vm0, %v3695_v24  ;;  %v5607_v55 = vpop.f32.mrb[122].mxu1  ;;  %v1175_v7 = vadd.f32 %v5456_v40, %v4501_v30  ;;  %v3696_v24 = vld [vmem:[%s6788_s0 + $0x198] sm:$0xff] }
 0x1d9   :  { %6894 = vst [vmem:[#allocation98_spill] sm:$0xff] %v5601_v12  ;;  %2495 = vmatmul.mubr.f32.gmra.mrb[228].mxu1 %v1161_v22  ;;  %v5609_v45 = vpop.f32.mrb[123].mxu1  ;;  %1613 = vmatprep.mubr.f32.mxu0 %v6801_v59 }
 0x1da   :  { %2499 = vmatprep.mubr.f32.mxu1 %v1169_v33 }
 0x1db   :  { %v5614_v6 = vpop.f32.mrb[124].mxu0 }
 0x1dc   :  { %6895 = vst [vmem:[#allocation99_spill] sm:$0xff] %v5614_v6  ;;  %v5618_v12 = vpop.f32.mrb[125].mxu0  ;;  %3197 = vmatmul.mubr.msk.f32.gmra.mrb[230].mxu0 %vm152_vm0, %v3696_v24  ;;  %v5624_v22 = vpop.f32.mrb[124].mxu1  ;;  %v1181_v6 = vadd.f32 %v5473_v35, %v4501_v30  ;;  %v3697_v24 = vld [vmem:[%s6788_s0 + $0x1a0] sm:$0xff] }
 0x1dd   :  { %6896 = vst [vmem:[#allocation100_spill] sm:$0xff] %v5618_v12  ;;  %2500 = vmatmul.mubr.f32.gmra.mrb[230].mxu1 %v1167_v47  ;;  %v5626_v33 = vpop.f32.mrb[125].mxu1  ;;  %1619 = vmatprep.mubr.f32.mxu0 %v6801_v59 }
 0x1de   :  { %2504 = vmatprep.mubr.f32.mxu1 %v1175_v7 }
 0x1df   :  { %v5631_v40 = vpop.f32.mrb[126].mxu0 }
 0x1e0   :  { %6897 = vst [vmem:[#allocation101_spill] sm:$0xff] %v5631_v40  ;;  %v5635_v12 = vpop.f32.mrb[127].mxu0  ;;  %3198 = vmatmul.mubr.msk.f32.gmra.mrb[232].mxu0 %vm152_vm0, %v3697_v24  ;;  %v5641_v47 = vpop.f32.mrb[126].mxu1  ;;  %v1187_v40 = vadd.f32 %v5490_v54, %v4501_v30  ;;  %v3698_v24 = vld [vmem:[%s6788_s0 + $0x1a8] sm:$0xff]  ;;  %v1193_v54 = vadd.f32 %v5507_v11, %v4501_v30  ;;  %v1199_v11 = vadd.f32 %v5524_v3, %v4501_v30 }
 0x1e1   :  { %6898 = vst [vmem:[#allocation102_spill] sm:$0xff] %v5635_v12  ;;  %2505 = vmatmul.mubr.f32.gmra.mrb[232].mxu1 %v1173_v17  ;;  %v5643_v7 = vpop.f32.mrb[127].mxu1  ;;  %1625 = vmatprep.mubr.f32.mxu0 %v6801_v59  ;;  %v1205_v3 = vadd.f32 %v5541_v13, %v4501_v30  ;;  %v1211_v13 = vadd.f32 %v5558_v39, %v4501_v30 }
 0x1e2   :  { %2509 = vmatprep.mubr.f32.mxu1 %v1181_v6  ;;  %v1217_v39 = vadd.f32 %v5575_v1, %v4501_v30  ;;  %v1223_v1 = vadd.f32 %v5592_v36, %v4501_v30  ;;  %v1229_v36 = vadd.f32 %v5609_v45, %v4501_v30  ;;  %v1235_v45 = vadd.f32 %v5626_v33, %v4501_v30  ;;  %v3707_v33 = vld [vmem:[%s6789_s2] sm:$0x3f] }
 0x1e3   :  { %v5648_v35 = vpop.f32.mrb[128].mxu0 }
 0x1e4   :  { %v5652_v12 = vpop.f32.mrb[129].mxu0  ;;  %3199 = vmatmul.mubr.msk.f32.gmra.mrb[234].mxu0 %vm152_vm0, %v3698_v24  ;;  %v3700_v24 = vld [vmem:[%s6788_s0 + $0x1b8] sm:$0xff] }
 0x1e5   :  { %2510 = vmatmul.mubr.f32.gmra.mrb[234].mxu1 %v1179_v14  ;;  %1631 = vmatprep.mubr.f32.mxu0 %v6801_v59 }
 0x1e6   :  { %2514 = vmatprep.mubr.f32.mxu1 %v1187_v40 }
 0x1e7   :  { %v5661_v6 = vpop.f32.mrb[130].mxu0 }
 0x1e8   :  { %v5665_v17 = vpop.f32.mrb[131].mxu0  ;;  %3200 = vmatmul.mubr.msk.f32.gmra.mrb[236].mxu0 %vm152_vm0, %v3699_v19  ;;  %v1197_v19 = vadd.f32 %v5522_v27, %v4522_v41  ;;  %v1203_v27 = vadd.f32 %v5539_v0, %v4522_v41  ;;  %v1209_v0 = vadd.f32 %v5556_v52, %v4522_v41  ;;  %v1215_v52 = vadd.f32 %v5573_v8, %v4522_v41 }
 0x1e9   :  { %2515 = vmatmul.mubr.f32.gmra.mrb[236].mxu1 %v1185_v58  ;;  %1637 = vmatprep.mubr.f32.mxu0 %v6801_v59  ;;  %v1221_v8 = vadd.f32 %v5590_v34, %v4522_v41  ;;  %v1227_v34 = vadd.f32 %v5607_v55, %v4522_v41  ;;  %v124_v55 = vsub.s32 0, %v4476_v20 }
 0x1ea   :  { %2519 = vmatprep.mubr.f32.mxu1 %v1193_v54  ;;  %v3701_v54 = vld [vmem:[%s6788_s0 + $0x1c0] sm:$0xff] }
 0x1eb   :  { %v5674_v40 = vpop.f32.mrb[132].mxu0 }
 0x1ec   :  { %v5678_v14 = vpop.f32.mrb[133].mxu0  ;;  %3201 = vmatmul.mubr.msk.f32.gmra.mrb[238].mxu0 %vm152_vm0, %v3700_v24  ;;  %v3702_v24 = vld [vmem:[%s6788_s0 + $0x1c8] sm:$0xff] }
 0x1ed   :  { %2520 = vmatmul.mubr.f32.gmra.mrb[238].mxu1 %v1191_v2  ;;  %1643 = vmatprep.mubr.f32.mxu0 %v6801_v59 }
 0x1ee   :  { %2524 = vmatprep.mubr.f32.mxu1 %v1199_v11 }
 0x1ef   :  { %v5687_v44 = vpop.f32.mrb[134].mxu0 }
 0x1f0   :  { %v5691_v58 = vpop.f32.mrb[135].mxu0  ;;  %3202 = vmatmul.mubr.msk.f32.gmra.mrb[240].mxu0 %vm152_vm0, %v3701_v54  ;;  %v3703_v54 = vld [vmem:[%s6788_s0 + $0x1d0] sm:$0xff] }
 0x1f1   :  { %2525 = vmatmul.mubr.f32.gmra.mrb[240].mxu1 %v1197_v19  ;;  %1649 = vmatprep.mubr.f32.mxu0 %v6801_v59 }
 0x1f2   :  { %2529 = vmatprep.mubr.f32.mxu1 %v1205_v3 }
 0x1f3   :  { %v5700_v2 = vpop.f32.mrb[136].mxu0 }
 0x1f4   :  { %v5704_v11 = vpop.f32.mrb[137].mxu0  ;;  %3203 = vmatmul.mubr.msk.f32.gmra.mrb[242].mxu0 %vm152_vm0, %v3702_v24  ;;  %v3704_v24 = vld [vmem:[%s6788_s0 + $0x1d8] sm:$0xff] }
 0x1f5   :  { %2530 = vmatmul.mubr.f32.gmra.mrb[242].mxu1 %v1203_v27  ;;  %1655 = vmatprep.mubr.f32.mxu0 %v6801_v59 }
 0x1f6   :  { %2534 = vmatprep.mubr.f32.mxu1 %v1211_v13 }
 0x1f7   :  { %v5713_v19 = vpop.f32.mrb[138].mxu0 }
 0x1f8   :  { %v5717_v3 = vpop.f32.mrb[139].mxu0  ;;  %3204 = vmatmul.mubr.msk.f32.gmra.mrb[244].mxu0 %vm152_vm0, %v3703_v54  ;;  %v3705_v54 = vld [vmem:[%s6788_s0 + $0x1e0] sm:$0xff] }
 0x1f9   :  { %2535 = vmatmul.mubr.f32.gmra.mrb[244].mxu1 %v1209_v0  ;;  %1661 = vmatprep.mubr.f32.mxu0 %v6801_v59 }
 0x1fa   :  { %2539 = vmatprep.mubr.f32.mxu1 %v1217_v39 }
 0x1fb   :  { %v5726_v27 = vpop.f32.mrb[140].mxu0 }
 0x1fc   :  { %v5730_v13 = vpop.f32.mrb[141].mxu0  ;;  %3205 = vmatmul.mubr.msk.f32.gmra.mrb[246].mxu0 %vm152_vm0, %v3704_v24  ;;  %v144_v24 = vsub.s32 5, %v4476_v20 }
 0x1fd   :  { %2540 = vmatmul.mubr.f32.gmra.mrb[246].mxu1 %v1215_v52  ;;  %1667 = vmatprep.mubr.f32.mxu0 %v6801_v59  ;;  %v128_v52 = vsub.s32 1, %v4476_v20 }
 0x1fe   :  { %2544 = vmatprep.mubr.f32.mxu1 %v1223_v1 }
 0x1ff   :  { %v5739_v0 = vpop.f32.mrb[142].mxu0 }
 0x200   :  { %v5743_v39 = vpop.f32.mrb[143].mxu0  ;;  %3206 = vmatmul.mubr.msk.f32.gmra.mrb[248].mxu0 %vm152_vm0, %v3705_v54  ;;  %v1233_v54 = vadd.f32 %v5624_v22, %v4522_v41  ;;  %v5787_v22 = vrot.slane %v3707_v33, %v124_v55 }
 0x201   :  { %2545 = vmatmul.mubr.f32.gmra.mrb[248].mxu1 %v1221_v8  ;;  %1673 = vmatprep.mubr.f32.mxu0 %v6801_v59  ;;  %v3706_v8 = vld [vmem:[%s6788_s0 + $0x1e8] sm:$0xff] }
 0x202   :  { %2549 = vmatprep.mubr.f32.mxu1 %v1229_v36  ;;  %v5769_v36 = vrot.slane %v3707_v33, %v128_v52 }
 0x203   :  { %v5753_v1 = vpop.f32.mrb[144].mxu0 }
 0x204   :  { %v5758_v63 = vpop.f32.mrb[145].mxu0  ;;  %3207 = vmatmul.mubr.msk.f32.gmra.mrb[250].mxu0 %vm152_vm0, %v3706_v8  ;;  %v5778_v8 = vrot.slane %v3707_v33, %v144_v24  ;;  %v414_v20 = vadd.f32 %v4359_v38, %v5769_v36  ;;  %v412_v38 = vadd.f32 %v4357_v37, %v5787_v22  ;;  %v418_v37 = vadd.f32 %v4372_v42, %v5787_v22 }
 0x205   :  { %2550 = vmatmul.mubr.f32.gmra.mrb[250].mxu1 %v1227_v34  ;;  %1679 = vmatprep.mubr.f32.mxu0 %v6801_v59  ;;  %v1241_v34 = vadd.f32 %v5643_v7, %v4501_v30  ;;  %v1239_v30 = vadd.f32 %v5641_v47, %v4522_v41  ;;  %v5793_v7 = vrot.slane %v3707_v33, %v140_v53 }
 0x206   :  { %2554 = vmatprep.mubr.f32.mxu1 %v1235_v45  ;;  %v3708_v45 = vld [vmem:[%s6788_s0 + $0x1f0] sm:$0xff]  ;;  %v1312_v24 = vadd.f32 %v5652_v12, %v5778_v8  ;;  %v420_v41 = vadd.f32 %v4374_v43, %v5769_v36  ;;  %v1318_v47 = vadd.f32 %v5665_v17, %v5778_v8  ;;  %v426_v43 = vadd.f32 %v4389_v51, %v5769_v36 }
 0x207   :  { %v5774_v26 = vpop.f32.mrb[146].mxu0  ;;  %v1310_v53 = vadd.f32 %v5648_v35, %v5793_v7  ;;  %v1316_v35 = vadd.f32 %v5661_v6, %v5793_v7  ;;  %v1324_v17 = vadd.f32 %v5678_v14, %v5778_v8  ;;  %v424_v42 = vadd.f32 %v4387_v49, %v5787_v22 }
 0x208   :  { %v5780_v18 = vpop.f32.mrb[147].mxu0  ;;  %3208 = vmatmul.mubr.msk.f32.gmra.mrb[252].mxu0 %vm152_vm0, %v3708_v45  ;;  %v432_v51 = vadd.f32 %v4404_v57, %v5769_v36  ;;  %v1322_v6 = vadd.f32 %v5674_v40, %v5793_v7  ;;  %v1330_v14 = vadd.f32 %v5691_v58, %v5778_v8  ;;  %v430_v49 = vadd.f32 %v4402_v56, %v5787_v22 }
 0x209   :  { %2555 = vmatmul.mubr.f32.gmra.mrb[252].mxu1 %v1233_v54  ;;  %1685 = vmatprep.mubr.f32.mxu0 %v6801_v59  ;;  %v3709_v59 = vld [vmem:[%s6788_s0 + $0x1f8] sm:$0xff]  ;;  %v438_v57 = vadd.f32 %v4419_v62, %v5769_v36  ;;  %v1328_v40 = vadd.f32 %v5687_v44, %v5793_v7  ;;  %v1336_v58 = vadd.f32 %v5704_v11, %v5778_v8 }
 0x20a   :  { %2559 = vmatprep.mubr.f32.mxu1 %v1241_v34  ;;  %v436_v56 = vadd.f32 %v4417_v61, %v5787_v22  ;;  %v444_v62 = vadd.f32 %v4434_v5, %v5769_v36  ;;  %v1334_v44 = vadd.f32 %v5700_v2, %v5793_v7  ;;  %v1342_v11 = vadd.f32 %v5717_v3, %v5778_v8 }
 0x20b   :  { %v5795_v52 = vpop.f32.mrb[148].mxu0  ;;  %v442_v61 = vadd.f32 %v4432_v4, %v5787_v22  ;;  %v450_v5 = vadd.f32 %v4449_v10, %v5769_v36  ;;  %v1340_v2 = vadd.f32 %v5713_v19, %v5793_v7  ;;  %v1348_v3 = vadd.f32 %v5730_v13, %v5778_v8 }
 0x20c   :  { %v5799_v45 = vpop.f32.mrb[149].mxu0  ;;  %3209 = vmatmul.mubr.msk.f32.gmra.mrb[254].mxu0 %vm152_vm0, %v3709_v59  ;;  %v448_v4 = vadd.f32 %v4447_v9, %v5787_v22  ;;  %v456_v10 = vadd.f32 %v4464_v16, %v5769_v36  ;;  %v1346_v19 = vadd.f32 %v5726_v27, %v5793_v7  ;;  %v1354_v13 = vadd.f32 %v5743_v39, %v5778_v8 }
 0x20d   :  { %2560 = vmatmul.mubr.f32.gmra.mrb[254].mxu1 %v1239_v30  ;;  %1859 = vmatprep.mubr.f32.mxu0 %v414_v20  ;;  %v454_v9 = vadd.f32 %v4462_v15, %v5787_v22  ;;  %v462_v16 = vadd.f32 %v4482_v23, %v5769_v36  ;;  %v1352_v27 = vadd.f32 %v5739_v0, %v5793_v7 }
 0x20e   :  { %2629 = vmatprep.mubr.f32.mxu1 %v1312_v24  ;;  %v1360_v39 = vadd.f32 %v5758_v63, %v5778_v8  ;;  %v460_v15 = vadd.f32 %v4479_v21, %v5787_v22  ;;  %v468_v23 = vadd.f32 %v4503_v31, %v5769_v36  ;;  %v1358_v0 = vadd.f32 %v5753_v1, %v5793_v7 }
 0x20f   :  { %v5811_v12 = vpop.f32.mrb[150].mxu0  ;;  %v1366_v63 = vadd.f32 %v5780_v18, %v5778_v8  ;;  %v466_v21 = vadd.f32 %v4499_v29, %v5787_v22  ;;  %v474_v31 = vadd.f32 %v4528_v60, %v5769_v36  ;;  %v1364_v1 = vadd.f32 %v5774_v26, %v5793_v7 }
 0x210   :  { %v5815_v55 = vpop.f32.mrb[151].mxu0  ;;  %1860 = vmatmul.mubr.f32.vlgmr.msra.gmra.mrb[0].mxu0 %v412_v38  ;;  %v1372_v18 = vadd.f32 %v5799_v45, %v5778_v8  ;;  %v472_v29 = vadd.f32 %v4524_v48, %v5787_v22  ;;  %v480_v60 = vadd.f32 %v4555_v46, %v5769_v36  ;;  %v1370_v26 = vadd.f32 %v5795_v52, %v5793_v7 }
 0x211   :  { %2630 = vmatmul.mubr.f32.vlgmr.msra.gmra.mrb[128].mxu1 %v1310_v53  ;;  %1864 = vmatprep.mubr.f32.mxu0 %v420_v41  ;;  %v1378_v45 = vadd.f32 %v5815_v55, %v5778_v8  ;;  %v486_v46 = vadd.f32 %v4583_v28, %v5769_v36  ;;  %v1376_v52 = vadd.f32 %v5811_v12, %v5793_v7 }
 0x212   :  { %2634 = vmatprep.mubr.f32.mxu1 %v1318_v47 }
 0x213   :  { %v5823_v33 = vpop.f32.mrb[152].mxu0 }
 0x214   :  { %v5827_v54 = vpop.f32.mrb[153].mxu0  ;;  %1865 = vmatmul.mubr.f32.gmra.mrb[2].mxu0 %v418_v37  ;;  %v1382_v12 = vadd.f32 %v5823_v33, %v5793_v7 }
 0x215   :  { %2635 = vmatmul.mubr.f32.gmra.mrb[130].mxu1 %v1316_v35  ;;  %1869 = vmatprep.mubr.f32.mxu0 %v426_v43  ;;  %v1384_v55 = vadd.f32 %v5827_v54, %v5778_v8 }
 0x216   :  { %2639 = vmatprep.mubr.f32.mxu1 %v1324_v17 }
 0x217   :  { %v5835_v34 = vpop.f32.mrb[154].mxu0 }
 0x218   :  { %v5839_v20 = vpop.f32.mrb[155].mxu0  ;;  %1870 = vmatmul.mubr.f32.gmra.mrb[4].mxu0 %v424_v42  ;;  %v1388_v33 = vadd.f32 %v5835_v34, %v5793_v7 }
 0x219   :  { %2640 = vmatmul.mubr.f32.gmra.mrb[132].mxu1 %v1322_v6  ;;  %1874 = vmatprep.mubr.f32.mxu0 %v432_v51  ;;  %v1390_v54 = vadd.f32 %v5839_v20, %v5778_v8 }
 0x21a   :  { %2644 = vmatprep.mubr.f32.mxu1 %v1330_v14 }
 0x21b   :  { %v5847_v30 = vpop.f32.mrb[156].mxu0 }
 0x21c   :  { %v5851_v24 = vpop.f32.mrb[157].mxu0  ;;  %1875 = vmatmul.mubr.f32.gmra.mrb[6].mxu0 %v430_v49  ;;  %v1394_v34 = vadd.f32 %v5847_v30, %v5793_v7 }
 0x21d   :  { %2645 = vmatmul.mubr.f32.gmra.mrb[134].mxu1 %v1328_v40  ;;  %1879 = vmatprep.mubr.f32.mxu0 %v438_v57  ;;  %v6899_v57 = vld [vmem:[#allocation2_spill] sm:$0xff]  ;;  %v1396_v20 = vadd.f32 %v5851_v24, %v5778_v8 }
 0x21e   :  { %2649 = vmatprep.mubr.f32.mxu1 %v1336_v58  ;;  %v478_v48 = vadd.f32 %v6899_v57, %v5787_v22 }
 0x21f   :  { %v5859_v59 = vpop.f32.mrb[158].mxu0 }
 0x220   :  { %v5863_v38 = vpop.f32.mrb[159].mxu0  ;;  %1880 = vmatmul.mubr.f32.gmra.mrb[8].mxu0 %v436_v56  ;;  %v6900_v56 = vld [vmem:[#allocation3_spill] sm:$0xff]  ;;  %v1400_v30 = vadd.f32 %v5859_v59, %v5793_v7 }
 0x221   :  { %2650 = vmatmul.mubr.f32.gmra.mrb[136].mxu1 %v1334_v44  ;;  %1884 = vmatprep.mubr.f32.mxu0 %v444_v62  ;;  %v484_v62 = vadd.f32 %v6900_v56, %v5787_v22  ;;  %v6901_v44 = vld [vmem:[#allocation5_spill] sm:$0xff]  ;;  %v1402_v24 = vadd.f32 %v5863_v38, %v5778_v8 }
 0x222   :  { %2654 = vmatprep.mubr.f32.mxu1 %v1342_v11  ;;  %v492_v28 = vadd.f32 %v6901_v44, %v5769_v36  ;;  %v6911_v56 = vld [vmem:[#allocation13_spill] sm:$0xff]  ;;  %v6912_v44 = vld [vmem:[#allocation16_spill] sm:$0xff] }
 0x223   :  { %v5871_v41 = vpop.f32.mrb[160].mxu0 }
 0x224   :  { %v5875_v53 = vpop.f32.mrb[161].mxu0  ;;  %1885 = vmatmul.mubr.f32.gmra.mrb[10].mxu0 %v442_v61  ;;  %v1406_v59 = vadd.f32 %v5871_v41, %v5793_v7 }
 0x225   :  { %2655 = vmatmul.mubr.f32.gmra.mrb[138].mxu1 %v1340_v2  ;;  %1889 = vmatprep.mubr.f32.mxu0 %v450_v5  ;;  %v6902_v5 = vld [vmem:[#allocation4_spill] sm:$0xff]  ;;  %v1408_v38 = vadd.f32 %v5875_v53, %v5778_v8 }
 0x226   :  { %2659 = vmatprep.mubr.f32.mxu1 %v1348_v3  ;;  %v490_v2 = vadd.f32 %v6902_v5, %v5787_v22  ;;  %v498_v3 = vadd.f32 %v4641_v50, %v5769_v36  ;;  %v6913_v5 = vld [vmem:[#allocation15_spill] sm:$0xff] }
 0x227   :  { %v5883_v47 = vpop.f32.mrb[162].mxu0 }
 0x228   :  { %v5887_v37 = vpop.f32.mrb[163].mxu0  ;;  %1890 = vmatmul.mubr.f32.gmra.mrb[12].mxu0 %v448_v4  ;;  %v1412_v41 = vadd.f32 %v5883_v47, %v5793_v7 }
 0x229   :  { %2660 = vmatmul.mubr.f32.gmra.mrb[140].mxu1 %v1346_v19  ;;  %1894 = vmatprep.mubr.f32.mxu0 %v456_v10  ;;  %v6903_v19 = vld [vmem:[#allocation6_spill] sm:$0xff]  ;;  %v1414_v53 = vadd.f32 %v5887_v37, %v5778_v8 }
 0x22a   :  { %2664 = vmatprep.mubr.f32.mxu1 %v1354_v13  ;;  %v496_v13 = vadd.f32 %v6903_v19, %v5787_v22 }
 0x22b   :  { %v5895_v43 = vpop.f32.mrb[164].mxu0 }
 0x22c   :  { %v5899_v35 = vpop.f32.mrb[165].mxu0  ;;  %1895 = vmatmul.mubr.f32.gmra.mrb[14].mxu0 %v454_v9  ;;  %v6904_v9 = vld [vmem:[#allocation8_spill] sm:$0xff]  ;;  %v1418_v47 = vadd.f32 %v5895_v43, %v5793_v7 }
 0x22d   :  { %2665 = vmatmul.mubr.f32.gmra.mrb[142].mxu1 %v1352_v27  ;;  %1899 = vmatprep.mubr.f32.mxu0 %v462_v16  ;;  %v504_v50 = vadd.f32 %v6904_v9, %v5769_v36  ;;  %v1420_v37 = vadd.f32 %v5899_v35, %v5778_v8 }
 0x22e   :  { %2669 = vmatprep.mubr.f32.mxu1 %v1360_v39  ;;  %v6905_v39 = vld [vmem:[#allocation7_spill] sm:$0xff] }
 0x22f   :  { %v5907_v17 = vpop.f32.mrb[166].mxu0 }
 0x230   :  { %v5911_v42 = vpop.f32.mrb[167].mxu0  ;;  %1900 = vmatmul.mubr.f32.gmra.mrb[16].mxu0 %v460_v15  ;;  %v502_v15 = vadd.f32 %v6905_v39, %v5787_v22  ;;  %v1424_v43 = vadd.f32 %v5907_v17, %v5793_v7  ;;  %v538_v39 = vadd.f32 %v4845_v32, %v5787_v22 }
 0x231   :  { %2670 = vmatmul.mubr.f32.gmra.mrb[144].mxu1 %v1358_v0  ;;  %1904 = vmatprep.mubr.f32.mxu0 %v468_v23  ;;  %v6906_v23 = vld [vmem:[#allocation10_spill] sm:$0xff]  ;;  %v1426_v35 = vadd.f32 %v5911_v42, %v5778_v8 }
 0x232   :  { %2674 = vmatprep.mubr.f32.mxu1 %v1366_v63  ;;  %v510_v0 = vadd.f32 %v6906_v23, %v5769_v36 }
 0x233   :  { %v5919_v51 = vpop.f32.mrb[168].mxu0 }
 0x234   :  { %v5923_v6 = vpop.f32.mrb[169].mxu0  ;;  %1905 = vmatmul.mubr.f32.gmra.mrb[18].mxu0 %v466_v21  ;;  %v1430_v17 = vadd.f32 %v5919_v51, %v5793_v7 }
 0x235   :  { %2675 = vmatmul.mubr.f32.gmra.mrb[146].mxu1 %v1364_v1  ;;  %1909 = vmatprep.mubr.f32.mxu0 %v474_v31  ;;  %v6907_v31 = vld [vmem:[#allocation9_spill] sm:$0xff]  ;;  %v1432_v42 = vadd.f32 %v5923_v6, %v5778_v8 }
 0x236   :  { %2679 = vmatprep.mubr.f32.mxu1 %v1372_v18  ;;  %v508_v1 = vadd.f32 %v6907_v31, %v5787_v22  ;;  %v6908_v18 = vld [vmem:[#allocation12_spill] sm:$0xff] }
 0x237   :  { %v5931_v14 = vpop.f32.mrb[170].mxu0 }
 0x238   :  { %v5935_v49 = vpop.f32.mrb[171].mxu0  ;;  %1910 = vmatmul.mubr.f32.gmra.mrb[20].mxu0 %v472_v29  ;;  %v516_v29 = vadd.f32 %v6908_v18, %v5769_v36  ;;  %v1436_v51 = vadd.f32 %v5931_v14, %v5793_v7 }
 0x239   :  { %2680 = vmatmul.mubr.f32.gmra.mrb[148].mxu1 %v1370_v26  ;;  %1914 = vmatprep.mubr.f32.mxu0 %v480_v60  ;;  %v1438_v6 = vadd.f32 %v5935_v49, %v5778_v8 }
 0x23a   :  { %2684 = vmatprep.mubr.f32.mxu1 %v1378_v45  ;;  %v6909_v45 = vld [vmem:[#allocation11_spill] sm:$0xff] }
 0x23b   :  { %v5943_v40 = vpop.f32.mrb[172].mxu0  ;;  %v514_v57 = vadd.f32 %v6909_v45, %v5787_v22 }
 0x23c   :  { %v5947_v58 = vpop.f32.mrb[173].mxu0  ;;  %1915 = vmatmul.mubr.f32.gmra.mrb[22].mxu0 %v478_v48  ;;  %v6910_v48 = vld [vmem:[#allocation14_spill] sm:$0xff]  ;;  %v1442_v14 = vadd.f32 %v5943_v40, %v5793_v7 }
 0x23d   :  { %2685 = vmatmul.mubr.f32.gmra.mrb[150].mxu1 %v1376_v52  ;;  %1919 = vmatprep.mubr.f32.mxu0 %v486_v46  ;;  %v522_v46 = vadd.f32 %v6910_v48, %v5769_v36  ;;  %v1444_v49 = vadd.f32 %v5947_v58, %v5778_v8 }
 0x23e   :  { %2689 = vmatprep.mubr.f32.mxu1 %v1384_v55 }
 0x23f   :  { %v5955_v11 = vpop.f32.mrb[174].mxu0 }
 0x240   :  { %v5959_v61 = vpop.f32.mrb[175].mxu0  ;;  %1920 = vmatmul.mubr.f32.gmra.mrb[24].mxu0 %v484_v62  ;;  %v520_v62 = vadd.f32 %v6911_v56, %v5787_v22  ;;  %v1448_v40 = vadd.f32 %v5955_v11, %v5793_v7 }
 0x241   :  { %2690 = vmatmul.mubr.f32.gmra.mrb[152].mxu1 %v1382_v12  ;;  %1924 = vmatprep.mubr.f32.mxu0 %v492_v28  ;;  %v528_v28 = vadd.f32 %v6912_v44, %v5769_v36  ;;  %v1450_v58 = vadd.f32 %v5959_v61, %v5778_v8 }
 0x242   :  { %2694 = vmatprep.mubr.f32.mxu1 %v1390_v54 }
 0x243   :  { %v5967_v4 = vpop.f32.mrb[176].mxu0 }
 0x244   :  { %v5971_v10 = vpop.f32.mrb[177].mxu0  ;;  %1925 = vmatmul.mubr.f32.gmra.mrb[26].mxu0 %v490_v2  ;;  %v526_v2 = vadd.f32 %v6913_v5, %v5787_v22  ;;  %v1454_v11 = vadd.f32 %v5967_v4, %v5793_v7 }
 0x245   :  { %2695 = vmatmul.mubr.f32.gmra.mrb[154].mxu1 %v1388_v33  ;;  %1929 = vmatprep.mubr.f32.mxu0 %v498_v3  ;;  %v6914_v3 = vld [vmem:[#allocation18_spill] sm:$0xff]  ;;  %v1456_v61 = vadd.f32 %v5971_v10, %v5778_v8 }
 0x246   :  { %2699 = vmatprep.mubr.f32.mxu1 %v1396_v20  ;;  %v534_v33 = vadd.f32 %v6914_v3, %v5769_v36 }
 0x247   :  { %v5979_v16 = vpop.f32.mrb[178].mxu0 }
 0x248   :  { %v5983_v27 = vpop.f32.mrb[179].mxu0  ;;  %1930 = vmatmul.mubr.f32.gmra.mrb[28].mxu0 %v496_v13  ;;  %v6915_v13 = vld [vmem:[#allocation17_spill] sm:$0xff]  ;;  %v1460_v4 = vadd.f32 %v5979_v16, %v5793_v7 }
 0x249   :  { %2700 = vmatmul.mubr.f32.gmra.mrb[156].mxu1 %v1394_v34  ;;  %1934 = vmatprep.mubr.f32.mxu0 %v504_v50  ;;  %v532_v9 = vadd.f32 %v6915_v13, %v5787_v22  ;;  %v540_v50 = vadd.f32 %v4850_v25, %v5769_v36  ;;  %v1462_v10 = vadd.f32 %v5983_v27, %v5778_v8 }
 0x24a   :  { %2704 = vmatprep.mubr.f32.mxu1 %v1402_v24 }
 0x24b   :  { %v5991_v63 = vpop.f32.mrb[180].mxu0 }
 0x24c   :  { %v5995_v21 = vpop.f32.mrb[181].mxu0  ;;  %1935 = vmatmul.mubr.f32.gmra.mrb[30].mxu0 %v502_v15  ;;  %v6916_v15 = vld [vmem:[#allocation20_spill] sm:$0xff]  ;;  %v1466_v16 = vadd.f32 %v5991_v63, %v5793_v7 }
 0x24d   :  { %2705 = vmatmul.mubr.f32.gmra.mrb[158].mxu1 %v1400_v30  ;;  %1939 = vmatprep.mubr.f32.mxu0 %v510_v0  ;;  %v546_v25 = vadd.f32 %v6916_v15, %v5769_v36  ;;  %v6917_v30 = vld [vmem:[#allocation19_spill] sm:$0xff]  ;;  %v1468_v27 = vadd.f32 %v5995_v21, %v5778_v8 }
 0x24e   :  { %2709 = vmatprep.mubr.f32.mxu1 %v1408_v38  ;;  %v544_v32 = vadd.f32 %v6917_v30, %v5787_v22  ;;  %v6918_v38 = vld [vmem:[#allocation22_spill] sm:$0xff] }
 0x24f   :  { %v6003_v60 = vpop.f32.mrb[182].mxu0  ;;  %v552_v31 = vadd.f32 %v6918_v38, %v5769_v36 }
 0x250   :  { %v6007_v26 = vpop.f32.mrb[183].mxu0  ;;  %1940 = vmatmul.mubr.f32.gmra.mrb[32].mxu0 %v508_v1  ;;  %v1472_v63 = vadd.f32 %v6003_v60, %v5793_v7 }
 0x251   :  { %2710 = vmatmul.mubr.f32.gmra.mrb[160].mxu1 %v1406_v59  ;;  %1944 = vmatprep.mubr.f32.mxu0 %v516_v29  ;;  %v6919_v29 = vld [vmem:[#allocation21_spill] sm:$0xff]  ;;  %v1474_v21 = vadd.f32 %v6007_v26, %v5778_v8 }
 0x252   :  { %2714 = vmatprep.mubr.f32.mxu1 %v1414_v53  ;;  %v550_v59 = vadd.f32 %v6919_v29, %v5787_v22  ;;  %v6920_v53 = vld [vmem:[#allocation24_spill] sm:$0xff] }
 0x253   :  { %v6015_v52 = vpop.f32.mrb[184].mxu0  ;;  %v558_v45 = vadd.f32 %v6920_v53, %v5769_v36 }
 0x254   :  { %v6019_v55 = vpop.f32.mrb[185].mxu0  ;;  %1945 = vmatmul.mubr.f32.gmra.mrb[34].mxu0 %v514_v57  ;;  %v1478_v60 = vadd.f32 %v6015_v52, %v5793_v7 }
 0x255   :  { %2715 = vmatmul.mubr.f32.gmra.mrb[162].mxu1 %v1412_v41  ;;  %1949 = vmatprep.mubr.f32.mxu0 %v522_v46  ;;  %v6921_v46 = vld [vmem:[#allocation23_spill] sm:$0xff]  ;;  %v1480_v26 = vadd.f32 %v6019_v55, %v5778_v8 }
 0x256   :  { %2719 = vmatprep.mubr.f32.mxu1 %v1420_v37  ;;  %v556_v41 = vadd.f32 %v6921_v46, %v5787_v22  ;;  %v6922_v37 = vld [vmem:[#allocation26_spill] sm:$0xff] }
 0x257   :  { %v6027_v12 = vpop.f32.mrb[186].mxu0  ;;  %v564_v56 = vadd.f32 %v6922_v37, %v5769_v36 }
 0x258   :  { %v6031_v54 = vpop.f32.mrb[187].mxu0  ;;  %1950 = vmatmul.mubr.f32.gmra.mrb[36].mxu0 %v520_v62  ;;  %v1484_v52 = vadd.f32 %v6027_v12, %v5793_v7 }
 0x259   :  { %2720 = vmatmul.mubr.f32.gmra.mrb[164].mxu1 %v1418_v47  ;;  %1954 = vmatprep.mubr.f32.mxu0 %v528_v28  ;;  %v6923_v28 = vld [vmem:[#allocation25_spill] sm:$0xff]  ;;  %v1486_v55 = vadd.f32 %v6031_v54, %v5778_v8 }
 0x25a   :  { %2724 = vmatprep.mubr.f32.mxu1 %v1426_v35  ;;  %v562_v47 = vadd.f32 %v6923_v28, %v5787_v22  ;;  %v6924_v35 = vld [vmem:[#allocation28_spill] sm:$0xff] }
 0x25b   :  { %v6039_v20 = vpop.f32.mrb[188].mxu0  ;;  %v570_v5 = vadd.f32 %v6924_v35, %v5769_v36 }
 0x25c   :  { %v6043_v19 = vpop.f32.mrb[189].mxu0  ;;  %1955 = vmatmul.mubr.f32.gmra.mrb[38].mxu0 %v526_v2  ;;  %v1490_v12 = vadd.f32 %v6039_v20, %v5793_v7 }
 0x25d   :  { %2725 = vmatmul.mubr.f32.gmra.mrb[166].mxu1 %v1424_v43  ;;  %1959 = vmatprep.mubr.f32.mxu0 %v534_v33  ;;  %v6925_v33 = vld [vmem:[#allocation27_spill] sm:$0xff]  ;;  %v1492_v54 = vadd.f32 %v6043_v19, %v5778_v8 }
 0x25e   :  { %2729 = vmatprep.mubr.f32.mxu1 %v1432_v42  ;;  %v568_v43 = vadd.f32 %v6925_v33, %v5787_v22  ;;  %v6926_v42 = vld [vmem:[#allocation30_spill] sm:$0xff] }
 0x25f   :  { %v6051_v34 = vpop.f32.mrb[190].mxu0  ;;  %v576_v13 = vadd.f32 %v6926_v42, %v5769_v36 }
 0x260   :  { %v6055_v24 = vpop.f32.mrb[191].mxu0  ;;  %1960 = vmatmul.mubr.f32.gmra.mrb[40].mxu0 %v532_v9  ;;  %v1496_v20 = vadd.f32 %v6051_v34, %v5793_v7 }
 0x261   :  { %2730 = vmatmul.mubr.f32.gmra.mrb[168].mxu1 %v1430_v17  ;;  %1964 = vmatprep.mubr.f32.mxu0 %v540_v50  ;;  %v6927_v17 = vld [vmem:[#allocation29_spill] sm:$0xff]  ;;  %v1498_v19 = vadd.f32 %v6055_v24, %v5778_v8 }
 0x262   :  { %2734 = vmatprep.mubr.f32.mxu1 %v1438_v6  ;;  %v574_v6 = vadd.f32 %v6927_v17, %v5787_v22 }
 0x263   :  { %v6063_v23 = vpop.f32.mrb[192].mxu0 }
 0x264   :  { %v6067_v0 = vpop.f32.mrb[193].mxu0  ;;  %1965 = vmatmul.mubr.f32.gmra.mrb[42].mxu0 %v538_v39  ;;  %v6928_v39 = vld [vmem:[#allocation32_spill] sm:$0xff]  ;;  %v1502_v34 = vadd.f32 %v6063_v23, %v5793_v7 }
 0x265   :  { %2735 = vmatmul.mubr.f32.gmra.mrb[170].mxu1 %v1436_v51  ;;  %1969 = vmatprep.mubr.f32.mxu0 %v546_v25  ;;  %v582_v15 = vadd.f32 %v6928_v39, %v5769_v36  ;;  %v1504_v24 = vadd.f32 %v6067_v0, %v5778_v8 }
 0x266   :  { %2739 = vmatprep.mubr.f32.mxu1 %v1444_v49  ;;  %v6929_v49 = vld [vmem:[#allocation31_spill] sm:$0xff] }
 0x267   :  { %v6075_v1 = vpop.f32.mrb[194].mxu0  ;;  %v580_v30 = vadd.f32 %v6929_v49, %v5787_v22 }
 0x268   :  { %v6079_v18 = vpop.f32.mrb[195].mxu0  ;;  %1970 = vmatmul.mubr.f32.gmra.mrb[44].mxu0 %v544_v32  ;;  %v6930_v32 = vld [vmem:[#allocation34_spill] sm:$0xff]  ;;  %v1508_v23 = vadd.f32 %v6075_v1, %v5793_v7 }
 0x269   :  { %2740 = vmatmul.mubr.f32.gmra.mrb[172].mxu1 %v1442_v14  ;;  %1974 = vmatprep.mubr.f32.mxu0 %v552_v31  ;;  %v588_v38 = vadd.f32 %v6930_v32, %v5769_v36  ;;  %v1510_v0 = vadd.f32 %v6079_v18, %v5778_v8 }
 0x26a   :  { %2744 = vmatprep.mubr.f32.mxu1 %v1450_v58  ;;  %v6931_v58 = vld [vmem:[#allocation33_spill] sm:$0xff] }
 0x26b   :  { %v6087_v57 = vpop.f32.mrb[196].mxu0  ;;  %v586_v29 = vadd.f32 %v6931_v58, %v5787_v22 }
 0x26c   :  { %v6091_v48 = vpop.f32.mrb[197].mxu0  ;;  %1975 = vmatmul.mubr.f32.gmra.mrb[46].mxu0 %v550_v59  ;;  %v6932_v59 = vld [vmem:[#allocation36_spill] sm:$0xff]  ;;  %v1514_v1 = vadd.f32 %v6087_v57, %v5793_v7 }
 0x26d   :  { %2745 = vmatmul.mubr.f32.gmra.mrb[174].mxu1 %v1448_v40  ;;  %1979 = vmatprep.mubr.f32.mxu0 %v558_v45  ;;  %v594_v53 = vadd.f32 %v6932_v59, %v5769_v36  ;;  %v1516_v18 = vadd.f32 %v6091_v48, %v5778_v8 }
 0x26e   :  { %2749 = vmatprep.mubr.f32.mxu1 %v1456_v61  ;;  %v6933_v61 = vld [vmem:[#allocation35_spill] sm:$0xff] }
 0x26f   :  { %v6099_v62 = vpop.f32.mrb[198].mxu0  ;;  %v592_v46 = vadd.f32 %v6933_v61, %v5787_v22 }
 0x270   :  { %v6103_v44 = vpop.f32.mrb[199].mxu0  ;;  %1980 = vmatmul.mubr.f32.gmra.mrb[48].mxu0 %v556_v41  ;;  %v6934_v41 = vld [vmem:[#allocation38_spill] sm:$0xff]  ;;  %v1520_v57 = vadd.f32 %v6099_v62, %v5793_v7 }
 0x271   :  { %2750 = vmatmul.mubr.f32.gmra.mrb[176].mxu1 %v1454_v11  ;;  %1984 = vmatprep.mubr.f32.mxu0 %v564_v56  ;;  %v600_v37 = vadd.f32 %v6934_v41, %v5769_v36  ;;  %v1522_v48 = vadd.f32 %v6103_v44, %v5778_v8 }
 0x272   :  { %2754 = vmatprep.mubr.f32.mxu1 %v1462_v10  ;;  %v6935_v10 = vld [vmem:[#allocation37_spill] sm:$0xff] }
 0x273   :  { %v6111_v2 = vpop.f32.mrb[200].mxu0  ;;  %v598_v28 = vadd.f32 %v6935_v10, %v5787_v22 }
 0x274   :  { %v6115_v3 = vpop.f32.mrb[201].mxu0  ;;  %1985 = vmatmul.mubr.f32.gmra.mrb[50].mxu0 %v562_v47  ;;  %v6936_v47 = vld [vmem:[#allocation40_spill] sm:$0xff]  ;;  %v1526_v62 = vadd.f32 %v6111_v2, %v5793_v7 }
 0x275   :  { %2755 = vmatmul.mubr.f32.gmra.mrb[178].mxu1 %v1460_v4  ;;  %1989 = vmatprep.mubr.f32.mxu0 %v570_v5  ;;  %v606_v35 = vadd.f32 %v6936_v47, %v5769_v36  ;;  %v1528_v44 = vadd.f32 %v6115_v3, %v5778_v8 }
 0x276   :  { %2759 = vmatprep.mubr.f32.mxu1 %v1468_v27  ;;  %v6937_v27 = vld [vmem:[#allocation39_spill] sm:$0xff] }
 0x277   :  { %v6123_v9 = vpop.f32.mrb[202].mxu0  ;;  %v604_v33 = vadd.f32 %v6937_v27, %v5787_v22 }
 0x278   :  { %v6127_v50 = vpop.f32.mrb[203].mxu0  ;;  %1990 = vmatmul.mubr.f32.gmra.mrb[52].mxu0 %v568_v43  ;;  %v6938_v43 = vld [vmem:[#allocation42_spill] sm:$0xff]  ;;  %v1532_v2 = vadd.f32 %v6123_v9, %v5793_v7 }
 0x279   :  { %2760 = vmatmul.mubr.f32.gmra.mrb[180].mxu1 %v1466_v16  ;;  %1994 = vmatprep.mubr.f32.mxu0 %v576_v13  ;;  %v612_v42 = vadd.f32 %v6938_v43, %v5769_v36  ;;  %v1534_v3 = vadd.f32 %v6127_v50, %v5778_v8 }
 0x27a   :  { %2764 = vmatprep.mubr.f32.mxu1 %v1474_v21  ;;  %v6939_v21 = vld [vmem:[#allocation41_spill] sm:$0xff] }
 0x27b   :  { %v6135_v25 = vpop.f32.mrb[204].mxu0  ;;  %v610_v17 = vadd.f32 %v6939_v21, %v5787_v22 }
 0x27c   :  { %v6139_v51 = vpop.f32.mrb[205].mxu0  ;;  %1995 = vmatmul.mubr.f32.gmra.mrb[54].mxu0 %v574_v6  ;;  %v6940_v6 = vld [vmem:[#allocation44_spill] sm:$0xff]  ;;  %v1538_v9 = vadd.f32 %v6135_v25, %v5793_v7 }
 0x27d   :  { %2765 = vmatmul.mubr.f32.gmra.mrb[182].mxu1 %v1472_v63  ;;  %1999 = vmatprep.mubr.f32.mxu0 %v582_v15  ;;  %v618_v39 = vadd.f32 %v6940_v6, %v5769_v36  ;;  %v1540_v50 = vadd.f32 %v6139_v51, %v5778_v8 }
 0x27e   :  { %2769 = vmatprep.mubr.f32.mxu1 %v1480_v26  ;;  %v6941_v26 = vld [vmem:[#allocation43_spill] sm:$0xff] }
 0x27f   :  { %v6147_v31 = vpop.f32.mrb[206].mxu0  ;;  %v616_v49 = vadd.f32 %v6941_v26, %v5787_v22 }
 0x280   :  { %v6151_v14 = vpop.f32.mrb[207].mxu0  ;;  %2000 = vmatmul.mubr.f32.gmra.mrb[56].mxu0 %v580_v30  ;;  %v6942_v30 = vld [vmem:[#allocation46_spill] sm:$0xff]  ;;  %v1544_v25 = vadd.f32 %v6147_v31, %v5793_v7 }
 0x281   :  { %2770 = vmatmul.mubr.f32.gmra.mrb[184].mxu1 %v1478_v60  ;;  %2004 = vmatprep.mubr.f32.mxu0 %v588_v38  ;;  %v624_v32 = vadd.f32 %v6942_v30, %v5769_v36  ;;  %v1546_v51 = vadd.f32 %v6151_v14, %v5778_v8 }
 0x282   :  { %2774 = vmatprep.mubr.f32.mxu1 %v1486_v55  ;;  %v6943_v55 = vld [vmem:[#allocation45_spill] sm:$0xff] }
 0x283   :  { %v6159_v45 = vpop.f32.mrb[208].mxu0  ;;  %v622_v58 = vadd.f32 %v6943_v55, %v5787_v22 }
 0x284   :  { %v6163_v40 = vpop.f32.mrb[209].mxu0  ;;  %2005 = vmatmul.mubr.f32.gmra.mrb[58].mxu0 %v586_v29  ;;  %v6944_v29 = vld [vmem:[#allocation48_spill] sm:$0xff]  ;;  %v1550_v31 = vadd.f32 %v6159_v45, %v5793_v7 }
 0x285   :  { %2775 = vmatmul.mubr.f32.gmra.mrb[186].mxu1 %v1484_v52  ;;  %2009 = vmatprep.mubr.f32.mxu0 %v594_v53  ;;  %v630_v59 = vadd.f32 %v6944_v29, %v5769_v36  ;;  %v1552_v14 = vadd.f32 %v6163_v40, %v5778_v8 }
 0x286   :  { %2779 = vmatprep.mubr.f32.mxu1 %v1492_v54  ;;  %v6945_v54 = vld [vmem:[#allocation47_spill] sm:$0xff] }
 0x287   :  { %v6171_v56 = vpop.f32.mrb[210].mxu0  ;;  %v628_v61 = vadd.f32 %v6945_v54, %v5787_v22 }
 0x288   :  { %v6175_v11 = vpop.f32.mrb[211].mxu0  ;;  %2010 = vmatmul.mubr.f32.gmra.mrb[60].mxu0 %v592_v46  ;;  %v6946_v46 = vld [vmem:[#allocation50_spill] sm:$0xff]  ;;  %v1556_v45 = vadd.f32 %v6171_v56, %v5793_v7 }
 0x289   :  { %2780 = vmatmul.mubr.f32.gmra.mrb[188].mxu1 %v1490_v12  ;;  %2014 = vmatprep.mubr.f32.mxu0 %v600_v37  ;;  %v636_v41 = vadd.f32 %v6946_v46, %v5769_v36  ;;  %v1558_v40 = vadd.f32 %v6175_v11, %v5778_v8 }
 0x28a   :  { %2784 = vmatprep.mubr.f32.mxu1 %v1498_v19  ;;  %v6947_v19 = vld [vmem:[#allocation49_spill] sm:$0xff] }
 0x28b   :  { %v6183_v5 = vpop.f32.mrb[212].mxu0  ;;  %v634_v10 = vadd.f32 %v6947_v19, %v5787_v22 }
 0x28c   :  { %v6187_v4 = vpop.f32.mrb[213].mxu0  ;;  %2015 = vmatmul.mubr.f32.gmra.mrb[62].mxu0 %v598_v28  ;;  %v6948_v28 = vld [vmem:[#allocation52_spill] sm:$0xff]  ;;  %v1562_v56 = vadd.f32 %v6183_v5, %v5793_v7 }
 0x28d   :  { %2785 = vmatmul.mubr.f32.gmra.mrb[190].mxu1 %v1496_v20  ;;  %2019 = vmatprep.mubr.f32.mxu0 %v606_v35  ;;  %v642_v47 = vadd.f32 %v6948_v28, %v5769_v36  ;;  %v1564_v11 = vadd.f32 %v6187_v4, %v5778_v8 }
 0x28e   :  { %2789 = vmatprep.mubr.f32.mxu1 %v1504_v24  ;;  %v6949_v24 = vld [vmem:[#allocation51_spill] sm:$0xff] }
 0x28f   :  { %v6195_v13 = vpop.f32.mrb[214].mxu0  ;;  %v640_v27 = vadd.f32 %v6949_v24, %v5787_v22 }
 0x290   :  { %v6199_v16 = vpop.f32.mrb[215].mxu0  ;;  %2020 = vmatmul.mubr.f32.gmra.mrb[64].mxu0 %v604_v33  ;;  %v6950_v33 = vld [vmem:[#allocation54_spill] sm:$0xff]  ;;  %v1568_v5 = vadd.f32 %v6195_v13, %v5793_v7 }
 0x291   :  { %2790 = vmatmul.mubr.f32.gmra.mrb[192].mxu1 %v1502_v34  ;;  %2024 = vmatprep.mubr.f32.mxu0 %v612_v42  ;;  %v648_v43 = vadd.f32 %v6950_v33, %v5769_v36  ;;  %v1570_v4 = vadd.f32 %v6199_v16, %v5778_v8 }
 0x292   :  { %2794 = vmatprep.mubr.f32.mxu1 %v1510_v0  ;;  %v6951_v0 = vld [vmem:[#allocation53_spill] sm:$0xff] }
 0x293   :  { %v6207_v15 = vpop.f32.mrb[216].mxu0  ;;  %v646_v21 = vadd.f32 %v6951_v0, %v5787_v22 }
 0x294   :  { %v6211_v63 = vpop.f32.mrb[217].mxu0  ;;  %2025 = vmatmul.mubr.f32.gmra.mrb[66].mxu0 %v610_v17  ;;  %v6952_v17 = vld [vmem:[#allocation56_spill] sm:$0xff]  ;;  %v1574_v13 = vadd.f32 %v6207_v15, %v5793_v7 }
 0x295   :  { %2795 = vmatmul.mubr.f32.gmra.mrb[194].mxu1 %v1508_v23  ;;  %2029 = vmatprep.mubr.f32.mxu0 %v618_v39  ;;  %v654_v6 = vadd.f32 %v6952_v17, %v5769_v36  ;;  %v1576_v16 = vadd.f32 %v6211_v63, %v5778_v8 }
 0x296   :  { %2799 = vmatprep.mubr.f32.mxu1 %v1516_v18  ;;  %v6953_v18 = vld [vmem:[#allocation55_spill] sm:$0xff] }
 0x297   :  { %v6219_v38 = vpop.f32.mrb[218].mxu0  ;;  %v652_v26 = vadd.f32 %v6953_v18, %v5787_v22 }
 0x298   :  { %v6223_v60 = vpop.f32.mrb[219].mxu0  ;;  %2030 = vmatmul.mubr.f32.gmra.mrb[68].mxu0 %v616_v49  ;;  %v6954_v49 = vld [vmem:[#allocation58_spill] sm:$0xff]  ;;  %v1580_v15 = vadd.f32 %v6219_v38, %v5793_v7 }
 0x299   :  { %2800 = vmatmul.mubr.f32.gmra.mrb[196].mxu1 %v1514_v1  ;;  %2034 = vmatprep.mubr.f32.mxu0 %v624_v32  ;;  %v660_v30 = vadd.f32 %v6954_v49, %v5769_v36  ;;  %v1582_v63 = vadd.f32 %v6223_v60, %v5778_v8 }
 0x29a   :  { %2804 = vmatprep.mubr.f32.mxu1 %v1522_v48  ;;  %v6955_v48 = vld [vmem:[#allocation57_spill] sm:$0xff] }
 0x29b   :  { %v6231_v53 = vpop.f32.mrb[220].mxu0  ;;  %v658_v55 = vadd.f32 %v6955_v48, %v5787_v22 }
 0x29c   :  { %v6235_v52 = vpop.f32.mrb[221].mxu0  ;;  %2035 = vmatmul.mubr.f32.gmra.mrb[70].mxu0 %v622_v58  ;;  %v6956_v58 = vld [vmem:[#allocation60_spill] sm:$0xff]  ;;  %v1586_v38 = vadd.f32 %v6231_v53, %v5793_v7 }
 0x29d   :  { %2805 = vmatmul.mubr.f32.gmra.mrb[198].mxu1 %v1520_v57  ;;  %2039 = vmatprep.mubr.f32.mxu0 %v630_v59  ;;  %v666_v29 = vadd.f32 %v6956_v58, %v5769_v36  ;;  %v1588_v60 = vadd.f32 %v6235_v52, %v5778_v8 }
 0x29e   :  { %2809 = vmatprep.mubr.f32.mxu1 %v1528_v44  ;;  %v6957_v44 = vld [vmem:[#allocation59_spill] sm:$0xff] }
 0x29f   :  { %v6243_v37 = vpop.f32.mrb[222].mxu0  ;;  %v664_v54 = vadd.f32 %v6957_v44, %v5787_v22 }
 0x2a0   :  { %v6247_v12 = vpop.f32.mrb[223].mxu0  ;;  %2040 = vmatmul.mubr.f32.gmra.mrb[72].mxu0 %v628_v61  ;;  %v6958_v61 = vld [vmem:[#allocation62_spill] sm:$0xff]  ;;  %v1592_v53 = vadd.f32 %v6243_v37, %v5793_v7 }
 0x2a1   :  { %2810 = vmatmul.mubr.f32.gmra.mrb[200].mxu1 %v1526_v62  ;;  %2044 = vmatprep.mubr.f32.mxu0 %v636_v41  ;;  %v672_v46 = vadd.f32 %v6958_v61, %v5769_v36  ;;  %v1594_v52 = vadd.f32 %v6247_v12, %v5778_v8 }
 0x2a2   :  { %2814 = vmatprep.mubr.f32.mxu1 %v1534_v3  ;;  %v6959_v3 = vld [vmem:[#allocation61_spill] sm:$0xff] }
 0x2a3   :  { %v6255_v35 = vpop.f32.mrb[224].mxu0  ;;  %v670_v19 = vadd.f32 %v6959_v3, %v5787_v22 }
 0x2a4   :  { %v6259_v20 = vpop.f32.mrb[225].mxu0  ;;  %2045 = vmatmul.mubr.f32.gmra.mrb[74].mxu0 %v634_v10  ;;  %v6960_v10 = vld [vmem:[#allocation64_spill] sm:$0xff]  ;;  %v1598_v37 = vadd.f32 %v6255_v35, %v5793_v7 }
 0x2a5   :  { %2815 = vmatmul.mubr.f32.gmra.mrb[202].mxu1 %v1532_v2  ;;  %2049 = vmatprep.mubr.f32.mxu0 %v642_v47  ;;  %v678_v28 = vadd.f32 %v6960_v10, %v5769_v36  ;;  %v1600_v12 = vadd.f32 %v6259_v20, %v5778_v8 }
 0x2a6   :  { %2819 = vmatprep.mubr.f32.mxu1 %v1540_v50  ;;  %v6961_v50 = vld [vmem:[#allocation63_spill] sm:$0xff] }
 0x2a7   :  { %v6267_v42 = vpop.f32.mrb[226].mxu0  ;;  %v676_v24 = vadd.f32 %v6961_v50, %v5787_v22 }
 0x2a8   :  { %v6271_v34 = vpop.f32.mrb[227].mxu0  ;;  %2050 = vmatmul.mubr.f32.gmra.mrb[76].mxu0 %v640_v27  ;;  %v6962_v27 = vld [vmem:[#allocation66_spill] sm:$0xff]  ;;  %v1604_v35 = vadd.f32 %v6267_v42, %v5793_v7 }
 0x2a9   :  { %2820 = vmatmul.mubr.f32.gmra.mrb[204].mxu1 %v1538_v9  ;;  %2054 = vmatprep.mubr.f32.mxu0 %v648_v43  ;;  %v684_v33 = vadd.f32 %v6962_v27, %v5769_v36  ;;  %v1606_v20 = vadd.f32 %v6271_v34, %v5778_v8 }
 0x2aa   :  { %2824 = vmatprep.mubr.f32.mxu1 %v1546_v51  ;;  %v6963_v51 = vld [vmem:[#allocation65_spill] sm:$0xff] }
 0x2ab   :  { %v6279_v39 = vpop.f32.mrb[228].mxu0  ;;  %v682_v0 = vadd.f32 %v6963_v51, %v5787_v22 }
 0x2ac   :  { %v6283_v23 = vpop.f32.mrb[229].mxu0  ;;  %2055 = vmatmul.mubr.f32.gmra.mrb[78].mxu0 %v646_v21  ;;  %v6964_v21 = vld [vmem:[#allocation68_spill] sm:$0xff]  ;;  %v1610_v42 = vadd.f32 %v6279_v39, %v5793_v7 }
 0x2ad   :  { %2825 = vmatmul.mubr.f32.gmra.mrb[206].mxu1 %v1544_v25  ;;  %2059 = vmatprep.mubr.f32.mxu0 %v654_v6  ;;  %v690_v17 = vadd.f32 %v6964_v21, %v5769_v36  ;;  %v1612_v34 = vadd.f32 %v6283_v23, %v5778_v8 }
 0x2ae   :  { %2829 = vmatprep.mubr.f32.mxu1 %v1552_v14  ;;  %v6965_v14 = vld [vmem:[#allocation67_spill] sm:$0xff] }
 0x2af   :  { %v6291_v32 = vpop.f32.mrb[230].mxu0  ;;  %v688_v18 = vadd.f32 %v6965_v14, %v5787_v22 }
 0x2b0   :  { %v6295_v1 = vpop.f32.mrb[231].mxu0  ;;  %2060 = vmatmul.mubr.f32.gmra.mrb[80].mxu0 %v652_v26  ;;  %v6966_v26 = vld [vmem:[#allocation70_spill] sm:$0xff]  ;;  %v1616_v39 = vadd.f32 %v6291_v32, %v5793_v7 }
 0x2b1   :  { %2830 = vmatmul.mubr.f32.gmra.mrb[208].mxu1 %v1550_v31  ;;  %2064 = vmatprep.mubr.f32.mxu0 %v660_v30  ;;  %v696_v49 = vadd.f32 %v6966_v26, %v5769_v36  ;;  %v1618_v23 = vadd.f32 %v6295_v1, %v5778_v8 }
 0x2b2   :  { %2834 = vmatprep.mubr.f32.mxu1 %v1558_v40  ;;  %v6967_v40 = vld [vmem:[#allocation69_spill] sm:$0xff] }
 0x2b3   :  { %v6303_v59 = vpop.f32.mrb[232].mxu0  ;;  %v694_v48 = vadd.f32 %v6967_v40, %v5787_v22  ;;  %v6979_v40 = vld [vmem:[#allocation81_spill] sm:$0xff] }
 0x2b4   :  { %v6307_v57 = vpop.f32.mrb[233].mxu0  ;;  %2065 = vmatmul.mubr.f32.gmra.mrb[82].mxu0 %v658_v55  ;;  %v6968_v55 = vld [vmem:[#allocation72_spill] sm:$0xff]  ;;  %v1622_v32 = vadd.f32 %v6303_v59, %v5793_v7 }
 0x2b5   :  { %2835 = vmatmul.mubr.f32.gmra.mrb[210].mxu1 %v1556_v45  ;;  %2069 = vmatprep.mubr.f32.mxu0 %v666_v29  ;;  %v702_v58 = vadd.f32 %v6968_v55, %v5769_v36  ;;  %v1624_v1 = vadd.f32 %v6307_v57, %v5778_v8  ;;  %v6980_v59 = vld [vmem:[#allocation84_spill] sm:$0xff] }
 0x2b6   :  { %2839 = vmatprep.mubr.f32.mxu1 %v1564_v11  ;;  %v6969_v11 = vld [vmem:[#allocation71_spill] sm:$0xff]  ;;  %v738_v55 = vadd.f32 %v6980_v59, %v5769_v36 }
 0x2b7   :  { %v6315_v41 = vpop.f32.mrb[234].mxu0  ;;  %v700_v44 = vadd.f32 %v6969_v11, %v5787_v22 }
 0x2b8   :  { %v6319_v62 = vpop.f32.mrb[235].mxu0  ;;  %2070 = vmatmul.mubr.f32.gmra.mrb[84].mxu0 %v664_v54  ;;  %v6970_v54 = vld [vmem:[#allocation74_spill] sm:$0xff] }
 0x2b9   :  { %2840 = vmatmul.mubr.f32.gmra.mrb[212].mxu1 %v1562_v56  ;;  %2074 = vmatprep.mubr.f32.mxu0 %v672_v46  ;;  %v708_v61 = vadd.f32 %v6970_v54, %v5769_v36  ;;  %v1630_v57 = vadd.f32 %v6319_v62, %v5778_v8  ;;  %v1628_v62 = vadd.f32 %v6315_v41, %v5793_v7 }
 0x2ba   :  { %2844 = vmatprep.mubr.f32.mxu1 %v1570_v4  ;;  %v6971_v4 = vld [vmem:[#allocation73_spill] sm:$0xff] }
 0x2bb   :  { %v6327_v47 = vpop.f32.mrb[236].mxu0  ;;  %v706_v3 = vadd.f32 %v6971_v4, %v5787_v22  ;;  %v6982_v4 = vld [vmem:[#allocation86_spill] sm:$0xff] }
 0x2bc   :  { %v6331_v2 = vpop.f32.mrb[237].mxu0  ;;  %2075 = vmatmul.mubr.f32.gmra.mrb[86].mxu0 %v670_v19  ;;  %v6972_v19 = vld [vmem:[#allocation76_spill] sm:$0xff]  ;;  %v744_v41 = vadd.f32 %v6982_v4, %v5769_v36 }
 0x2bd   :  { %2845 = vmatmul.mubr.f32.gmra.mrb[214].mxu1 %v1568_v5  ;;  %2079 = vmatprep.mubr.f32.mxu0 %v678_v28  ;;  %v714_v10 = vadd.f32 %v6972_v19, %v5769_v36 }
 0x2be   :  { %2849 = vmatprep.mubr.f32.mxu1 %v1576_v16  ;;  %v6973_v16 = vld [vmem:[#allocation75_spill] sm:$0xff] }
 0x2bf   :  { %v6339_v43 = vpop.f32.mrb[238].mxu0  ;;  %v712_v50 = vadd.f32 %v6973_v16, %v5787_v22 }
 0x2c0   :  { %v6343_v9 = vpop.f32.mrb[239].mxu0  ;;  %2080 = vmatmul.mubr.f32.gmra.mrb[88].mxu0 %v676_v24  ;;  %v6974_v24 = vld [vmem:[#allocation78_spill] sm:$0xff] }
 0x2c1   :  { %2850 = vmatmul.mubr.f32.gmra.mrb[216].mxu1 %v1574_v13  ;;  %2084 = vmatprep.mubr.f32.mxu0 %v684_v33  ;;  %v720_v27 = vadd.f32 %v6974_v24, %v5769_v36  ;;  %v1642_v19 = vadd.f32 %v6343_v9, %v5778_v8 }
 0x2c2   :  { %2854 = vmatprep.mubr.f32.mxu1 %v1582_v63  ;;  %v6975_v63 = vld [vmem:[#allocation77_spill] sm:$0xff] }
 0x2c3   :  { %v6351_v6 = vpop.f32.mrb[240].mxu0  ;;  %v718_v51 = vadd.f32 %v6975_v63, %v5787_v22 }
 0x2c4   :  { %v6355_v25 = vpop.f32.mrb[241].mxu0  ;;  %2085 = vmatmul.mubr.f32.gmra.mrb[90].mxu0 %v682_v0  ;;  %v6976_v0 = vld [vmem:[#allocation80_spill] sm:$0xff] }
 0x2c5   :  { %2855 = vmatmul.mubr.f32.gmra.mrb[218].mxu1 %v1580_v15  ;;  %2089 = vmatprep.mubr.f32.mxu0 %v690_v17  ;;  %v726_v21 = vadd.f32 %v6976_v0, %v5769_v36  ;;  %v1648_v63 = vadd.f32 %v6355_v25, %v5778_v8 }
 0x2c6   :  { %2859 = vmatprep.mubr.f32.mxu1 %v1588_v60  ;;  %v6977_v60 = vld [vmem:[#allocation79_spill] sm:$0xff] }
 0x2c7   :  { %v6363_v30 = vpop.f32.mrb[242].mxu0  ;;  %v724_v14 = vadd.f32 %v6977_v60, %v5787_v22 }
 0x2c8   :  { %v6367_v31 = vpop.f32.mrb[243].mxu0  ;;  %2090 = vmatmul.mubr.f32.gmra.mrb[92].mxu0 %v688_v18  ;;  %v6978_v18 = vld [vmem:[#allocation82_spill] sm:$0xff] }
 0x2c9   :  { %2860 = vmatmul.mubr.f32.gmra.mrb[220].mxu1 %v1586_v38  ;;  %2094 = vmatprep.mubr.f32.mxu0 %v696_v49  ;;  %v732_v26 = vadd.f32 %v6978_v18, %v5769_v36  ;;  %v1646_v18 = vadd.f32 %v6351_v6, %v5793_v7 }
 0x2ca   :  { %2864 = vmatprep.mubr.f32.mxu1 %v1594_v52  ;;  %v6444_v52 = vld [vmem:[%s6790_s4] ss:$0 sm:$0xff] }
 0x2cb   :  { %v6375_v29 = vpop.f32.mrb[244].mxu0 }
 0x2cc   :  { %v6379_v45 = vpop.f32.mrb[245].mxu0  ;;  %2095 = vmatmul.mubr.f32.gmra.mrb[94].mxu0 %v694_v48  ;;  %v730_v48 = vadd.f32 %v6979_v40, %v5787_v22 }
 0x2cd   :  { %2865 = vmatmul.mubr.f32.gmra.mrb[222].mxu1 %v1592_v53  ;;  %2099 = vmatprep.mubr.f32.mxu0 %v702_v58  ;;  %v1636_v53 = vadd.f32 %v6331_v2, %v5778_v8 }
 0x2ce   :  { %2869 = vmatprep.mubr.f32.mxu1 %v1600_v12 }
 0x2cf   :  { %v6387_v46 = vpop.f32.mrb[246].mxu0 }
 0x2d0   :  { %v6391_v56 = vpop.f32.mrb[247].mxu0  ;;  %2100 = vmatmul.mubr.f32.gmra.mrb[96].mxu0 %v700_v44 }
 0x2d1   :  { %2870 = vmatmul.mubr.f32.gmra.mrb[224].mxu1 %v1598_v37  ;;  %2104 = vmatprep.mubr.f32.mxu0 %v708_v61  ;;  %v6981_v61 = vld [vmem:[#allocation83_spill] sm:$0xff] }
 0x2d2   :  { %2874 = vmatprep.mubr.f32.mxu1 %v1606_v20  ;;  %v736_v37 = vadd.f32 %v6981_v61, %v5787_v22 }
 0x2d3   :  { %v6399_v28 = vpop.f32.mrb[248].mxu0 }
 0x2d4   :  { %v6403_v5 = vpop.f32.mrb[249].mxu0  ;;  %2105 = vmatmul.mubr.f32.gmra.mrb[98].mxu0 %v706_v3  ;;  %v1634_v3 = vadd.f32 %v6327_v47, %v5793_v7 }
 0x2d5   :  { %2875 = vmatmul.mubr.f32.gmra.mrb[226].mxu1 %v1604_v35  ;;  %2109 = vmatprep.mubr.f32.mxu0 %v714_v10 }
 0x2d6   :  { %2879 = vmatprep.mubr.f32.mxu1 %v1612_v34 }
 0x2d7   :  { %v6411_v33 = vpop.f32.mrb[250].mxu0 }
 0x2d8   :  { %v6415_v13 = vpop.f32.mrb[251].mxu0  ;;  %2110 = vmatmul.mubr.f32.gmra.mrb[100].mxu0 %v712_v50  ;;  %v6983_v50 = vld [vmem:[#allocation85_spill] sm:$0xff] }
 0x2d9   :  { %2880 = vmatmul.mubr.f32.gmra.mrb[228].mxu1 %v1610_v42  ;;  %2114 = vmatprep.mubr.f32.mxu0 %v720_v27  ;;  %v742_v24 = vadd.f32 %v6983_v50, %v5787_v22  ;;  %v6984_v27 = vld [vmem:[#allocation88_spill] sm:$0xff]  ;;  %v1640_v42 = vadd.f32 %v6339_v43, %v5793_v7  ;;  %v6991_v50 = vld [vmem:[#allocation93_spill] sm:$0xff] }
 0x2da   :  { %2884 = vmatprep.mubr.f32.mxu1 %v1618_v23  ;;  %v750_v9 = vadd.f32 %v6984_v27, %v5769_v36  ;;  %v1664_v27 = vadd.f32 %v6387_v46, %v5793_v7 }
 0x2db   :  { %v6423_v17 = vpop.f32.mrb[252].mxu0 }
 0x2dc   :  { %v6427_v15 = vpop.f32.mrb[253].mxu0  ;;  %2115 = vmatmul.mubr.f32.gmra.mrb[102].mxu0 %v718_v51 }
 0x2dd   :  { %2885 = vmatmul.mubr.f32.gmra.mrb[230].mxu1 %v1616_v39  ;;  %2119 = vmatprep.mubr.f32.mxu0 %v726_v21 }
 0x2de   :  { %2889 = vmatprep.mubr.f32.mxu1 %v1624_v1  ;;  %v6985_v1 = vld [vmem:[#allocation87_spill] sm:$0xff] }
 0x2df   :  { %v6435_v49 = vpop.f32.mrb[254].mxu0  ;;  %v748_v60 = vadd.f32 %v6985_v1, %v5787_v22  ;;  %v6994_v1 = vld [vmem:[#allocation98_spill] sm:$0xff] }
 0x2e0   :  { %v6439_v38 = vpop.f32.mrb[255].mxu0  ;;  %2120 = vmatmul.mubr.f32.gmra.mrb[104].mxu0 %v724_v14  ;;  %v6986_v14 = vld [vmem:[#allocation90_spill] sm:$0xff] }
 0x2e1   :  { %2890 = vmatmul.mubr.f32.gmra.mrb[232].mxu1 %v1622_v32  ;;  %2124 = vmatprep.mubr.f32.mxu0 %v732_v26  ;;  %v756_v25 = vadd.f32 %v6986_v14, %v5769_v36  ;;  %v1654_v32 = vadd.f32 %v6367_v31, %v5778_v8  ;;  %v1678_v14 = vadd.f32 %v6415_v13, %v5778_v8 }
 0x2e2   :  { %2894 = vmatprep.mubr.f32.mxu1 %v1630_v57 }
 0x2e3   :  { %v1861_v58 = vpop.f32.mrb[0].mxu0 }
 0x2e4   :  { %v1862_v12 = vadd.f32 %v6444_v52, %v1861_v58  ;;  %v2631_v11 = vpop.f32.mrb[128].mxu1  ;;  %v1863_v44 = vpop.f32.mrb[1].mxu0  ;;  %2125 = vmatmul.mubr.f32.gmra.mrb[106].mxu0 %v730_v48  ;;  %v6988_v58 = vld [vmem:[#allocation92_spill] sm:$0xff] }
 0x2e5   :  { %v2633_v54 = vpop.f32.mrb[129].mxu1  ;;  %2895 = vmatmul.mubr.f32.gmra.mrb[234].mxu1 %v1628_v62  ;;  %2129 = vmatprep.mubr.f32.mxu0 %v738_v55  ;;  %v6987_v55 = vld [vmem:[#allocation89_spill] sm:$0xff]  ;;  %v762_v31 = vadd.f32 %v6988_v58, %v5769_v36 }
 0x2e6   :  { %v3392_v20 = vadd.f32 %v2631_v11, %v1862_v12  ;;  %2899 = vmatprep.mubr.f32.mxu1 %v1636_v53  ;;  %v754_v62 = vadd.f32 %v6987_v55, %v5787_v22  ;;  %v1652_v53 = vadd.f32 %v6363_v30, %v5793_v7  ;;  %v1660_v11 = vadd.f32 %v6379_v45, %v5778_v8 }
 0x2e7   :  { %v1866_v2 = vpop.f32.mrb[2].mxu0 }
 0x2e8   :  { %2950 = vst [vmem:[%s6791_s5] sm:$0xff] %v3392_v20  ;;  %v1867_v10 = vadd.f32 %v6444_v52, %v1866_v2  ;;  %v2636_v35 = vpop.f32.mrb[130].mxu1  ;;  %v1868_v34 = vpop.f32.mrb[3].mxu0  ;;  %2130 = vmatmul.mubr.f32.gmra.mrb[108].mxu0 %v736_v37  ;;  %v6989_v20 = vld [vmem:[#allocation91_spill] sm:$0xff] }
 0x2e9   :  { %v2638_v16 = vpop.f32.mrb[131].mxu1  ;;  %2900 = vmatmul.mubr.f32.gmra.mrb[236].mxu1 %v1634_v3  ;;  %2134 = vmatprep.mubr.f32.mxu0 %v744_v41  ;;  %v760_v4 = vadd.f32 %v6989_v20, %v5787_v22  ;;  %v6990_v41 = vld [vmem:[#allocation94_spill] sm:$0xff]  ;;  %v1658_v3 = vadd.f32 %v6375_v29, %v5793_v7 }
 0x2ea   :  { %v3394_v47 = vadd.f32 %v2636_v35, %v1867_v10  ;;  %2904 = vmatprep.mubr.f32.mxu1 %v1642_v19  ;;  %v768_v45 = vadd.f32 %v6990_v41, %v5769_v36  ;;  %v1666_v19 = vadd.f32 %v6391_v56, %v5778_v8 }
 0x2eb   :  { %v1871_v23 = vpop.f32.mrb[4].mxu0 }
 0x2ec   :  { %2951 = vst [vmem:[%s6791_s5 + $0x8] sm:$0xff] %v3394_v47  ;;  %v1872_v51 = vadd.f32 %v6444_v52, %v1871_v23  ;;  %v2641_v0 = vpop.f32.mrb[132].mxu1  ;;  %v1873_v21 = vpop.f32.mrb[5].mxu0  ;;  %2135 = vmatmul.mubr.f32.gmra.mrb[110].mxu0 %v742_v24  ;;  %v766_v24 = vadd.f32 %v6991_v50, %v5787_v22  ;;  %v6992_v47 = vld [vmem:[#allocation96_spill] sm:$0xff] }
 0x2ed   :  { %v2643_v39 = vpop.f32.mrb[133].mxu1  ;;  %2905 = vmatmul.mubr.f32.gmra.mrb[238].mxu1 %v1640_v42  ;;  %2139 = vmatprep.mubr.f32.mxu0 %v750_v9  ;;  %v774_v56 = vadd.f32 %v6992_v47, %v5769_v36  ;;  %v1672_v42 = vadd.f32 %v6403_v5, %v5778_v8  ;;  %v6993_v21 = vld [vmem:[#allocation95_spill] sm:$0xff]  ;;  %v780_v5 = vadd.f32 %v6994_v1, %v5769_v36 }
 0x2ee   :  { %v3396_v43 = vadd.f32 %v2641_v0, %v1872_v51  ;;  %2909 = vmatprep.mubr.f32.mxu1 %v1648_v63  ;;  %v772_v39 = vadd.f32 %v6993_v21, %v5787_v22 }
 0x2ef   :  { %v1876_v26 = vpop.f32.mrb[6].mxu0 }
 0x2f0   :  { %2952 = vst [vmem:[%s6791_s5 + $0x10] sm:$0xff] %v3396_v43  ;;  %v1877_v57 = vadd.f32 %v6444_v52, %v1876_v26  ;;  %v2646_v40 = vpop.f32.mrb[134].mxu1  ;;  %v1878_v48 = vpop.f32.mrb[7].mxu0  ;;  %2140 = vmatmul.mubr.f32.gmra.mrb[112].mxu0 %v748_v60  ;;  %v1670_v60 = vadd.f32 %v6399_v28, %v5793_v7 }
 0x2f1   :  { %v2648_v59 = vpop.f32.mrb[135].mxu1  ;;  %2910 = vmatmul.mubr.f32.gmra.mrb[240].mxu1 %v1646_v18  ;;  %2144 = vmatprep.mubr.f32.mxu0 %v756_v25  ;;  %v6996_v48 = vld [vmem:[#allocation100_spill] sm:$0xff] }
 0x2f2   :  { %v3398_v6 = vadd.f32 %v2646_v40, %v1877_v57  ;;  %2914 = vmatprep.mubr.f32.mxu1 %v1654_v32  ;;  %v6995_v57 = vld [vmem:[#allocation97_spill] sm:$0xff]  ;;  %v786_v13 = vadd.f32 %v6996_v48, %v5769_v36  ;;  %v1676_v59 = vadd.f32 %v6411_v33, %v5793_v7 }
 0x2f3   :  { %v1881_v12 = vpop.f32.mrb[8].mxu0  ;;  %v778_v40 = vadd.f32 %v6995_v57, %v5787_v22 }
 0x2f4   :  { %2953 = vst [vmem:[%s6791_s5 + $0x18] sm:$0xff] %v3398_v6  ;;  %v1882_v44 = vadd.f32 %v6444_v52, %v1881_v12  ;;  %v2651_v54 = vpop.f32.mrb[136].mxu1  ;;  %v1883_v61 = vpop.f32.mrb[9].mxu0  ;;  %2145 = vmatmul.mubr.f32.gmra.mrb[114].mxu0 %v754_v62  ;;  %v1684_v62 = vadd.f32 %v6427_v15, %v5778_v8  ;;  %v6997_v12 = vld [vmem:[#allocation99_spill] sm:$0xff] }
 0x2f5   :  { %v2653_v37 = vpop.f32.mrb[137].mxu1  ;;  %2915 = vmatmul.mubr.f32.gmra.mrb[242].mxu1 %v1652_v53  ;;  %2149 = vmatprep.mubr.f32.mxu0 %v762_v31 }
 0x2f6   :  { %v3400_v30 = vadd.f32 %v2651_v54, %v1882_v44  ;;  %2919 = vmatprep.mubr.f32.mxu1 %v1660_v11  ;;  %v784_v11 = vadd.f32 %v6997_v12, %v5787_v22  ;;  %v6998_v44 = vld [vmem:[#allocation102_spill] sm:$0xff]  ;;  %v1682_v54 = vadd.f32 %v6423_v17, %v5793_v7  ;;  %v1690_v37 = vadd.f32 %v6439_v38, %v5778_v8 }
 0x2f7   :  { %v1886_v2 = vpop.f32.mrb[10].mxu0  ;;  %v792_v15 = vadd.f32 %v6998_v44, %v5769_v36  ;;  %v6999_v36 = vld [vmem:[#allocation101_spill] sm:$0xff]  ;;  %v1688_v8 = vadd.f32 %v6435_v49, %v5793_v7 }
 0x2f8   :  { %2954 = vst [vmem:[%s6791_s5 + $0x20] sm:$0xff] %v3400_v30  ;;  %v1887_v10 = vadd.f32 %v6444_v52, %v1886_v2  ;;  %v2656_v35 = vpop.f32.mrb[138].mxu1  ;;  %v1888_v34 = vpop.f32.mrb[11].mxu0  ;;  %2150 = vmatmul.mubr.f32.gmra.mrb[116].mxu0 %v760_v4 }
 0x2f9   :  { %v2658_v16 = vpop.f32.mrb[139].mxu1  ;;  %2920 = vmatmul.mubr.f32.gmra.mrb[244].mxu1 %v1658_v3  ;;  %2154 = vmatprep.mubr.f32.mxu0 %v768_v45  ;;  %v790_v45 = vadd.f32 %v6999_v36, %v5787_v22 }
 0x2fa   :  { %v3402_v29 = vadd.f32 %v2656_v35, %v1887_v10  ;;  %2924 = vmatprep.mubr.f32.mxu1 %v1666_v19 }
 0x2fb   :  { %v1891_v9 = vpop.f32.mrb[12].mxu0 }
 0x2fc   :  { %2955 = vst [vmem:[%s6791_s5 + $0x28] sm:$0xff] %v3402_v29  ;;  %v1892_v23 = vadd.f32 %v6444_v52, %v1891_v9  ;;  %v2661_v63 = vpop.f32.mrb[140].mxu1  ;;  %v1893_v51 = vpop.f32.mrb[13].mxu0  ;;  %2155 = vmatmul.mubr.f32.gmra.mrb[118].mxu0 %v766_v24 }
 0x2fd   :  { %v2663_v0 = vpop.f32.mrb[141].mxu1  ;;  %2925 = vmatmul.mubr.f32.gmra.mrb[246].mxu1 %v1664_v27  ;;  %2159 = vmatprep.mubr.f32.mxu0 %v774_v56 }
 0x2fe   :  { %v3404_v46 = vadd.f32 %v2661_v63, %v1892_v23  ;;  %2929 = vmatprep.mubr.f32.mxu1 %v1672_v42 }
 0x2ff   :  { %v1896_v43 = vpop.f32.mrb[14].mxu0 }
 0x300   :  { %2956 = vst [vmem:[%s6791_s5 + $0x30] sm:$0xff] %v3404_v46  ;;  %v1897_v25 = vadd.f32 %v6444_v52, %v1896_v43  ;;  %v2666_v18 = vpop.f32.mrb[142].mxu1  ;;  %v1898_v26 = vpop.f32.mrb[15].mxu0  ;;  %2160 = vmatmul.mubr.f32.gmra.mrb[120].mxu0 %v772_v39 }
 0x301   :  { %v2668_v32 = vpop.f32.mrb[143].mxu1  ;;  %2930 = vmatmul.mubr.f32.gmra.mrb[248].mxu1 %v1670_v60  ;;  %2164 = vmatprep.mubr.f32.mxu0 %v780_v5 }
 0x302   :  { %v3406_v28 = vadd.f32 %v2666_v18, %v1897_v25  ;;  %2934 = vmatprep.mubr.f32.mxu1 %v1678_v14 }
 0x303   :  { %v1901_v55 = vpop.f32.mrb[16].mxu0 }
 0x304   :  { %2957 = vst [vmem:[%s6791_s5 + $0x38] sm:$0xff] %v3406_v28  ;;  %v1902_v6 = vadd.f32 %v6444_v52, %v1901_v55  ;;  %v2671_v58 = vpop.f32.mrb[144].mxu1  ;;  %v1903_v31 = vpop.f32.mrb[17].mxu0  ;;  %2165 = vmatmul.mubr.f32.gmra.mrb[122].mxu0 %v778_v40 }
 0x305   :  { %v2673_v53 = vpop.f32.mrb[145].mxu1  ;;  %2935 = vmatmul.mubr.f32.gmra.mrb[250].mxu1 %v1676_v59  ;;  %2169 = vmatprep.mubr.f32.mxu0 %v786_v13 }
 0x306   :  { %v3408_v33 = vadd.f32 %v2671_v58, %v1902_v6  ;;  %2939 = vmatprep.mubr.f32.mxu1 %v1684_v62 }
 0x307   :  { %v1906_v61 = vpop.f32.mrb[18].mxu0 }
 0x308   :  { %2958 = vst [vmem:[%s6791_s5 + $0x40] sm:$0xff] %v3408_v33  ;;  %v1907_v20 = vadd.f32 %v6444_v52, %v1906_v61  ;;  %v2676_v4 = vpop.f32.mrb[146].mxu1  ;;  %v1908_v30 = vpop.f32.mrb[19].mxu0  ;;  %2170 = vmatmul.mubr.f32.gmra.mrb[124].mxu0 %v784_v11 }
 0x309   :  { %v2678_v41 = vpop.f32.mrb[147].mxu1  ;;  %2940 = vmatmul.mubr.f32.gmra.mrb[252].mxu1 %v1682_v54  ;;  %2174 = vmatprep.mubr.f32.mxu0 %v792_v15 }
 0x30a   :  { %v3410_v17 = vadd.f32 %v2676_v4, %v1907_v20  ;;  %2944 = vmatprep.mubr.f32.mxu1 %v1690_v37 }
 0x30b   :  { %v1911_v38 = vpop.f32.mrb[20].mxu0 }
 0x30c   :  { %2959 = vst [vmem:[%s6791_s5 + $0x48] sm:$0xff] %v3410_v17  ;;  %v1912_v3 = vadd.f32 %v6444_v52, %v1911_v38  ;;  %v2681_v2 = vpop.f32.mrb[148].mxu1  ;;  %v1913_v19 = vpop.f32.mrb[21].mxu0  ;;  %2175 = vmatmul.mubr.f32.gmra.mrb[126].mxu0 %v790_v45 }
 0x30d   :  { %v2683_v10 = vpop.f32.mrb[149].mxu1  ;;  %2945 = vmatmul.mubr.f32.gmra.mrb[254].mxu1 %v1688_v8 }
 0x30e   :  { %v3412_v35 = vadd.f32 %v2681_v2, %v1912_v3 }
 0x30f   :  { %v1916_v34 = vpop.f32.mrb[22].mxu0 }
 0x310   :  { %2960 = vst [vmem:[%s6791_s5 + $0x50] sm:$0xff] %v3412_v35  ;;  %v1917_v22 = vadd.f32 %v6444_v52, %v1916_v34  ;;  %v2686_v7 = vpop.f32.mrb[150].mxu1  ;;  %v1918_v49 = vpop.f32.mrb[23].mxu0 }
 0x311   :  { %v2688_v16 = vpop.f32.mrb[151].mxu1 }
 0x312   :  { %v3414_v50 = vadd.f32 %v2686_v7, %v1917_v22 }
 0x313   :  { %v1921_v24 = vpop.f32.mrb[24].mxu0 }
 0x314   :  { %2961 = vst [vmem:[%s6791_s5 + $0x58] sm:$0xff] %v3414_v50  ;;  %v1922_v29 = vadd.f32 %v6444_v52, %v1921_v24  ;;  %v2691_v47 = vpop.f32.mrb[152].mxu1  ;;  %v1923_v56 = vpop.f32.mrb[25].mxu0 }
 0x315   :  { %v2693_v27 = vpop.f32.mrb[153].mxu1 }
 0x316   :  { %v3416_v9 = vadd.f32 %v2691_v47, %v1922_v29 }
 0x317   :  { %v1926_v42 = vpop.f32.mrb[26].mxu0 }
 0x318   :  { %2962 = vst [vmem:[%s6791_s5 + $0x60] sm:$0xff] %v3416_v9  ;;  %v1927_v23 = vadd.f32 %v6444_v52, %v1926_v42  ;;  %v2696_v63 = vpop.f32.mrb[154].mxu1  ;;  %v1928_v51 = vpop.f32.mrb[27].mxu0 }
 0x319   :  { %v2698_v0 = vpop.f32.mrb[155].mxu1 }
 0x31a   :  { %v3418_v21 = vadd.f32 %v2696_v63, %v1927_v23 }
 0x31b   :  { %v1931_v39 = vpop.f32.mrb[28].mxu0 }
 0x31c   :  { %2963 = vst [vmem:[%s6791_s5 + $0x68] sm:$0xff] %v3418_v21  ;;  %v1932_v46 = vadd.f32 %v6444_v52, %v1931_v39  ;;  %v2701_v1 = vpop.f32.mrb[156].mxu1  ;;  %v1933_v5 = vpop.f32.mrb[29].mxu0 }
 0x31d   :  { %v2703_v60 = vpop.f32.mrb[157].mxu1 }
 0x31e   :  { %v3420_v43 = vadd.f32 %v2701_v1, %v1932_v46 }
 0x31f   :  { %v1936_v14 = vpop.f32.mrb[30].mxu0 }
 0x320   :  { %2964 = vst [vmem:[%s6791_s5 + $0x70] sm:$0xff] %v3420_v43  ;;  %v1937_v25 = vadd.f32 %v6444_v52, %v1936_v14  ;;  %v2706_v18 = vpop.f32.mrb[158].mxu1  ;;  %v1938_v26 = vpop.f32.mrb[31].mxu0 }
 0x321   :  { %v2708_v32 = vpop.f32.mrb[159].mxu1 }
 0x322   :  { %v3422_v57 = vadd.f32 %v2706_v18, %v1937_v25 }
 0x323   :  { %v1941_v40 = vpop.f32.mrb[32].mxu0 }
 0x324   :  { %2965 = vst [vmem:[%s6791_s5 + $0x78] sm:$0xff] %v3422_v57  ;;  %v1942_v28 = vadd.f32 %v6444_v52, %v1941_v40  ;;  %v2711_v48 = vpop.f32.mrb[160].mxu1  ;;  %v1943_v13 = vpop.f32.mrb[33].mxu0 }
 0x325   :  { %v2713_v59 = vpop.f32.mrb[161].mxu1 }
 0x326   :  { %v3424_v55 = vadd.f32 %v2711_v48, %v1942_v28 }
 0x327   :  { %v1946_v62 = vpop.f32.mrb[34].mxu0 }
 0x328   :  { %2966 = vst [vmem:[%s6791_s5 + $0x80] sm:$0xff] %v3424_v55  ;;  %v1947_v6 = vadd.f32 %v6444_v52, %v1946_v62  ;;  %v2716_v58 = vpop.f32.mrb[162].mxu1  ;;  %v1948_v31 = vpop.f32.mrb[35].mxu0 }
 0x329   :  { %v2718_v53 = vpop.f32.mrb[163].mxu1 }
 0x32a   :  { %v3426_v12 = vadd.f32 %v2716_v58, %v1947_v6 }
 0x32b   :  { %v1951_v11 = vpop.f32.mrb[36].mxu0 }
 0x32c   :  { %2967 = vst [vmem:[%s6791_s5 + $0x88] sm:$0xff] %v3426_v12  ;;  %v1952_v33 = vadd.f32 %v6444_v52, %v1951_v11  ;;  %v2721_v44 = vpop.f32.mrb[164].mxu1  ;;  %v1953_v15 = vpop.f32.mrb[37].mxu0 }
 0x32d   :  { %v2723_v54 = vpop.f32.mrb[165].mxu1 }
 0x32e   :  { %v3428_v61 = vadd.f32 %v2721_v44, %v1952_v33 }
 0x32f   :  { %v1956_v37 = vpop.f32.mrb[38].mxu0 }
 0x330   :  { %2968 = vst [vmem:[%s6791_s5 + $0x90] sm:$0xff] %v3428_v61  ;;  %v1957_v20 = vadd.f32 %v6444_v52, %v1956_v37  ;;  %v2726_v4 = vpop.f32.mrb[166].mxu1  ;;  %v1958_v30 = vpop.f32.mrb[39].mxu0 }
 0x331   :  { %v2728_v41 = vpop.f32.mrb[167].mxu1 }
 0x332   :  { %v3430_v36 = vadd.f32 %v2726_v4, %v1957_v20 }
 0x333   :  { %v1961_v45 = vpop.f32.mrb[40].mxu0 }
 0x334   :  { %2969 = vst [vmem:[%s6791_s5 + $0x98] sm:$0xff] %v3430_v36  ;;  %v1962_v17 = vadd.f32 %v6444_v52, %v1961_v45  ;;  %v2731_v8 = vpop.f32.mrb[168].mxu1  ;;  %v1963_v38 = vpop.f32.mrb[41].mxu0 }
 0x335   :  { %v2733_v3 = vpop.f32.mrb[169].mxu1 }
 0x336   :  { %v3432_v2 = vadd.f32 %v2731_v8, %v1962_v17 }
 0x337   :  { %v1966_v19 = vpop.f32.mrb[42].mxu0 }
 0x338   :  { %2970 = vst [vmem:[%s6791_s5 + $0xa0] sm:$0xff] %v3432_v2  ;;  %v1967_v10 = vadd.f32 %v6444_v52, %v1966_v19  ;;  %v2736_v35 = vpop.f32.mrb[170].mxu1  ;;  %v1968_v34 = vpop.f32.mrb[43].mxu0 }
 0x339   :  { %v2738_v22 = vpop.f32.mrb[171].mxu1 }
 0x33a   :  { %v3434_v7 = vadd.f32 %v2736_v35, %v1967_v10 }
 0x33b   :  { %v1971_v49 = vpop.f32.mrb[44].mxu0 }
 0x33c   :  { %2971 = vst [vmem:[%s6791_s5 + $0xa8] sm:$0xff] %v3434_v7  ;;  %v1972_v16 = vadd.f32 %v6444_v52, %v1971_v49  ;;  %v2741_v50 = vpop.f32.mrb[172].mxu1  ;;  %v1973_v24 = vpop.f32.mrb[45].mxu0 }
 0x33d   :  { %v2743_v29 = vpop.f32.mrb[173].mxu1 }
 0x33e   :  { %v3436_v47 = vadd.f32 %v2741_v50, %v1972_v16 }
 0x33f   :  { %v1976_v56 = vpop.f32.mrb[46].mxu0 }
 0x340   :  { %2972 = vst [vmem:[%s6791_s5 + $0xb0] sm:$0xff] %v3436_v47  ;;  %v1977_v27 = vadd.f32 %v6444_v52, %v1976_v56  ;;  %v2746_v9 = vpop.f32.mrb[174].mxu1  ;;  %v1978_v42 = vpop.f32.mrb[47].mxu0 }
 0x341   :  { %v2748_v23 = vpop.f32.mrb[175].mxu1 }
 0x342   :  { %v3438_v63 = vadd.f32 %v2746_v9, %v1977_v27 }
 0x343   :  { %v1981_v51 = vpop.f32.mrb[48].mxu0 }
 0x344   :  { %2973 = vst [vmem:[%s6791_s5 + $0xb8] sm:$0xff] %v3438_v63  ;;  %v1982_v0 = vadd.f32 %v6444_v52, %v1981_v51  ;;  %v2751_v21 = vpop.f32.mrb[176].mxu1  ;;  %v1983_v39 = vpop.f32.mrb[49].mxu0 }
 0x345   :  { %v2753_v46 = vpop.f32.mrb[177].mxu1 }
 0x346   :  { %v3440_v1 = vadd.f32 %v2751_v21, %v1982_v0 }
 0x347   :  { %v1986_v5 = vpop.f32.mrb[50].mxu0 }
 0x348   :  { %2974 = vst [vmem:[%s6791_s5 + $0xc0] sm:$0xff] %v3440_v1  ;;  %v1987_v60 = vadd.f32 %v6444_v52, %v1986_v5  ;;  %v2756_v43 = vpop.f32.mrb[178].mxu1  ;;  %v1988_v14 = vpop.f32.mrb[51].mxu0 }
 0x349   :  { %v2758_v25 = vpop.f32.mrb[179].mxu1 }
 0x34a   :  { %v3442_v18 = vadd.f32 %v2756_v43, %v1987_v60 }
 0x34b   :  { %v1991_v26 = vpop.f32.mrb[52].mxu0 }
 0x34c   :  { %2975 = vst [vmem:[%s6791_s5 + $0xc8] sm:$0xff] %v3442_v18  ;;  %v1992_v32 = vadd.f32 %v6444_v52, %v1991_v26  ;;  %v2761_v57 = vpop.f32.mrb[180].mxu1  ;;  %v1993_v40 = vpop.f32.mrb[53].mxu0 }
 0x34d   :  { %v2763_v28 = vpop.f32.mrb[181].mxu1 }
 0x34e   :  { %v3444_v48 = vadd.f32 %v2761_v57, %v1992_v32 }
 0x34f   :  { %v1996_v13 = vpop.f32.mrb[54].mxu0 }
 0x350   :  { %2976 = vst [vmem:[%s6791_s5 + $0xd0] sm:$0xff] %v3444_v48  ;;  %v1997_v59 = vadd.f32 %v6444_v52, %v1996_v13  ;;  %v2766_v55 = vpop.f32.mrb[182].mxu1  ;;  %v1998_v62 = vpop.f32.mrb[55].mxu0 }
 0x351   :  { %v2768_v6 = vpop.f32.mrb[183].mxu1 }
 0x352   :  { %v3446_v58 = vadd.f32 %v2766_v55, %v1997_v59 }
 0x353   :  { %v2001_v31 = vpop.f32.mrb[56].mxu0 }
 0x354   :  { %2977 = vst [vmem:[%s6791_s5 + $0xd8] sm:$0xff] %v3446_v58  ;;  %v2002_v53 = vadd.f32 %v6444_v52, %v2001_v31  ;;  %v2771_v12 = vpop.f32.mrb[184].mxu1  ;;  %v2003_v11 = vpop.f32.mrb[57].mxu0 }
 0x355   :  { %v2773_v33 = vpop.f32.mrb[185].mxu1 }
 0x356   :  { %v3448_v44 = vadd.f32 %v2771_v12, %v2002_v53 }
 0x357   :  { %v2006_v15 = vpop.f32.mrb[58].mxu0 }
 0x358   :  { %2978 = vst [vmem:[%s6791_s5 + $0xe0] sm:$0xff] %v3448_v44  ;;  %v2007_v54 = vadd.f32 %v6444_v52, %v2006_v15  ;;  %v2776_v61 = vpop.f32.mrb[186].mxu1  ;;  %v2008_v37 = vpop.f32.mrb[59].mxu0 }
 0x359   :  { %v2778_v20 = vpop.f32.mrb[187].mxu1 }
 0x35a   :  { %v3450_v4 = vadd.f32 %v2776_v61, %v2007_v54 }
 0x35b   :  { %v2011_v30 = vpop.f32.mrb[60].mxu0 }
 0x35c   :  { %2979 = vst [vmem:[%s6791_s5 + $0xe8] sm:$0xff] %v3450_v4  ;;  %v2012_v41 = vadd.f32 %v6444_v52, %v2011_v30  ;;  %v2781_v36 = vpop.f32.mrb[188].mxu1  ;;  %v2013_v45 = vpop.f32.mrb[61].mxu0 }
 0x35d   :  { %v2783_v17 = vpop.f32.mrb[189].mxu1 }
 0x35e   :  { %v3452_v8 = vadd.f32 %v2781_v36, %v2012_v41 }
 0x35f   :  { %v2016_v38 = vpop.f32.mrb[62].mxu0 }
 0x360   :  { %2980 = vst [vmem:[%s6791_s5 + $0xf0] sm:$0xff] %v3452_v8  ;;  %v2017_v3 = vadd.f32 %v6444_v52, %v2016_v38  ;;  %v2786_v2 = vpop.f32.mrb[190].mxu1  ;;  %v2018_v19 = vpop.f32.mrb[63].mxu0 }
 0x361   :  { %v2788_v10 = vpop.f32.mrb[191].mxu1 }
 0x362   :  { %v3454_v35 = vadd.f32 %v2786_v2, %v2017_v3 }
 0x363   :  { %v2021_v34 = vpop.f32.mrb[64].mxu0 }
 0x364   :  { %2981 = vst [vmem:[%s6791_s5 + $0xf8] sm:$0xff] %v3454_v35  ;;  %v2022_v22 = vadd.f32 %v6444_v52, %v2021_v34  ;;  %v2791_v7 = vpop.f32.mrb[192].mxu1  ;;  %v2023_v49 = vpop.f32.mrb[65].mxu0 }
 0x365   :  { %v2793_v16 = vpop.f32.mrb[193].mxu1 }
 0x366   :  { %v3456_v50 = vadd.f32 %v2791_v7, %v2022_v22 }
 0x367   :  { %v2026_v24 = vpop.f32.mrb[66].mxu0 }
 0x368   :  { %2982 = vst [vmem:[%s6791_s5 + $0x100] sm:$0xff] %v3456_v50  ;;  %v2027_v29 = vadd.f32 %v6444_v52, %v2026_v24  ;;  %v2796_v47 = vpop.f32.mrb[194].mxu1  ;;  %v2028_v56 = vpop.f32.mrb[67].mxu0 }
 0x369   :  { %v2798_v27 = vpop.f32.mrb[195].mxu1 }
 0x36a   :  { %v3458_v9 = vadd.f32 %v2796_v47, %v2027_v29 }
 0x36b   :  { %v2031_v42 = vpop.f32.mrb[68].mxu0 }
 0x36c   :  { %2983 = vst [vmem:[%s6791_s5 + $0x108] sm:$0xff] %v3458_v9  ;;  %v2032_v23 = vadd.f32 %v6444_v52, %v2031_v42  ;;  %v2801_v63 = vpop.f32.mrb[196].mxu1  ;;  %v2033_v51 = vpop.f32.mrb[69].mxu0 }
 0x36d   :  { %v2803_v0 = vpop.f32.mrb[197].mxu1 }
 0x36e   :  { %v3460_v21 = vadd.f32 %v2801_v63, %v2032_v23 }
 0x36f   :  { %v2036_v39 = vpop.f32.mrb[70].mxu0 }
 0x370   :  { %2984 = vst [vmem:[%s6791_s5 + $0x110] sm:$0xff] %v3460_v21  ;;  %v2037_v46 = vadd.f32 %v6444_v52, %v2036_v39  ;;  %v2806_v1 = vpop.f32.mrb[198].mxu1  ;;  %v2038_v5 = vpop.f32.mrb[71].mxu0 }
 0x371   :  { %v2808_v60 = vpop.f32.mrb[199].mxu1 }
 0x372   :  { %v3462_v43 = vadd.f32 %v2806_v1, %v2037_v46 }
 0x373   :  { %v2041_v14 = vpop.f32.mrb[72].mxu0 }
 0x374   :  { %2985 = vst [vmem:[%s6791_s5 + $0x118] sm:$0xff] %v3462_v43  ;;  %v2042_v25 = vadd.f32 %v6444_v52, %v2041_v14  ;;  %v2811_v18 = vpop.f32.mrb[200].mxu1  ;;  %v2043_v26 = vpop.f32.mrb[73].mxu0 }
 0x375   :  { %v2813_v32 = vpop.f32.mrb[201].mxu1 }
 0x376   :  { %v3464_v57 = vadd.f32 %v2811_v18, %v2042_v25 }
 0x377   :  { %v2046_v40 = vpop.f32.mrb[74].mxu0 }
 0x378   :  { %2986 = vst [vmem:[%s6791_s5 + $0x120] sm:$0xff] %v3464_v57  ;;  %v2047_v28 = vadd.f32 %v6444_v52, %v2046_v40  ;;  %v2816_v48 = vpop.f32.mrb[202].mxu1  ;;  %v2048_v13 = vpop.f32.mrb[75].mxu0 }
 0x379   :  { %v2818_v59 = vpop.f32.mrb[203].mxu1 }
 0x37a   :  { %v3466_v55 = vadd.f32 %v2816_v48, %v2047_v28 }
 0x37b   :  { %v2051_v62 = vpop.f32.mrb[76].mxu0 }
 0x37c   :  { %2987 = vst [vmem:[%s6791_s5 + $0x128] sm:$0xff] %v3466_v55  ;;  %v2052_v6 = vadd.f32 %v6444_v52, %v2051_v62  ;;  %v2821_v58 = vpop.f32.mrb[204].mxu1  ;;  %v2053_v31 = vpop.f32.mrb[77].mxu0 }
 0x37d   :  { %v2823_v53 = vpop.f32.mrb[205].mxu1 }
 0x37e   :  { %v3468_v12 = vadd.f32 %v2821_v58, %v2052_v6 }
 0x37f   :  { %v2056_v11 = vpop.f32.mrb[78].mxu0 }
 0x380   :  { %2988 = vst [vmem:[%s6791_s5 + $0x130] sm:$0xff] %v3468_v12  ;;  %v2057_v33 = vadd.f32 %v6444_v52, %v2056_v11  ;;  %v2826_v44 = vpop.f32.mrb[206].mxu1  ;;  %v2058_v15 = vpop.f32.mrb[79].mxu0 }
 0x381   :  { %v2828_v54 = vpop.f32.mrb[207].mxu1 }
 0x382   :  { %v3470_v61 = vadd.f32 %v2826_v44, %v2057_v33 }
 0x383   :  { %v2061_v37 = vpop.f32.mrb[80].mxu0 }
 0x384   :  { %2989 = vst [vmem:[%s6791_s5 + $0x138] sm:$0xff] %v3470_v61  ;;  %v2062_v20 = vadd.f32 %v6444_v52, %v2061_v37  ;;  %v2831_v4 = vpop.f32.mrb[208].mxu1  ;;  %v2063_v30 = vpop.f32.mrb[81].mxu0 }
 0x385   :  { %v2833_v41 = vpop.f32.mrb[209].mxu1 }
 0x386   :  { %v3472_v36 = vadd.f32 %v2831_v4, %v2062_v20 }
 0x387   :  { %v2066_v45 = vpop.f32.mrb[82].mxu0 }
 0x388   :  { %2990 = vst [vmem:[%s6791_s5 + $0x140] sm:$0xff] %v3472_v36  ;;  %v2067_v17 = vadd.f32 %v6444_v52, %v2066_v45  ;;  %v2836_v8 = vpop.f32.mrb[210].mxu1  ;;  %v2068_v38 = vpop.f32.mrb[83].mxu0 }
 0x389   :  { %v2838_v3 = vpop.f32.mrb[211].mxu1 }
 0x38a   :  { %v3474_v2 = vadd.f32 %v2836_v8, %v2067_v17 }
 0x38b   :  { %v2071_v19 = vpop.f32.mrb[84].mxu0 }
 0x38c   :  { %2991 = vst [vmem:[%s6791_s5 + $0x148] sm:$0xff] %v3474_v2  ;;  %v2072_v10 = vadd.f32 %v6444_v52, %v2071_v19  ;;  %v2841_v35 = vpop.f32.mrb[212].mxu1  ;;  %v2073_v34 = vpop.f32.mrb[85].mxu0 }
 0x38d   :  { %v2843_v22 = vpop.f32.mrb[213].mxu1 }
 0x38e   :  { %v3476_v7 = vadd.f32 %v2841_v35, %v2072_v10 }
 0x38f   :  { %v2076_v49 = vpop.f32.mrb[86].mxu0 }
 0x390   :  { %2992 = vst [vmem:[%s6791_s5 + $0x150] sm:$0xff] %v3476_v7  ;;  %v2077_v16 = vadd.f32 %v6444_v52, %v2076_v49  ;;  %v2846_v50 = vpop.f32.mrb[214].mxu1  ;;  %v2078_v24 = vpop.f32.mrb[87].mxu0 }
 0x391   :  { %v2848_v29 = vpop.f32.mrb[215].mxu1 }
 0x392   :  { %v3478_v47 = vadd.f32 %v2846_v50, %v2077_v16 }
 0x393   :  { %v2081_v56 = vpop.f32.mrb[88].mxu0 }
 0x394   :  { %2993 = vst [vmem:[%s6791_s5 + $0x158] sm:$0xff] %v3478_v47  ;;  %v2082_v27 = vadd.f32 %v6444_v52, %v2081_v56  ;;  %v2851_v9 = vpop.f32.mrb[216].mxu1  ;;  %v2083_v42 = vpop.f32.mrb[89].mxu0 }
 0x395   :  { %v2853_v23 = vpop.f32.mrb[217].mxu1 }
 0x396   :  { %v3480_v63 = vadd.f32 %v2851_v9, %v2082_v27 }
 0x397   :  { %v2086_v51 = vpop.f32.mrb[90].mxu0 }
 0x398   :  { %2994 = vst [vmem:[%s6791_s5 + $0x160] sm:$0xff] %v3480_v63  ;;  %v2087_v0 = vadd.f32 %v6444_v52, %v2086_v51  ;;  %v2856_v21 = vpop.f32.mrb[218].mxu1  ;;  %v2088_v39 = vpop.f32.mrb[91].mxu0 }
 0x399   :  { %v2858_v46 = vpop.f32.mrb[219].mxu1 }
 0x39a   :  { %v3482_v1 = vadd.f32 %v2856_v21, %v2087_v0 }
 0x39b   :  { %v2091_v5 = vpop.f32.mrb[92].mxu0 }
 0x39c   :  { %2995 = vst [vmem:[%s6791_s5 + $0x168] sm:$0xff] %v3482_v1  ;;  %v2092_v60 = vadd.f32 %v6444_v52, %v2091_v5  ;;  %v2861_v43 = vpop.f32.mrb[220].mxu1  ;;  %v2093_v14 = vpop.f32.mrb[93].mxu0 }
 0x39d   :  { %v2863_v25 = vpop.f32.mrb[221].mxu1 }
 0x39e   :  { %v3484_v18 = vadd.f32 %v2861_v43, %v2092_v60 }
 0x39f   :  { %v2096_v26 = vpop.f32.mrb[94].mxu0 }
 0x3a0   :  { %2996 = vst [vmem:[%s6791_s5 + $0x170] sm:$0xff] %v3484_v18  ;;  %v2097_v32 = vadd.f32 %v6444_v52, %v2096_v26  ;;  %v2866_v57 = vpop.f32.mrb[222].mxu1  ;;  %v2098_v40 = vpop.f32.mrb[95].mxu0 }
 0x3a1   :  { %v2868_v28 = vpop.f32.mrb[223].mxu1 }
 0x3a2   :  { %v3486_v48 = vadd.f32 %v2866_v57, %v2097_v32 }
 0x3a3   :  { %v2101_v13 = vpop.f32.mrb[96].mxu0 }
 0x3a4   :  { %2997 = vst [vmem:[%s6791_s5 + $0x178] sm:$0xff] %v3486_v48  ;;  %v2102_v59 = vadd.f32 %v6444_v52, %v2101_v13  ;;  %v2871_v55 = vpop.f32.mrb[224].mxu1  ;;  %v2103_v62 = vpop.f32.mrb[97].mxu0 }
 0x3a5   :  { %v2873_v6 = vpop.f32.mrb[225].mxu1 }
 0x3a6   :  { %v3488_v58 = vadd.f32 %v2871_v55, %v2102_v59 }
 0x3a7   :  { %v2106_v31 = vpop.f32.mrb[98].mxu0 }
 0x3a8   :  { %2998 = vst [vmem:[%s6791_s5 + $0x180] sm:$0xff] %v3488_v58  ;;  %v2107_v53 = vadd.f32 %v6444_v52, %v2106_v31  ;;  %v2876_v12 = vpop.f32.mrb[226].mxu1  ;;  %v2108_v11 = vpop.f32.mrb[99].mxu0 }
 0x3a9   :  { %v2878_v33 = vpop.f32.mrb[227].mxu1 }
 0x3aa   :  { %v3490_v44 = vadd.f32 %v2876_v12, %v2107_v53 }
 0x3ab   :  { %v2111_v15 = vpop.f32.mrb[100].mxu0 }
 0x3ac   :  { %2999 = vst [vmem:[%s6791_s5 + $0x188] sm:$0xff] %v3490_v44  ;;  %v2112_v54 = vadd.f32 %v6444_v52, %v2111_v15  ;;  %v2881_v61 = vpop.f32.mrb[228].mxu1  ;;  %v2113_v37 = vpop.f32.mrb[101].mxu0 }
 0x3ad   :  { %v2883_v20 = vpop.f32.mrb[229].mxu1 }
 0x3ae   :  { %v3492_v4 = vadd.f32 %v2881_v61, %v2112_v54  ;;  %v3710_v20 = vld [vmem:[%s6790_s4] ss:$0 sm:$0xff] }
 0x3af   :  { %v2116_v30 = vpop.f32.mrb[102].mxu0 }
 0x3b0   :  { %3000 = vst [vmem:[%s6791_s5 + $0x190] sm:$0xff] %v3492_v4  ;;  %v2117_v41 = vadd.f32 %v6444_v52, %v2116_v30  ;;  %v2886_v36 = vpop.f32.mrb[230].mxu1  ;;  %v2118_v45 = vpop.f32.mrb[103].mxu0 }
 0x3b1   :  { %v2888_v17 = vpop.f32.mrb[231].mxu1 }
 0x3b2   :  { %v3494_v8 = vadd.f32 %v2886_v36, %v2117_v41 }
 0x3b3   :  { %v2121_v38 = vpop.f32.mrb[104].mxu0 }
 0x3b4   :  { %3001 = vst [vmem:[%s6791_s5 + $0x198] sm:$0xff] %v3494_v8  ;;  %v2122_v3 = vadd.f32 %v6444_v52, %v2121_v38  ;;  %v2891_v2 = vpop.f32.mrb[232].mxu1  ;;  %v2123_v19 = vpop.f32.mrb[105].mxu0 }
 0x3b5   :  { %v2893_v10 = vpop.f32.mrb[233].mxu1 }
 0x3b6   :  { %v3496_v35 = vadd.f32 %v2891_v2, %v2122_v3 }
 0x3b7   :  { %v2126_v34 = vpop.f32.mrb[106].mxu0 }
 0x3b8   :  { %3002 = vst [vmem:[%s6791_s5 + $0x1a0] sm:$0xff] %v3496_v35  ;;  %v2127_v22 = vadd.f32 %v6444_v52, %v2126_v34  ;;  %v2896_v7 = vpop.f32.mrb[234].mxu1  ;;  %v2128_v49 = vpop.f32.mrb[107].mxu0 }
 0x3b9   :  { %v2898_v16 = vpop.f32.mrb[235].mxu1 }
 0x3ba   :  { %v3498_v50 = vadd.f32 %v2896_v7, %v2127_v22 }
 0x3bb   :  { %v2131_v24 = vpop.f32.mrb[108].mxu0 }
 0x3bc   :  { %3003 = vst [vmem:[%s6791_s5 + $0x1a8] sm:$0xff] %v3498_v50  ;;  %v2132_v29 = vadd.f32 %v6444_v52, %v2131_v24  ;;  %v2901_v47 = vpop.f32.mrb[236].mxu1  ;;  %v2133_v56 = vpop.f32.mrb[109].mxu0 }
 0x3bd   :  { %v2903_v27 = vpop.f32.mrb[237].mxu1 }
 0x3be   :  { %v3500_v9 = vadd.f32 %v2901_v47, %v2132_v29 }
 0x3bf   :  { %v2136_v42 = vpop.f32.mrb[110].mxu0 }
 0x3c0   :  { %3004 = vst [vmem:[%s6791_s5 + $0x1b0] sm:$0xff] %v3500_v9  ;;  %v2137_v23 = vadd.f32 %v6444_v52, %v2136_v42  ;;  %v2906_v63 = vpop.f32.mrb[238].mxu1  ;;  %v2138_v51 = vpop.f32.mrb[111].mxu0 }
 0x3c1   :  { %v2908_v0 = vpop.f32.mrb[239].mxu1 }
 0x3c2   :  { %v3502_v21 = vadd.f32 %v2906_v63, %v2137_v23 }
 0x3c3   :  { %v2141_v39 = vpop.f32.mrb[112].mxu0 }
 0x3c4   :  { %3005 = vst [vmem:[%s6791_s5 + $0x1b8] sm:$0xff] %v3502_v21  ;;  %v2142_v46 = vadd.f32 %v6444_v52, %v2141_v39  ;;  %v2911_v1 = vpop.f32.mrb[240].mxu1  ;;  %v2143_v5 = vpop.f32.mrb[113].mxu0 }
 0x3c5   :  { %v2913_v60 = vpop.f32.mrb[241].mxu1 }
 0x3c6   :  { %v3504_v43 = vadd.f32 %v2911_v1, %v2142_v46 }
 0x3c7   :  { %v2146_v14 = vpop.f32.mrb[114].mxu0 }
 0x3c8   :  { %3006 = vst [vmem:[%s6791_s5 + $0x1c0] sm:$0xff] %v3504_v43  ;;  %v2147_v25 = vadd.f32 %v6444_v52, %v2146_v14  ;;  %v2916_v18 = vpop.f32.mrb[242].mxu1  ;;  %v2148_v26 = vpop.f32.mrb[115].mxu0 }
 0x3c9   :  { %v2918_v32 = vpop.f32.mrb[243].mxu1 }
 0x3ca   :  { %v3506_v57 = vadd.f32 %v2916_v18, %v2147_v25 }
 0x3cb   :  { %v2151_v40 = vpop.f32.mrb[116].mxu0 }
 0x3cc   :  { %3007 = vst [vmem:[%s6791_s5 + $0x1c8] sm:$0xff] %v3506_v57  ;;  %v2152_v28 = vadd.f32 %v6444_v52, %v2151_v40  ;;  %v2921_v48 = vpop.f32.mrb[244].mxu1  ;;  %v2153_v13 = vpop.f32.mrb[117].mxu0 }
 0x3cd   :  { %v2923_v59 = vpop.f32.mrb[245].mxu1 }
 0x3ce   :  { %v3508_v55 = vadd.f32 %v2921_v48, %v2152_v28 }
 0x3cf   :  { %v2156_v62 = vpop.f32.mrb[118].mxu0 }
 0x3d0   :  { %3008 = vst [vmem:[%s6791_s5 + $0x1d0] sm:$0xff] %v3508_v55  ;;  %v2157_v6 = vadd.f32 %v6444_v52, %v2156_v62  ;;  %v2926_v58 = vpop.f32.mrb[246].mxu1  ;;  %v2158_v31 = vpop.f32.mrb[119].mxu0 }
 0x3d1   :  { %v2928_v53 = vpop.f32.mrb[247].mxu1 }
 0x3d2   :  { %v3510_v12 = vadd.f32 %v2926_v58, %v2157_v6 }
 0x3d3   :  { %v2161_v11 = vpop.f32.mrb[120].mxu0 }
 0x3d4   :  { %3009 = vst [vmem:[%s6791_s5 + $0x1d8] sm:$0xff] %v3510_v12  ;;  %v2162_v33 = vadd.f32 %v6444_v52, %v2161_v11  ;;  %v2931_v44 = vpop.f32.mrb[248].mxu1  ;;  %v2163_v15 = vpop.f32.mrb[121].mxu0 }
 0x3d5   :  { %v2933_v54 = vpop.f32.mrb[249].mxu1 }
 0x3d6   :  { %v3512_v61 = vadd.f32 %v2931_v44, %v2162_v33 }
 0x3d7   :  { %v2166_v37 = vpop.f32.mrb[122].mxu0 }
 0x3d8   :  { %3010 = vst [vmem:[%s6791_s5 + $0x1e0] sm:$0xff] %v3512_v61  ;;  %v2167_v4 = vadd.f32 %v3710_v20, %v2166_v37  ;;  %v2936_v30 = vpop.f32.mrb[250].mxu1  ;;  %v2168_v41 = vpop.f32.mrb[123].mxu0 }
 0x3d9   :  { %v2938_v36 = vpop.f32.mrb[251].mxu1 }
 0x3da   :  { %v3514_v45 = vadd.f32 %v2936_v30, %v2167_v4 }
 0x3db   :  { %v2171_v17 = vpop.f32.mrb[124].mxu0 }
 0x3dc   :  { %3011 = vst [vmem:[%s6791_s5 + $0x1e8] sm:$0xff] %v3514_v45  ;;  %v2172_v52 = vadd.f32 %v3710_v20, %v2171_v17  ;;  %v2941_v8 = vpop.f32.mrb[252].mxu1  ;;  %v2173_v38 = vpop.f32.mrb[125].mxu0 }
 0x3dd   :  { %v2943_v3 = vpop.f32.mrb[253].mxu1 }
 0x3de   :  { %v3516_v2 = vadd.f32 %v2941_v8, %v2172_v52 }
 0x3df   :  { %v2176_v19 = vpop.f32.mrb[126].mxu0 }
 0x3e0   :  { %3012 = vst [vmem:[%s6791_s5 + $0x1f0] sm:$0xff] %v3516_v2  ;;  %v2177_v10 = vadd.f32 %v3710_v20, %v2176_v19  ;;  %v2946_v35 = vpop.f32.mrb[254].mxu1  ;;  %v2178_v34 = vpop.f32.mrb[127].mxu0 }
 0x3e1   :  { %v2948_v22 = vpop.f32.mrb[255].mxu1 }
 0x3e2   :  { %v3518_v7 = vadd.f32 %v2946_v35, %v2177_v10 }
 0x3e4   :  { %3013 = vst [vmem:[%s6791_s5 + $0x1f8] sm:$0xff] %v3518_v7 }

// kernel: pix2seq_forward.3
= control target key start
LH: loop header
LB: loop body
LE: loop exit
PB: predicated region body
PF: predicated region fallthrough
CT: control target
= control target key end

     0   :  { %v2417_v3 = vmov 0.0   ;;  %vm75_vm0 = vcmask 261120   ;;  %s3700_s1 = inlined_call_operand.vmem [shape: f32[32,768], index: 1, kind: input, shape index: {}]   ;;  %s3701_s2 = inlined_call_operand.vmem [shape: f32[1,768], index: 2, kind: input, shape index: {}]   ;;  %s3702_s0 = inlined_call_operand.vmem [shape: f32[184,32], index: 0, kind: input, shape index: {}]   ;;  %s3703_s3 = inlined_call_operand.vmem [shape: f32[768,128], index: 3, kind: input, shape index: {}]   ;;  %s3704_s5 = inlined_call_operand.vmem [shape: f32[768,128], index: 5, kind: input, shape index: {}]   ;;  %s3705_s4 = inlined_call_operand.vmem [shape: f32[1,128], index: 4, kind: input, shape index: {}]   ;;  %s3706_s7 = inlined_call_operand.vmem [shape: f32[56,128], index: 7, kind: output, shape index: {0}]   ;;  %s3707_s6 = inlined_call_operand.vmem [shape: f32[1,128], index: 6, kind: input, shape index: {}]   ;;  %s3708_s8 = inlined_call_operand.vmem [shape: f32[128,128], index: 8, kind: output, shape index: {1}]  }
   0x1   :  { %v52_v0 = vld [vmem:[%s3700_s1 + $0x8] sm:$0xff]  ;;  %v58_v1 = vld [vmem:[%s3700_s1 + $0x38] sm:$0xff]  ;;  %v51_v2 = vld [vmem:[%s3700_s1] sm:$0xff]  ;;  %209 = vmatprep.mubr.f32.mxu0 %v2417_v3  ;;  %305 = vmatprep.mubr.f32.mxu1 %v2417_v3 }
   0x2   :  { %v2196_v4 = vpack.c.bf16 %v58_v1, %v52_v0  ;;  %v57_v5 = vld [vmem:[%s3700_s1 + $0x30] sm:$0xff]  ;;  %v64_v6 = vld [vmem:[%s3700_s1 + $0x68] sm:$0xff]  ;;  %v70_v7 = vld [vmem:[%s3700_s1 + $0x98] sm:$0xff] }
   0x3   :  { %v2198_v8 = vpack.c.bf16 %v57_v5, %v51_v2  ;;  %v2200_v9 = vpack.c.bf16 %v70_v7, %v64_v6  ;;  %v63_v10 = vld [vmem:[%s3700_s1 + $0x60] sm:$0xff]  ;;  %v69_v11 = vld [vmem:[%s3700_s1 + $0x90] sm:$0xff]  ;;  %v56_v12 = vld [vmem:[%s3700_s1 + $0x28] sm:$0xff] }
   0x4   :  { %2197 = vmatprep.subr.bf16.mxu0 %v2196_v4  ;;  %2412 = vmatprep.subr.bf16.mxu1 %v2196_v4  ;;  %v62_v13 = vld [vmem:[%s3700_s1 + $0x58] sm:$0xff]  ;;  %v2202_v14 = vpack.c.bf16 %v69_v11, %v63_v10  ;;  %v55_v15 = vld [vmem:[%s3700_s1 + $0x20] sm:$0xff]  ;;  %v61_v17 = vld [vmem:[%s3700_s1 + $0x50] sm:$0xff] }
   0x5   :  { %2199 = vmatpush1.bf16.msra.mxu0 %v2198_v8  ;;  %2414 = vmatpush1.bf16.msra.mxu1 %v2198_v8  ;;  %v2212_v16 = vpack.c.bf16 %v62_v13, %v56_v12  ;;  %v54_v18 = vld [vmem:[%s3700_s1 + $0x18] sm:$0xff]  ;;  %v60_v19 = vld [vmem:[%s3700_s1 + $0x48] sm:$0xff]  ;;  %v53_v21 = vld [vmem:[%s3700_s1 + $0x10] sm:$0xff]  ;;  %v2214_v24 = vpack.c.bf16 %v61_v17, %v55_v15 }
   0x6   :  { %2201 = vmatprep.subr.bf16.mxu0 %v2200_v9  ;;  %2413 = vmatprep.subr.bf16.mxu1 %v2200_v9  ;;  %v2204_v20 = vpack.c.bf16 %v60_v19, %v54_v18  ;;  %v59_v22 = vld [vmem:[%s3700_s1 + $0x40] sm:$0xff]  ;;  %v66_v26 = vld [vmem:[%s3700_s1 + $0x78] sm:$0xff]  ;;  %v72_v27 = vld [vmem:[%s3700_s1 + $0xa8] sm:$0xff] }
   0x7   :  { %v2516_v23 = vld [vmem:[%s3702_s0] sm:$0xff]  ;;  %v2206_v28 = vpack.c.bf16 %v59_v22, %v53_v21  ;;  %v2208_v29 = vpack.c.bf16 %v72_v27, %v66_v26  ;;  %v65_v30 = vld [vmem:[%s3700_s1 + $0x70] sm:$0xff]  ;;  %v2542_v32 = vld [vmem:[%s3702_s0 + $0x8] sm:$0xff] }
   0x8   :  { %v2521_v25 = vld [vmem:[%s3702_s0 + $0x80] sm:$0xff]  ;;  %v2547_v33 = vld [vmem:[%s3702_s0 + $0x88] sm:$0xff]  ;;  %v74_v35 = vld [vmem:[%s3700_s1 + $0xb8] sm:$0xff] }
   0x9   :  { %2203 = vmatpush1.bf16.msra.mxu0 %v2202_v14  ;;  %2415 = vmatpush1.bf16.msra.mxu1 %v2202_v14  ;;  %v71_v31 = vld [vmem:[%s3700_s1 + $0xa0] sm:$0xff]  ;;  %v68_v34 = vld [vmem:[%s3700_s1 + $0x88] sm:$0xff]  ;;  %v73_v39 = vld [vmem:[%s3700_s1 + $0xb0] sm:$0xff] }
   0xa   :  { %2213 = vmatprep.subr.bf16.mxu0 %v2212_v16  ;;  %2205 = vmatprep.subr.bf16.mxu1 %v2204_v20  ;;  %v67_v36 = vld [vmem:[%s3700_s1 + $0x80] sm:$0xff]  ;;  %v2210_v37 = vpack.c.bf16 %v71_v31, %v65_v30  ;;  %v2216_v38 = vpack.c.bf16 %v74_v35, %v68_v34  ;;  %v2574_v42 = vld [vmem:[%s3702_s0 + $0x10] sm:$0xff]  ;;  %v771_v44 = vld [vmem:[%s3703_s3 + $0x88] sm:$0xff] }
   0xb   :  { %v2218_v40 = vpack.c.bf16 %v73_v39, %v67_v36  ;;  %v770_v41 = vld [vmem:[%s3703_s3 + $0x80] sm:$0xff]  ;;  %v2580_v43 = vld [vmem:[%s3702_s0 + $0x90] sm:$0xff]  ;;  %v2593_v46 = vld [vmem:[%s3702_s0 + $0x18] sm:$0xff] }
   0xc   :  { %1726 = vmatmul.mubr.msk.f32.vlgmr.msra.gmra.mrb[0].mxu0 %vm75_vm0, %v2516_v23  ;;  %1742 = vmatmul.mubr.msk.f32.vlgmr.msra.gmra.mrb[0].mxu1 %vm75_vm0, %v2521_v25  ;;  %v2220_v45 = vpack.c.bf16 %v771_v44, %v770_v41  ;;  %v2599_v47 = vld [vmem:[%s3702_s0 + $0x98] sm:$0xff]  ;;  %v2609_v48 = vld [vmem:[%s3702_s0 + $0x20] sm:$0xff]  ;;  %v2625_v50 = vld [vmem:[%s3702_s0 + $0x28] sm:$0xff] }
   0xd   :  { %2215 = vmatpush1.bf16.msra.mxu0 %v2214_v24  ;;  %215 = vmatprep.mubr.f32.mxu0 %v2417_v3  ;;  %v2615_v49 = vld [vmem:[%s3702_s0 + $0xa0] sm:$0xff]  ;;  %v2631_v51 = vld [vmem:[%s3702_s0 + $0xa8] sm:$0xff]  ;;  %v2641_v52 = vld [vmem:[%s3702_s0 + $0x30] sm:$0xff] }
   0xe   :  { %2207 = vmatpush1.bf16.msra.mxu1 %v2206_v28  ;;  %311 = vmatprep.mubr.f32.mxu1 %v2417_v3  ;;  %v2647_v53 = vld [vmem:[%s3702_s0 + $0xb0] sm:$0xff]  ;;  %v754_v54 = vld [vmem:[%s3703_s3] sm:$0xff]  ;;  %v755_v55 = vld [vmem:[%s3703_s3 + $0x8] sm:$0xff] }
   0xf   :  { %2209 = vmatprep.subr.bf16.mxu1 %v2208_v29  ;;  %2217 = vmatprep.subr.bf16.mxu0 %v2216_v38  ;;  %v772_v56 = vld [vmem:[%s3703_s3 + $0x90] sm:$0xff]  ;;  %v773_v57 = vld [vmem:[%s3703_s3 + $0x98] sm:$0xff]  ;;  %v866_v59 = vld [vmem:[%s3704_s5 + $0x80] sm:$0xff]  ;;  %v2222_v61 = vpack.c.bf16 %v755_v55, %v754_v54 }
  0x10   :  { %1727 = vmatmul.mubr.msk.f32.gmra.mrb[2].mxu0 %vm75_vm0, %v2542_v32  ;;  %1743 = vmatmul.mubr.msk.f32.gmra.mrb[2].mxu1 %vm75_vm0, %v2547_v33  ;;  %v2669_v58 = vld [vmem:[%s3702_s0 + $0x38] sm:$0xff]  ;;  %v867_v60 = vld [vmem:[%s3704_s5 + $0x88] sm:$0xff]  ;;  %v2224_v63 = vpack.c.bf16 %v773_v57, %v772_v56  ;;  %v756_v0 = vld [vmem:[%s3703_s3 + $0x10] sm:$0xff] }
  0x11   :  { %221 = vmatprep.mubr.f32.mxu0 %v2417_v3  ;;  %317 = vmatprep.mubr.f32.mxu1 %v2417_v3  ;;  %v2316_v62 = vpack.c.bf16 %v867_v60, %v866_v59  ;;  %v757_v1 = vld [vmem:[%s3703_s3 + $0x18] sm:$0xff]  ;;  %v774_v2 = vld [vmem:[%s3703_s3 + $0xa0] sm:$0xff]  ;;  %v775_v4 = vld [vmem:[%s3703_s3 + $0xa8] sm:$0xff] }
  0x12   :  { %2211 = vmatpush1.bf16.msra.mxu1 %v2210_v37  ;;  %2219 = vmatpush1.bf16.msra.mxu0 %v2218_v40  ;;  %v2698_v5 = vld [vmem:[%s3702_s0 + $0x40] sm:$0xff]  ;;  %v2226_v6 = vpack.c.bf16 %v757_v1, %v756_v0  ;;  %v2228_v7 = vpack.c.bf16 %v775_v4, %v774_v2  ;;  %v759_v9 = vld [vmem:[%s3703_s3 + $0x28] sm:$0xff]  ;;  %v776_v10 = vld [vmem:[%s3703_s3 + $0xb0] sm:$0xff] }
  0x13   :  { %2221 = vmatprep.subr.bf16.mxu1 %v2220_v45  ;;  %2317 = vmatprep.subr.bf16.mxu0 %v2316_v62  ;;  %v758_v8 = vld [vmem:[%s3703_s3 + $0x20] sm:$0xff]  ;;  %v777_v11 = vld [vmem:[%s3703_s3 + $0xb8] sm:$0xff]  ;;  %v2721_v12 = vld [vmem:[%s3702_s0 + $0x48] sm:$0xff] }
  0x14   :  { %1728 = vmatmul.mubr.msk.f32.gmra.mrb[4].mxu0 %vm75_vm0, %v2574_v42  ;;  %1744 = vmatmul.mubr.msk.f32.gmra.mrb[4].mxu1 %vm75_vm0, %v2580_v43  ;;  %v2230_v13 = vpack.c.bf16 %v759_v9, %v758_v8  ;;  %v2232_v14 = vpack.c.bf16 %v777_v11, %v776_v10  ;;  %v760_v15 = vld [vmem:[%s3703_s3 + $0x30] sm:$0xff]  ;;  %v761_v16 = vld [vmem:[%s3703_s3 + $0x38] sm:$0xff]  ;;  %v778_v17 = vld [vmem:[%s3703_s3 + $0xc0] sm:$0xff] }
  0x15   :  { %227 = vmatprep.mubr.f32.mxu0 %v2417_v3  ;;  %323 = vmatprep.mubr.f32.mxu1 %v2417_v3  ;;  %v779_v18 = vld [vmem:[%s3703_s3 + $0xc8] sm:$0xff]  ;;  %v2744_v19 = vld [vmem:[%s3702_s0 + $0x50] sm:$0xff]  ;;  %v2234_v20 = vpack.c.bf16 %v761_v16, %v760_v15  ;;  %v762_v22 = vld [vmem:[%s3703_s3 + $0x40] sm:$0xff] }
  0x16   :  { %v2236_v21 = vpack.c.bf16 %v779_v18, %v778_v17  ;;  %v763_v24 = vld [vmem:[%s3703_s3 + $0x48] sm:$0xff]  ;;  %v780_v26 = vld [vmem:[%s3703_s3 + $0xd0] sm:$0xff]  ;;  %v781_v27 = vld [vmem:[%s3703_s3 + $0xd8] sm:$0xff] }
  0x17   :  { %v2767_v28 = vld [vmem:[%s3702_s0 + $0x58] sm:$0xff]  ;;  %v2238_v29 = vpack.c.bf16 %v763_v24, %v762_v22  ;;  %v2240_v30 = vpack.c.bf16 %v781_v27, %v780_v26  ;;  %v764_v31 = vld [vmem:[%s3703_s3 + $0x50] sm:$0xff]  ;;  %v782_v35 = vld [vmem:[%s3703_s3 + $0xe0] sm:$0xff] }
  0x18   :  { %1729 = vmatmul.mubr.msk.f32.gmra.mrb[6].mxu0 %vm75_vm0, %v2593_v46  ;;  %1745 = vmatmul.mubr.msk.f32.gmra.mrb[6].mxu1 %vm75_vm0, %v2599_v47  ;;  %v765_v34 = vld [vmem:[%s3703_s3 + $0x58] sm:$0xff]  ;;  %v783_v36 = vld [vmem:[%s3703_s3 + $0xe8] sm:$0xff]  ;;  %v2790_v37 = vld [vmem:[%s3702_s0 + $0x60] sm:$0xff] }
  0x19   :  { %233 = vmatprep.mubr.f32.mxu0 %v2417_v3  ;;  %329 = vmatprep.mubr.f32.mxu1 %v2417_v3  ;;  %v2242_v38 = vpack.c.bf16 %v765_v34, %v764_v31  ;;  %v2244_v39 = vpack.c.bf16 %v783_v36, %v782_v35  ;;  %v766_v40 = vld [vmem:[%s3703_s3 + $0x60] sm:$0xff]  ;;  %v767_v41 = vld [vmem:[%s3703_s3 + $0x68] sm:$0xff]  ;;  %v784_v44 = vld [vmem:[%s3703_s3 + $0xf0] sm:$0xff] }
  0x1a   :  { %v785_v45 = vld [vmem:[%s3703_s3 + $0xf8] sm:$0xff]  ;;  %v2813_v54 = vld [vmem:[%s3702_s0 + $0x68] sm:$0xff]  ;;  %v2246_v55 = vpack.c.bf16 %v767_v41, %v766_v40  ;;  %v768_v57 = vld [vmem:[%s3703_s3 + $0x70] sm:$0xff] }
  0x1b   :  { %v2248_v56 = vpack.c.bf16 %v785_v45, %v784_v44  ;;  %v769_v59 = vld [vmem:[%s3703_s3 + $0x78] sm:$0xff]  ;;  %v2830_v60 = vld [vmem:[%s3702_s0 + $0x70] sm:$0xff]  ;;  %v851_v0 = vld [vmem:[%s3704_s5 + $0x8] sm:$0xff] }
  0x1c   :  { %1730 = vmatmul.mubr.msk.f32.gmra.mrb[8].mxu0 %vm75_vm0, %v2609_v48  ;;  %1746 = vmatmul.mubr.msk.f32.gmra.mrb[8].mxu1 %vm75_vm0, %v2615_v49  ;;  %v2841_v62 = vld [vmem:[%s3702_s0 + $0x78] sm:$0xff]  ;;  %v868_v1 = vld [vmem:[%s3704_s5 + $0x90] sm:$0xff]  ;;  %v870_v9 = vld [vmem:[%s3704_s5 + $0xa0] sm:$0xff] }
  0x1d   :  { %239 = vmatprep.mubr.f32.mxu0 %v2417_v3  ;;  %335 = vmatprep.mubr.f32.mxu1 %v2417_v3  ;;  %v869_v2 = vld [vmem:[%s3704_s5 + $0x98] sm:$0xff]  ;;  %v871_v10 = vld [vmem:[%s3704_s5 + $0xa8] sm:$0xff]  ;;  %v872_v15 = vld [vmem:[%s3704_s5 + $0xb0] sm:$0xff] }
  0x1e   :  { %v853_v8 = vld [vmem:[%s3704_s5 + $0x18] sm:$0xff]  ;;  %v875_v22 = vld [vmem:[%s3704_s5 + $0xc8] sm:$0xff] }
  0x1f   :  { %v873_v16 = vld [vmem:[%s3704_s5 + $0xb8] sm:$0xff]  ;;  %v859_v27 = vld [vmem:[%s3704_s5 + $0x48] sm:$0xff] }
  0x20   :  { %1731 = vmatmul.mubr.msk.f32.gmra.mrb[10].mxu0 %vm75_vm0, %v2625_v50  ;;  %1747 = vmatmul.mubr.msk.f32.gmra.mrb[10].mxu1 %vm75_vm0, %v2631_v51  ;;  %v2328_v18 = vpack.c.bf16 %v873_v16, %v872_v15  ;;  %v877_v34 = vld [vmem:[%s3704_s5 + $0xd8] sm:$0xff]  ;;  %v863_v40 = vld [vmem:[%s3704_s5 + $0x68] sm:$0xff] }
  0x21   :  { %245 = vmatprep.mubr.f32.mxu0 %v2417_v3  ;;  %341 = vmatprep.mubr.f32.mxu1 %v2417_v3  ;;  %v861_v36 = vld [vmem:[%s3704_s5 + $0x58] sm:$0xff] }
  0x22   :  { %v865_v45 = vld [vmem:[%s3704_s5 + $0x78] sm:$0xff] }
  0x24   :  { %1732 = vmatmul.mubr.msk.f32.gmra.mrb[12].mxu0 %vm75_vm0, %v2641_v52  ;;  %1748 = vmatmul.mubr.msk.f32.gmra.mrb[12].mxu1 %vm75_vm0, %v2647_v53 }
  0x25   :  { %251 = vmatprep.mubr.f32.mxu0 %v2417_v3  ;;  %412 = vmatprep.mubr.f32.mxu1 %v2417_v3 }
  0x28   :  { %1733 = vmatmul.mubr.msk.f32.gmra.mrb[14].mxu0 %vm75_vm0, %v2669_v58  ;;  %1749 = vmatmul.mubr.msk.f32.vlgmr.msra.gmra.mrb[14].mxu1 %vm75_vm0, %v2516_v23 }
  0x29   :  { %257 = vmatprep.mubr.f32.mxu0 %v2417_v3  ;;  %418 = vmatprep.mubr.f32.mxu1 %v2417_v3 }
  0x2a   :  { %2223 = vmatpush3.bf16.msra.mxu1 %v2222_v61  ;;  %v2250_v61 = vpack.c.bf16 %v769_v59, %v768_v57 }
  0x2b   :  { %2225 = vmatprep.subr.bf16.mxu1 %v2224_v63  ;;  %v850_v63 = vld [vmem:[%s3704_s5] sm:$0xff] }
  0x2c   :  { %1734 = vmatmul.mubr.msk.f32.gmra.mrb[16].mxu0 %vm75_vm0, %v2698_v5  ;;  %1750 = vmatmul.mubr.msk.f32.gmra.mrb[16].mxu1 %vm75_vm0, %v2542_v32  ;;  %v2318_v4 = vpack.c.bf16 %v851_v0, %v850_v63  ;;  %v807_v63 = vld [vmem:[%s3703_s3 + $0x1a8] sm:$0xff] }
  0x2d   :  { %263 = vmatprep.mubr.f32.mxu0 %v2417_v3  ;;  %424 = vmatprep.mubr.f32.mxu1 %v2417_v3 }
  0x2e   :  { %2227 = vmatpush3.bf16.msra.mxu1 %v2226_v6  ;;  %v2320_v6 = vpack.c.bf16 %v869_v2, %v868_v1 }
  0x2f   :  { %2229 = vmatprep.subr.bf16.mxu1 %v2228_v7  ;;  %v852_v7 = vld [vmem:[%s3704_s5 + $0x10] sm:$0xff] }
  0x30   :  { %1735 = vmatmul.mubr.msk.f32.gmra.mrb[18].mxu0 %vm75_vm0, %v2721_v12  ;;  %1751 = vmatmul.mubr.msk.f32.gmra.mrb[18].mxu1 %vm75_vm0, %v2574_v42  ;;  %v2322_v11 = vpack.c.bf16 %v853_v8, %v852_v7  ;;  %v790_v8 = vld [vmem:[%s3703_s3 + $0x120] sm:$0xff] }
  0x31   :  { %269 = vmatprep.mubr.f32.mxu0 %v2417_v3  ;;  %430 = vmatprep.mubr.f32.mxu1 %v2417_v3 }
  0x32   :  { %2231 = vmatpush3.bf16.msra.mxu1 %v2230_v13  ;;  %v2324_v13 = vpack.c.bf16 %v871_v10, %v870_v9  ;;  %v791_v9 = vld [vmem:[%s3703_s3 + $0x128] sm:$0xff]  ;;  %v808_v10 = vld [vmem:[%s3703_s3 + $0x1b0] sm:$0xff] }
  0x33   :  { %2233 = vmatprep.subr.bf16.mxu1 %v2232_v14  ;;  %v855_v14 = vld [vmem:[%s3704_s5 + $0x28] sm:$0xff] }
  0x34   :  { %1736 = vmatmul.mubr.msk.f32.gmra.mrb[20].mxu0 %vm75_vm0, %v2744_v19  ;;  %1752 = vmatmul.mubr.msk.f32.gmra.mrb[20].mxu1 %vm75_vm0, %v2593_v46 }
  0x35   :  { %275 = vmatprep.mubr.f32.mxu0 %v2417_v3  ;;  %436 = vmatprep.mubr.f32.mxu1 %v2417_v3 }
  0x36   :  { %2235 = vmatpush3.bf16.msra.mxu1 %v2234_v20  ;;  %v857_v20 = vld [vmem:[%s3704_s5 + $0x38] sm:$0xff] }
  0x37   :  { %2237 = vmatprep.subr.bf16.mxu1 %v2236_v21  ;;  %v874_v21 = vld [vmem:[%s3704_s5 + $0xc0] sm:$0xff] }
  0x38   :  { %1737 = vmatmul.mubr.msk.f32.gmra.mrb[22].mxu0 %vm75_vm0, %v2767_v28  ;;  %1753 = vmatmul.mubr.msk.f32.gmra.mrb[22].mxu1 %vm75_vm0, %v2609_v48  ;;  %v2332_v26 = vpack.c.bf16 %v875_v22, %v874_v21  ;;  %v811_v21 = vld [vmem:[%s3703_s3 + $0x1c8] sm:$0xff] }
  0x39   :  { %281 = vmatprep.mubr.f32.mxu0 %v2417_v3  ;;  %442 = vmatprep.mubr.f32.mxu1 %v2417_v3 }
  0x3a   :  { %2239 = vmatpush3.bf16.msra.mxu1 %v2238_v29 }
  0x3b   :  { %2241 = vmatprep.subr.bf16.mxu1 %v2240_v30  ;;  %v803_v30 = vld [vmem:[%s3703_s3 + $0x188] sm:$0xff] }
  0x3c   :  { %1738 = vmatmul.mubr.msk.f32.gmra.mrb[24].mxu0 %vm75_vm0, %v2790_v37  ;;  %1754 = vmatmul.mubr.msk.f32.gmra.mrb[24].mxu1 %vm75_vm0, %v2625_v50 }
  0x3d   :  { %287 = vmatprep.mubr.f32.mxu0 %v2417_v3  ;;  %448 = vmatprep.mubr.f32.mxu1 %v2417_v3 }
  0x3e   :  { %2243 = vmatpush3.bf16.msra.mxu1 %v2242_v38 }
  0x3f   :  { %2245 = vmatprep.subr.bf16.mxu1 %v2244_v39 }
  0x40   :  { %1739 = vmatmul.mubr.msk.f32.gmra.mrb[26].mxu0 %vm75_vm0, %v2813_v54  ;;  %1755 = vmatmul.mubr.msk.f32.gmra.mrb[26].mxu1 %vm75_vm0, %v2641_v52 }
  0x41   :  { %293 = vmatprep.mubr.f32.mxu0 %v2417_v3  ;;  %454 = vmatprep.mubr.f32.mxu1 %v2417_v3 }
  0x42   :  { %2247 = vmatpush3.bf16.msra.mxu1 %v2246_v55 }
  0x43   :  { %2249 = vmatprep.subr.bf16.mxu1 %v2248_v56  ;;  %v931_v56 = vld [vmem:[%s3704_s5 + $0x288] sm:$0xff] }
  0x44   :  { %1740 = vmatmul.mubr.msk.f32.gmra.mrb[28].mxu0 %vm75_vm0, %v2830_v60  ;;  %1756 = vmatmul.mubr.msk.f32.gmra.mrb[28].mxu1 %vm75_vm0, %v2669_v58 }
  0x45   :  { %299 = vmatprep.mubr.f32.mxu0 %v2417_v3  ;;  %460 = vmatprep.mubr.f32.mxu1 %v2417_v3 }
  0x46   :  { %2251 = vmatpush3.bf16.msra.mxu1 %v2250_v61  ;;  %v789_v61 = vld [vmem:[%s3703_s3 + $0x118] sm:$0xff] }
  0x48   :  { %1741 = vmatmul.mubr.msk.f32.gmra.mrb[30].mxu0 %vm75_vm0, %v2841_v62  ;;  %1757 = vmatmul.mubr.msk.f32.gmra.mrb[30].mxu1 %vm75_vm0, %v2698_v5 }
  0x49   :  { %615 = vmatprep.mubr.f32.mxu0 %v2417_v3  ;;  %466 = vmatprep.mubr.f32.mxu1 %v2417_v3 }
  0x4c   :  { %1772 = vmatmul.mubr.msk.f32.vlgmr.msra.gmra.mrb[32].mxu0 %vm75_vm0, %v2516_v23  ;;  %1758 = vmatmul.mubr.msk.f32.gmra.mrb[32].mxu1 %vm75_vm0, %v2721_v12  ;;  %v854_v23 = vld [vmem:[%s3704_s5 + $0x20] sm:$0xff] }
  0x4d   :  { %621 = vmatprep.mubr.f32.mxu0 %v2417_v3  ;;  %472 = vmatprep.mubr.f32.mxu1 %v2417_v3  ;;  %v2326_v17 = vpack.c.bf16 %v855_v14, %v854_v23  ;;  %v2262_v23 = vpack.c.bf16 %v791_v9, %v790_v8 }
  0x4e   :  { %2319 = vmatpush3.bf16.msra.mxu0 %v2318_v4 }
  0x4f   :  { %2321 = vmatprep.subr.bf16.mxu0 %v2320_v6 }
  0x50   :  { %1773 = vmatmul.mubr.msk.f32.gmra.mrb[34].mxu0 %vm75_vm0, %v2542_v32  ;;  %1759 = vmatmul.mubr.msk.f32.gmra.mrb[34].mxu1 %vm75_vm0, %v2744_v19  ;;  %v856_v32 = vld [vmem:[%s3704_s5 + $0x30] sm:$0xff] }
  0x51   :  { %627 = vmatprep.mubr.f32.mxu0 %v2417_v3  ;;  %478 = vmatprep.mubr.f32.mxu1 %v2417_v3  ;;  %v2330_v24 = vpack.c.bf16 %v857_v20, %v856_v32  ;;  %v793_v32 = vld [vmem:[%s3703_s3 + $0x138] sm:$0xff]  ;;  %v810_v20 = vld [vmem:[%s3703_s3 + $0x1c0] sm:$0xff] }
  0x52   :  { %2323 = vmatpush3.bf16.msra.mxu0 %v2322_v11  ;;  %v809_v11 = vld [vmem:[%s3703_s3 + $0x1b8] sm:$0xff] }
  0x53   :  { %2325 = vmatprep.subr.bf16.mxu0 %v2324_v13 }
  0x54   :  { %1774 = vmatmul.mubr.msk.f32.gmra.mrb[36].mxu0 %vm75_vm0, %v2574_v42  ;;  %1760 = vmatmul.mubr.msk.f32.gmra.mrb[36].mxu1 %vm75_vm0, %v2767_v28  ;;  %v858_v42 = vld [vmem:[%s3704_s5 + $0x40] sm:$0xff] }
  0x55   :  { %633 = vmatprep.mubr.f32.mxu0 %v2417_v3  ;;  %484 = vmatprep.mubr.f32.mxu1 %v2417_v3  ;;  %v2334_v29 = vpack.c.bf16 %v859_v27, %v858_v42 }
  0x56   :  { %2327 = vmatpush3.bf16.msra.mxu0 %v2326_v17  ;;  %v2264_v17 = vpack.c.bf16 %v809_v11, %v808_v10 }
  0x57   :  { %2329 = vmatprep.subr.bf16.mxu0 %v2328_v18  ;;  %v792_v18 = vld [vmem:[%s3703_s3 + $0x130] sm:$0xff] }
  0x58   :  { %1775 = vmatmul.mubr.msk.f32.gmra.mrb[38].mxu0 %vm75_vm0, %v2593_v46  ;;  %1761 = vmatmul.mubr.msk.f32.gmra.mrb[38].mxu1 %vm75_vm0, %v2790_v37  ;;  %v802_v46 = vld [vmem:[%s3703_s3 + $0x180] sm:$0xff] }
  0x59   :  { %639 = vmatprep.mubr.f32.mxu0 %v2417_v3  ;;  %490 = vmatprep.mubr.f32.mxu1 %v2417_v3  ;;  %v2252_v31 = vpack.c.bf16 %v803_v30, %v802_v46  ;;  %v794_v46 = vld [vmem:[%s3703_s3 + $0x140] sm:$0xff]  ;;  %v795_v30 = vld [vmem:[%s3703_s3 + $0x148] sm:$0xff] }
  0x5a   :  { %2331 = vmatpush3.bf16.msra.mxu0 %v2330_v24  ;;  %v2266_v24 = vpack.c.bf16 %v793_v32, %v792_v18  ;;  %v837_v32 = vld [vmem:[%s3703_s3 + $0x298] sm:$0xff] }
  0x5b   :  { %2333 = vmatprep.subr.bf16.mxu0 %v2332_v26  ;;  %2253 = vmatprep.subr.bf16.mxu1 %v2252_v31  ;;  %v812_v31 = vld [vmem:[%s3703_s3 + $0x1d0] sm:$0xff] }
  0x5c   :  { %1776 = vmatmul.mubr.msk.f32.gmra.mrb[40].mxu0 %vm75_vm0, %v2609_v48  ;;  %1762 = vmatmul.mubr.msk.f32.gmra.mrb[40].mxu1 %vm75_vm0, %v2813_v54  ;;  %v876_v48 = vld [vmem:[%s3704_s5 + $0xd0] sm:$0xff] }
  0x5d   :  { %645 = vmatprep.mubr.f32.mxu0 %v2417_v3  ;;  %496 = vmatprep.mubr.f32.mxu1 %v2417_v3  ;;  %v2336_v35 = vpack.c.bf16 %v877_v34, %v876_v48  ;;  %v813_v48 = vld [vmem:[%s3703_s3 + $0x1d8] sm:$0xff] }
  0x5e   :  { %2335 = vmatpush3.bf16.msra.mxu0 %v2334_v29  ;;  %v2268_v29 = vpack.c.bf16 %v811_v21, %v810_v20  ;;  %v916_v20 = vld [vmem:[%s3704_s5 + $0x210] sm:$0xff]  ;;  %v917_v21 = vld [vmem:[%s3704_s5 + $0x218] sm:$0xff] }
  0x5f   :  { %2337 = vmatprep.subr.bf16.mxu0 %v2336_v35  ;;  %v2270_v35 = vpack.c.bf16 %v795_v30, %v794_v46 }
  0x60   :  { %1777 = vmatmul.mubr.msk.f32.gmra.mrb[42].mxu0 %vm75_vm0, %v2625_v50  ;;  %1763 = vmatmul.mubr.msk.f32.gmra.mrb[42].mxu1 %vm75_vm0, %v2830_v60  ;;  %v860_v50 = vld [vmem:[%s3704_s5 + $0x50] sm:$0xff] }
  0x61   :  { %651 = vmatprep.mubr.f32.mxu0 %v2417_v3  ;;  %502 = vmatprep.mubr.f32.mxu1 %v2417_v3  ;;  %v2338_v38 = vpack.c.bf16 %v861_v36, %v860_v50 }
  0x63   :  { %2339 = vmatpush3.bf16.msra.mxu0 %v2338_v38 }
  0x64   :  { %1778 = vmatmul.mubr.msk.f32.gmra.mrb[44].mxu0 %vm75_vm0, %v2641_v52  ;;  %1764 = vmatmul.mubr.msk.f32.gmra.mrb[44].mxu1 %vm75_vm0, %v2841_v62  ;;  %v878_v52 = vld [vmem:[%s3704_s5 + $0xe0] sm:$0xff] }
  0x65   :  { %657 = vmatprep.mubr.f32.mxu0 %v2417_v3  ;;  %508 = vmatprep.mubr.f32.mxu1 %v2417_v3 }
  0x68   :  { %1779 = vmatmul.mubr.msk.f32.gmra.mrb[46].mxu0 %vm75_vm0, %v2669_v58  ;;  %1765 = vmatmul.mubr.msk.f32.gmra.mrb[46].mxu1 %vm75_vm0, %v2521_v25  ;;  %v879_v58 = vld [vmem:[%s3704_s5 + $0xe8] sm:$0xff] }
  0x69   :  { %663 = vmatprep.mubr.f32.mxu0 %v2417_v3  ;;  %514 = vmatprep.mubr.f32.mxu1 %v2417_v3  ;;  %v2340_v39 = vpack.c.bf16 %v879_v58, %v878_v52  ;;  %v2272_v52 = vpack.c.bf16 %v813_v48, %v812_v31  ;;  %v796_v58 = vld [vmem:[%s3703_s3 + $0x150] sm:$0xff] }
  0x6b   :  { %2341 = vmatprep.subr.bf16.mxu0 %v2340_v39  ;;  %v797_v39 = vld [vmem:[%s3703_s3 + $0x158] sm:$0xff] }
  0x6c   :  { %1780 = vmatmul.mubr.msk.f32.gmra.mrb[48].mxu0 %vm75_vm0, %v2698_v5  ;;  %1766 = vmatmul.mubr.msk.f32.gmra.mrb[48].mxu1 %vm75_vm0, %v2547_v33  ;;  %v862_v5 = vld [vmem:[%s3704_s5 + $0x60] sm:$0xff] }
  0x6d   :  { %669 = vmatprep.mubr.f32.mxu0 %v2417_v3  ;;  %520 = vmatprep.mubr.f32.mxu1 %v2417_v3  ;;  %v2342_v41 = vpack.c.bf16 %v863_v40, %v862_v5  ;;  %v814_v5 = vld [vmem:[%s3703_s3 + $0x1e0] sm:$0xff]  ;;  %v815_v40 = vld [vmem:[%s3703_s3 + $0x1e8] sm:$0xff] }
  0x6f   :  { %2343 = vmatpush3.bf16.msra.mxu0 %v2342_v41 }
  0x70   :  { %1781 = vmatmul.mubr.msk.f32.gmra.mrb[50].mxu0 %vm75_vm0, %v2721_v12  ;;  %1767 = vmatmul.mubr.msk.f32.gmra.mrb[50].mxu1 %vm75_vm0, %v2580_v43  ;;  %v880_v12 = vld [vmem:[%s3704_s5 + $0xf0] sm:$0xff] }
  0x71   :  { %675 = vmatprep.mubr.f32.mxu0 %v2417_v3  ;;  %526 = vmatprep.mubr.f32.mxu1 %v2417_v3 }
  0x74   :  { %1782 = vmatmul.mubr.msk.f32.gmra.mrb[52].mxu0 %vm75_vm0, %v2744_v19  ;;  %1768 = vmatmul.mubr.msk.f32.gmra.mrb[52].mxu1 %vm75_vm0, %v2599_v47  ;;  %v881_v19 = vld [vmem:[%s3704_s5 + $0xf8] sm:$0xff] }
  0x75   :  { %681 = vmatprep.mubr.f32.mxu0 %v2417_v3  ;;  %532 = vmatprep.mubr.f32.mxu1 %v2417_v3  ;;  %v2344_v44 = vpack.c.bf16 %v881_v19, %v880_v12  ;;  %v2274_v12 = vpack.c.bf16 %v797_v39, %v796_v58  ;;  %v839_v58 = vld [vmem:[%s3703_s3 + $0x2a8] sm:$0xff] }
  0x77   :  { %2345 = vmatprep.subr.bf16.mxu0 %v2344_v44 }
  0x78   :  { %1783 = vmatmul.mubr.msk.f32.gmra.mrb[54].mxu0 %vm75_vm0, %v2767_v28  ;;  %1769 = vmatmul.mubr.msk.f32.gmra.mrb[54].mxu1 %vm75_vm0, %v2615_v49  ;;  %v864_v28 = vld [vmem:[%s3704_s5 + $0x70] sm:$0xff] }
  0x79   :  { %687 = vmatprep.mubr.f32.mxu0 %v2417_v3  ;;  %538 = vmatprep.mubr.f32.mxu1 %v2417_v3  ;;  %v2346_v55 = vpack.c.bf16 %v865_v45, %v864_v28  ;;  %v2276_v45 = vpack.c.bf16 %v815_v40, %v814_v5  ;;  %v918_v5 = vld [vmem:[%s3704_s5 + $0x220] sm:$0xff]  ;;  %v919_v40 = vld [vmem:[%s3704_s5 + $0x228] sm:$0xff] }
  0x7b   :  { %2347 = vmatpush3.bf16.msra.mxu0 %v2346_v55  ;;  %v798_v55 = vld [vmem:[%s3703_s3 + $0x160] sm:$0xff] }
  0x7c   :  { %1784 = vmatmul.mubr.msk.f32.gmra.mrb[56].mxu0 %vm75_vm0, %v2790_v37  ;;  %1770 = vmatmul.mubr.msk.f32.gmra.mrb[56].mxu1 %vm75_vm0, %v2631_v51  ;;  %v930_v37 = vld [vmem:[%s3704_s5 + $0x280] sm:$0xff] }
  0x7d   :  { %693 = vmatprep.mubr.f32.mxu0 %v2417_v3  ;;  %544 = vmatprep.mubr.f32.mxu1 %v2417_v3  ;;  %v2380_v57 = vpack.c.bf16 %v931_v56, %v930_v37  ;;  %v799_v37 = vld [vmem:[%s3703_s3 + $0x168] sm:$0xff]  ;;  %v816_v56 = vld [vmem:[%s3703_s3 + $0x1f0] sm:$0xff] }
  0x7f   :  { %2381 = vmatprep.subr.bf16.mxu0 %v2380_v57  ;;  %v817_v57 = vld [vmem:[%s3703_s3 + $0x1f8] sm:$0xff] }
  0x80   :  { %1785 = vmatmul.mubr.msk.f32.gmra.mrb[58].mxu0 %vm75_vm0, %v2813_v54  ;;  %1771 = vmatmul.mubr.msk.f32.gmra.mrb[58].mxu1 %vm75_vm0, %v2647_v53 }
  0x81   :  { %699 = vmatprep.mubr.f32.mxu0 %v2417_v3 }
  0x84   :  { %1786 = vmatmul.mubr.msk.f32.gmra.mrb[60].mxu0 %vm75_vm0, %v2830_v60  ;;  %v788_v60 = vld [vmem:[%s3703_s3 + $0x110] sm:$0xff] }
  0x85   :  { %705 = vmatprep.mubr.f32.mxu0 %v2417_v3  ;;  %v2258_v1 = vpack.c.bf16 %v789_v61, %v788_v60  ;;  %v834_v60 = vld [vmem:[%s3703_s3 + $0x280] sm:$0xff] }
  0x86   :  { %v914_v61 = vld [vmem:[%s3704_s5 + $0x200] sm:$0xff] }
  0x88   :  { %1787 = vmatmul.mubr.msk.f32.gmra.mrb[62].mxu0 %vm75_vm0, %v2841_v62  ;;  %v806_v62 = vld [vmem:[%s3703_s3 + $0x1a0] sm:$0xff] }
  0x89   :  { %711 = vmatprep.mubr.f32.mxu0 %v2417_v3  ;;  %v2260_v7 = vpack.c.bf16 %v807_v63, %v806_v62  ;;  %v915_v62 = vld [vmem:[%s3704_s5 + $0x208] sm:$0xff] }
  0x8a   :  { %v835_v63 = vld [vmem:[%s3703_s3 + $0x288] sm:$0xff]  ;;  %v2382_v9 = vpack.c.bf16 %v915_v62, %v914_v61  ;;  %v921_v61 = vld [vmem:[%s3704_s5 + $0x238] sm:$0xff]  ;;  %v938_v62 = vld [vmem:[%s3704_s5 + $0x2c0] sm:$0xff] }
  0x8c   :  { %1788 = vmatmul.mubr.msk.f32.gmra.mrb[64].mxu0 %vm75_vm0, %v2521_v25  ;;  %v786_v25 = vld [vmem:[%s3703_s3 + $0x100] sm:$0xff] }
  0x8d   :  { %717 = vmatprep.mubr.f32.mxu0 %v2417_v3 }
  0x90   :  { %1789 = vmatmul.mubr.msk.f32.gmra.mrb[66].mxu0 %vm75_vm0, %v2547_v33  ;;  %v787_v33 = vld [vmem:[%s3703_s3 + $0x108] sm:$0xff] }
  0x91   :  { %723 = vmatprep.mubr.f32.mxu0 %v2417_v3 }
  0x94   :  { %1790 = vmatmul.mubr.msk.f32.gmra.mrb[68].mxu0 %vm75_vm0, %v2580_v43  ;;  %v804_v43 = vld [vmem:[%s3703_s3 + $0x190] sm:$0xff] }
  0x95   :  { %729 = vmatprep.mubr.f32.mxu0 %v2417_v3 }
  0x98   :  { %1791 = vmatmul.mubr.msk.f32.gmra.mrb[70].mxu0 %vm75_vm0, %v2599_v47  ;;  %v805_v47 = vld [vmem:[%s3703_s3 + $0x198] sm:$0xff] }
  0x99   :  { %735 = vmatprep.mubr.f32.mxu0 %v2417_v3  ;;  %v2256_v59 = vpack.c.bf16 %v805_v47, %v804_v43  ;;  %v800_v47 = vld [vmem:[%s3703_s3 + $0x170] sm:$0xff] }
  0x9c   :  { %1792 = vmatmul.mubr.msk.f32.gmra.mrb[72].mxu0 %vm75_vm0, %v2615_v49  ;;  %v2254_v49 = vpack.c.bf16 %v787_v33, %v786_v25  ;;  %v2278_v33 = vpack.c.bf16 %v799_v37, %v798_v55 }
  0x9d   :  { %741 = vmatprep.mubr.f32.mxu0 %v2417_v3 }
  0xa0   :  { %1793 = vmatmul.mubr.msk.f32.gmra.mrb[74].mxu0 %vm75_vm0, %v2631_v51 }
  0xa1   :  { %747 = vmatprep.mubr.f32.mxu0 %v2417_v3 }
  0xa4   :  { %1794 = vmatmul.mubr.msk.f32.gmra.mrb[76].mxu0 %vm75_vm0, %v2647_v53 }
  0xdf   :  { %v211_v3 = vpop.f32.mrb[0].mxu0  ;;  %v3073_v51 = vpop.f32.mrb[0].mxu1 }
  0xe0   :  { %v213_v53 = vpop.f32.mrb[1].mxu0  ;;  %v3075_v54 = vpop.f32.mrb[1].mxu1 }
  0xe1   :  { %1017 = vmatprep.mubr.f32.mxu1 %v213_v53 }
  0xe2   :  { %1018 = vmatmul.mubr.f32.vlgmr.msra.gmra.mrb[60].mxu1 %v211_v3  ;;  %v801_v3 = vld [vmem:[%s3703_s3 + $0x178] sm:$0xff] }
  0xe3   :  { %2255 = vmatpush3.bf16.msra.mxu1 %v2254_v49  ;;  %v217_v0 = vpop.f32.mrb[2].mxu0  ;;  %v3089_v2 = vpop.f32.mrb[2].mxu1  ;;  %v2282_v8 = vpack.c.bf16 %v801_v3, %v800_v47  ;;  %v840_v47 = vld [vmem:[%s3703_s3 + $0x2b0] sm:$0xff]  ;;  %v2390_v3 = vpack.c.bf16 %v919_v40, %v918_v5  ;;  %v942_v5 = vld [vmem:[%s3704_s5 + $0x2e0] sm:$0xff]  ;;  %v943_v40 = vld [vmem:[%s3704_s5 + $0x2e8] sm:$0xff] }
  0xe4   :  { %v219_v4 = vpop.f32.mrb[3].mxu0  ;;  %2257 = vmatprep.subr.bf16.mxu1 %v2256_v59  ;;  %v3091_v6 = vpop.f32.mrb[3].mxu1  ;;  %v2280_v59 = vpack.c.bf16 %v817_v57, %v816_v56 }
  0xe5   :  { %1022 = vmatprep.mubr.f32.mxu1 %v219_v4 }
  0xe6   :  { %1023 = vmatmul.mubr.f32.gmra.mrb[62].mxu1 %v217_v0  ;;  %v932_v0 = vld [vmem:[%s3704_s5 + $0x290] sm:$0xff] }
  0xe7   :  { %2259 = vmatpush3.bf16.msra.mxu1 %v2258_v1  ;;  %v223_v13 = vpop.f32.mrb[4].mxu0  ;;  %v3105_v14 = vpop.f32.mrb[4].mxu1  ;;  %v933_v1 = vld [vmem:[%s3704_s5 + $0x298] sm:$0xff] }
  0xe8   :  { %v225_v15 = vpop.f32.mrb[5].mxu0  ;;  %2261 = vmatprep.subr.bf16.mxu1 %v2260_v7  ;;  %v3107_v16 = vpop.f32.mrb[5].mxu1  ;;  %v2384_v18 = vpack.c.bf16 %v933_v1, %v932_v0 }
  0xe9   :  { %1027 = vmatprep.mubr.f32.mxu1 %v225_v15  ;;  %v819_v15 = vld [vmem:[%s3703_s3 + $0x208] sm:$0xff] }
  0xea   :  { %1028 = vmatmul.mubr.f32.gmra.mrb[64].mxu1 %v223_v13  ;;  %v2284_v13 = vpack.c.bf16 %v835_v63, %v834_v60  ;;  %v920_v60 = vld [vmem:[%s3704_s5 + $0x230] sm:$0xff]  ;;  %v939_v63 = vld [vmem:[%s3704_s5 + $0x2c8] sm:$0xff] }
  0xeb   :  { %2263 = vmatpush3.bf16.msra.mxu1 %v2262_v23  ;;  %v229_v22 = vpop.f32.mrb[6].mxu0  ;;  %v3121_v26 = vpop.f32.mrb[6].mxu1  ;;  %v818_v23 = vld [vmem:[%s3703_s3 + $0x200] sm:$0xff] }
  0xec   :  { %v231_v42 = vpop.f32.mrb[7].mxu0  ;;  %2265 = vmatprep.subr.bf16.mxu1 %v2264_v17  ;;  %v3123_v27 = vpop.f32.mrb[7].mxu1  ;;  %v836_v17 = vld [vmem:[%s3703_s3 + $0x290] sm:$0xff]  ;;  %v2286_v46 = vpack.c.bf16 %v819_v15, %v818_v23  ;;  %v2394_v23 = vpack.c.bf16 %v921_v61, %v920_v60  ;;  %v843_v15 = vld [vmem:[%s3703_s3 + $0x2c8] sm:$0xff]  ;;  %v945_v61 = vld [vmem:[%s3704_s5 + $0x2f8] sm:$0xff] }
  0xed   :  { %1032 = vmatprep.mubr.f32.mxu1 %v231_v42  ;;  %v2288_v48 = vpack.c.bf16 %v837_v32, %v836_v17  ;;  %v2396_v17 = vpack.c.bf16 %v939_v63, %v938_v62  ;;  %v923_v32 = vld [vmem:[%s3704_s5 + $0x248] sm:$0xff]  ;;  %v944_v60 = vld [vmem:[%s3704_s5 + $0x2f0] sm:$0xff] }
  0xee   :  { %1033 = vmatmul.mubr.f32.gmra.mrb[66].mxu1 %v229_v22  ;;  %v934_v22 = vld [vmem:[%s3704_s5 + $0x2a0] sm:$0xff] }
  0xef   :  { %2267 = vmatpush3.bf16.msra.mxu1 %v2266_v24  ;;  %v235_v34 = vpop.f32.mrb[8].mxu0  ;;  %v3137_v50 = vpop.f32.mrb[8].mxu1  ;;  %v935_v24 = vld [vmem:[%s3704_s5 + $0x2a8] sm:$0xff] }
  0xf0   :  { %v237_v36 = vpop.f32.mrb[9].mxu0  ;;  %2269 = vmatprep.subr.bf16.mxu1 %v2268_v29  ;;  %v3139_v38 = vpop.f32.mrb[9].mxu1  ;;  %v2388_v39 = vpack.c.bf16 %v935_v24, %v934_v22 }
  0xf1   :  { %1037 = vmatprep.mubr.f32.mxu1 %v237_v36  ;;  %v838_v36 = vld [vmem:[%s3703_s3 + $0x2a0] sm:$0xff] }
  0xf2   :  { %1038 = vmatmul.mubr.f32.gmra.mrb[68].mxu1 %v235_v34  ;;  %v820_v34 = vld [vmem:[%s3703_s3 + $0x210] sm:$0xff]  ;;  %v2292_v57 = vpack.c.bf16 %v839_v58, %v838_v36  ;;  %v845_v36 = vld [vmem:[%s3703_s3 + $0x2d8] sm:$0xff] }
  0xf3   :  { %2271 = vmatpush3.bf16.msra.mxu1 %v2270_v35  ;;  %v241_v41 = vpop.f32.mrb[10].mxu0  ;;  %v3153_v19 = vpop.f32.mrb[10].mxu1  ;;  %v821_v35 = vld [vmem:[%s3703_s3 + $0x218] sm:$0xff]  ;;  %v924_v58 = vld [vmem:[%s3704_s5 + $0x250] sm:$0xff] }
  0xf4   :  { %v243_v44 = vpop.f32.mrb[11].mxu0  ;;  %2273 = vmatprep.subr.bf16.mxu1 %v2272_v52  ;;  %v3155_v28 = vpop.f32.mrb[11].mxu1  ;;  %v2386_v52 = vpack.c.bf16 %v917_v21, %v916_v20  ;;  %v2290_v55 = vpack.c.bf16 %v821_v35, %v820_v34  ;;  %v940_v20 = vld [vmem:[%s3704_s5 + $0x2d0] sm:$0xff]  ;;  %v941_v21 = vld [vmem:[%s3704_s5 + $0x2d8] sm:$0xff] }
  0xf5   :  { %1042 = vmatprep.mubr.f32.mxu1 %v243_v44  ;;  %v844_v34 = vld [vmem:[%s3703_s3 + $0x2d0] sm:$0xff] }
  0xf6   :  { %1043 = vmatmul.mubr.f32.gmra.mrb[70].mxu1 %v241_v41  ;;  %v936_v41 = vld [vmem:[%s3704_s5 + $0x2b0] sm:$0xff] }
  0xf7   :  { %2275 = vmatpush3.bf16.msra.mxu1 %v2274_v12  ;;  %v247_v25 = vpop.f32.mrb[12].mxu0  ;;  %v3169_v43 = vpop.f32.mrb[12].mxu1  ;;  %v937_v12 = vld [vmem:[%s3704_s5 + $0x2b8] sm:$0xff] }
  0xf8   :  { %v249_v49 = vpop.f32.mrb[13].mxu0  ;;  %2277 = vmatprep.subr.bf16.mxu1 %v2276_v45  ;;  %v3177_v53 = vpop.f32.mrb[13].mxu1 }
  0xf9   :  { %1047 = vmatprep.mubr.f32.mxu1 %v249_v49  ;;  %v841_v49 = vld [vmem:[%s3703_s3 + $0x2b8] sm:$0xff] }
  0xfa   :  { %1048 = vmatmul.mubr.f32.gmra.mrb[72].mxu1 %v247_v25  ;;  %v822_v25 = vld [vmem:[%s3703_s3 + $0x220] sm:$0xff] }
  0xfb   :  { %2279 = vmatpush3.bf16.msra.mxu1 %v2278_v33  ;;  %v253_v4 = vpop.f32.mrb[14].mxu0  ;;  %v414_v7 = vpop.f32.mrb[14].mxu1  ;;  %v823_v33 = vld [vmem:[%s3703_s3 + $0x228] sm:$0xff] }
  0xfc   :  { %v255_v10 = vpop.f32.mrb[15].mxu0  ;;  %2281 = vmatprep.subr.bf16.mxu1 %v2280_v59  ;;  %v416_v11 = vpop.f32.mrb[15].mxu1  ;;  %v2392_v59 = vpack.c.bf16 %v937_v12, %v936_v41 }
  0xfd   :  { %1331 = vmatprep.mubr.f32.mxu0 %v255_v10  ;;  %1117 = vmatprep.mubr.f32.mxu1 %v416_v11  ;;  %v824_v10 = vld [vmem:[%s3703_s3 + $0x230] sm:$0xff]  ;;  %v825_v11 = vld [vmem:[%s3703_s3 + $0x238] sm:$0xff] }
  0xfe   :  { %1332 = vmatmul.mubr.f32.vlgmr.msra.gmra.mrb[78].mxu0 %v253_v4  ;;  %v2294_v4 = vpack.c.bf16 %v823_v33, %v822_v25  ;;  %v846_v25 = vld [vmem:[%s3703_s3 + $0x2e0] sm:$0xff] }
  0xff   :  { %2283 = vmatpush3.bf16.msra.mxu1 %v2282_v8  ;;  %v259_v42 = vpop.f32.mrb[16].mxu0  ;;  %v420_v29 = vpop.f32.mrb[16].mxu1  ;;  %2383 = vmatpush3.bf16.msra.mxu0 %v2382_v9  ;;  %v2296_v9 = vpack.c.bf16 %v841_v49, %v840_v47  ;;  %v847_v47 = vld [vmem:[%s3703_s3 + $0x2e8] sm:$0xff]  ;;  %v926_v49 = vld [vmem:[%s3704_s5 + $0x260] sm:$0xff] }
 0x100   :  { %v261_v30 = vpop.f32.mrb[17].mxu0  ;;  %2285 = vmatprep.subr.bf16.mxu1 %v2284_v13  ;;  %v422_v31 = vpop.f32.mrb[17].mxu1  ;;  %2385 = vmatprep.subr.bf16.mxu0 %v2384_v18  ;;  %v842_v13 = vld [vmem:[%s3703_s3 + $0x2c0] sm:$0xff] }
 0x101   :  { %1336 = vmatprep.mubr.f32.mxu0 %v261_v30  ;;  %v922_v18 = vld [vmem:[%s3704_s5 + $0x240] sm:$0xff]  ;;  %v2300_v30 = vpack.c.bf16 %v843_v15, %v842_v13  ;;  %v849_v13 = vld [vmem:[%s3703_s3 + $0x2f8] sm:$0xff]  ;;  %v928_v15 = vld [vmem:[%s3704_s5 + $0x270] sm:$0xff] }
 0x102   :  { %1118 = vmatmul.mubr.f32.vlgmr.msra.gmra.mrb[74].mxu1 %v414_v7  ;;  %1337 = vmatmul.mubr.f32.gmra.mrb[80].mxu0 %v259_v42  ;;  %v2298_v42 = vpack.c.bf16 %v825_v11, %v824_v10  ;;  %v2398_v35 = vpack.c.bf16 %v923_v32, %v922_v18  ;;  %v848_v10 = vld [vmem:[%s3703_s3 + $0x2f0] sm:$0xff] }
 0x103   :  { %2287 = vmatpush3.bf16.msra.mxu1 %v2286_v46  ;;  %v265_v44 = vpop.f32.mrb[18].mxu0  ;;  %1122 = vmatprep.mubr.f32.mxu1 %v422_v31  ;;  %v426_v45 = vpop.f32.mrb[18].mxu1  ;;  %v826_v31 = vld [vmem:[%s3703_s3 + $0x240] sm:$0xff] }
 0x104   :  { %v267_v37 = vpop.f32.mrb[19].mxu0  ;;  %2289 = vmatprep.subr.bf16.mxu1 %v2288_v48  ;;  %v428_v56 = vpop.f32.mrb[19].mxu1  ;;  %2387 = vmatpush3.bf16.msra.mxu0 %v2386_v52  ;;  %v827_v48 = vld [vmem:[%s3703_s3 + $0x248] sm:$0xff]  ;;  %v2400_v52 = vpack.c.bf16 %v941_v21, %v940_v20 }
 0x105   :  { %1341 = vmatprep.mubr.f32.mxu0 %v267_v37  ;;  %2389 = vmatprep.subr.bf16.mxu0 %v2388_v39  ;;  %v925_v39 = vld [vmem:[%s3704_s5 + $0x258] sm:$0xff]  ;;  %v2304_v37 = vpack.c.bf16 %v845_v36, %v844_v34 }
 0x106   :  { %1123 = vmatmul.mubr.f32.gmra.mrb[76].mxu1 %v420_v29  ;;  %1342 = vmatmul.mubr.f32.gmra.mrb[82].mxu0 %v265_v44  ;;  %v2302_v44 = vpack.c.bf16 %v827_v48, %v826_v31  ;;  %v2402_v33 = vpack.c.bf16 %v925_v39, %v924_v58  ;;  %v899_v31 = vld [vmem:[%s3704_s5 + $0x188] sm:$0xff]  ;;  %v882_v58 = vld [vmem:[%s3704_s5 + $0x100] sm:$0xff] }
 0x107   :  { %2291 = vmatpush3.bf16.msra.mxu1 %v2290_v55  ;;  %v271_v0 = vpop.f32.mrb[20].mxu0  ;;  %1127 = vmatprep.mubr.f32.mxu1 %v428_v56  ;;  %v432_v1 = vpop.f32.mrb[20].mxu1  ;;  %v828_v56 = vld [vmem:[%s3703_s3 + $0x250] sm:$0xff]  ;;  %v883_v39 = vld [vmem:[%s3704_s5 + $0x108] sm:$0xff] }
 0x108   :  { %v273_v7 = vpop.f32.mrb[21].mxu0  ;;  %2293 = vmatprep.subr.bf16.mxu1 %v2292_v57  ;;  %v434_v8 = vpop.f32.mrb[21].mxu1  ;;  %2391 = vmatpush3.bf16.msra.mxu0 %v2390_v3  ;;  %v829_v57 = vld [vmem:[%s3703_s3 + $0x258] sm:$0xff]  ;;  %v2404_v3 = vpack.c.bf16 %v943_v40, %v942_v5  ;;  %v900_v40 = vld [vmem:[%s3704_s5 + $0x190] sm:$0xff] }
 0x109   :  { %1346 = vmatprep.mubr.f32.mxu0 %v273_v7  ;;  %2393 = vmatprep.subr.bf16.mxu0 %v2392_v59  ;;  %v927_v59 = vld [vmem:[%s3704_s5 + $0x268] sm:$0xff]  ;;  %v2308_v7 = vpack.c.bf16 %v847_v47, %v846_v25 }
 0x10a   :  { %1128 = vmatmul.mubr.f32.gmra.mrb[78].mxu1 %v426_v45  ;;  %1347 = vmatmul.mubr.f32.gmra.mrb[84].mxu0 %v271_v0  ;;  %v2306_v0 = vpack.c.bf16 %v829_v57, %v828_v56  ;;  %v2406_v11 = vpack.c.bf16 %v927_v59, %v926_v49  ;;  %v884_v56 = vld [vmem:[%s3704_s5 + $0x110] sm:$0xff]  ;;  %v885_v57 = vld [vmem:[%s3704_s5 + $0x118] sm:$0xff] }
 0x10b   :  { %2295 = vmatpush3.bf16.msra.mxu1 %v2294_v4  ;;  %v277_v22 = vpop.f32.mrb[22].mxu0  ;;  %1132 = vmatprep.mubr.f32.mxu1 %v434_v8  ;;  %v438_v24 = vpop.f32.mrb[22].mxu1  ;;  %v830_v8 = vld [vmem:[%s3703_s3 + $0x260] sm:$0xff] }
 0x10c   :  { %v279_v29 = vpop.f32.mrb[23].mxu0  ;;  %2297 = vmatprep.subr.bf16.mxu1 %v2296_v9  ;;  %v440_v46 = vpop.f32.mrb[23].mxu1  ;;  %2395 = vmatpush3.bf16.msra.mxu0 %v2394_v23  ;;  %v831_v9 = vld [vmem:[%s3703_s3 + $0x268] sm:$0xff]  ;;  %v2408_v23 = vpack.c.bf16 %v945_v61, %v944_v60  ;;  %v886_v61 = vld [vmem:[%s3704_s5 + $0x120] sm:$0xff] }
 0x10d   :  { %1351 = vmatprep.mubr.f32.mxu0 %v279_v29  ;;  %2397 = vmatprep.subr.bf16.mxu0 %v2396_v17  ;;  %v929_v17 = vld [vmem:[%s3704_s5 + $0x278] sm:$0xff]  ;;  %v2310_v32 = vpack.c.bf16 %v831_v9, %v830_v8  ;;  %v888_v9 = vld [vmem:[%s3704_s5 + $0x130] sm:$0xff] }
 0x10e   :  { %1133 = vmatmul.mubr.f32.gmra.mrb[80].mxu1 %v432_v1  ;;  %1352 = vmatmul.mubr.f32.gmra.mrb[86].mxu0 %v277_v22  ;;  %v2312_v22 = vpack.c.bf16 %v849_v13, %v848_v10  ;;  %v2410_v29 = vpack.c.bf16 %v929_v17, %v928_v15  ;;  %v889_v10 = vld [vmem:[%s3704_s5 + $0x138] sm:$0xff] }
 0x10f   :  { %2299 = vmatpush3.bf16.msra.mxu1 %v2298_v42  ;;  %v283_v41 = vpop.f32.mrb[24].mxu0  ;;  %1137 = vmatprep.mubr.f32.mxu1 %v440_v46  ;;  %v444_v12 = vpop.f32.mrb[24].mxu1  ;;  %v833_v42 = vld [vmem:[%s3703_s3 + $0x278] sm:$0xff] }
 0x110   :  { %v285_v45 = vpop.f32.mrb[25].mxu0  ;;  %2301 = vmatprep.subr.bf16.mxu1 %v2300_v30  ;;  %v446_v55 = vpop.f32.mrb[25].mxu1  ;;  %2399 = vmatpush3.bf16.msra.mxu0 %v2398_v35  ;;  %v898_v30 = vld [vmem:[%s3704_s5 + $0x180] sm:$0xff] }
 0x111   :  { %1356 = vmatprep.mubr.f32.mxu0 %v285_v45  ;;  %2401 = vmatprep.subr.bf16.mxu0 %v2400_v52  ;;  %v2348_v52 = vpack.c.bf16 %v899_v31, %v898_v30 }
 0x112   :  { %1138 = vmatmul.mubr.f32.gmra.mrb[82].mxu1 %v438_v24  ;;  %1357 = vmatmul.mubr.f32.gmra.mrb[88].mxu0 %v283_v41  ;;  %v832_v24 = vld [vmem:[%s3703_s3 + $0x270] sm:$0xff]  ;;  %v901_v41 = vld [vmem:[%s3704_s5 + $0x198] sm:$0xff] }
 0x113   :  { %2303 = vmatpush3.bf16.msra.mxu1 %v2302_v44  ;;  %v289_v62 = vpop.f32.mrb[26].mxu0  ;;  %1142 = vmatprep.mubr.f32.mxu1 %v446_v55  ;;  %v450_v63 = vpop.f32.mrb[26].mxu1  ;;  %v2314_v34 = vpack.c.bf16 %v833_v42, %v832_v24  ;;  %v2350_v44 = vpack.c.bf16 %v883_v39, %v882_v58 }
 0x114   :  { %v291_v1 = vpop.f32.mrb[27].mxu0  ;;  %2305 = vmatprep.subr.bf16.mxu1 %v2304_v37  ;;  %v452_v4 = vpop.f32.mrb[27].mxu1  ;;  %2403 = vmatpush3.bf16.msra.mxu0 %v2402_v33  ;;  %v2352_v37 = vpack.c.bf16 %v901_v41, %v900_v40  ;;  %v903_v33 = vld [vmem:[%s3704_s5 + $0x1a8] sm:$0xff] }
 0x115   :  { %1361 = vmatprep.mubr.f32.mxu0 %v291_v1  ;;  %2405 = vmatprep.subr.bf16.mxu0 %v2404_v3  ;;  %v2354_v3 = vpack.c.bf16 %v885_v57, %v884_v56 }
 0x116   :  { %1143 = vmatmul.mubr.f32.gmra.mrb[84].mxu1 %v444_v12  ;;  %1362 = vmatmul.mubr.f32.gmra.mrb[90].mxu0 %v289_v62  ;;  %v887_v62 = vld [vmem:[%s3704_s5 + $0x128] sm:$0xff] }
 0x117   :  { %2307 = vmatpush3.bf16.msra.mxu1 %v2306_v0  ;;  %v295_v18 = vpop.f32.mrb[28].mxu0  ;;  %1147 = vmatprep.mubr.f32.mxu1 %v452_v4  ;;  %v3359_v20 = vpop.f32.mrb[28].mxu1  ;;  %v2358_v1 = vpack.c.bf16 %v887_v62, %v886_v61 }
 0x118   :  { %v297_v21 = vpop.f32.mrb[29].mxu0  ;;  %2309 = vmatprep.subr.bf16.mxu1 %v2308_v7  ;;  %2407 = vmatpush3.bf16.msra.mxu0 %v2406_v11  ;;  %v3367_v46 = vpop.f32.mrb[29].mxu1 }
 0x119   :  { %1366 = vmatprep.mubr.f32.mxu0 %v297_v21  ;;  %2409 = vmatprep.subr.bf16.mxu0 %v2408_v23  ;;  %v2362_v23 = vpack.c.bf16 %v889_v10, %v888_v9  ;;  %v891_v21 = vld [vmem:[%s3704_s5 + $0x148] sm:$0xff] }
 0x11a   :  { %1148 = vmatmul.mubr.f32.gmra.mrb[86].mxu1 %v450_v63  ;;  %1367 = vmatmul.mubr.f32.gmra.mrb[92].mxu0 %v295_v18 }
 0x11b   :  { %2311 = vmatpush3.bf16.msra.mxu1 %v2310_v32  ;;  %v301_v48 = vpop.f32.mrb[30].mxu0  ;;  %v3375_v35 = vpop.f32.mrb[30].mxu1  ;;  %v890_v32 = vld [vmem:[%s3704_s5 + $0x140] sm:$0xff] }
 0x11c   :  { %v303_v36 = vpop.f32.mrb[31].mxu0  ;;  %2313 = vmatprep.subr.bf16.mxu1 %v2312_v22  ;;  %2411 = vmatpush3.bf16.msra.mxu0 %v2410_v29  ;;  %v3383_v5 = vpop.f32.mrb[31].mxu1  ;;  %v2366_v42 = vpack.c.bf16 %v891_v21, %v890_v32 }
 0x11d   :  { %1371 = vmatprep.mubr.f32.mxu0 %v303_v36 }
 0x11e   :  { %1372 = vmatmul.mubr.f32.gmra.mrb[94].mxu0 %v301_v48  ;;  %v892_v48 = vld [vmem:[%s3704_s5 + $0x150] sm:$0xff] }
 0x11f   :  { %2315 = vmatpush3.bf16.msra.mxu1 %v2314_v34  ;;  %v617_v12 = vpop.f32.mrb[32].mxu0  ;;  %1376 = vmatprep.mubr.f32.mxu0 %v3075_v54  ;;  %v3392_v45 = vpop.f32.mrb[32].mxu1  ;;  %v902_v54 = vld [vmem:[%s3704_s5 + $0x1a0] sm:$0xff]  ;;  %v893_v34 = vld [vmem:[%s3704_s5 + $0x158] sm:$0xff] }
 0x120   :  { %v619_v55 = vpop.f32.mrb[33].mxu0  ;;  %2349 = vmatprep.subr.bf16.mxu1 %v2348_v52  ;;  %v3400_v25 = vpop.f32.mrb[33].mxu1  ;;  %v2356_v60 = vpack.c.bf16 %v903_v33, %v902_v54  ;;  %v2370_v58 = vpack.c.bf16 %v893_v34, %v892_v48 }
 0x121   :  { %1217 = vmatprep.mubr.f32.mxu1 %v619_v55 }
 0x122   :  { %1218 = vmatmul.mubr.f32.vlgmr.msra.gmra.mrb[88].mxu1 %v617_v12  ;;  %1377 = vmatmul.mubr.f32.gmra.mrb[96].mxu0 %v3073_v51  ;;  %v904_v51 = vld [vmem:[%s3704_s5 + $0x1b0] sm:$0xff]  ;;  %v894_v12 = vld [vmem:[%s3704_s5 + $0x160] sm:$0xff] }
 0x123   :  { %2351 = vmatpush3.bf16.msra.mxu1 %v2350_v44  ;;  %v623_v47 = vpop.f32.mrb[34].mxu0  ;;  %1381 = vmatprep.mubr.f32.mxu0 %v3091_v6  ;;  %v3410_v49 = vpop.f32.mrb[34].mxu1  ;;  %v905_v6 = vld [vmem:[%s3704_s5 + $0x1b8] sm:$0xff]  ;;  %v895_v44 = vld [vmem:[%s3704_s5 + $0x168] sm:$0xff] }
 0x124   :  { %v625_v59 = vpop.f32.mrb[35].mxu0  ;;  %2353 = vmatprep.subr.bf16.mxu1 %v2352_v37  ;;  %v3418_v63 = vpop.f32.mrb[35].mxu1  ;;  %v2360_v8 = vpack.c.bf16 %v905_v6, %v904_v51  ;;  %v2374_v56 = vpack.c.bf16 %v895_v44, %v894_v12 }
 0x125   :  { %1222 = vmatprep.mubr.f32.mxu1 %v625_v59 }
 0x126   :  { %1223 = vmatmul.mubr.f32.gmra.mrb[90].mxu1 %v623_v47  ;;  %1382 = vmatmul.mubr.f32.gmra.mrb[98].mxu0 %v3089_v2  ;;  %v906_v2 = vld [vmem:[%s3704_s5 + $0x1c0] sm:$0xff]  ;;  %v896_v47 = vld [vmem:[%s3704_s5 + $0x170] sm:$0xff] }
 0x127   :  { %2355 = vmatpush3.bf16.msra.mxu1 %v2354_v3  ;;  %v629_v0 = vpop.f32.mrb[36].mxu0  ;;  %1386 = vmatprep.mubr.f32.mxu0 %v3107_v16  ;;  %v3428_v4 = vpop.f32.mrb[36].mxu1  ;;  %v907_v16 = vld [vmem:[%s3704_s5 + $0x1c8] sm:$0xff]  ;;  %v897_v3 = vld [vmem:[%s3704_s5 + $0x178] sm:$0xff] }
 0x128   :  { %v631_v7 = vpop.f32.mrb[37].mxu0  ;;  %2357 = vmatprep.subr.bf16.mxu1 %v2356_v60  ;;  %v3436_v11 = vpop.f32.mrb[37].mxu1  ;;  %v2364_v18 = vpack.c.bf16 %v907_v16, %v906_v2 }
 0x129   :  { %1227 = vmatprep.mubr.f32.mxu1 %v631_v7 }
 0x12a   :  { %1228 = vmatmul.mubr.f32.gmra.mrb[92].mxu1 %v629_v0  ;;  %1387 = vmatmul.mubr.f32.gmra.mrb[100].mxu0 %v3105_v14  ;;  %v908_v14 = vld [vmem:[%s3704_s5 + $0x1d0] sm:$0xff] }
 0x12b   :  { %2359 = vmatpush3.bf16.msra.mxu1 %v2358_v1  ;;  %v635_v13 = vpop.f32.mrb[38].mxu0  ;;  %1391 = vmatprep.mubr.f32.mxu0 %v3123_v27  ;;  %v3446_v15 = vpop.f32.mrb[38].mxu1  ;;  %v909_v27 = vld [vmem:[%s3704_s5 + $0x1d8] sm:$0xff] }
 0x12c   :  { %v637_v17 = vpop.f32.mrb[39].mxu0  ;;  %2361 = vmatprep.subr.bf16.mxu1 %v2360_v8  ;;  %v3454_v22 = vpop.f32.mrb[39].mxu1  ;;  %v2368_v31 = vpack.c.bf16 %v909_v27, %v908_v14 }
 0x12d   :  { %1232 = vmatprep.mubr.f32.mxu1 %v637_v17 }
 0x12e   :  { %1233 = vmatmul.mubr.f32.gmra.mrb[94].mxu1 %v635_v13  ;;  %1392 = vmatmul.mubr.f32.gmra.mrb[102].mxu0 %v3121_v26  ;;  %v910_v26 = vld [vmem:[%s3704_s5 + $0x1e0] sm:$0xff] }
 0x12f   :  { %2363 = vmatpush3.bf16.msra.mxu1 %v2362_v23  ;;  %v641_v24 = vpop.f32.mrb[40].mxu0  ;;  %1396 = vmatprep.mubr.f32.mxu0 %v3139_v38  ;;  %v3464_v29 = vpop.f32.mrb[40].mxu1  ;;  %v911_v38 = vld [vmem:[%s3704_s5 + $0x1e8] sm:$0xff] }
 0x130   :  { %v643_v30 = vpop.f32.mrb[41].mxu0  ;;  %2365 = vmatprep.subr.bf16.mxu1 %v2364_v18  ;;  %v3472_v36 = vpop.f32.mrb[41].mxu1  ;;  %v2372_v41 = vpack.c.bf16 %v911_v38, %v910_v26 }
 0x131   :  { %1237 = vmatprep.mubr.f32.mxu1 %v643_v30 }
 0x132   :  { %1238 = vmatmul.mubr.f32.gmra.mrb[96].mxu1 %v641_v24  ;;  %1397 = vmatmul.mubr.f32.gmra.mrb[104].mxu0 %v3137_v50  ;;  %v912_v50 = vld [vmem:[%s3704_s5 + $0x1f0] sm:$0xff] }
 0x133   :  { %2367 = vmatpush3.bf16.msra.mxu1 %v2366_v42  ;;  %v647_v52 = vpop.f32.mrb[42].mxu0  ;;  %1401 = vmatprep.mubr.f32.mxu0 %v3155_v28  ;;  %v3482_v39 = vpop.f32.mrb[42].mxu1  ;;  %v913_v28 = vld [vmem:[%s3704_s5 + $0x1f8] sm:$0xff] }
 0x134   :  { %v649_v40 = vpop.f32.mrb[43].mxu0  ;;  %2369 = vmatprep.subr.bf16.mxu1 %v2368_v31  ;;  %v3490_v55 = vpop.f32.mrb[43].mxu1  ;;  %v2376_v33 = vpack.c.bf16 %v913_v28, %v912_v50 }
 0x135   :  { %1242 = vmatprep.mubr.f32.mxu1 %v649_v40 }
 0x136   :  { %1243 = vmatmul.mubr.f32.gmra.mrb[98].mxu1 %v647_v52  ;;  %1402 = vmatmul.mubr.f32.gmra.mrb[106].mxu0 %v3153_v19 }
 0x137   :  { %2371 = vmatpush3.bf16.msra.mxu1 %v2370_v58  ;;  %v653_v37 = vpop.f32.mrb[44].mxu0  ;;  %1406 = vmatprep.mubr.f32.mxu0 %v3177_v53  ;;  %v3500_v57 = vpop.f32.mrb[44].mxu1  ;;  %v2378_v53 = vpack.c.bf16 %v897_v3, %v896_v47 }
 0x138   :  { %v655_v54 = vpop.f32.mrb[45].mxu0  ;;  %2373 = vmatprep.subr.bf16.mxu1 %v2372_v41  ;;  %v3508_v59 = vpop.f32.mrb[45].mxu1 }
 0x139   :  { %1247 = vmatprep.mubr.f32.mxu1 %v655_v54 }
 0x13a   :  { %1248 = vmatmul.mubr.f32.gmra.mrb[100].mxu1 %v653_v37  ;;  %1407 = vmatmul.mubr.f32.gmra.mrb[108].mxu0 %v3169_v43 }
 0x13b   :  { %2375 = vmatpush3.bf16.msra.mxu1 %v2374_v56  ;;  %v659_v19 = vpop.f32.mrb[46].mxu0  ;;  %1476 = vmatprep.mubr.f32.mxu1 %v3367_v46  ;;  %v3512_v60 = vpop.f32.mrb[46].mxu1 }
 0x13c   :  { %2377 = vmatprep.subr.bf16.mxu1 %v2376_v33  ;;  %v661_v61 = vpop.f32.mrb[47].mxu0  ;;  %v3514_v62 = vpop.f32.mrb[47].mxu1 }
 0x13d   :  { %1621 = vmatprep.mubr.f32.mxu0 %v661_v61 }
 0x13e   :  { %1622 = vmatmul.mubr.f32.vlgmr.msra.gmra.mrb[110].mxu0 %v659_v19 }
 0x13f   :  { %2379 = vmatpush3.bf16.msra.mxu1 %v2378_v53  ;;  %v665_v51 = vpop.f32.mrb[48].mxu0  ;;  %v3516_v6 = vpop.f32.mrb[48].mxu1 }
 0x140   :  { %v667_v0 = vpop.f32.mrb[49].mxu0  ;;  %v3518_v1 = vpop.f32.mrb[49].mxu1 }
 0x141   :  { %1626 = vmatprep.mubr.f32.mxu0 %v667_v0  ;;  %v1795_v0 = vld [vmem:[%s3705_s4] ss:$0 sm:$0xff] }
 0x142   :  { %1477 = vmatmul.mubr.f32.vlgmr.msra.gmra.mrb[102].mxu1 %v3359_v20  ;;  %1627 = vmatmul.mubr.f32.gmra.mrb[112].mxu0 %v665_v51 }
 0x143   :  { %1481 = vmatprep.mubr.f32.mxu1 %v3383_v5  ;;  %v671_v43 = vpop.f32.mrb[50].mxu0  ;;  %v3522_v46 = vpop.f32.mrb[50].mxu1 }
 0x144   :  { %v673_v7 = vpop.f32.mrb[51].mxu0  ;;  %v3524_v8 = vpop.f32.mrb[51].mxu1 }
 0x145   :  { %1631 = vmatprep.mubr.f32.mxu0 %v673_v7 }
 0x146   :  { %1482 = vmatmul.mubr.f32.gmra.mrb[104].mxu1 %v3375_v35  ;;  %1632 = vmatmul.mubr.f32.gmra.mrb[114].mxu0 %v671_v43 }
 0x147   :  { %1486 = vmatprep.mubr.f32.mxu1 %v3400_v25  ;;  %v677_v9 = vpop.f32.mrb[52].mxu0  ;;  %v3528_v10 = vpop.f32.mrb[52].mxu1 }
 0x148   :  { %v679_v2 = vpop.f32.mrb[53].mxu0  ;;  %v3530_v20 = vpop.f32.mrb[53].mxu1 }
 0x149   :  { %1636 = vmatprep.mubr.f32.mxu0 %v679_v2 }
 0x14a   :  { %1487 = vmatmul.mubr.f32.gmra.mrb[106].mxu1 %v3392_v45  ;;  %1637 = vmatmul.mubr.f32.gmra.mrb[116].mxu0 %v677_v9 }
 0x14b   :  { %1491 = vmatprep.mubr.f32.mxu1 %v3418_v63  ;;  %v683_v5 = vpop.f32.mrb[54].mxu0  ;;  %v3534_v16 = vpop.f32.mrb[54].mxu1 }
 0x14c   :  { %v685_v13 = vpop.f32.mrb[55].mxu0  ;;  %v536_v35 = vpop.f32.mrb[55].mxu1 }
 0x14d   :  { %1641 = vmatprep.mubr.f32.mxu0 %v685_v13 }
 0x14e   :  { %1492 = vmatmul.mubr.f32.gmra.mrb[108].mxu1 %v3410_v49  ;;  %1642 = vmatmul.mubr.f32.gmra.mrb[118].mxu0 %v683_v5 }
 0x14f   :  { %1496 = vmatprep.mubr.f32.mxu1 %v3436_v11  ;;  %v689_v25 = vpop.f32.mrb[56].mxu0  ;;  %v3538_v23 = vpop.f32.mrb[56].mxu1 }
 0x150   :  { %v691_v17 = vpop.f32.mrb[57].mxu0  ;;  %v542_v18 = vpop.f32.mrb[57].mxu1 }
 0x151   :  { %1646 = vmatprep.mubr.f32.mxu0 %v691_v17 }
 0x152   :  { %1497 = vmatmul.mubr.f32.gmra.mrb[110].mxu1 %v3428_v4  ;;  %1647 = vmatmul.mubr.f32.gmra.mrb[120].mxu0 %v689_v25 }
 0x153   :  { %1501 = vmatprep.mubr.f32.mxu1 %v3454_v22  ;;  %v695_v45 = vpop.f32.mrb[58].mxu0  ;;  %v546_v63 = vpop.f32.mrb[58].mxu1 }
 0x154   :  { %v697_v32 = vpop.f32.mrb[59].mxu0  ;;  %v548_v21 = vpop.f32.mrb[59].mxu1 }
 0x155   :  { %1651 = vmatprep.mubr.f32.mxu0 %v697_v32 }
 0x156   :  { %1502 = vmatmul.mubr.f32.gmra.mrb[112].mxu1 %v3446_v15  ;;  %1652 = vmatmul.mubr.f32.gmra.mrb[122].mxu0 %v695_v45 }
 0x157   :  { %1506 = vmatprep.mubr.f32.mxu1 %v3472_v36  ;;  %v701_v49 = vpop.f32.mrb[60].mxu0 }
 0x158   :  { %v703_v11 = vpop.f32.mrb[61].mxu0 }
 0x159   :  { %1656 = vmatprep.mubr.f32.mxu0 %v703_v11 }
 0x15a   :  { %1507 = vmatmul.mubr.f32.gmra.mrb[114].mxu1 %v3464_v29  ;;  %1657 = vmatmul.mubr.f32.gmra.mrb[124].mxu0 %v701_v49 }
 0x15b   :  { %1511 = vmatprep.mubr.f32.mxu1 %v3490_v55  ;;  %v707_v4 = vpop.f32.mrb[62].mxu0 }
 0x15c   :  { %v709_v22 = vpop.f32.mrb[63].mxu0 }
 0x15d   :  { %1661 = vmatprep.mubr.f32.mxu0 %v709_v22 }
 0x15e   :  { %1512 = vmatmul.mubr.f32.gmra.mrb[116].mxu1 %v3482_v39  ;;  %1662 = vmatmul.mubr.f32.gmra.mrb[126].mxu0 %v707_v4 }
 0x15f   :  { %1516 = vmatprep.mubr.f32.mxu1 %v3508_v59  ;;  %v713_v15 = vpop.f32.mrb[64].mxu0 }
 0x160   :  { %v715_v14 = vpop.f32.mrb[65].mxu0 }
 0x161   :  { %1666 = vmatprep.mubr.f32.mxu0 %v715_v14 }
 0x162   :  { %1517 = vmatmul.mubr.f32.gmra.mrb[118].mxu1 %v3500_v57  ;;  %1667 = vmatmul.mubr.f32.gmra.mrb[128].mxu0 %v713_v15 }
 0x163   :  { %1521 = vmatprep.mubr.f32.mxu1 %v3514_v62  ;;  %v719_v27 = vpop.f32.mrb[66].mxu0 }
 0x164   :  { %v721_v24 = vpop.f32.mrb[67].mxu0 }
 0x165   :  { %1671 = vmatprep.mubr.f32.mxu0 %v721_v24 }
 0x166   :  { %1522 = vmatmul.mubr.f32.gmra.mrb[120].mxu1 %v3512_v60  ;;  %1672 = vmatmul.mubr.f32.gmra.mrb[130].mxu0 %v719_v27 }
 0x167   :  { %1526 = vmatprep.mubr.f32.mxu1 %v3518_v1  ;;  %v725_v42 = vpop.f32.mrb[68].mxu0 }
 0x168   :  { %v727_v29 = vpop.f32.mrb[69].mxu0 }
 0x169   :  { %1676 = vmatprep.mubr.f32.mxu0 %v727_v29 }
 0x16a   :  { %1527 = vmatmul.mubr.f32.gmra.mrb[122].mxu1 %v3516_v6  ;;  %1677 = vmatmul.mubr.f32.gmra.mrb[132].mxu0 %v725_v42 }
 0x16b   :  { %1531 = vmatprep.mubr.f32.mxu1 %v3524_v8  ;;  %v731_v30 = vpop.f32.mrb[70].mxu0 }
 0x16c   :  { %v733_v31 = vpop.f32.mrb[71].mxu0 }
 0x16d   :  { %1681 = vmatprep.mubr.f32.mxu0 %v733_v31 }
 0x16e   :  { %1532 = vmatmul.mubr.f32.gmra.mrb[124].mxu1 %v3522_v46  ;;  %1682 = vmatmul.mubr.f32.gmra.mrb[134].mxu0 %v731_v30 }
 0x16f   :  { %1536 = vmatprep.mubr.f32.mxu1 %v3530_v20  ;;  %v737_v48 = vpop.f32.mrb[72].mxu0 }
 0x170   :  { %v739_v34 = vpop.f32.mrb[73].mxu0 }
 0x171   :  { %1686 = vmatprep.mubr.f32.mxu0 %v739_v34 }
 0x172   :  { %1537 = vmatmul.mubr.f32.gmra.mrb[126].mxu1 %v3528_v10  ;;  %1687 = vmatmul.mubr.f32.gmra.mrb[136].mxu0 %v737_v48 }
 0x173   :  { %1541 = vmatprep.mubr.f32.mxu1 %v536_v35  ;;  %v743_v36 = vpop.f32.mrb[74].mxu0 }
 0x174   :  { %v745_v26 = vpop.f32.mrb[75].mxu0 }
 0x175   :  { %1691 = vmatprep.mubr.f32.mxu0 %v745_v26 }
 0x176   :  { %1542 = vmatmul.mubr.f32.gmra.mrb[128].mxu1 %v3534_v16  ;;  %1692 = vmatmul.mubr.f32.gmra.mrb[138].mxu0 %v743_v36 }
 0x177   :  { %1546 = vmatprep.mubr.f32.mxu1 %v542_v18  ;;  %v749_v38 = vpop.f32.mrb[76].mxu0 }
 0x178   :  { %v751_v52 = vpop.f32.mrb[77].mxu0 }
 0x179   :  { %1696 = vmatprep.mubr.f32.mxu0 %v751_v52 }
 0x17a   :  { %1547 = vmatmul.mubr.f32.gmra.mrb[130].mxu1 %v3538_v23  ;;  %1697 = vmatmul.mubr.f32.gmra.mrb[140].mxu0 %v749_v38 }
 0x17b   :  { %1551 = vmatprep.mubr.f32.mxu1 %v548_v21 }
 0x17e   :  { %1552 = vmatmul.mubr.f32.gmra.mrb[132].mxu1 %v546_v63 }
 0x1b5   :  { %v1829_v58 = vpop.f32.mrb[60].mxu1 }
 0x1b6   :  { %v1830_v39 = vpop.f32.mrb[61].mxu1 }
 0x1b7   :  { %v1831_v40 = vadd.f32 %v1830_v39, %v1829_v58 }
 0x1b9   :  { %v1832_v41 = vpop.f32.mrb[62].mxu1  ;;  %v1020_v8 = vadd.f32 %v1831_v40, %v1795_v0 }
 0x1ba   :  { %v1833_v12 = vpop.f32.mrb[63].mxu1 }
 0x1bb   :  { %v1834_v44 = vadd.f32 %v1833_v12, %v1832_v41 }
 0x1bd   :  { %v1835_v55 = vpop.f32.mrb[64].mxu1  ;;  %v1025_v35 = vadd.f32 %v1834_v44, %v1795_v0 }
 0x1be   :  { %v1836_v50 = vpop.f32.mrb[65].mxu1 }
 0x1bf   :  { %v1837_v28 = vadd.f32 %v1836_v50, %v1835_v55 }
 0x1c1   :  { %v1838_v37 = vpop.f32.mrb[66].mxu1  ;;  %v1030_v21 = vadd.f32 %v1837_v28, %v1795_v0 }
 0x1c2   :  { %v1839_v56 = vpop.f32.mrb[67].mxu1 }
 0x1c3   :  { %v1840_v57 = vadd.f32 %v1839_v56, %v1838_v37 }
 0x1c5   :  { %v1841_v54 = vpop.f32.mrb[68].mxu1  ;;  %v1035_v24 = vadd.f32 %v1840_v57, %v1795_v0 }
 0x1c6   :  { %v1842_v33 = vpop.f32.mrb[69].mxu1 }
 0x1c7   :  { %v1843_v47 = vadd.f32 %v1842_v33, %v1841_v54 }
 0x1c9   :  { %v1844_v3 = vpop.f32.mrb[70].mxu1  ;;  %v1040_v26 = vadd.f32 %v1843_v47, %v1795_v0 }
 0x1ca   :  { %v1845_v59 = vpop.f32.mrb[71].mxu1 }
 0x1cb   :  { %v1846_v19 = vadd.f32 %v1845_v59, %v1844_v3 }
 0x1cd   :  { %v1847_v53 = vpop.f32.mrb[72].mxu1  ;;  %v1045_v44 = vadd.f32 %v1846_v19, %v1795_v0 }
 0x1ce   :  { %v1848_v60 = vpop.f32.mrb[73].mxu1 }
 0x1cf   :  { %v1849_v61 = vadd.f32 %v1848_v60, %v1847_v53 }
 0x1d1   :  { %v1988_v62 = vpop.f32.mrb[78].mxu0  ;;  %v1050_v33 = vadd.f32 %v1849_v61, %v1795_v0 }
 0x1d2   :  { %v1989_v51 = vpop.f32.mrb[79].mxu0 }
 0x1d3   :  { %v3559_v6 = vadd.f32 %v1989_v51, %v1988_v62 }
 0x1d5   :  { %v1882_v1 = vpop.f32.mrb[74].mxu1  ;;  %v1991_v43 = vpop.f32.mrb[80].mxu0 }
 0x1d6   :  { %v1883_v46 = vpop.f32.mrb[75].mxu1  ;;  %v1992_v7 = vpop.f32.mrb[81].mxu0 }
 0x1d7   :  { %v1884_v9 = vadd.f32 %v1883_v46, %v1882_v1  ;;  %v3564_v10 = vadd.f32 %v1992_v7, %v1991_v43 }
 0x1d9   :  { %v1120_v2 = vadd.f32 %v1884_v9, %v1020_v8  ;;  %v1885_v20 = vpop.f32.mrb[76].mxu1  ;;  %v1994_v5 = vpop.f32.mrb[82].mxu0 }
 0x1da   :  { %v1886_v16 = vpop.f32.mrb[77].mxu1  ;;  %v1995_v13 = vpop.f32.mrb[83].mxu0 }
 0x1db   :  { %v1887_v25 = vadd.f32 %v1886_v16, %v1885_v20  ;;  %v3566_v23 = vadd.f32 %v1995_v13, %v1994_v5 }
 0x1dd   :  { %v1125_v17 = vadd.f32 %v1887_v25, %v1025_v35  ;;  %v1888_v18 = vpop.f32.mrb[78].mxu1  ;;  %v1997_v45 = vpop.f32.mrb[84].mxu0 }
 0x1de   :  { %v1889_v63 = vpop.f32.mrb[79].mxu1  ;;  %v1998_v32 = vpop.f32.mrb[85].mxu0 }
 0x1df   :  { %v1890_v49 = vadd.f32 %v1889_v63, %v1888_v18  ;;  %v3568_v11 = vadd.f32 %v1998_v32, %v1997_v45 }
 0x1e1   :  { %v1130_v4 = vadd.f32 %v1890_v49, %v1030_v21  ;;  %v1891_v22 = vpop.f32.mrb[80].mxu1  ;;  %v2000_v15 = vpop.f32.mrb[86].mxu0 }
 0x1e2   :  { %v1892_v14 = vpop.f32.mrb[81].mxu1  ;;  %v2001_v27 = vpop.f32.mrb[87].mxu0 }
 0x1e3   :  { %v1893_v42 = vadd.f32 %v1892_v14, %v1891_v22  ;;  %v3570_v29 = vadd.f32 %v2001_v27, %v2000_v15 }
 0x1e5   :  { %v1135_v30 = vadd.f32 %v1893_v42, %v1035_v24  ;;  %v1894_v31 = vpop.f32.mrb[82].mxu1  ;;  %v2003_v48 = vpop.f32.mrb[88].mxu0 }
 0x1e6   :  { %v1895_v34 = vpop.f32.mrb[83].mxu1  ;;  %v2004_v36 = vpop.f32.mrb[89].mxu0 }
 0x1e7   :  { %v1896_v38 = vadd.f32 %v1895_v34, %v1894_v31  ;;  %v3572_v52 = vadd.f32 %v2004_v36, %v2003_v48 }
 0x1e9   :  { %v1140_v58 = vadd.f32 %v1896_v38, %v1040_v26  ;;  %v1897_v39 = vpop.f32.mrb[84].mxu1  ;;  %v2006_v40 = vpop.f32.mrb[90].mxu0 }
 0x1ea   :  { %v1898_v41 = vpop.f32.mrb[85].mxu1  ;;  %v2007_v12 = vpop.f32.mrb[91].mxu0 }
 0x1eb   :  { %v1899_v55 = vadd.f32 %v1898_v41, %v1897_v39  ;;  %v3574_v50 = vadd.f32 %v2007_v12, %v2006_v40 }
 0x1ed   :  { %v1145_v28 = vadd.f32 %v1899_v55, %v1045_v44  ;;  %v1900_v37 = vpop.f32.mrb[86].mxu1  ;;  %v2009_v56 = vpop.f32.mrb[92].mxu0 }
 0x1ee   :  { %v1901_v57 = vpop.f32.mrb[87].mxu1  ;;  %v2010_v54 = vpop.f32.mrb[93].mxu0 }
 0x1ef   :  { %v1902_v3 = vadd.f32 %v1901_v57, %v1900_v37  ;;  %v3576_v47 = vadd.f32 %v2010_v54, %v2009_v56 }
 0x1f1   :  { %v1150_v59 = vadd.f32 %v1902_v3, %v1050_v33  ;;  %v2012_v53 = vpop.f32.mrb[94].mxu0 }
 0x1f2   :  { %v2013_v60 = vpop.f32.mrb[95].mxu0 }
 0x1f3   :  { %v3578_v62 = vadd.f32 %v2013_v60, %v2012_v53 }
 0x1f5   :  { %v1935_v51 = vpop.f32.mrb[88].mxu1  ;;  %v2015_v1 = vpop.f32.mrb[96].mxu0 }
 0x1f6   :  { %v1936_v19 = vpop.f32.mrb[89].mxu1  ;;  %v2016_v43 = vpop.f32.mrb[97].mxu0 }
 0x1f7   :  { %v1937_v46 = vadd.f32 %v1936_v19, %v1935_v51  ;;  %v3580_v7 = vadd.f32 %v2016_v43, %v2015_v1 }
 0x1f9   :  { %v1220_v8 = vadd.f32 %v1937_v46, %v1120_v2  ;;  %v1938_v9 = vpop.f32.mrb[90].mxu1  ;;  %v2018_v20 = vpop.f32.mrb[98].mxu0 }
 0x1fa   :  { %v1939_v5 = vpop.f32.mrb[91].mxu1  ;;  %v2019_v61 = vpop.f32.mrb[99].mxu0 }
 0x1fb   :  { %1253 = vst [vmem:[%s3706_s7] sm:$0xff] %v1220_v8  ;;  %v1940_v0 = vadd.f32 %v1939_v5, %v1938_v9  ;;  %v3585_v16 = vadd.f32 %v2019_v61, %v2018_v20 }
 0x1fd   :  { %v1225_v13 = vadd.f32 %v1940_v0, %v1125_v17  ;;  %v1941_v35 = vpop.f32.mrb[92].mxu1  ;;  %v2021_v25 = vpop.f32.mrb[100].mxu0 }
 0x1fe   :  { %v1942_v18 = vpop.f32.mrb[93].mxu1  ;;  %v2022_v45 = vpop.f32.mrb[101].mxu0 }
 0x1ff   :  { %1254 = vst [vmem:[%s3706_s7 + $0x8] sm:$0xff] %v1225_v13  ;;  %v1943_v2 = vadd.f32 %v1942_v18, %v1941_v35  ;;  %v3590_v63 = vadd.f32 %v2022_v45, %v2021_v25 }
 0x201   :  { %v1230_v32 = vadd.f32 %v1943_v2, %v1130_v4  ;;  %v1944_v21 = vpop.f32.mrb[94].mxu1  ;;  %v2024_v49 = vpop.f32.mrb[102].mxu0 }
 0x202   :  { %v1945_v22 = vpop.f32.mrb[95].mxu1  ;;  %v2025_v15 = vpop.f32.mrb[103].mxu0 }
 0x203   :  { %1255 = vst [vmem:[%s3706_s7 + $0x10] sm:$0xff] %v1230_v32  ;;  %v1946_v17 = vadd.f32 %v1945_v22, %v1944_v21  ;;  %v3595_v14 = vadd.f32 %v2025_v15, %v2024_v49 }
 0x205   :  { %v1235_v27 = vadd.f32 %v1946_v17, %v1135_v30  ;;  %v1947_v24 = vpop.f32.mrb[96].mxu1  ;;  %v2027_v42 = vpop.f32.mrb[104].mxu0 }
 0x206   :  { %v1948_v31 = vpop.f32.mrb[97].mxu1  ;;  %v2028_v48 = vpop.f32.mrb[105].mxu0 }
 0x207   :  { %1256 = vst [vmem:[%s3706_s7 + $0x18] sm:$0xff] %v1235_v27  ;;  %v1949_v4 = vadd.f32 %v1948_v31, %v1947_v24  ;;  %v3600_v34 = vadd.f32 %v2028_v48, %v2027_v42 }
 0x209   :  { %v1240_v36 = vadd.f32 %v1949_v4, %v1140_v58  ;;  %v1950_v26 = vpop.f32.mrb[98].mxu1  ;;  %v2030_v38 = vpop.f32.mrb[106].mxu0 }
 0x20a   :  { %v1951_v39 = vpop.f32.mrb[99].mxu1  ;;  %v2031_v40 = vpop.f32.mrb[107].mxu0 }
 0x20b   :  { %1257 = vst [vmem:[%s3706_s7 + $0x20] sm:$0xff] %v1240_v36  ;;  %v1952_v30 = vadd.f32 %v1951_v39, %v1950_v26  ;;  %v3605_v41 = vadd.f32 %v2031_v40, %v2030_v38 }
 0x20d   :  { %v1245_v12 = vadd.f32 %v1952_v30, %v1145_v28  ;;  %v1953_v44 = vpop.f32.mrb[100].mxu1  ;;  %v2033_v55 = vpop.f32.mrb[108].mxu0  ;;  %v3618_v28 = vld [vmem:[%s3707_s6] ss:$0 sm:$0xff] }
 0x20e   :  { %v1954_v37 = vpop.f32.mrb[101].mxu1  ;;  %v2034_v56 = vpop.f32.mrb[109].mxu0  ;;  %v1334_v43 = vadd.f32 %v3559_v6, %v3618_v28  ;;  %v1339_v0 = vadd.f32 %v3564_v10, %v3618_v28  ;;  %v1344_v21 = vadd.f32 %v3566_v23, %v3618_v28  ;;  %v1349_v31 = vadd.f32 %v3568_v11, %v3618_v28 }
 0x20f   :  { %1258 = vst [vmem:[%s3706_s7 + $0x28] sm:$0xff] %v1245_v12  ;;  %v1955_v58 = vadd.f32 %v1954_v37, %v1953_v44  ;;  %v3610_v57 = vadd.f32 %v2034_v56, %v2033_v55  ;;  %v1354_v30 = vadd.f32 %v3570_v29, %v3618_v28 }
 0x211   :  { %v1250_v54 = vadd.f32 %v1955_v58, %v1150_v59  ;;  %v2148_v33 = vpop.f32.mrb[110].mxu0 }
 0x212   :  { %v2149_v3 = vpop.f32.mrb[111].mxu0 }
 0x213   :  { %1259 = vst [vmem:[%s3706_s7 + $0x30] sm:$0xff] %v1250_v54  ;;  %v2150_v53 = vadd.f32 %v2149_v3, %v2148_v33  ;;  %v1359_v33 = vadd.f32 %v3572_v52, %v3618_v28 }
 0x215   :  { %v2068_v60 = vpop.f32.mrb[102].mxu1  ;;  %v2151_v51 = vpop.f32.mrb[112].mxu0 }
 0x216   :  { %v2069_v1 = vpop.f32.mrb[103].mxu1  ;;  %v2152_v19 = vpop.f32.mrb[113].mxu0 }
 0x217   :  { %v2070_v59 = vadd.f32 %v2069_v1, %v2068_v60  ;;  %v2153_v46 = vadd.f32 %v2152_v19, %v2151_v51 }
 0x219   :  { %v1479_v8 = vadd.f32 %v2070_v59, %v1334_v43  ;;  %v2071_v9 = vpop.f32.mrb[104].mxu1  ;;  %v2154_v20 = vpop.f32.mrb[114].mxu0  ;;  %v1364_v59 = vadd.f32 %v3574_v50, %v3618_v28 }
 0x21a   :  { %v2072_v5 = vpop.f32.mrb[105].mxu1  ;;  %v2155_v61 = vpop.f32.mrb[115].mxu0 }
 0x21b   :  { %v1624_v13 = vadd.f32 %v2150_v53, %v1479_v8  ;;  %v2073_v35 = vadd.f32 %v2072_v5, %v2071_v9  ;;  %v2156_v25 = vadd.f32 %v2155_v61, %v2154_v20 }
 0x21d   :  { %1702 = vst [vmem:[%s3708_s8] sm:$0xff] %v1624_v13  ;;  %v1484_v18 = vadd.f32 %v2073_v35, %v1339_v0  ;;  %v2074_v45 = vpop.f32.mrb[106].mxu1  ;;  %v2157_v6 = vpop.f32.mrb[116].mxu0  ;;  %v1369_v13 = vadd.f32 %v3576_v47, %v3618_v28 }
 0x21e   :  { %v2075_v2 = vpop.f32.mrb[107].mxu1  ;;  %v2158_v32 = vpop.f32.mrb[117].mxu0 }
 0x21f   :  { %v1629_v49 = vadd.f32 %v2153_v46, %v1484_v18  ;;  %v2076_v22 = vadd.f32 %v2075_v2, %v2074_v45  ;;  %v2159_v15 = vadd.f32 %v2158_v32, %v2157_v6 }
 0x221   :  { %1703 = vst [vmem:[%s3708_s8 + $0x8] sm:$0xff] %v1629_v49  ;;  %v1489_v10 = vadd.f32 %v2076_v22, %v1344_v21  ;;  %v2077_v17 = vpop.f32.mrb[108].mxu1  ;;  %v2160_v27 = vpop.f32.mrb[118].mxu0  ;;  %v1374_v21 = vadd.f32 %v3578_v62, %v3618_v28 }
 0x222   :  { %v2078_v24 = vpop.f32.mrb[109].mxu1  ;;  %v2161_v42 = vpop.f32.mrb[119].mxu0 }
 0x223   :  { %v1634_v48 = vadd.f32 %v2156_v25, %v1489_v10  ;;  %v2079_v4 = vadd.f32 %v2078_v24, %v2077_v17  ;;  %v2162_v36 = vadd.f32 %v2161_v42, %v2160_v27  ;;  %v1379_v42 = vadd.f32 %v3580_v7, %v3618_v28 }
 0x225   :  { %1704 = vst [vmem:[%s3708_s8 + $0x10] sm:$0xff] %v1634_v48  ;;  %v1494_v23 = vadd.f32 %v2079_v4, %v1349_v31  ;;  %v2080_v26 = vpop.f32.mrb[110].mxu1  ;;  %v2163_v38 = vpop.f32.mrb[120].mxu0 }
 0x226   :  { %v2081_v39 = vpop.f32.mrb[111].mxu1  ;;  %v2164_v40 = vpop.f32.mrb[121].mxu0 }
 0x227   :  { %v1639_v12 = vadd.f32 %v2159_v15, %v1494_v23  ;;  %v2082_v44 = vadd.f32 %v2081_v39, %v2080_v26  ;;  %v2165_v55 = vadd.f32 %v2164_v40, %v2163_v38  ;;  %v1384_v39 = vadd.f32 %v3585_v16, %v3618_v28 }
 0x229   :  { %1705 = vst [vmem:[%s3708_s8 + $0x18] sm:$0xff] %v1639_v12  ;;  %v1499_v11 = vadd.f32 %v2082_v44, %v1354_v30  ;;  %v2083_v37 = vpop.f32.mrb[112].mxu1  ;;  %v2166_v56 = vpop.f32.mrb[122].mxu0 }
 0x22a   :  { %v2084_v58 = vpop.f32.mrb[113].mxu1  ;;  %v2167_v54 = vpop.f32.mrb[123].mxu0 }
 0x22b   :  { %v1644_v3 = vadd.f32 %v2162_v36, %v1499_v11  ;;  %v2085_v53 = vadd.f32 %v2084_v58, %v2083_v37  ;;  %v2168_v60 = vadd.f32 %v2167_v54, %v2166_v56  ;;  %v1389_v56 = vadd.f32 %v3590_v63, %v3618_v28 }
 0x22d   :  { %1706 = vst [vmem:[%s3708_s8 + $0x20] sm:$0xff] %v1644_v3  ;;  %v1504_v29 = vadd.f32 %v2085_v53, %v1359_v33  ;;  %v2086_v51 = vpop.f32.mrb[114].mxu1  ;;  %v2169_v1 = vpop.f32.mrb[124].mxu0 }
 0x22e   :  { %v2087_v19 = vpop.f32.mrb[115].mxu1  ;;  %v2170_v43 = vpop.f32.mrb[125].mxu0 }
 0x22f   :  { %v1649_v46 = vadd.f32 %v2165_v55, %v1504_v29  ;;  %v2088_v8 = vadd.f32 %v2087_v19, %v2086_v51  ;;  %v2171_v9 = vadd.f32 %v2170_v43, %v2169_v1  ;;  %v1394_v51 = vadd.f32 %v3595_v14, %v3618_v28 }
 0x231   :  { %1707 = vst [vmem:[%s3708_s8 + $0x28] sm:$0xff] %v1649_v46  ;;  %v1509_v52 = vadd.f32 %v2088_v8, %v1364_v59  ;;  %v2089_v20 = vpop.f32.mrb[116].mxu1  ;;  %v2172_v5 = vpop.f32.mrb[126].mxu0 }
 0x232   :  { %v2090_v61 = vpop.f32.mrb[117].mxu1  ;;  %v2173_v0 = vpop.f32.mrb[127].mxu0 }
 0x233   :  { %v1654_v35 = vadd.f32 %v2168_v60, %v1509_v52  ;;  %v2091_v25 = vadd.f32 %v2090_v61, %v2089_v20  ;;  %v2174_v18 = vadd.f32 %v2173_v0, %v2172_v5  ;;  %v1399_v52 = vadd.f32 %v3600_v34, %v3618_v28 }
 0x235   :  { %1708 = vst [vmem:[%s3708_s8 + $0x30] sm:$0xff] %v1654_v35  ;;  %v1514_v50 = vadd.f32 %v2091_v25, %v1369_v13  ;;  %v2092_v45 = vpop.f32.mrb[118].mxu1  ;;  %v2175_v6 = vpop.f32.mrb[128].mxu0 }
 0x236   :  { %v2093_v2 = vpop.f32.mrb[119].mxu1  ;;  %v2176_v32 = vpop.f32.mrb[129].mxu0 }
 0x237   :  { %v1659_v49 = vadd.f32 %v2171_v9, %v1514_v50  ;;  %v2094_v22 = vadd.f32 %v2093_v2, %v2092_v45  ;;  %v2177_v15 = vadd.f32 %v2176_v32, %v2175_v6 }
 0x239   :  { %1709 = vst [vmem:[%s3708_s8 + $0x38] sm:$0xff] %v1659_v49  ;;  %v1519_v47 = vadd.f32 %v2094_v22, %v1374_v21  ;;  %v2095_v10 = vpop.f32.mrb[120].mxu1  ;;  %v2178_v17 = vpop.f32.mrb[130].mxu0  ;;  %v1409_v21 = vadd.f32 %v3610_v57, %v3618_v28 }
 0x23a   :  { %v2096_v27 = vpop.f32.mrb[121].mxu1  ;;  %v2179_v24 = vpop.f32.mrb[131].mxu0 }
 0x23b   :  { %v1664_v31 = vadd.f32 %v2174_v18, %v1519_v47  ;;  %v2097_v48 = vadd.f32 %v2096_v27, %v2095_v10  ;;  %v2180_v4 = vadd.f32 %v2179_v24, %v2178_v17  ;;  %v1404_v18 = vadd.f32 %v3605_v41, %v3618_v28 }
 0x23d   :  { %1710 = vst [vmem:[%s3708_s8 + $0x40] sm:$0xff] %v1664_v31  ;;  %v1524_v62 = vadd.f32 %v2097_v48, %v1379_v42  ;;  %v2098_v36 = vpop.f32.mrb[122].mxu1  ;;  %v2181_v23 = vpop.f32.mrb[132].mxu0 }
 0x23e   :  { %v2099_v26 = vpop.f32.mrb[123].mxu1  ;;  %v2182_v38 = vpop.f32.mrb[133].mxu0 }
 0x23f   :  { %v1669_v40 = vadd.f32 %v2177_v15, %v1524_v62  ;;  %v2100_v30 = vadd.f32 %v2099_v26, %v2098_v36  ;;  %v2183_v12 = vadd.f32 %v2182_v38, %v2181_v23 }
 0x241   :  { %1711 = vst [vmem:[%s3708_s8 + $0x48] sm:$0xff] %v1669_v40  ;;  %v1529_v7 = vadd.f32 %v2100_v30, %v1384_v39  ;;  %v2101_v44 = vpop.f32.mrb[124].mxu1  ;;  %v2184_v55 = vpop.f32.mrb[134].mxu0 }
 0x242   :  { %v2102_v11 = vpop.f32.mrb[125].mxu1  ;;  %v2185_v37 = vpop.f32.mrb[135].mxu0 }
 0x243   :  { %v1674_v58 = vadd.f32 %v2180_v4, %v1529_v7  ;;  %v2103_v54 = vadd.f32 %v2102_v11, %v2101_v44  ;;  %v2186_v33 = vadd.f32 %v2185_v37, %v2184_v55 }
 0x245   :  { %1712 = vst [vmem:[%s3708_s8 + $0x50] sm:$0xff] %v1674_v58  ;;  %v1534_v16 = vadd.f32 %v2103_v54, %v1389_v56  ;;  %v2104_v3 = vpop.f32.mrb[126].mxu1  ;;  %v2187_v53 = vpop.f32.mrb[136].mxu0 }
 0x246   :  { %v2105_v60 = vpop.f32.mrb[127].mxu1  ;;  %v2188_v29 = vpop.f32.mrb[137].mxu0 }
 0x247   :  { %v1679_v1 = vadd.f32 %v2183_v12, %v1534_v16  ;;  %v2106_v19 = vadd.f32 %v2105_v60, %v2104_v3  ;;  %v2189_v43 = vadd.f32 %v2188_v29, %v2187_v53 }
 0x249   :  { %1713 = vst [vmem:[%s3708_s8 + $0x58] sm:$0xff] %v1679_v1  ;;  %v1539_v63 = vadd.f32 %v2106_v19, %v1394_v51  ;;  %v2107_v59 = vpop.f32.mrb[128].mxu1  ;;  %v2190_v46 = vpop.f32.mrb[138].mxu0 }
 0x24a   :  { %v2108_v8 = vpop.f32.mrb[129].mxu1  ;;  %v2191_v9 = vpop.f32.mrb[139].mxu0 }
 0x24b   :  { %v1684_v20 = vadd.f32 %v2186_v33, %v1539_v63  ;;  %v2109_v5 = vadd.f32 %v2108_v8, %v2107_v59  ;;  %v2192_v61 = vadd.f32 %v2191_v9, %v2190_v46 }
 0x24d   :  { %1714 = vst [vmem:[%s3708_s8 + $0x60] sm:$0xff] %v1684_v20  ;;  %v1544_v14 = vadd.f32 %v2109_v5, %v1399_v52  ;;  %v2110_v0 = vpop.f32.mrb[130].mxu1  ;;  %v2193_v13 = vpop.f32.mrb[140].mxu0 }
 0x24e   :  { %v2111_v35 = vpop.f32.mrb[131].mxu1  ;;  %v2194_v25 = vpop.f32.mrb[141].mxu0 }
 0x24f   :  { %v1689_v50 = vadd.f32 %v2189_v43, %v1544_v14  ;;  %v2112_v45 = vadd.f32 %v2111_v35, %v2110_v0  ;;  %v2195_v6 = vadd.f32 %v2194_v25, %v2193_v13 }
 0x251   :  { %1715 = vst [vmem:[%s3708_s8 + $0x68] sm:$0xff] %v1689_v50  ;;  %v1549_v34 = vadd.f32 %v2112_v45, %v1404_v18  ;;  %v2113_v2 = vpop.f32.mrb[132].mxu1 }
 0x252   :  { %v2114_v32 = vpop.f32.mrb[133].mxu1 }
 0x253   :  { %v1694_v49 = vadd.f32 %v2192_v61, %v1549_v34  ;;  %v2115_v22 = vadd.f32 %v2114_v32, %v2113_v2 }
 0x255   :  { %1716 = vst [vmem:[%s3708_s8 + $0x70] sm:$0xff] %v1694_v49  ;;  %v1554_v41 = vadd.f32 %v2115_v22, %v1409_v21 }
 0x257   :  { %v1699_v15 = vadd.f32 %v2195_v6, %v1554_v41 }
 0x259   :  { %1717 = vst [vmem:[%s3708_s8 + $0x78] sm:$0xff] %v1699_v15 }

</bundles_post_ra>
